<compile_context>
chip_gen: v7x
topology: tpu7x:2x2x1
jax: 0.10.0
libtpu: 0.0.40
codegen_flags: <defaults>
</compile_context>

<pallas_src>
import math
from functools import partial

import numpy as np
import jax
import jax.numpy as jnp
from jax import lax
from jax.experimental import pallas as pl
from jax.experimental.pallas import tpu as pltpu

# ----------------------- configuration (small synthetic shapes) --------------------
IMG_SIZE = 32                       # image_encoder.img_size
PATCH = 4                           # synthetic patch-embed image encoder
EMBED = 32                          # transformer_dim == prompt embed_dim
EMB_HW = IMG_SIZE // PATCH          # image_embedding_size = (8, 8)
HW = EMB_HW * EMB_HW
INPUT_IMAGE_SIZE = (IMG_SIZE, IMG_SIZE)
NUM_MULTIMASK = 3
NUM_MASK_TOKENS = NUM_MULTIMASK + 1
IOU_HIDDEN = 32
MASK_THRESHOLD = 0.0

PIXEL_MEAN = jnp.array([123.675, 116.28, 103.53], jnp.float32).reshape(3, 1, 1)
PIXEL_STD = jnp.array([58.395, 57.12, 57.375], jnp.float32).reshape(3, 1, 1)


# ------------------------------------ helpers ---------------------------------------
def _gelu(x):
    # TODO(synk): nn.GELU default is the exact erf form; tanh approximation used here.
    c = math.sqrt(2.0 / math.pi)
    return 0.5 * x * (1.0 + jnp.tanh(c * (x + 0.044715 * x * x * x)))


def _block_diag(ws):
    # ws: (G, K, N) -> (G*K, G*N) block-diagonal (host-side packing, runs under jit).
    G, K, N = ws.shape
    eye = jnp.eye(G, dtype=ws.dtype)
    return (eye[:, None, :, None] * ws[:, :, None, :]).reshape(G * K, G * N)


# ------------------------------ fused decoder kernel --------------------------------
def _decoder_kernel(tok_ref, src_ref, pos_ref,
                    wa_ref, ba_ref, wm1_ref, bm1_ref, wm2_ref, bm2_ref,
                    hw1_ref, hb1_ref, hw2_ref, hb2_ref, hw3_ref, hb3_ref,
                    iw1_ref, ib1_ref, iw2_ref, ib2_ref, iw3_ref, ib3_ref,
                    u1w_ref, u1b_ref, lnw_ref, lnb_ref, u2w_ref, u2b_ref,
                    mask_ref, iou_ref):
    # Whole mask-decoder for a chunk of Bc prompt-batch elements, entirely in VMEM.
    # TODO(synk): the externally-injected TwoWayTransformer is a synthetic single-layer
    #             stand-in (no multi-head split / layer norms / second layer).
    f32 = jnp.float32
    Bc, Nt, C = tok_ref.shape
    L = src_ref.shape[1]
    C4 = lnw_ref.shape[-1]
    C8 = hb3_ref.shape[-1] // NUM_MASK_TOKENS
    scale = 1.0 / math.sqrt(C)

    tok3 = tok_ref[...]          # (Bc, Nt, C)
    src3 = src_ref[...]          # (Bc, L, C)
    pos = pos_ref[...]           # (L, C)

    def pj(x, i):
        return jnp.dot(x, wa_ref[i], preferred_element_type=f32) + ba_ref[i]

    def softmax_rows(s):
        s = s - jnp.max(s, axis=-1, keepdims=True)
        e = jnp.exp(s)
        return e * pl.reciprocal(jnp.sum(e, axis=-1, keepdims=True), approx=True)

    # Image-side projections with the whole chunk flattened to (Bc*L, C) rows so each
    # projection is one matmul with M = Bc*L instead of one per batch element.
    src_flat = jnp.concatenate([src3[b] for b in range(Bc)], axis=0)
    a_flat = jnp.concatenate([src3[b] + pos for b in range(Bc)], axis=0)
    k1_flat = pj(a_flat, 1)
    v1_flat = pj(src_flat, 2)
    q2_flat = pj(a_flat, 3)

    iou_rows, mask_rows, src_rows = [], [], []
    for b in range(Bc):
        t = tok3[b]                                               # (Nt, C)
        # tokens -> image cross attention (+ residual)
        q = pj(t, 0)
        k = k1_flat[b * L:(b + 1) * L]
        v = v1_flat[b * L:(b + 1) * L]
        s = lax.dot_general(q, k, (((1,), (1,)), ((), ())),
                            preferred_element_type=f32) * scale
        t = t + jnp.dot(softmax_rows(s), v, preferred_element_type=f32)
        # token MLP (+ residual)
        h = jnp.maximum(jnp.dot(t, wm1_ref[...], preferred_element_type=f32)
                        + bm1_ref[...], 0.0)
        t = t + jnp.dot(h, wm2_ref[...], preferred_element_type=f32) + bm2_ref[...]
        # image -> tokens cross attention (+ residual)
        q2 = q2_flat[b * L:(b + 1) * L]
        k2 = pj(t, 4)
        v2 = pj(t, 5)
        s2 = lax.dot_general(q2, k2, (((1,), (1,)), ((), ())),
                             preferred_element_type=f32) * scale
        src_rows.append(src3[b] + jnp.dot(softmax_rows(s2), v2,
                                          preferred_element_type=f32))

        iou_rows.append(t[0:1, :])
        mask_rows.append(jnp.concatenate(
            [t[1 + m:2 + m, :] for m in range(NUM_MASK_TOKENS)], axis=-1))

    iou_tok = jnp.concatenate(iou_rows, axis=0)       # (Bc, C)
    mask_tok = jnp.concatenate(mask_rows, axis=0)     # (Bc, NUM_MASK_TOKENS*C) = (Bc, 128)
    src_up = jnp.concatenate(src_rows, axis=0)        # (Bc*L, C)

    # ---- 4 hyper-network MLPs fused via block-diagonal weights (128-wide contraction) --
    h = jnp.maximum(jnp.dot(mask_tok, hw1_ref[...], preferred_element_type=f32)
                    + hb1_ref[...], 0.0)
    h = jnp.maximum(jnp.dot(h, hw2_ref[...], preferred_element_type=f32)
                    + hb2_ref[...], 0.0)
    hyper = jnp.dot(h, hw3_ref[...], preferred_element_type=f32) + hb3_ref[...]  # (Bc, 4*C8)

    # ---- IoU prediction head (fused -> no extra pallas_call) ----
    ih = jnp.maximum(jnp.dot(iou_tok, iw1_ref[...], preferred_element_type=f32)
                     + ib1_ref[...], 0.0)
    ih = jnp.maximum(jnp.dot(ih, iw2_ref[...], preferred_element_type=f32)
                     + ib2_ref[...], 0.0)
    iou_ref[:, 0, :] = jnp.dot(ih, iw3_ref[...], preferred_element_type=f32) + ib3_ref[...]

    # ---- output upscaling: both ConvT(2,2,s2) as stacked / block-diag pointwise matmuls --
    y = jnp.dot(src_up, u1w_ref[...], preferred_element_type=f32) + u1b_ref[...]  # (Bc*L, 4*C4)
    groups = []
    for k1 in range(4):                               # grouped LayerNorm2d per 2x2 offset
        yk = y[:, k1 * C4:(k1 + 1) * C4]
        u = jnp.mean(yk, axis=-1, keepdims=True)
        d = yk - u
        var = jnp.mean(d * d, axis=-1, keepdims=True)
        yk = d * lax.rsqrt(var + 1e-6) * lnw_ref[...] + lnb_ref[...]
        groups.append(_gelu(yk))
    y_ln = jnp.concatenate(groups, axis=-1)           # (Bc*L, 4*C4)
    # block-diagonal second ConvT: ONE matmul for all 16 (dy1,dx1,dy2,dx2) slabs
    z = _gelu(jnp.dot(y_ln, u2w_ref[...], preferred_element_type=f32) + u2b_ref[...])
    # z: (Bc*L, 16*C8), columns ordered (dy1, dx1, dy2, dx2, c8)

    # ---- hyper-network mask product: ONE lane-dense (4, 16*L) store per element ----
    for b in range(Bc):
        hyp = jnp.concatenate(
            [hyper[b:b + 1, m * C8:(m + 1) * C8] for m in range(NUM_MASK_TOKENS)],
            axis=0)                                   # (num_mask_tokens, C8)
        zb = z[b * L:(b + 1) * L, :]
        pieces = []
        for g in range(16):                           # offset slab (dy1, dx1, dy2, dx2)
            zs = zb[:, g * C8:(g + 1) * C8]           # (L, C8)
            pieces.append(lax.dot_general(hyp, zs, (((1,), (1,)), ((), ())),
                                          preferred_element_type=f32))     # (4, L)
        mask_ref[b] = jnp.concatenate(pieces, axis=-1)                       # (4, 16*L)


def _decoder_call(tokens, src, pos, w_list):
    Bt, Nt, C = tokens.shape
    L = src.shape[1]
    # Keep a size-2 "parallel" grid axis (feeds both TensorCores on v7x); on v5e/v6e the
    # chunks just run back-to-back on the single core.
    G = 2 if (Bt % 2 == 0 and Bt >= 2) else 1
    Bc = Bt // G

    def bspec(shape):
        nd = len(shape)
        return pl.BlockSpec((Bc,) + tuple(shape[1:]),
                            lambda g, _nd=nd: (g,) + (0,) * (_nd - 1))

    def wspec(shape):
        nd = len(shape)
        return pl.BlockSpec(tuple(shape), lambda g, _nd=nd: (0,) * _nd)

    out_shapes = (jax.ShapeDtypeStruct((Bt, NUM_MASK_TOKENS, 16 * L), jnp.float32),
                  jax.ShapeDtypeStruct((Bt, 1, NUM_MASK_TOKENS), jnp.float32))
    return pl.pallas_call(
        _decoder_kernel,
        out_shape=out_shapes,
        grid=(G,),
        in_specs=[bspec(tokens.shape), bspec(src.shape), wspec(pos.shape)]
                + [wspec(w.shape) for w in w_list],
        out_specs=(bspec((Bt, NUM_MASK_TOKENS, 16 * L)),
                   bspec((Bt, 1, NUM_MASK_TOKENS))),
        compiler_params=pltpu.CompilerParams(dimension_semantics=("parallel",)),
    )(tokens, src, pos, *w_list)


# ------------------- fused (resize ∘ crop ∘ resize) postprocessing ------------------
def _resize_kernel(x_ref, ry_ref, rxt_ref, o_ref):
    # out[n] = Ry @ X[n] @ Rx^T  for a whole block of images, in VMEM.
    Nb, H, _ = x_ref.shape
    xall = jnp.concatenate([x_ref[n] for n in range(Nb)], axis=0)       # (Nb*H, W)
    t = jnp.dot(xall, rxt_ref[...], preferred_element_type=jnp.float32)  # (Nb*H, OW)
    ry = ry_ref[...]
    for n in range(Nb):
        o_ref[n] = jnp.dot(ry, t[n * H:(n + 1) * H], preferred_element_type=jnp.float32)


def batched_resize(x, ry, rxt):
    N, H, W = x.shape
    OH, OW = ry.shape[0], rxt.shape[1]
    G = 2 if (N % 2 == 0 and N >= 2) else 1
    Nb = N // G
    return pl.pallas_call(
        _resize_kernel,
        out_shape=jax.ShapeDtypeStruct((N, OH, OW), jnp.float32),
        grid=(G,),
        in_specs=[pl.BlockSpec((Nb, H, W), lambda g: (g, 0, 0)),
                  pl.BlockSpec((OH, H), lambda g: (0, 0)),
                  pl.BlockSpec((W, OW), lambda g: (0, 0))],
        out_specs=pl.BlockSpec((Nb, OH, OW), lambda g: (g, 0, 0)),
        compiler_params=pltpu.CompilerParams(dimension_semantics=("parallel",)),
    )(x, ry, rxt)


def _bilinear_matrix_np(in_size, out_size):
    i = np.arange(out_size, dtype=np.float64)
    src = np.clip((i + 0.5) * (in_size / out_size) - 0.5, 0.0, None)
    i0 = np.clip(np.floor(src).astype(np.int64), 0, in_size - 1)
    i1 = np.clip(i0 + 1, 0, in_size - 1)
    w1 = src - i0
    w0 = 1.0 - w1
    r = np.zeros((out_size, in_size), np.float64)
    r[np.arange(out_size), i0] += w0
    r[np.arange(out_size), i1] += w1
    return r


def _composite_resize_matrices(low_hw, pad_hw, input_size, original_size):
    # crop ∘ bilinear is linear: compose (resize to img_size) -> crop -> (resize to orig).
    ry1 = _bilinear_matrix_np(low_hw[0], pad_hw[0])[:input_size[0], :]
    rx1 = _bilinear_matrix_np(low_hw[1], pad_hw[1])[:input_size[1], :]
    ry2 = _bilinear_matrix_np(input_size[0], original_size[0])
    rx2 = _bilinear_matrix_np(input_size[1], original_size[1])
    ry = jnp.asarray((ry2 @ ry1).astype(np.float32))       # (orig_h, low_h)
    rxt = jnp.asarray((rx2 @ rx1).T.astype(np.float32))    # (low_w, orig_w)
    return ry, rxt


def postprocess_masks(low_res, input_size, original_size):
    B, Cm, H, W = low_res.shape
    ry, rxt = _composite_resize_matrices((H, W), (IMG_SIZE, IMG_SIZE),
                                         input_size, original_size)
    out = batched_resize(low_res.reshape(B * Cm, H, W), ry, rxt)
    return out.reshape(B, Cm, original_size[0], original_size[1])


# ---------------------------------- Sam forward -------------------------------------
@partial(jax.jit, static_argnames=("input_size", "original_size", "multimask_output"))
def _sam_forward_group(params, images, coords, labels, input_size, original_size,
                       multimask_output):
    # images: [R, 3, H, W]; coords: [R, Bp, Np, 2]; labels: [R, Bp, Np]
    R = images.shape[0]
    Bp, Np = coords.shape[1], coords.shape[2]
    Bt = R * Bp
    C = EMBED

    # ---- preprocess + synthetic patch-embed image encoder (plain jnp; XLA fuses) ----
    # TODO(synk): the reference injects an external image_encoder; a patch-embed stand-in.
    x = (images.astype(jnp.float32) - PIXEL_MEAN) / PIXEL_STD
    h_in, w_in = input_size
    x = jnp.pad(x, ((0, 0), (0, 0), (0, IMG_SIZE - h_in), (0, IMG_SIZE - w_in)))
    g = IMG_SIZE // PATCH
    xp = x.reshape(R, 3, g, PATCH, g, PATCH).transpose(0, 2, 4, 1, 3, 5)
    xp = xp.reshape(R, g * g, 3 * PATCH * PATCH)
    ie = params['image_encoder']
    img_emb = jnp.dot(xp, ie['patch_w']) + ie['patch_b']              # (R, HW, C)

    # ---- prompt encoder (points; pad point because boxes is None) ----
    pe = params['prompt_encoder']
    pts = coords.reshape(Bt, Np, 2).astype(jnp.float32) + 0.5
    pts = jnp.concatenate([pts, jnp.zeros((Bt, 1, 2), jnp.float32)], axis=1)
    lbl = jnp.concatenate([labels.reshape(Bt, Np).astype(jnp.float32),
                           -jnp.ones((Bt, 1), jnp.float32)], axis=1)
    norm = pts / jnp.array([INPUT_IMAGE_SIZE[1], INPUT_IMAGE_SIZE[0]], jnp.float32)

    def pe_encode(c):
        proj = 2.0 * math.pi * jnp.dot(2.0 * c - 1.0, pe['pe_gaussian'])
        return jnp.concatenate([jnp.sin(proj), jnp.cos(proj)], axis=-1)

    gvals = (jnp.arange(EMB_HW, dtype=jnp.float32) + 0.5) / EMB_HW
    yy = jnp.broadcast_to(gvals[:, None], (EMB_HW, EMB_HW))
    xx = jnp.broadcast_to(gvals[None, :], (EMB_HW, EMB_HW))
    dense_pe = pe_encode(jnp.stack([xx, yy], axis=-1).reshape(HW, 2))   # (HW, C)
    point_pe = pe_encode(norm.reshape(-1, 2)).reshape(Bt, Np + 1, C)

    lblx = lbl[..., None]
    sparse = (point_pe
              + jnp.where(lblx == -1.0, 1.0, 0.0) * pe['not_a_point'][0]
              + jnp.where(lblx == 0.0, 1.0, 0.0) * pe['point_embeds'][0]
              + jnp.where(lblx == 1.0, 1.0, 0.0) * pe['point_embeds'][1])

    # ---- mask decoder: one fused Pallas kernel over the whole prompt batch ----
    md = params['mask_decoder']
    tr = md['transformer']
    out_tok = jnp.concatenate([md['iou_token'], md['mask_tokens']], axis=0)   # (5, C)
    tokens = jnp.concatenate(
        [jnp.broadcast_to(out_tok[None], (Bt, 1 + NUM_MASK_TOKENS, C)), sparse], axis=1)
    src = jnp.repeat(img_emb, Bp, axis=0) + pe['no_mask_embed'][0][None, None, :]

    C4, C8 = C // 4, C // 8
    # pack weights: block-diagonal hyper MLPs, stacked / block-diag ConvT offset slabs
    hw1, hw2, hw3 = (_block_diag(md['hyper_w1']), _block_diag(md['hyper_w2']),
                     _block_diag(md['hyper_w3']))
    hb1 = md['hyper_b1'].reshape(1, -1)
    hb2 = md['hyper_b2'].reshape(1, -1)
    hb3 = md['hyper_b3'].reshape(1, -1)
    u1w = md['up1_w'].transpose(1, 0, 2).reshape(C, 4 * C4)
    u1b = jnp.tile(md['up1_b'], (1, 4))
    u2w_stk = md['up2_w'].transpose(1, 0, 2).reshape(C4, 4 * C8)
    u2w = _block_diag(jnp.broadcast_to(u2w_stk[None], (4, C4, 4 * C8)))
    u2b = jnp.tile(md['up2_b'], (1, 16))

    w_list = [tr['w_attn'], tr['b_attn'], tr['wm1'], tr['bm1'], tr['wm2'], tr['bm2'],
              hw1, hb1, hw2, hb2, hw3, hb3,
              md['iou_w1'], md['iou_b1'], md['iou_w2'], md['iou_b2'],
              md['iou_w3'], md['iou_b3'],
              u1w, u1b, md['ln_w'], md['ln_b'], u2w, u2b]

    mask_flat, iou3 = _decoder_call(tokens, src, dense_pe, w_list)
    iou_pred = iou3[:, 0, :]                                           # (Bt, 4)

    # pixel-shuffle the (dy1, dx1, dy2, dx2) ConvT offset slabs into the 4x grid (tiny glue)
    low_res = mask_flat.reshape(Bt, NUM_MASK_TOKENS, 2, 2, 2, 2, EMB_HW, EMB_HW)
    low_res = low_res.transpose(0, 1, 6, 2, 4, 7, 3, 5)
    low_res = low_res.reshape(Bt, NUM_MASK_TOKENS, 4 * EMB_HW, 4 * EMB_HW)

    if multimask_output:
        low_res, iou_pred = low_res[:, 1:], iou_pred[:, 1:]
    else:
        low_res, iou_pred = low_res[:, :1], iou_pred[:, :1]

    masks = postprocess_masks(low_res, input_size, original_size) > MASK_THRESHOLD
    return masks, iou_pred, low_res


def _record_key(r):
    return (tuple(r['image'].shape),
            tuple(r['original_size']),
            tuple(r['point_coords'].shape) if 'point_coords' in r else None,
            tuple(r['point_labels'].shape) if 'point_labels' in r else None)


def sam_forward(params, batched_input, multimask_output):
    # Records with identical shapes are batched through a single decoder pass.
    keys = [_record_key(r) for r in batched_input]
    if all(k == keys[0] for k in keys):
        groups = [list(range(len(batched_input)))]
    else:
        groups = [[i] for i in range(len(batched_input))]

    outputs = [None] * len(batched_input)
    for idx in groups:
        recs = [batched_input[i] for i in idx]
        # TODO(synk): box / mask-downscaling prompt branches unused in this driver.
        assert all('point_coords' in r for r in recs)
        images = jnp.stack([r['image'] for r in recs], axis=0)
        coords = jnp.stack([r['point_coords'] for r in recs], axis=0)
        labels = jnp.stack([r['point_labels'] for r in recs], axis=0)
        input_size = tuple(int(s) for s in recs[0]['image'].shape[-2:])
        original_size = tuple(int(s) for s in recs[0]['original_size'])
        masks, iou, low = _sam_forward_group(params, images, coords, labels,
                                             input_size, original_size,
                                             bool(multimask_output))
        Bp = coords.shape[1]
        for j, i in enumerate(idx):
            sl = slice(j * Bp, (j + 1) * Bp)
            outputs[i] = {'masks': masks[sl], 'iou_predictions': iou[sl],
                          'low_res_logits': low[sl]}
    return outputs


# ------------------------------ parameter initialization -----------------------------
def init_params(key):
    ks = iter(jax.random.split(key, 64))

    def nrm(shape, scale=0.05):
        return scale * jax.random.normal(next(ks), shape, jnp.float32)

    C = EMBED
    C4, C8 = C // 4, C // 8
    return {
        'image_encoder': {'patch_w': nrm((3 * PATCH * PATCH, C)),
                          'patch_b': jnp.zeros((1, C), jnp.float32)},
        'prompt_encoder': {
            'pe_gaussian': nrm((2, C // 2), 1.0),
            'point_embeds': nrm((4, C)),
            'not_a_point': nrm((1, C)),
            'no_mask_embed': nrm((1, C)),
        },
        'mask_decoder': {
            'iou_token': nrm((1, C)),
            'mask_tokens': nrm((NUM_MASK_TOKENS, C)),
            'transformer': {
                # stacked (q, k, v, q2, k2, v2) projections
                'w_attn': nrm((6, C, C)),
                'b_attn': jnp.zeros((6, 1, C), jnp.float32),
                'wm1': nrm((C, 2 * C)), 'bm1': jnp.zeros((1, 2 * C), jnp.float32),
                'wm2': nrm((2 * C, C)), 'bm2': jnp.zeros((1, C), jnp.float32),
            },
            # ConvTranspose2d weights stored as per-2x2-offset slabs [4, Cin, Cout]
            'up1_w': nrm((4, C, C4)), 'up1_b': jnp.zeros((1, C4), jnp.float32),
            'ln_w': jnp.ones((1, C4), jnp.float32),
            'ln_b': jnp.zeros((1, C4), jnp.float32),
            'up2_w': nrm((4, C4, C8)), 'up2_b': jnp.zeros((1, C8), jnp.float32),
            # 4 hyper-network MLPs (stacked; packed block-diagonally at call time)
            'hyper_w1': nrm((NUM_MASK_TOKENS, C, C)),
            'hyper_b1': jnp.zeros((NUM_MASK_TOKENS, 1, C), jnp.float32),
            'hyper_w2': nrm((NUM_MASK_TOKENS, C, C)),
            'hyper_b2': jnp.zeros((NUM_MASK_TOKENS, 1, C), jnp.float32),
            'hyper_w3': nrm((NUM_MASK_TOKENS, C, C8)),
            'hyper_b3': jnp.zeros((NUM_MASK_TOKENS, 1, C8), jnp.float32),
            # IoU head (fused into the decoder kernel)
            'iou_w1': nrm((C, IOU_HIDDEN)),
            'iou_b1': jnp.zeros((1, IOU_HIDDEN), jnp.float32),
            'iou_w2': nrm((IOU_HIDDEN, IOU_HIDDEN)),
            'iou_b2': jnp.zeros((1, IOU_HIDDEN), jnp.float32),
            'iou_w3': nrm((IOU_HIDDEN, NUM_MASK_TOKENS)),
            'iou_b3': jnp.zeros((1, NUM_MASK_TOKENS), jnp.float32),
        },
    }


if __name__ == "__main__":
    params = init_params(jax.random.PRNGKey(0))

    dkeys = jax.random.split(jax.random.PRNGKey(0), 8)
    H_in, W_in = 32, 24            # non-square input -> exercises padding + un-padding
    ORIG = (40, 30)
    batched_input = []
    for i in range(2):
        img = jax.random.uniform(dkeys[i], (3, H_in, W_in), jnp.float32) * 255.0
        coords = jax.random.uniform(dkeys[2 + i], (2, 1, 2), jnp.float32) * (IMG_SIZE - 1.0)
        labels = jnp.array([[1.0], [0.0]], jnp.float32)
        batched_input.append({'image': img, 'original_size': ORIG,
                              'point_coords': coords, 'point_labels': labels})

    outputs = sam_forward(params, batched_input, multimask_output=True)
    jax.block_until_ready(outputs)

    assert outputs[0]['masks'].shape == (2, NUM_MULTIMASK, ORIG[0], ORIG[1])
    assert outputs[0]['masks'].dtype == jnp.bool_
    assert outputs[0]['iou_predictions'].shape == (2, NUM_MULTIMASK)
    assert outputs[0]['low_res_logits'].shape == (2, NUM_MULTIMASK, 4 * EMB_HW, 4 * EMB_HW)
    assert outputs[1]['masks'].shape == (2, NUM_MULTIMASK, ORIG[0], ORIG[1])
    print("KERNEL_OK")
</pallas_src>

<mosaic_0001>
module attributes {stable_mosaic.version = 11 : i64} {
  func.func @_decoder_kernel(%arg0: i32, %arg1: memref<2x7x32xf32, #tpu.memory_space<vmem>>, %arg2: memref<2x64x32xf32, #tpu.memory_space<vmem>>, %arg3: memref<64x32xf32, #tpu.memory_space<vmem>>, %arg4: memref<6x32x32xf32, #tpu.memory_space<vmem>>, %arg5: memref<6x1x32xf32, #tpu.memory_space<vmem>>, %arg6: memref<32x64xf32, #tpu.memory_space<vmem>>, %arg7: memref<1x64xf32, #tpu.memory_space<vmem>>, %arg8: memref<64x32xf32, #tpu.memory_space<vmem>>, %arg9: memref<1x32xf32, #tpu.memory_space<vmem>>, %arg10: memref<128x128xf32, #tpu.memory_space<vmem>>, %arg11: memref<1x128xf32, #tpu.memory_space<vmem>>, %arg12: memref<128x128xf32, #tpu.memory_space<vmem>>, %arg13: memref<1x128xf32, #tpu.memory_space<vmem>>, %arg14: memref<128x16xf32, #tpu.memory_space<vmem>>, %arg15: memref<1x16xf32, #tpu.memory_space<vmem>>, %arg16: memref<32x32xf32, #tpu.memory_space<vmem>>, %arg17: memref<1x32xf32, #tpu.memory_space<vmem>>, %arg18: memref<32x32xf32, #tpu.memory_space<vmem>>, %arg19: memref<1x32xf32, #tpu.memory_space<vmem>>, %arg20: memref<32x4xf32, #tpu.memory_space<vmem>>, %arg21: memref<1x4xf32, #tpu.memory_space<vmem>>, %arg22: memref<32x32xf32, #tpu.memory_space<vmem>>, %arg23: memref<1x32xf32, #tpu.memory_space<vmem>>, %arg24: memref<1x8xf32, #tpu.memory_space<vmem>>, %arg25: memref<1x8xf32, #tpu.memory_space<vmem>>, %arg26: memref<32x64xf32, #tpu.memory_space<vmem>>, %arg27: memref<1x64xf32, #tpu.memory_space<vmem>>, %arg28: memref<2x4x1024xf32, #tpu.memory_space<vmem>>, %arg29: memref<2x1x4xf32, #tpu.memory_space<vmem>>) attributes {dimension_semantics = [#tpu.dimension_semantics<parallel>], iteration_bounds = array<i64: 2>, scalar_prefetch = 0 : i64, scratch_operands = 0 : i64, tpu.core_type = #tpu.core_type<tc>, window_params = [{transform_indices = @transform_0, window_bounds = array<i64: 2, 7, 32>}, {transform_indices = @transform_1, window_bounds = array<i64: 2, 64, 32>}, {pipeline_mode = #tpu.pipeline_mode<synchronous>, transform_indices = @transform_2, window_bounds = array<i64: 64, 32>}, {pipeline_mode = #tpu.pipeline_mode<synchronous>, transform_indices = @transform_3, window_bounds = array<i64: 6, 32, 32>}, {pipeline_mode = #tpu.pipeline_mode<synchronous>, transform_indices = @transform_4, window_bounds = array<i64: 6, 1, 32>}, {pipeline_mode = #tpu.pipeline_mode<synchronous>, transform_indices = @transform_5, window_bounds = array<i64: 32, 64>}, {pipeline_mode = #tpu.pipeline_mode<synchronous>, transform_indices = @transform_6, window_bounds = array<i64: 1, 64>}, {pipeline_mode = #tpu.pipeline_mode<synchronous>, transform_indices = @transform_7, window_bounds = array<i64: 64, 32>}, {pipeline_mode = #tpu.pipeline_mode<synchronous>, transform_indices = @transform_8, window_bounds = array<i64: 1, 32>}, {pipeline_mode = #tpu.pipeline_mode<synchronous>, transform_indices = @transform_9, window_bounds = array<i64: 128, 128>}, {pipeline_mode = #tpu.pipeline_mode<synchronous>, transform_indices = @transform_10, window_bounds = array<i64: 1, 128>}, {pipeline_mode = #tpu.pipeline_mode<synchronous>, transform_indices = @transform_11, window_bounds = array<i64: 128, 128>}, {pipeline_mode = #tpu.pipeline_mode<synchronous>, transform_indices = @transform_12, window_bounds = array<i64: 1, 128>}, {pipeline_mode = #tpu.pipeline_mode<synchronous>, transform_indices = @transform_13, window_bounds = array<i64: 128, 16>}, {pipeline_mode = #tpu.pipeline_mode<synchronous>, transform_indices = @transform_14, window_bounds = array<i64: 1, 16>}, {pipeline_mode = #tpu.pipeline_mode<synchronous>, transform_indices = @transform_15, window_bounds = array<i64: 32, 32>}, {pipeline_mode = #tpu.pipeline_mode<synchronous>, transform_indices = @transform_16, window_bounds = array<i64: 1, 32>}, {pipeline_mode = #tpu.pipeline_mode<synchronous>, transform_indices = @transform_17, window_bounds = array<i64: 32, 32>}, {pipeline_mode = #tpu.pipeline_mode<synchronous>, transform_indices = @transform_18, window_bounds = array<i64: 1, 32>}, {pipeline_mode = #tpu.pipeline_mode<synchronous>, transform_indices = @transform_19, window_bounds = array<i64: 32, 4>}, {pipeline_mode = #tpu.pipeline_mode<synchronous>, transform_indices = @transform_20, window_bounds = array<i64: 1, 4>}, {pipeline_mode = #tpu.pipeline_mode<synchronous>, transform_indices = @transform_21, window_bounds = array<i64: 32, 32>}, {pipeline_mode = #tpu.pipeline_mode<synchronous>, transform_indices = @transform_22, window_bounds = array<i64: 1, 32>}, {pipeline_mode = #tpu.pipeline_mode<synchronous>, transform_indices = @transform_23, window_bounds = array<i64: 1, 8>}, {pipeline_mode = #tpu.pipeline_mode<synchronous>, transform_indices = @transform_24, window_bounds = array<i64: 1, 8>}, {pipeline_mode = #tpu.pipeline_mode<synchronous>, transform_indices = @transform_25, window_bounds = array<i64: 32, 64>}, {pipeline_mode = #tpu.pipeline_mode<synchronous>, transform_indices = @transform_26, window_bounds = array<i64: 1, 64>}, {transform_indices = @transform_27, window_bounds = array<i64: 2, 4, 1024>}, {transform_indices = @transform_28, window_bounds = array<i64: 2, 1, 4>}]} {
    %c0 = arith.constant 0 : index
    %c0_0 = arith.constant 0 : index
    %c0_1 = arith.constant 0 : index
    %0 = vector.load %arg1[%c0, %c0_0, %c0_1] : memref<2x7x32xf32, #tpu.memory_space<vmem>>, vector<2x7x32xf32>
    %c0_2 = arith.constant 0 : index
    %c0_3 = arith.constant 0 : index
    %c0_4 = arith.constant 0 : index
    %1 = vector.load %arg2[%c0_2, %c0_3, %c0_4] : memref<2x64x32xf32, #tpu.memory_space<vmem>>, vector<2x64x32xf32>
    %c0_5 = arith.constant 0 : index
    %c0_6 = arith.constant 0 : index
    %2 = vector.load %arg3[%c0_5, %c0_6] : memref<64x32xf32, #tpu.memory_space<vmem>>, vector<64x32xf32>
    %3 = vector.extract_strided_slice %1 {offsets = [0, 0, 0], sizes = [1, 64, 32], strides = [1, 1, 1]} : vector<2x64x32xf32> to vector<1x64x32xf32>
    %4 = vector.shape_cast %3 : vector<1x64x32xf32> to vector<64x32xf32>
    %5 = vector.extract_strided_slice %1 {offsets = [1, 0, 0], sizes = [1, 64, 32], strides = [1, 1, 1]} : vector<2x64x32xf32> to vector<1x64x32xf32>
    %6 = vector.shape_cast %5 : vector<1x64x32xf32> to vector<64x32xf32>
    %7 = tpu.concatenate %4, %6 in 0 : vector<64x32xf32>, vector<64x32xf32> -> vector<128x32xf32>
    %8 = vector.extract_strided_slice %1 {offsets = [0, 0, 0], sizes = [1, 64, 32], strides = [1, 1, 1]} : vector<2x64x32xf32> to vector<1x64x32xf32>
    %9 = vector.shape_cast %8 : vector<1x64x32xf32> to vector<64x32xf32>
    %10 = arith.addf %9, %2 : vector<64x32xf32>
    %11 = vector.extract_strided_slice %1 {offsets = [1, 0, 0], sizes = [1, 64, 32], strides = [1, 1, 1]} : vector<2x64x32xf32> to vector<1x64x32xf32>
    %12 = vector.shape_cast %11 : vector<1x64x32xf32> to vector<64x32xf32>
    %13 = arith.addf %12, %2 : vector<64x32xf32>
    %14 = tpu.concatenate %10, %13 in 0 : vector<64x32xf32>, vector<64x32xf32> -> vector<128x32xf32>
    %c1 = arith.constant 1 : index
    %c0_7 = arith.constant 0 : index
    %c0_8 = arith.constant 0 : index
    %15 = vector.load %arg4[%c1, %c0_7, %c0_8] : memref<6x32x32xf32, #tpu.memory_space<vmem>>, vector<1x32x32xf32>
    %16 = vector.shape_cast %15 : vector<1x32x32xf32> to vector<32x32xf32>
    %cst = arith.constant dense<0.000000e+00> : vector<128x32xf32>
    %17 = tpu.matmul %14, %16, %cst {dimension_numbers = #tpu.dot_dimension_numbers<[1], [0], [0], [1], [0, 0, 1, 1], [], []>} : vector<128x32xf32>, vector<32x32xf32>, vector<128x32xf32> -> vector<128x32xf32>
    %c1_9 = arith.constant 1 : index
    %c0_10 = arith.constant 0 : index
    %c0_11 = arith.constant 0 : index
    %18 = vector.load %arg5[%c1_9, %c0_10, %c0_11] : memref<6x1x32xf32, #tpu.memory_space<vmem>>, vector<1x1x32xf32>
    %19 = vector.shape_cast %18 : vector<1x1x32xf32> to vector<1x32xf32>
    %20 = vector.broadcast %19 : vector<1x32xf32> to vector<128x32xf32>
    %21 = arith.addf %17, %20 : vector<128x32xf32>
    %c2 = arith.constant 2 : index
    %c0_12 = arith.constant 0 : index
    %c0_13 = arith.constant 0 : index
    %22 = vector.load %arg4[%c2, %c0_12, %c0_13] : memref<6x32x32xf32, #tpu.memory_space<vmem>>, vector<1x32x32xf32>
    %23 = vector.shape_cast %22 : vector<1x32x32xf32> to vector<32x32xf32>
    %cst_14 = arith.constant dense<0.000000e+00> : vector<128x32xf32>
    %24 = tpu.matmul %7, %23, %cst_14 {dimension_numbers = #tpu.dot_dimension_numbers<[1], [0], [0], [1], [0, 0, 1, 1], [], []>} : vector<128x32xf32>, vector<32x32xf32>, vector<128x32xf32> -> vector<128x32xf32>
    %c2_15 = arith.constant 2 : index
    %c0_16 = arith.constant 0 : index
    %c0_17 = arith.constant 0 : index
    %25 = vector.load %arg5[%c2_15, %c0_16, %c0_17] : memref<6x1x32xf32, #tpu.memory_space<vmem>>, vector<1x1x32xf32>
    %26 = vector.shape_cast %25 : vector<1x1x32xf32> to vector<1x32xf32>
    %27 = vector.broadcast %26 : vector<1x32xf32> to vector<128x32xf32>
    %28 = arith.addf %24, %27 : vector<128x32xf32>
    %c3 = arith.constant 3 : index
    %c0_18 = arith.constant 0 : index
    %c0_19 = arith.constant 0 : index
    %29 = vector.load %arg4[%c3, %c0_18, %c0_19] : memref<6x32x32xf32, #tpu.memory_space<vmem>>, vector<1x32x32xf32>
    %30 = vector.shape_cast %29 : vector<1x32x32xf32> to vector<32x32xf32>
    %cst_20 = arith.constant dense<0.000000e+00> : vector<128x32xf32>
    %31 = tpu.matmul %14, %30, %cst_20 {dimension_numbers = #tpu.dot_dimension_numbers<[1], [0], [0], [1], [0, 0, 1, 1], [], []>} : vector<128x32xf32>, vector<32x32xf32>, vector<128x32xf32> -> vector<128x32xf32>
    %c3_21 = arith.constant 3 : index
    %c0_22 = arith.constant 0 : index
    %c0_23 = arith.constant 0 : index
    %32 = vector.load %arg5[%c3_21, %c0_22, %c0_23] : memref<6x1x32xf32, #tpu.memory_space<vmem>>, vector<1x1x32xf32>
    %33 = vector.shape_cast %32 : vector<1x1x32xf32> to vector<1x32xf32>
    %34 = vector.broadcast %33 : vector<1x32xf32> to vector<128x32xf32>
    %35 = arith.addf %31, %34 : vector<128x32xf32>
    %36 = vector.extract_strided_slice %0 {offsets = [0, 0, 0], sizes = [1, 7, 32], strides = [1, 1, 1]} : vector<2x7x32xf32> to vector<1x7x32xf32>
    %37 = vector.shape_cast %36 : vector<1x7x32xf32> to vector<7x32xf32>
    %c0_24 = arith.constant 0 : index
    %c0_25 = arith.constant 0 : index
    %c0_26 = arith.constant 0 : index
    %38 = vector.load %arg4[%c0_24, %c0_25, %c0_26] : memref<6x32x32xf32, #tpu.memory_space<vmem>>, vector<1x32x32xf32>
    %39 = vector.shape_cast %38 : vector<1x32x32xf32> to vector<32x32xf32>
    %cst_27 = arith.constant dense<0.000000e+00> : vector<7x32xf32>
    %40 = tpu.matmul %37, %39, %cst_27 {dimension_numbers = #tpu.dot_dimension_numbers<[1], [0], [0], [1], [0, 0, 1, 1], [], []>} : vector<7x32xf32>, vector<32x32xf32>, vector<7x32xf32> -> vector<7x32xf32>
    %c0_28 = arith.constant 0 : index
    %c0_29 = arith.constant 0 : index
    %c0_30 = arith.constant 0 : index
    %41 = vector.load %arg5[%c0_28, %c0_29, %c0_30] : memref<6x1x32xf32, #tpu.memory_space<vmem>>, vector<1x1x32xf32>
    %42 = vector.shape_cast %41 : vector<1x1x32xf32> to vector<1x32xf32>
    %43 = vector.broadcast %42 : vector<1x32xf32> to vector<7x32xf32>
    %44 = arith.addf %40, %43 : vector<7x32xf32>
    %45 = vector.extract_strided_slice %21 {offsets = [0, 0], sizes = [64, 32], strides = [1, 1]} : vector<128x32xf32> to vector<64x32xf32>
    %46 = vector.extract_strided_slice %28 {offsets = [0, 0], sizes = [64, 32], strides = [1, 1]} : vector<128x32xf32> to vector<64x32xf32>
    %cst_31 = arith.constant dense<0.000000e+00> : vector<7x64xf32>
    %47 = tpu.matmul %44, %45, %cst_31 {dimension_numbers = #tpu.dot_dimension_numbers<[1], [1], [0], [0], [0, 0, 1, 0], [], []>} : vector<7x32xf32>, vector<64x32xf32>, vector<7x64xf32> -> vector<7x64xf32>
    %cst_32 = arith.constant 0.176776692 : f32
    %48 = vector.broadcast %cst_32 : f32 to vector<7x64xf32>
    %49 = arith.mulf %47, %48 : vector<7x64xf32>
    %cst_33 = arith.constant dense<0xFF800000> : vector<7xf32>
    %50 = vector.multi_reduction <maximumf>, %49, %cst_33 [1] : vector<7x64xf32> to vector<7xf32>
    %51 = vector.shape_cast %50 : vector<7xf32> to vector<7x1xf32>
    %52 = vector.broadcast %51 : vector<7x1xf32> to vector<7x64xf32>
    %53 = arith.subf %49, %52 : vector<7x64xf32>
    %54 = math.exp %53 : vector<7x64xf32>
    %cst_34 = arith.constant dense<0.000000e+00> : vector<7xf32>
    %55 = vector.multi_reduction <add>, %54, %cst_34 [1] : vector<7x64xf32> to vector<7xf32>
    %56 = vector.shape_cast %55 : vector<7xf32> to vector<7x1xf32>
    %57 = tpu.reciprocal %56 {approx = true} : vector<7x1xf32> -> vector<7x1xf32>
    %58 = vector.broadcast %57 : vector<7x1xf32> to vector<7x64xf32>
    %59 = arith.mulf %54, %58 : vector<7x64xf32>
    %cst_35 = arith.constant dense<0.000000e+00> : vector<7x32xf32>
    %60 = tpu.matmul %59, %46, %cst_35 {dimension_numbers = #tpu.dot_dimension_numbers<[1], [0], [0], [1], [0, 0, 1, 1], [], []>} : vector<7x64xf32>, vector<64x32xf32>, vector<7x32xf32> -> vector<7x32xf32>
    %61 = arith.addf %37, %60 : vector<7x32xf32>
    %c0_36 = arith.constant 0 : index
    %c0_37 = arith.constant 0 : index
    %62 = vector.load %arg6[%c0_36, %c0_37] : memref<32x64xf32, #tpu.memory_space<vmem>>, vector<32x64xf32>
    %cst_38 = arith.constant dense<0.000000e+00> : vector<7x64xf32>
    %63 = tpu.matmul %61, %62, %cst_38 {dimension_numbers = #tpu.dot_dimension_numbers<[1], [0], [0], [1], [0, 0, 1, 1], [], []>} : vector<7x32xf32>, vector<32x64xf32>, vector<7x64xf32> -> vector<7x64xf32>
    %c0_39 = arith.constant 0 : index
    %c0_40 = arith.constant 0 : index
    %64 = vector.load %arg7[%c0_39, %c0_40] : memref<1x64xf32, #tpu.memory_space<vmem>>, vector<1x64xf32>
    %65 = vector.broadcast %64 : vector<1x64xf32> to vector<7x64xf32>
    %66 = arith.addf %63, %65 : vector<7x64xf32>
    %cst_41 = arith.constant 0.000000e+00 : f32
    %67 = vector.broadcast %cst_41 : f32 to vector<7x64xf32>
    %68 = arith.maximumf %66, %67 : vector<7x64xf32>
    %c0_42 = arith.constant 0 : index
    %c0_43 = arith.constant 0 : index
    %69 = vector.load %arg8[%c0_42, %c0_43] : memref<64x32xf32, #tpu.memory_space<vmem>>, vector<64x32xf32>
    %cst_44 = arith.constant dense<0.000000e+00> : vector<7x32xf32>
    %70 = tpu.matmul %68, %69, %cst_44 {dimension_numbers = #tpu.dot_dimension_numbers<[1], [0], [0], [1], [0, 0, 1, 1], [], []>} : vector<7x64xf32>, vector<64x32xf32>, vector<7x32xf32> -> vector<7x32xf32>
    %71 = arith.addf %61, %70 : vector<7x32xf32>
    %c0_45 = arith.constant 0 : index
    %c0_46 = arith.constant 0 : index
    %72 = vector.load %arg9[%c0_45, %c0_46] : memref<1x32xf32, #tpu.memory_space<vmem>>, vector<1x32xf32>
    %73 = vector.broadcast %72 : vector<1x32xf32> to vector<7x32xf32>
    %74 = arith.addf %71, %73 : vector<7x32xf32>
    %75 = vector.extract_strided_slice %35 {offsets = [0, 0], sizes = [64, 32], strides = [1, 1]} : vector<128x32xf32> to vector<64x32xf32>
    %c4 = arith.constant 4 : index
    %c0_47 = arith.constant 0 : index
    %c0_48 = arith.constant 0 : index
    %76 = vector.load %arg4[%c4, %c0_47, %c0_48] : memref<6x32x32xf32, #tpu.memory_space<vmem>>, vector<1x32x32xf32>
    %77 = vector.shape_cast %76 : vector<1x32x32xf32> to vector<32x32xf32>
    %cst_49 = arith.constant dense<0.000000e+00> : vector<7x32xf32>
    %78 = tpu.matmul %74, %77, %cst_49 {dimension_numbers = #tpu.dot_dimension_numbers<[1], [0], [0], [1], [0, 0, 1, 1], [], []>} : vector<7x32xf32>, vector<32x32xf32>, vector<7x32xf32> -> vector<7x32xf32>
    %c4_50 = arith.constant 4 : index
    %c0_51 = arith.constant 0 : index
    %c0_52 = arith.constant 0 : index
    %79 = vector.load %arg5[%c4_50, %c0_51, %c0_52] : memref<6x1x32xf32, #tpu.memory_space<vmem>>, vector<1x1x32xf32>
    %80 = vector.shape_cast %79 : vector<1x1x32xf32> to vector<1x32xf32>
    %81 = vector.broadcast %80 : vector<1x32xf32> to vector<7x32xf32>
    %82 = arith.addf %78, %81 : vector<7x32xf32>
    %c5 = arith.constant 5 : index
    %c0_53 = arith.constant 0 : index
    %c0_54 = arith.constant 0 : index
    %83 = vector.load %arg4[%c5, %c0_53, %c0_54] : memref<6x32x32xf32, #tpu.memory_space<vmem>>, vector<1x32x32xf32>
    %84 = vector.shape_cast %83 : vector<1x32x32xf32> to vector<32x32xf32>
    %cst_55 = arith.constant dense<0.000000e+00> : vector<7x32xf32>
    %85 = tpu.matmul %74, %84, %cst_55 {dimension_numbers = #tpu.dot_dimension_numbers<[1], [0], [0], [1], [0, 0, 1, 1], [], []>} : vector<7x32xf32>, vector<32x32xf32>, vector<7x32xf32> -> vector<7x32xf32>
    %c5_56 = arith.constant 5 : index
    %c0_57 = arith.constant 0 : index
    %c0_58 = arith.constant 0 : index
    %86 = vector.load %arg5[%c5_56, %c0_57, %c0_58] : memref<6x1x32xf32, #tpu.memory_space<vmem>>, vector<1x1x32xf32>
    %87 = vector.shape_cast %86 : vector<1x1x32xf32> to vector<1x32xf32>
    %88 = vector.broadcast %87 : vector<1x32xf32> to vector<7x32xf32>
    %89 = arith.addf %85, %88 : vector<7x32xf32>
    %cst_59 = arith.constant dense<0.000000e+00> : vector<64x7xf32>
    %90 = tpu.matmul %75, %82, %cst_59 {dimension_numbers = #tpu.dot_dimension_numbers<[1], [1], [0], [0], [0, 0, 1, 0], [], []>} : vector<64x32xf32>, vector<7x32xf32>, vector<64x7xf32> -> vector<64x7xf32>
    %cst_60 = arith.constant 0.176776692 : f32
    %91 = vector.broadcast %cst_60 : f32 to vector<64x7xf32>
    %92 = arith.mulf %90, %91 : vector<64x7xf32>
    %93 = vector.extract_strided_slice %1 {offsets = [0, 0, 0], sizes = [1, 64, 32], strides = [1, 1, 1]} : vector<2x64x32xf32> to vector<1x64x32xf32>
    %94 = vector.shape_cast %93 : vector<1x64x32xf32> to vector<64x32xf32>
    %cst_61 = arith.constant dense<0xFF800000> : vector<64xf32>
    %95 = vector.multi_reduction <maximumf>, %92, %cst_61 [1] : vector<64x7xf32> to vector<64xf32>
    %96 = vector.shape_cast %95 : vector<64xf32> to vector<64x1xf32>
    %97 = vector.broadcast %96 : vector<64x1xf32> to vector<64x7xf32>
    %98 = arith.subf %92, %97 : vector<64x7xf32>
    %99 = math.exp %98 : vector<64x7xf32>
    %cst_62 = arith.constant dense<0.000000e+00> : vector<64xf32>
    %100 = vector.multi_reduction <add>, %99, %cst_62 [1] : vector<64x7xf32> to vector<64xf32>
    %101 = vector.shape_cast %100 : vector<64xf32> to vector<64x1xf32>
    %102 = tpu.reciprocal %101 {approx = true} : vector<64x1xf32> -> vector<64x1xf32>
    %103 = vector.broadcast %102 : vector<64x1xf32> to vector<64x7xf32>
    %104 = arith.mulf %99, %103 : vector<64x7xf32>
    %cst_63 = arith.constant dense<0.000000e+00> : vector<64x32xf32>
    %105 = tpu.matmul %104, %89, %cst_63 {dimension_numbers = #tpu.dot_dimension_numbers<[1], [0], [0], [1], [0, 0, 1, 1], [], []>} : vector<64x7xf32>, vector<7x32xf32>, vector<64x32xf32> -> vector<64x32xf32>
    %106 = arith.addf %94, %105 : vector<64x32xf32>
    %107 = vector.extract_strided_slice %74 {offsets = [0, 0], sizes = [1, 32], strides = [1, 1]} : vector<7x32xf32> to vector<1x32xf32>
    %108 = vector.extract_strided_slice %74 {offsets = [1, 0], sizes = [1, 32], strides = [1, 1]} : vector<7x32xf32> to vector<1x32xf32>
    %109 = vector.extract_strided_slice %74 {offsets = [2, 0], sizes = [1, 32], strides = [1, 1]} : vector<7x32xf32> to vector<1x32xf32>
    %110 = vector.extract_strided_slice %74 {offsets = [3, 0], sizes = [1, 32], strides = [1, 1]} : vector<7x32xf32> to vector<1x32xf32>
    %111 = vector.extract_strided_slice %74 {offsets = [4, 0], sizes = [1, 32], strides = [1, 1]} : vector<7x32xf32> to vector<1x32xf32>
    %112 = tpu.concatenate %108, %109, %110, %111 in 1 : vector<1x32xf32>, vector<1x32xf32>, vector<1x32xf32>, vector<1x32xf32> -> vector<1x128xf32>
    %113 = vector.extract_strided_slice %0 {offsets = [1, 0, 0], sizes = [1, 7, 32], strides = [1, 1, 1]} : vector<2x7x32xf32> to vector<1x7x32xf32>
    %114 = vector.shape_cast %113 : vector<1x7x32xf32> to vector<7x32xf32>
    %c0_64 = arith.constant 0 : index
    %c0_65 = arith.constant 0 : index
    %c0_66 = arith.constant 0 : index
    %115 = vector.load %arg4[%c0_64, %c0_65, %c0_66] : memref<6x32x32xf32, #tpu.memory_space<vmem>>, vector<1x32x32xf32>
    %116 = vector.shape_cast %115 : vector<1x32x32xf32> to vector<32x32xf32>
    %cst_67 = arith.constant dense<0.000000e+00> : vector<7x32xf32>
    %117 = tpu.matmul %114, %116, %cst_67 {dimension_numbers = #tpu.dot_dimension_numbers<[1], [0], [0], [1], [0, 0, 1, 1], [], []>} : vector<7x32xf32>, vector<32x32xf32>, vector<7x32xf32> -> vector<7x32xf32>
    %c0_68 = arith.constant 0 : index
    %c0_69 = arith.constant 0 : index
    %c0_70 = arith.constant 0 : index
    %118 = vector.load %arg5[%c0_68, %c0_69, %c0_70] : memref<6x1x32xf32, #tpu.memory_space<vmem>>, vector<1x1x32xf32>
    %119 = vector.shape_cast %118 : vector<1x1x32xf32> to vector<1x32xf32>
    %120 = vector.broadcast %119 : vector<1x32xf32> to vector<7x32xf32>
    %121 = arith.addf %117, %120 : vector<7x32xf32>
    %122 = vector.extract_strided_slice %21 {offsets = [64, 0], sizes = [64, 32], strides = [1, 1]} : vector<128x32xf32> to vector<64x32xf32>
    %123 = vector.extract_strided_slice %28 {offsets = [64, 0], sizes = [64, 32], strides = [1, 1]} : vector<128x32xf32> to vector<64x32xf32>
    %cst_71 = arith.constant dense<0.000000e+00> : vector<7x64xf32>
    %124 = tpu.matmul %121, %122, %cst_71 {dimension_numbers = #tpu.dot_dimension_numbers<[1], [1], [0], [0], [0, 0, 1, 0], [], []>} : vector<7x32xf32>, vector<64x32xf32>, vector<7x64xf32> -> vector<7x64xf32>
    %cst_72 = arith.constant 0.176776692 : f32
    %125 = vector.broadcast %cst_72 : f32 to vector<7x64xf32>
    %126 = arith.mulf %124, %125 : vector<7x64xf32>
    %cst_73 = arith.constant dense<0xFF800000> : vector<7xf32>
    %127 = vector.multi_reduction <maximumf>, %126, %cst_73 [1] : vector<7x64xf32> to vector<7xf32>
    %128 = vector.shape_cast %127 : vector<7xf32> to vector<7x1xf32>
    %129 = vector.broadcast %128 : vector<7x1xf32> to vector<7x64xf32>
    %130 = arith.subf %126, %129 : vector<7x64xf32>
    %131 = math.exp %130 : vector<7x64xf32>
    %cst_74 = arith.constant dense<0.000000e+00> : vector<7xf32>
    %132 = vector.multi_reduction <add>, %131, %cst_74 [1] : vector<7x64xf32> to vector<7xf32>
    %133 = vector.shape_cast %132 : vector<7xf32> to vector<7x1xf32>
    %134 = tpu.reciprocal %133 {approx = true} : vector<7x1xf32> -> vector<7x1xf32>
    %135 = vector.broadcast %134 : vector<7x1xf32> to vector<7x64xf32>
    %136 = arith.mulf %131, %135 : vector<7x64xf32>
    %cst_75 = arith.constant dense<0.000000e+00> : vector<7x32xf32>
    %137 = tpu.matmul %136, %123, %cst_75 {dimension_numbers = #tpu.dot_dimension_numbers<[1], [0], [0], [1], [0, 0, 1, 1], [], []>} : vector<7x64xf32>, vector<64x32xf32>, vector<7x32xf32> -> vector<7x32xf32>
    %138 = arith.addf %114, %137 : vector<7x32xf32>
    %c0_76 = arith.constant 0 : index
    %c0_77 = arith.constant 0 : index
    %139 = vector.load %arg6[%c0_76, %c0_77] : memref<32x64xf32, #tpu.memory_space<vmem>>, vector<32x64xf32>
    %cst_78 = arith.constant dense<0.000000e+00> : vector<7x64xf32>
    %140 = tpu.matmul %138, %139, %cst_78 {dimension_numbers = #tpu.dot_dimension_numbers<[1], [0], [0], [1], [0, 0, 1, 1], [], []>} : vector<7x32xf32>, vector<32x64xf32>, vector<7x64xf32> -> vector<7x64xf32>
    %c0_79 = arith.constant 0 : index
    %c0_80 = arith.constant 0 : index
    %141 = vector.load %arg7[%c0_79, %c0_80] : memref<1x64xf32, #tpu.memory_space<vmem>>, vector<1x64xf32>
    %142 = vector.broadcast %141 : vector<1x64xf32> to vector<7x64xf32>
    %143 = arith.addf %140, %142 : vector<7x64xf32>
    %cst_81 = arith.constant 0.000000e+00 : f32
    %144 = vector.broadcast %cst_81 : f32 to vector<7x64xf32>
    %145 = arith.maximumf %143, %144 : vector<7x64xf32>
    %c0_82 = arith.constant 0 : index
    %c0_83 = arith.constant 0 : index
    %146 = vector.load %arg8[%c0_82, %c0_83] : memref<64x32xf32, #tpu.memory_space<vmem>>, vector<64x32xf32>
    %cst_84 = arith.constant dense<0.000000e+00> : vector<7x32xf32>
    %147 = tpu.matmul %145, %146, %cst_84 {dimension_numbers = #tpu.dot_dimension_numbers<[1], [0], [0], [1], [0, 0, 1, 1], [], []>} : vector<7x64xf32>, vector<64x32xf32>, vector<7x32xf32> -> vector<7x32xf32>
    %148 = arith.addf %138, %147 : vector<7x32xf32>
    %c0_85 = arith.constant 0 : index
    %c0_86 = arith.constant 0 : index
    %149 = vector.load %arg9[%c0_85, %c0_86] : memref<1x32xf32, #tpu.memory_space<vmem>>, vector<1x32xf32>
    %150 = vector.broadcast %149 : vector<1x32xf32> to vector<7x32xf32>
    %151 = arith.addf %148, %150 : vector<7x32xf32>
    %152 = vector.extract_strided_slice %35 {offsets = [64, 0], sizes = [64, 32], strides = [1, 1]} : vector<128x32xf32> to vector<64x32xf32>
    %c4_87 = arith.constant 4 : index
    %c0_88 = arith.constant 0 : index
    %c0_89 = arith.constant 0 : index
    %153 = vector.load %arg4[%c4_87, %c0_88, %c0_89] : memref<6x32x32xf32, #tpu.memory_space<vmem>>, vector<1x32x32xf32>
    %154 = vector.shape_cast %153 : vector<1x32x32xf32> to vector<32x32xf32>
    %cst_90 = arith.constant dense<0.000000e+00> : vector<7x32xf32>
    %155 = tpu.matmul %151, %154, %cst_90 {dimension_numbers = #tpu.dot_dimension_numbers<[1], [0], [0], [1], [0, 0, 1, 1], [], []>} : vector<7x32xf32>, vector<32x32xf32>, vector<7x32xf32> -> vector<7x32xf32>
    %c4_91 = arith.constant 4 : index
    %c0_92 = arith.constant 0 : index
    %c0_93 = arith.constant 0 : index
    %156 = vector.load %arg5[%c4_91, %c0_92, %c0_93] : memref<6x1x32xf32, #tpu.memory_space<vmem>>, vector<1x1x32xf32>
    %157 = vector.shape_cast %156 : vector<1x1x32xf32> to vector<1x32xf32>
    %158 = vector.broadcast %157 : vector<1x32xf32> to vector<7x32xf32>
    %159 = arith.addf %155, %158 : vector<7x32xf32>
    %c5_94 = arith.constant 5 : index
    %c0_95 = arith.constant 0 : index
    %c0_96 = arith.constant 0 : index
    %160 = vector.load %arg4[%c5_94, %c0_95, %c0_96] : memref<6x32x32xf32, #tpu.memory_space<vmem>>, vector<1x32x32xf32>
    %161 = vector.shape_cast %160 : vector<1x32x32xf32> to vector<32x32xf32>
    %cst_97 = arith.constant dense<0.000000e+00> : vector<7x32xf32>
    %162 = tpu.matmul %151, %161, %cst_97 {dimension_numbers = #tpu.dot_dimension_numbers<[1], [0], [0], [1], [0, 0, 1, 1], [], []>} : vector<7x32xf32>, vector<32x32xf32>, vector<7x32xf32> -> vector<7x32xf32>
    %c5_98 = arith.constant 5 : index
    %c0_99 = arith.constant 0 : index
    %c0_100 = arith.constant 0 : index
    %163 = vector.load %arg5[%c5_98, %c0_99, %c0_100] : memref<6x1x32xf32, #tpu.memory_space<vmem>>, vector<1x1x32xf32>
    %164 = vector.shape_cast %163 : vector<1x1x32xf32> to vector<1x32xf32>
    %165 = vector.broadcast %164 : vector<1x32xf32> to vector<7x32xf32>
    %166 = arith.addf %162, %165 : vector<7x32xf32>
    %cst_101 = arith.constant dense<0.000000e+00> : vector<64x7xf32>
    %167 = tpu.matmul %152, %159, %cst_101 {dimension_numbers = #tpu.dot_dimension_numbers<[1], [1], [0], [0], [0, 0, 1, 0], [], []>} : vector<64x32xf32>, vector<7x32xf32>, vector<64x7xf32> -> vector<64x7xf32>
    %cst_102 = arith.constant 0.176776692 : f32
    %168 = vector.broadcast %cst_102 : f32 to vector<64x7xf32>
    %169 = arith.mulf %167, %168 : vector<64x7xf32>
    %170 = vector.extract_strided_slice %1 {offsets = [1, 0, 0], sizes = [1, 64, 32], strides = [1, 1, 1]} : vector<2x64x32xf32> to vector<1x64x32xf32>
    %171 = vector.shape_cast %170 : vector<1x64x32xf32> to vector<64x32xf32>
    %cst_103 = arith.constant dense<0xFF800000> : vector<64xf32>
    %172 = vector.multi_reduction <maximumf>, %169, %cst_103 [1] : vector<64x7xf32> to vector<64xf32>
    %173 = vector.shape_cast %172 : vector<64xf32> to vector<64x1xf32>
    %174 = vector.broadcast %173 : vector<64x1xf32> to vector<64x7xf32>
    %175 = arith.subf %169, %174 : vector<64x7xf32>
    %176 = math.exp %175 : vector<64x7xf32>
    %cst_104 = arith.constant dense<0.000000e+00> : vector<64xf32>
    %177 = vector.multi_reduction <add>, %176, %cst_104 [1] : vector<64x7xf32> to vector<64xf32>
    %178 = vector.shape_cast %177 : vector<64xf32> to vector<64x1xf32>
    %179 = tpu.reciprocal %178 {approx = true} : vector<64x1xf32> -> vector<64x1xf32>
    %180 = vector.broadcast %179 : vector<64x1xf32> to vector<64x7xf32>
    %181 = arith.mulf %176, %180 : vector<64x7xf32>
    %cst_105 = arith.constant dense<0.000000e+00> : vector<64x32xf32>
    %182 = tpu.matmul %181, %166, %cst_105 {dimension_numbers = #tpu.dot_dimension_numbers<[1], [0], [0], [1], [0, 0, 1, 1], [], []>} : vector<64x7xf32>, vector<7x32xf32>, vector<64x32xf32> -> vector<64x32xf32>
    %183 = arith.addf %171, %182 : vector<64x32xf32>
    %184 = vector.extract_strided_slice %151 {offsets = [0, 0], sizes = [1, 32], strides = [1, 1]} : vector<7x32xf32> to vector<1x32xf32>
    %185 = vector.extract_strided_slice %151 {offsets = [1, 0], sizes = [1, 32], strides = [1, 1]} : vector<7x32xf32> to vector<1x32xf32>
    %186 = vector.extract_strided_slice %151 {offsets = [2, 0], sizes = [1, 32], strides = [1, 1]} : vector<7x32xf32> to vector<1x32xf32>
    %187 = vector.extract_strided_slice %151 {offsets = [3, 0], sizes = [1, 32], strides = [1, 1]} : vector<7x32xf32> to vector<1x32xf32>
    %188 = vector.extract_strided_slice %151 {offsets = [4, 0], sizes = [1, 32], strides = [1, 1]} : vector<7x32xf32> to vector<1x32xf32>
    %189 = tpu.concatenate %185, %186, %187, %188 in 1 : vector<1x32xf32>, vector<1x32xf32>, vector<1x32xf32>, vector<1x32xf32> -> vector<1x128xf32>
    %190 = tpu.concatenate %107, %184 in 0 : vector<1x32xf32>, vector<1x32xf32> -> vector<2x32xf32>
    %191 = tpu.concatenate %112, %189 in 0 : vector<1x128xf32>, vector<1x128xf32> -> vector<2x128xf32>
    %192 = tpu.concatenate %106, %183 in 0 : vector<64x32xf32>, vector<64x32xf32> -> vector<128x32xf32>
    %c0_106 = arith.constant 0 : index
    %c0_107 = arith.constant 0 : index
    %193 = vector.load %arg10[%c0_106, %c0_107] : memref<128x128xf32, #tpu.memory_space<vmem>>, vector<128x128xf32>
    %cst_108 = arith.constant dense<0.000000e+00> : vector<2x128xf32>
    %194 = tpu.matmul %191, %193, %cst_108 {dimension_numbers = #tpu.dot_dimension_numbers<[1], [0], [0], [1], [0, 0, 1, 1], [], []>} : vector<2x128xf32>, vector<128x128xf32>, vector<2x128xf32> -> vector<2x128xf32>
    %c0_109 = arith.constant 0 : index
    %c0_110 = arith.constant 0 : index
    %195 = vector.load %arg11[%c0_109, %c0_110] : memref<1x128xf32, #tpu.memory_space<vmem>>, vector<1x128xf32>
    %196 = vector.broadcast %195 : vector<1x128xf32> to vector<2x128xf32>
    %197 = arith.addf %194, %196 : vector<2x128xf32>
    %cst_111 = arith.constant 0.000000e+00 : f32
    %198 = vector.broadcast %cst_111 : f32 to vector<2x128xf32>
    %199 = arith.maximumf %197, %198 : vector<2x128xf32>
    %c0_112 = arith.constant 0 : index
    %c0_113 = arith.constant 0 : index
    %200 = vector.load %arg12[%c0_112, %c0_113] : memref<128x128xf32, #tpu.memory_space<vmem>>, vector<128x128xf32>
    %cst_114 = arith.constant dense<0.000000e+00> : vector<2x128xf32>
    %201 = tpu.matmul %199, %200, %cst_114 {dimension_numbers = #tpu.dot_dimension_numbers<[1], [0], [0], [1], [0, 0, 1, 1], [], []>} : vector<2x128xf32>, vector<128x128xf32>, vector<2x128xf32> -> vector<2x128xf32>
    %c0_115 = arith.constant 0 : index
    %c0_116 = arith.constant 0 : index
    %202 = vector.load %arg13[%c0_115, %c0_116] : memref<1x128xf32, #tpu.memory_space<vmem>>, vector<1x128xf32>
    %203 = vector.broadcast %202 : vector<1x128xf32> to vector<2x128xf32>
    %204 = arith.addf %201, %203 : vector<2x128xf32>
    %cst_117 = arith.constant 0.000000e+00 : f32
    %205 = vector.broadcast %cst_117 : f32 to vector<2x128xf32>
    %206 = arith.maximumf %204, %205 : vector<2x128xf32>
    %c0_118 = arith.constant 0 : index
    %c0_119 = arith.constant 0 : index
    %207 = vector.load %arg14[%c0_118, %c0_119] : memref<128x16xf32, #tpu.memory_space<vmem>>, vector<128x16xf32>
    %cst_120 = arith.constant dense<0.000000e+00> : vector<2x16xf32>
    %208 = tpu.matmul %206, %207, %cst_120 {dimension_numbers = #tpu.dot_dimension_numbers<[1], [0], [0], [1], [0, 0, 1, 1], [], []>} : vector<2x128xf32>, vector<128x16xf32>, vector<2x16xf32> -> vector<2x16xf32>
    %c0_121 = arith.constant 0 : index
    %c0_122 = arith.constant 0 : index
    %209 = vector.load %arg15[%c0_121, %c0_122] : memref<1x16xf32, #tpu.memory_space<vmem>>, vector<1x16xf32>
    %210 = vector.broadcast %209 : vector<1x16xf32> to vector<2x16xf32>
    %211 = arith.addf %208, %210 : vector<2x16xf32>
    %c0_123 = arith.constant 0 : index
    %c0_124 = arith.constant 0 : index
    %212 = vector.load %arg16[%c0_123, %c0_124] : memref<32x32xf32, #tpu.memory_space<vmem>>, vector<32x32xf32>
    %cst_125 = arith.constant dense<0.000000e+00> : vector<2x32xf32>
    %213 = tpu.matmul %190, %212, %cst_125 {dimension_numbers = #tpu.dot_dimension_numbers<[1], [0], [0], [1], [0, 0, 1, 1], [], []>} : vector<2x32xf32>, vector<32x32xf32>, vector<2x32xf32> -> vector<2x32xf32>
    %c0_126 = arith.constant 0 : index
    %c0_127 = arith.constant 0 : index
    %214 = vector.load %arg17[%c0_126, %c0_127] : memref<1x32xf32, #tpu.memory_space<vmem>>, vector<1x32xf32>
    %215 = vector.broadcast %214 : vector<1x32xf32> to vector<2x32xf32>
    %216 = arith.addf %213, %215 : vector<2x32xf32>
    %cst_128 = arith.constant 0.000000e+00 : f32
    %217 = vector.broadcast %cst_128 : f32 to vector<2x32xf32>
    %218 = arith.maximumf %216, %217 : vector<2x32xf32>
    %c0_129 = arith.constant 0 : index
    %c0_130 = arith.constant 0 : index
    %219 = vector.load %arg18[%c0_129, %c0_130] : memref<32x32xf32, #tpu.memory_space<vmem>>, vector<32x32xf32>
    %cst_131 = arith.constant dense<0.000000e+00> : vector<2x32xf32>
    %220 = tpu.matmul %218, %219, %cst_131 {dimension_numbers = #tpu.dot_dimension_numbers<[1], [0], [0], [1], [0, 0, 1, 1], [], []>} : vector<2x32xf32>, vector<32x32xf32>, vector<2x32xf32> -> vector<2x32xf32>
    %c0_132 = arith.constant 0 : index
    %c0_133 = arith.constant 0 : index
    %221 = vector.load %arg19[%c0_132, %c0_133] : memref<1x32xf32, #tpu.memory_space<vmem>>, vector<1x32xf32>
    %222 = vector.broadcast %221 : vector<1x32xf32> to vector<2x32xf32>
    %223 = arith.addf %220, %222 : vector<2x32xf32>
    %cst_134 = arith.constant 0.000000e+00 : f32
    %224 = vector.broadcast %cst_134 : f32 to vector<2x32xf32>
    %225 = arith.maximumf %223, %224 : vector<2x32xf32>
    %c0_135 = arith.constant 0 : index
    %c0_136 = arith.constant 0 : index
    %226 = vector.load %arg20[%c0_135, %c0_136] : memref<32x4xf32, #tpu.memory_space<vmem>>, vector<32x4xf32>
    %cst_137 = arith.constant dense<0.000000e+00> : vector<2x4xf32>
    %227 = tpu.matmul %225, %226, %cst_137 {dimension_numbers = #tpu.dot_dimension_numbers<[1], [0], [0], [1], [0, 0, 1, 1], [], []>} : vector<2x32xf32>, vector<32x4xf32>, vector<2x4xf32> -> vector<2x4xf32>
    %c0_138 = arith.constant 0 : index
    %c0_139 = arith.constant 0 : index
    %228 = vector.load %arg21[%c0_138, %c0_139] : memref<1x4xf32, #tpu.memory_space<vmem>>, vector<1x4xf32>
    %229 = vector.broadcast %228 : vector<1x4xf32> to vector<2x4xf32>
    %230 = arith.addf %227, %229 : vector<2x4xf32>
    %c0_140 = arith.constant 0 : index
    %c0_141 = arith.constant 0 : index
    %c0_142 = arith.constant 0 : index
    %231 = vector.load %arg29[%c0_140, %c0_141, %c0_142] : memref<2x1x4xf32, #tpu.memory_space<vmem>>, vector<2x1x4xf32>
    %232 = vector.shape_cast %231 : vector<2x1x4xf32> to vector<2x4xf32>
    %233 = vector.shape_cast %230 : vector<2x4xf32> to vector<2x1x4xf32>
    tpu.vector_store %arg29[%c0_140, %c0_141, %c0_142], %233 {strides = array<i32>} : memref<2x1x4xf32, #tpu.memory_space<vmem>>, vector<2x1x4xf32>,
    %c0_143 = arith.constant 0 : index
    %c0_144 = arith.constant 0 : index
    %234 = vector.load %arg22[%c0_143, %c0_144] : memref<32x32xf32, #tpu.memory_space<vmem>>, vector<32x32xf32>
    %cst_145 = arith.constant dense<0.000000e+00> : vector<128x32xf32>
    %235 = tpu.matmul %192, %234, %cst_145 {dimension_numbers = #tpu.dot_dimension_numbers<[1], [0], [0], [1], [0, 0, 1, 1], [], []>} : vector<128x32xf32>, vector<32x32xf32>, vector<128x32xf32> -> vector<128x32xf32>
    %c0_146 = arith.constant 0 : index
    %c0_147 = arith.constant 0 : index
    %236 = vector.load %arg23[%c0_146, %c0_147] : memref<1x32xf32, #tpu.memory_space<vmem>>, vector<1x32xf32>
    %237 = vector.broadcast %236 : vector<1x32xf32> to vector<128x32xf32>
    %238 = arith.addf %235, %237 : vector<128x32xf32>
    %239 = vector.extract_strided_slice %238 {offsets = [0, 0], sizes = [128, 8], strides = [1, 1]} : vector<128x32xf32> to vector<128x8xf32>
    %cst_148 = arith.constant dense<0.000000e+00> : vector<128xf32>
    %240 = vector.multi_reduction <add>, %239, %cst_148 [1] : vector<128x8xf32> to vector<128xf32>
    %241 = vector.shape_cast %240 : vector<128xf32> to vector<128x1xf32>
    %cst_149 = arith.constant 8.000000e+00 : f32
    %242 = vector.broadcast %cst_149 : f32 to vector<128x1xf32>
    %243 = arith.divf %241, %242 : vector<128x1xf32>
    %244 = vector.broadcast %243 : vector<128x1xf32> to vector<128x8xf32>
    %245 = arith.subf %239, %244 : vector<128x8xf32>
    %246 = arith.mulf %245, %245 : vector<128x8xf32>
    %cst_150 = arith.constant dense<0.000000e+00> : vector<128xf32>
    %247 = vector.multi_reduction <add>, %246, %cst_150 [1] : vector<128x8xf32> to vector<128xf32>
    %248 = vector.shape_cast %247 : vector<128xf32> to vector<128x1xf32>
    %cst_151 = arith.constant 8.000000e+00 : f32
    %249 = vector.broadcast %cst_151 : f32 to vector<128x1xf32>
    %250 = arith.divf %248, %249 : vector<128x1xf32>
    %cst_152 = arith.constant 9.99999997E-7 : f32
    %251 = vector.broadcast %cst_152 : f32 to vector<128x1xf32>
    %252 = arith.addf %250, %251 : vector<128x1xf32>
    %253 = math.rsqrt %252 : vector<128x1xf32>
    %254 = vector.broadcast %253 : vector<128x1xf32> to vector<128x8xf32>
    %255 = arith.mulf %245, %254 : vector<128x8xf32>
    %c0_153 = arith.constant 0 : index
    %c0_154 = arith.constant 0 : index
    %256 = vector.load %arg24[%c0_153, %c0_154] : memref<1x8xf32, #tpu.memory_space<vmem>>, vector<1x8xf32>
    %257 = vector.broadcast %256 : vector<1x8xf32> to vector<128x8xf32>
    %258 = arith.mulf %255, %257 : vector<128x8xf32>
    %c0_155 = arith.constant 0 : index
    %c0_156 = arith.constant 0 : index
    %259 = vector.load %arg25[%c0_155, %c0_156] : memref<1x8xf32, #tpu.memory_space<vmem>>, vector<1x8xf32>
    %260 = vector.broadcast %259 : vector<1x8xf32> to vector<128x8xf32>
    %261 = arith.addf %258, %260 : vector<128x8xf32>
    %cst_157 = arith.constant 5.000000e-01 : f32
    %262 = vector.broadcast %cst_157 : f32 to vector<128x8xf32>
    %263 = arith.mulf %262, %261 : vector<128x8xf32>
    %cst_158 = arith.constant 4.471500e-02 : f32
    %264 = vector.broadcast %cst_158 : f32 to vector<128x8xf32>
    %265 = arith.mulf %264, %261 : vector<128x8xf32>
    %266 = arith.mulf %265, %261 : vector<128x8xf32>
    %267 = arith.mulf %266, %261 : vector<128x8xf32>
    %268 = arith.addf %261, %267 : vector<128x8xf32>
    %cst_159 = arith.constant 0.797884583 : f32
    %269 = vector.broadcast %cst_159 : f32 to vector<128x8xf32>
    %270 = arith.mulf %269, %268 : vector<128x8xf32>
    %271 = math.tanh %270 : vector<128x8xf32>
    %cst_160 = arith.constant 1.000000e+00 : f32
    %272 = vector.broadcast %cst_160 : f32 to vector<128x8xf32>
    %273 = arith.addf %272, %271 : vector<128x8xf32>
    %274 = arith.mulf %263, %273 : vector<128x8xf32>
    %275 = vector.extract_strided_slice %238 {offsets = [0, 8], sizes = [128, 8], strides = [1, 1]} : vector<128x32xf32> to vector<128x8xf32>
    %cst_161 = arith.constant dense<0.000000e+00> : vector<128xf32>
    %276 = vector.multi_reduction <add>, %275, %cst_161 [1] : vector<128x8xf32> to vector<128xf32>
    %277 = vector.shape_cast %276 : vector<128xf32> to vector<128x1xf32>
    %cst_162 = arith.constant 8.000000e+00 : f32
    %278 = vector.broadcast %cst_162 : f32 to vector<128x1xf32>
    %279 = arith.divf %277, %278 : vector<128x1xf32>
    %280 = vector.broadcast %279 : vector<128x1xf32> to vector<128x8xf32>
    %281 = arith.subf %275, %280 : vector<128x8xf32>
    %282 = arith.mulf %281, %281 : vector<128x8xf32>
    %cst_163 = arith.constant dense<0.000000e+00> : vector<128xf32>
    %283 = vector.multi_reduction <add>, %282, %cst_163 [1] : vector<128x8xf32> to vector<128xf32>
    %284 = vector.shape_cast %283 : vector<128xf32> to vector<128x1xf32>
    %cst_164 = arith.constant 8.000000e+00 : f32
    %285 = vector.broadcast %cst_164 : f32 to vector<128x1xf32>
    %286 = arith.divf %284, %285 : vector<128x1xf32>
    %cst_165 = arith.constant 9.99999997E-7 : f32
    %287 = vector.broadcast %cst_165 : f32 to vector<128x1xf32>
    %288 = arith.addf %286, %287 : vector<128x1xf32>
    %289 = math.rsqrt %288 : vector<128x1xf32>
    %290 = vector.broadcast %289 : vector<128x1xf32> to vector<128x8xf32>
    %291 = arith.mulf %281, %290 : vector<128x8xf32>
    %c0_166 = arith.constant 0 : index
    %c0_167 = arith.constant 0 : index
    %292 = vector.load %arg24[%c0_166, %c0_167] : memref<1x8xf32, #tpu.memory_space<vmem>>, vector<1x8xf32>
    %293 = vector.broadcast %292 : vector<1x8xf32> to vector<128x8xf32>
    %294 = arith.mulf %291, %293 : vector<128x8xf32>
    %c0_168 = arith.constant 0 : index
    %c0_169 = arith.constant 0 : index
    %295 = vector.load %arg25[%c0_168, %c0_169] : memref<1x8xf32, #tpu.memory_space<vmem>>, vector<1x8xf32>
    %296 = vector.broadcast %295 : vector<1x8xf32> to vector<128x8xf32>
    %297 = arith.addf %294, %296 : vector<128x8xf32>
    %cst_170 = arith.constant 5.000000e-01 : f32
    %298 = vector.broadcast %cst_170 : f32 to vector<128x8xf32>
    %299 = arith.mulf %298, %297 : vector<128x8xf32>
    %cst_171 = arith.constant 4.471500e-02 : f32
    %300 = vector.broadcast %cst_171 : f32 to vector<128x8xf32>
    %301 = arith.mulf %300, %297 : vector<128x8xf32>
    %302 = arith.mulf %301, %297 : vector<128x8xf32>
    %303 = arith.mulf %302, %297 : vector<128x8xf32>
    %304 = arith.addf %297, %303 : vector<128x8xf32>
    %cst_172 = arith.constant 0.797884583 : f32
    %305 = vector.broadcast %cst_172 : f32 to vector<128x8xf32>
    %306 = arith.mulf %305, %304 : vector<128x8xf32>
    %307 = math.tanh %306 : vector<128x8xf32>
    %cst_173 = arith.constant 1.000000e+00 : f32
    %308 = vector.broadcast %cst_173 : f32 to vector<128x8xf32>
    %309 = arith.addf %308, %307 : vector<128x8xf32>
    %310 = arith.mulf %299, %309 : vector<128x8xf32>
    %311 = vector.extract_strided_slice %238 {offsets = [0, 16], sizes = [128, 8], strides = [1, 1]} : vector<128x32xf32> to vector<128x8xf32>
    %cst_174 = arith.constant dense<0.000000e+00> : vector<128xf32>
    %312 = vector.multi_reduction <add>, %311, %cst_174 [1] : vector<128x8xf32> to vector<128xf32>
    %313 = vector.shape_cast %312 : vector<128xf32> to vector<128x1xf32>
    %cst_175 = arith.constant 8.000000e+00 : f32
    %314 = vector.broadcast %cst_175 : f32 to vector<128x1xf32>
    %315 = arith.divf %313, %314 : vector<128x1xf32>
    %316 = vector.broadcast %315 : vector<128x1xf32> to vector<128x8xf32>
    %317 = arith.subf %311, %316 : vector<128x8xf32>
    %318 = arith.mulf %317, %317 : vector<128x8xf32>
    %cst_176 = arith.constant dense<0.000000e+00> : vector<128xf32>
    %319 = vector.multi_reduction <add>, %318, %cst_176 [1] : vector<128x8xf32> to vector<128xf32>
    %320 = vector.shape_cast %319 : vector<128xf32> to vector<128x1xf32>
    %cst_177 = arith.constant 8.000000e+00 : f32
    %321 = vector.broadcast %cst_177 : f32 to vector<128x1xf32>
    %322 = arith.divf %320, %321 : vector<128x1xf32>
    %cst_178 = arith.constant 9.99999997E-7 : f32
    %323 = vector.broadcast %cst_178 : f32 to vector<128x1xf32>
    %324 = arith.addf %322, %323 : vector<128x1xf32>
    %325 = math.rsqrt %324 : vector<128x1xf32>
    %326 = vector.broadcast %325 : vector<128x1xf32> to vector<128x8xf32>
    %327 = arith.mulf %317, %326 : vector<128x8xf32>
    %c0_179 = arith.constant 0 : index
    %c0_180 = arith.constant 0 : index
    %328 = vector.load %arg24[%c0_179, %c0_180] : memref<1x8xf32, #tpu.memory_space<vmem>>, vector<1x8xf32>
    %329 = vector.broadcast %328 : vector<1x8xf32> to vector<128x8xf32>
    %330 = arith.mulf %327, %329 : vector<128x8xf32>
    %c0_181 = arith.constant 0 : index
    %c0_182 = arith.constant 0 : index
    %331 = vector.load %arg25[%c0_181, %c0_182] : memref<1x8xf32, #tpu.memory_space<vmem>>, vector<1x8xf32>
    %332 = vector.broadcast %331 : vector<1x8xf32> to vector<128x8xf32>
    %333 = arith.addf %330, %332 : vector<128x8xf32>
    %cst_183 = arith.constant 5.000000e-01 : f32
    %334 = vector.broadcast %cst_183 : f32 to vector<128x8xf32>
    %335 = arith.mulf %334, %333 : vector<128x8xf32>
    %cst_184 = arith.constant 4.471500e-02 : f32
    %336 = vector.broadcast %cst_184 : f32 to vector<128x8xf32>
    %337 = arith.mulf %336, %333 : vector<128x8xf32>
    %338 = arith.mulf %337, %333 : vector<128x8xf32>
    %339 = arith.mulf %338, %333 : vector<128x8xf32>
    %340 = arith.addf %333, %339 : vector<128x8xf32>
    %cst_185 = arith.constant 0.797884583 : f32
    %341 = vector.broadcast %cst_185 : f32 to vector<128x8xf32>
    %342 = arith.mulf %341, %340 : vector<128x8xf32>
    %343 = math.tanh %342 : vector<128x8xf32>
    %cst_186 = arith.constant 1.000000e+00 : f32
    %344 = vector.broadcast %cst_186 : f32 to vector<128x8xf32>
    %345 = arith.addf %344, %343 : vector<128x8xf32>
    %346 = arith.mulf %335, %345 : vector<128x8xf32>
    %347 = vector.extract_strided_slice %238 {offsets = [0, 24], sizes = [128, 8], strides = [1, 1]} : vector<128x32xf32> to vector<128x8xf32>
    %cst_187 = arith.constant dense<0.000000e+00> : vector<128xf32>
    %348 = vector.multi_reduction <add>, %347, %cst_187 [1] : vector<128x8xf32> to vector<128xf32>
    %349 = vector.shape_cast %348 : vector<128xf32> to vector<128x1xf32>
    %cst_188 = arith.constant 8.000000e+00 : f32
    %350 = vector.broadcast %cst_188 : f32 to vector<128x1xf32>
    %351 = arith.divf %349, %350 : vector<128x1xf32>
    %352 = vector.broadcast %351 : vector<128x1xf32> to vector<128x8xf32>
    %353 = arith.subf %347, %352 : vector<128x8xf32>
    %354 = arith.mulf %353, %353 : vector<128x8xf32>
    %cst_189 = arith.constant dense<0.000000e+00> : vector<128xf32>
    %355 = vector.multi_reduction <add>, %354, %cst_189 [1] : vector<128x8xf32> to vector<128xf32>
    %356 = vector.shape_cast %355 : vector<128xf32> to vector<128x1xf32>
    %cst_190 = arith.constant 8.000000e+00 : f32
    %357 = vector.broadcast %cst_190 : f32 to vector<128x1xf32>
    %358 = arith.divf %356, %357 : vector<128x1xf32>
    %cst_191 = arith.constant 9.99999997E-7 : f32
    %359 = vector.broadcast %cst_191 : f32 to vector<128x1xf32>
    %360 = arith.addf %358, %359 : vector<128x1xf32>
    %361 = math.rsqrt %360 : vector<128x1xf32>
    %362 = vector.broadcast %361 : vector<128x1xf32> to vector<128x8xf32>
    %363 = arith.mulf %353, %362 : vector<128x8xf32>
    %c0_192 = arith.constant 0 : index
    %c0_193 = arith.constant 0 : index
    %364 = vector.load %arg24[%c0_192, %c0_193] : memref<1x8xf32, #tpu.memory_space<vmem>>, vector<1x8xf32>
    %365 = vector.broadcast %364 : vector<1x8xf32> to vector<128x8xf32>
    %366 = arith.mulf %363, %365 : vector<128x8xf32>
    %c0_194 = arith.constant 0 : index
    %c0_195 = arith.constant 0 : index
    %367 = vector.load %arg25[%c0_194, %c0_195] : memref<1x8xf32, #tpu.memory_space<vmem>>, vector<1x8xf32>
    %368 = vector.broadcast %367 : vector<1x8xf32> to vector<128x8xf32>
    %369 = arith.addf %366, %368 : vector<128x8xf32>
    %cst_196 = arith.constant 5.000000e-01 : f32
    %370 = vector.broadcast %cst_196 : f32 to vector<128x8xf32>
    %371 = arith.mulf %370, %369 : vector<128x8xf32>
    %cst_197 = arith.constant 4.471500e-02 : f32
    %372 = vector.broadcast %cst_197 : f32 to vector<128x8xf32>
    %373 = arith.mulf %372, %369 : vector<128x8xf32>
    %374 = arith.mulf %373, %369 : vector<128x8xf32>
    %375 = arith.mulf %374, %369 : vector<128x8xf32>
    %376 = arith.addf %369, %375 : vector<128x8xf32>
    %cst_198 = arith.constant 0.797884583 : f32
    %377 = vector.broadcast %cst_198 : f32 to vector<128x8xf32>
    %378 = arith.mulf %377, %376 : vector<128x8xf32>
    %379 = math.tanh %378 : vector<128x8xf32>
    %cst_199 = arith.constant 1.000000e+00 : f32
    %380 = vector.broadcast %cst_199 : f32 to vector<128x8xf32>
    %381 = arith.addf %380, %379 : vector<128x8xf32>
    %382 = arith.mulf %371, %381 : vector<128x8xf32>
    %383 = tpu.concatenate %274, %310, %346, %382 in 1 : vector<128x8xf32>, vector<128x8xf32>, vector<128x8xf32>, vector<128x8xf32> -> vector<128x32xf32>
    %c0_200 = arith.constant 0 : index
    %c0_201 = arith.constant 0 : index
    %384 = vector.load %arg26[%c0_200, %c0_201] : memref<32x64xf32, #tpu.memory_space<vmem>>, vector<32x64xf32>
    %cst_202 = arith.constant dense<0.000000e+00> : vector<128x64xf32>
    %385 = tpu.matmul %383, %384, %cst_202 {dimension_numbers = #tpu.dot_dimension_numbers<[1], [0], [0], [1], [0, 0, 1, 1], [], []>} : vector<128x32xf32>, vector<32x64xf32>, vector<128x64xf32> -> vector<128x64xf32>
    %c0_203 = arith.constant 0 : index
    %c0_204 = arith.constant 0 : index
    %386 = vector.load %arg27[%c0_203, %c0_204] : memref<1x64xf32, #tpu.memory_space<vmem>>, vector<1x64xf32>
    %387 = vector.broadcast %386 : vector<1x64xf32> to vector<128x64xf32>
    %388 = arith.addf %385, %387 : vector<128x64xf32>
    %cst_205 = arith.constant 5.000000e-01 : f32
    %389 = vector.broadcast %cst_205 : f32 to vector<128x64xf32>
    %390 = arith.mulf %389, %388 : vector<128x64xf32>
    %cst_206 = arith.constant 4.471500e-02 : f32
    %391 = vector.broadcast %cst_206 : f32 to vector<128x64xf32>
    %392 = arith.mulf %391, %388 : vector<128x64xf32>
    %393 = arith.mulf %392, %388 : vector<128x64xf32>
    %394 = arith.mulf %393, %388 : vector<128x64xf32>
    %395 = arith.addf %388, %394 : vector<128x64xf32>
    %cst_207 = arith.constant 0.797884583 : f32
    %396 = vector.broadcast %cst_207 : f32 to vector<128x64xf32>
    %397 = arith.mulf %396, %395 : vector<128x64xf32>
    %398 = math.tanh %397 : vector<128x64xf32>
    %cst_208 = arith.constant 1.000000e+00 : f32
    %399 = vector.broadcast %cst_208 : f32 to vector<128x64xf32>
    %400 = arith.addf %399, %398 : vector<128x64xf32>
    %401 = arith.mulf %390, %400 : vector<128x64xf32>
    %402 = vector.extract_strided_slice %211 {offsets = [0, 0], sizes = [1, 4], strides = [1, 1]} : vector<2x16xf32> to vector<1x4xf32>
    %403 = vector.extract_strided_slice %211 {offsets = [0, 4], sizes = [1, 4], strides = [1, 1]} : vector<2x16xf32> to vector<1x4xf32>
    %404 = vector.extract_strided_slice %211 {offsets = [0, 8], sizes = [1, 4], strides = [1, 1]} : vector<2x16xf32> to vector<1x4xf32>
    %405 = vector.extract_strided_slice %211 {offsets = [0, 12], sizes = [1, 4], strides = [1, 1]} : vector<2x16xf32> to vector<1x4xf32>
    %406 = tpu.concatenate %402, %403, %404, %405 in 0 : vector<1x4xf32>, vector<1x4xf32>, vector<1x4xf32>, vector<1x4xf32> -> vector<4x4xf32>
    %407 = vector.extract_strided_slice %401 {offsets = [0, 0], sizes = [64, 64], strides = [1, 1]} : vector<128x64xf32> to vector<64x64xf32>
    %408 = vector.extract_strided_slice %407 {offsets = [0, 0], sizes = [64, 4], strides = [1, 1]} : vector<64x64xf32> to vector<64x4xf32>
    %cst_209 = arith.constant dense<0.000000e+00> : vector<4x64xf32>
    %409 = tpu.matmul %406, %408, %cst_209 {dimension_numbers = #tpu.dot_dimension_numbers<[1], [1], [0], [0], [0, 0, 1, 0], [], []>} : vector<4x4xf32>, vector<64x4xf32>, vector<4x64xf32> -> vector<4x64xf32>
    %410 = vector.extract_strided_slice %407 {offsets = [0, 4], sizes = [64, 4], strides = [1, 1]} : vector<64x64xf32> to vector<64x4xf32>
    %cst_210 = arith.constant dense<0.000000e+00> : vector<4x64xf32>
    %411 = tpu.matmul %406, %410, %cst_210 {dimension_numbers = #tpu.dot_dimension_numbers<[1], [1], [0], [0], [0, 0, 1, 0], [], []>} : vector<4x4xf32>, vector<64x4xf32>, vector<4x64xf32> -> vector<4x64xf32>
    %412 = vector.extract_strided_slice %407 {offsets = [0, 8], sizes = [64, 4], strides = [1, 1]} : vector<64x64xf32> to vector<64x4xf32>
    %cst_211 = arith.constant dense<0.000000e+00> : vector<4x64xf32>
    %413 = tpu.matmul %406, %412, %cst_211 {dimension_numbers = #tpu.dot_dimension_numbers<[1], [1], [0], [0], [0, 0, 1, 0], [], []>} : vector<4x4xf32>, vector<64x4xf32>, vector<4x64xf32> -> vector<4x64xf32>
    %414 = vector.extract_strided_slice %407 {offsets = [0, 12], sizes = [64, 4], strides = [1, 1]} : vector<64x64xf32> to vector<64x4xf32>
    %cst_212 = arith.constant dense<0.000000e+00> : vector<4x64xf32>
    %415 = tpu.matmul %406, %414, %cst_212 {dimension_numbers = #tpu.dot_dimension_numbers<[1], [1], [0], [0], [0, 0, 1, 0], [], []>} : vector<4x4xf32>, vector<64x4xf32>, vector<4x64xf32> -> vector<4x64xf32>
    %416 = vector.extract_strided_slice %407 {offsets = [0, 16], sizes = [64, 4], strides = [1, 1]} : vector<64x64xf32> to vector<64x4xf32>
    %cst_213 = arith.constant dense<0.000000e+00> : vector<4x64xf32>
    %417 = tpu.matmul %406, %416, %cst_213 {dimension_numbers = #tpu.dot_dimension_numbers<[1], [1], [0], [0], [0, 0, 1, 0], [], []>} : vector<4x4xf32>, vector<64x4xf32>, vector<4x64xf32> -> vector<4x64xf32>
    %418 = vector.extract_strided_slice %407 {offsets = [0, 20], sizes = [64, 4], strides = [1, 1]} : vector<64x64xf32> to vector<64x4xf32>
    %cst_214 = arith.constant dense<0.000000e+00> : vector<4x64xf32>
    %419 = tpu.matmul %406, %418, %cst_214 {dimension_numbers = #tpu.dot_dimension_numbers<[1], [1], [0], [0], [0, 0, 1, 0], [], []>} : vector<4x4xf32>, vector<64x4xf32>, vector<4x64xf32> -> vector<4x64xf32>
    %420 = vector.extract_strided_slice %407 {offsets = [0, 24], sizes = [64, 4], strides = [1, 1]} : vector<64x64xf32> to vector<64x4xf32>
    %cst_215 = arith.constant dense<0.000000e+00> : vector<4x64xf32>
    %421 = tpu.matmul %406, %420, %cst_215 {dimension_numbers = #tpu.dot_dimension_numbers<[1], [1], [0], [0], [0, 0, 1, 0], [], []>} : vector<4x4xf32>, vector<64x4xf32>, vector<4x64xf32> -> vector<4x64xf32>
    %422 = vector.extract_strided_slice %407 {offsets = [0, 28], sizes = [64, 4], strides = [1, 1]} : vector<64x64xf32> to vector<64x4xf32>
    %cst_216 = arith.constant dense<0.000000e+00> : vector<4x64xf32>
    %423 = tpu.matmul %406, %422, %cst_216 {dimension_numbers = #tpu.dot_dimension_numbers<[1], [1], [0], [0], [0, 0, 1, 0], [], []>} : vector<4x4xf32>, vector<64x4xf32>, vector<4x64xf32> -> vector<4x64xf32>
    %424 = vector.extract_strided_slice %407 {offsets = [0, 32], sizes = [64, 4], strides = [1, 1]} : vector<64x64xf32> to vector<64x4xf32>
    %cst_217 = arith.constant dense<0.000000e+00> : vector<4x64xf32>
    %425 = tpu.matmul %406, %424, %cst_217 {dimension_numbers = #tpu.dot_dimension_numbers<[1], [1], [0], [0], [0, 0, 1, 0], [], []>} : vector<4x4xf32>, vector<64x4xf32>, vector<4x64xf32> -> vector<4x64xf32>
    %426 = vector.extract_strided_slice %407 {offsets = [0, 36], sizes = [64, 4], strides = [1, 1]} : vector<64x64xf32> to vector<64x4xf32>
    %cst_218 = arith.constant dense<0.000000e+00> : vector<4x64xf32>
    %427 = tpu.matmul %406, %426, %cst_218 {dimension_numbers = #tpu.dot_dimension_numbers<[1], [1], [0], [0], [0, 0, 1, 0], [], []>} : vector<4x4xf32>, vector<64x4xf32>, vector<4x64xf32> -> vector<4x64xf32>
    %428 = vector.extract_strided_slice %407 {offsets = [0, 40], sizes = [64, 4], strides = [1, 1]} : vector<64x64xf32> to vector<64x4xf32>
    %cst_219 = arith.constant dense<0.000000e+00> : vector<4x64xf32>
    %429 = tpu.matmul %406, %428, %cst_219 {dimension_numbers = #tpu.dot_dimension_numbers<[1], [1], [0], [0], [0, 0, 1, 0], [], []>} : vector<4x4xf32>, vector<64x4xf32>, vector<4x64xf32> -> vector<4x64xf32>
    %430 = vector.extract_strided_slice %407 {offsets = [0, 44], sizes = [64, 4], strides = [1, 1]} : vector<64x64xf32> to vector<64x4xf32>
    %cst_220 = arith.constant dense<0.000000e+00> : vector<4x64xf32>
    %431 = tpu.matmul %406, %430, %cst_220 {dimension_numbers = #tpu.dot_dimension_numbers<[1], [1], [0], [0], [0, 0, 1, 0], [], []>} : vector<4x4xf32>, vector<64x4xf32>, vector<4x64xf32> -> vector<4x64xf32>
    %432 = vector.extract_strided_slice %407 {offsets = [0, 48], sizes = [64, 4], strides = [1, 1]} : vector<64x64xf32> to vector<64x4xf32>
    %cst_221 = arith.constant dense<0.000000e+00> : vector<4x64xf32>
    %433 = tpu.matmul %406, %432, %cst_221 {dimension_numbers = #tpu.dot_dimension_numbers<[1], [1], [0], [0], [0, 0, 1, 0], [], []>} : vector<4x4xf32>, vector<64x4xf32>, vector<4x64xf32> -> vector<4x64xf32>
    %434 = vector.extract_strided_slice %407 {offsets = [0, 52], sizes = [64, 4], strides = [1, 1]} : vector<64x64xf32> to vector<64x4xf32>
    %cst_222 = arith.constant dense<0.000000e+00> : vector<4x64xf32>
    %435 = tpu.matmul %406, %434, %cst_222 {dimension_numbers = #tpu.dot_dimension_numbers<[1], [1], [0], [0], [0, 0, 1, 0], [], []>} : vector<4x4xf32>, vector<64x4xf32>, vector<4x64xf32> -> vector<4x64xf32>
    %436 = vector.extract_strided_slice %407 {offsets = [0, 56], sizes = [64, 4], strides = [1, 1]} : vector<64x64xf32> to vector<64x4xf32>
    %cst_223 = arith.constant dense<0.000000e+00> : vector<4x64xf32>
    %437 = tpu.matmul %406, %436, %cst_223 {dimension_numbers = #tpu.dot_dimension_numbers<[1], [1], [0], [0], [0, 0, 1, 0], [], []>} : vector<4x4xf32>, vector<64x4xf32>, vector<4x64xf32> -> vector<4x64xf32>
    %438 = vector.extract_strided_slice %407 {offsets = [0, 60], sizes = [64, 4], strides = [1, 1]} : vector<64x64xf32> to vector<64x4xf32>
    %cst_224 = arith.constant dense<0.000000e+00> : vector<4x64xf32>
    %439 = tpu.matmul %406, %438, %cst_224 {dimension_numbers = #tpu.dot_dimension_numbers<[1], [1], [0], [0], [0, 0, 1, 0], [], []>} : vector<4x4xf32>, vector<64x4xf32>, vector<4x64xf32> -> vector<4x64xf32>
    %440 = tpu.concatenate %409, %411, %413, %415, %417, %419, %421, %423, %425, %427, %429, %431, %433, %435, %437, %439 in 1 : vector<4x64xf32>, vector<4x64xf32>, vector<4x64xf32>, vector<4x64xf32>, vector<4x64xf32>, vector<4x64xf32>, vector<4x64xf32>, vector<4x64xf32>, vector<4x64xf32>, vector<4x64xf32>, vector<4x64xf32>, vector<4x64xf32>, vector<4x64xf32>, vector<4x64xf32>, vector<4x64xf32>, vector<4x64xf32> -> vector<4x1024xf32>
    %c0_225 = arith.constant 0 : index
    %c0_226 = arith.constant 0 : index
    %c0_227 = arith.constant 0 : index
    %441 = vector.load %arg28[%c0_225, %c0_226, %c0_227] : memref<2x4x1024xf32, #tpu.memory_space<vmem>>, vector<1x4x1024xf32>
    %442 = vector.shape_cast %441 : vector<1x4x1024xf32> to vector<4x1024xf32>
    %443 = vector.shape_cast %440 : vector<4x1024xf32> to vector<1x4x1024xf32>
    tpu.vector_store %arg28[%c0_225, %c0_226, %c0_227], %443 {strides = array<i32>} : memref<2x4x1024xf32, #tpu.memory_space<vmem>>, vector<1x4x1024xf32>,
    %444 = vector.extract_strided_slice %211 {offsets = [1, 0], sizes = [1, 4], strides = [1, 1]} : vector<2x16xf32> to vector<1x4xf32>
    %445 = vector.extract_strided_slice %211 {offsets = [1, 4], sizes = [1, 4], strides = [1, 1]} : vector<2x16xf32> to vector<1x4xf32>
    %446 = vector.extract_strided_slice %211 {offsets = [1, 8], sizes = [1, 4], strides = [1, 1]} : vector<2x16xf32> to vector<1x4xf32>
    %447 = vector.extract_strided_slice %211 {offsets = [1, 12], sizes = [1, 4], strides = [1, 1]} : vector<2x16xf32> to vector<1x4xf32>
    %448 = tpu.concatenate %444, %445, %446, %447 in 0 : vector<1x4xf32>, vector<1x4xf32>, vector<1x4xf32>, vector<1x4xf32> -> vector<4x4xf32>
    %449 = vector.extract_strided_slice %401 {offsets = [64, 0], sizes = [64, 64], strides = [1, 1]} : vector<128x64xf32> to vector<64x64xf32>
    %450 = vector.extract_strided_slice %449 {offsets = [0, 0], sizes = [64, 4], strides = [1, 1]} : vector<64x64xf32> to vector<64x4xf32>
    %cst_228 = arith.constant dense<0.000000e+00> : vector<4x64xf32>
    %451 = tpu.matmul %448, %450, %cst_228 {dimension_numbers = #tpu.dot_dimension_numbers<[1], [1], [0], [0], [0, 0, 1, 0], [], []>} : vector<4x4xf32>, vector<64x4xf32>, vector<4x64xf32> -> vector<4x64xf32>
    %452 = vector.extract_strided_slice %449 {offsets = [0, 4], sizes = [64, 4], strides = [1, 1]} : vector<64x64xf32> to vector<64x4xf32>
    %cst_229 = arith.constant dense<0.000000e+00> : vector<4x64xf32>
    %453 = tpu.matmul %448, %452, %cst_229 {dimension_numbers = #tpu.dot_dimension_numbers<[1], [1], [0], [0], [0, 0, 1, 0], [], []>} : vector<4x4xf32>, vector<64x4xf32>, vector<4x64xf32> -> vector<4x64xf32>
    %454 = vector.extract_strided_slice %449 {offsets = [0, 8], sizes = [64, 4], strides = [1, 1]} : vector<64x64xf32> to vector<64x4xf32>
    %cst_230 = arith.constant dense<0.000000e+00> : vector<4x64xf32>
    %455 = tpu.matmul %448, %454, %cst_230 {dimension_numbers = #tpu.dot_dimension_numbers<[1], [1], [0], [0], [0, 0, 1, 0], [], []>} : vector<4x4xf32>, vector<64x4xf32>, vector<4x64xf32> -> vector<4x64xf32>
    %456 = vector.extract_strided_slice %449 {offsets = [0, 12], sizes = [64, 4], strides = [1, 1]} : vector<64x64xf32> to vector<64x4xf32>
    %cst_231 = arith.constant dense<0.000000e+00> : vector<4x64xf32>
    %457 = tpu.matmul %448, %456, %cst_231 {dimension_numbers = #tpu.dot_dimension_numbers<[1], [1], [0], [0], [0, 0, 1, 0], [], []>} : vector<4x4xf32>, vector<64x4xf32>, vector<4x64xf32> -> vector<4x64xf32>
    %458 = vector.extract_strided_slice %449 {offsets = [0, 16], sizes = [64, 4], strides = [1, 1]} : vector<64x64xf32> to vector<64x4xf32>
    %cst_232 = arith.constant dense<0.000000e+00> : vector<4x64xf32>
    %459 = tpu.matmul %448, %458, %cst_232 {dimension_numbers = #tpu.dot_dimension_numbers<[1], [1], [0], [0], [0, 0, 1, 0], [], []>} : vector<4x4xf32>, vector<64x4xf32>, vector<4x64xf32> -> vector<4x64xf32>
    %460 = vector.extract_strided_slice %449 {offsets = [0, 20], sizes = [64, 4], strides = [1, 1]} : vector<64x64xf32> to vector<64x4xf32>
    %cst_233 = arith.constant dense<0.000000e+00> : vector<4x64xf32>
    %461 = tpu.matmul %448, %460, %cst_233 {dimension_numbers = #tpu.dot_dimension_numbers<[1], [1], [0], [0], [0, 0, 1, 0], [], []>} : vector<4x4xf32>, vector<64x4xf32>, vector<4x64xf32> -> vector<4x64xf32>
    %462 = vector.extract_strided_slice %449 {offsets = [0, 24], sizes = [64, 4], strides = [1, 1]} : vector<64x64xf32> to vector<64x4xf32>
    %cst_234 = arith.constant dense<0.000000e+00> : vector<4x64xf32>
    %463 = tpu.matmul %448, %462, %cst_234 {dimension_numbers = #tpu.dot_dimension_numbers<[1], [1], [0], [0], [0, 0, 1, 0], [], []>} : vector<4x4xf32>, vector<64x4xf32>, vector<4x64xf32> -> vector<4x64xf32>
    %464 = vector.extract_strided_slice %449 {offsets = [0, 28], sizes = [64, 4], strides = [1, 1]} : vector<64x64xf32> to vector<64x4xf32>
    %cst_235 = arith.constant dense<0.000000e+00> : vector<4x64xf32>
    %465 = tpu.matmul %448, %464, %cst_235 {dimension_numbers = #tpu.dot_dimension_numbers<[1], [1], [0], [0], [0, 0, 1, 0], [], []>} : vector<4x4xf32>, vector<64x4xf32>, vector<4x64xf32> -> vector<4x64xf32>
    %466 = vector.extract_strided_slice %449 {offsets = [0, 32], sizes = [64, 4], strides = [1, 1]} : vector<64x64xf32> to vector<64x4xf32>
    %cst_236 = arith.constant dense<0.000000e+00> : vector<4x64xf32>
    %467 = tpu.matmul %448, %466, %cst_236 {dimension_numbers = #tpu.dot_dimension_numbers<[1], [1], [0], [0], [0, 0, 1, 0], [], []>} : vector<4x4xf32>, vector<64x4xf32>, vector<4x64xf32> -> vector<4x64xf32>
    %468 = vector.extract_strided_slice %449 {offsets = [0, 36], sizes = [64, 4], strides = [1, 1]} : vector<64x64xf32> to vector<64x4xf32>
    %cst_237 = arith.constant dense<0.000000e+00> : vector<4x64xf32>
    %469 = tpu.matmul %448, %468, %cst_237 {dimension_numbers = #tpu.dot_dimension_numbers<[1], [1], [0], [0], [0, 0, 1, 0], [], []>} : vector<4x4xf32>, vector<64x4xf32>, vector<4x64xf32> -> vector<4x64xf32>
    %470 = vector.extract_strided_slice %449 {offsets = [0, 40], sizes = [64, 4], strides = [1, 1]} : vector<64x64xf32> to vector<64x4xf32>
    %cst_238 = arith.constant dense<0.000000e+00> : vector<4x64xf32>
    %471 = tpu.matmul %448, %470, %cst_238 {dimension_numbers = #tpu.dot_dimension_numbers<[1], [1], [0], [0], [0, 0, 1, 0], [], []>} : vector<4x4xf32>, vector<64x4xf32>, vector<4x64xf32> -> vector<4x64xf32>
    %472 = vector.extract_strided_slice %449 {offsets = [0, 44], sizes = [64, 4], strides = [1, 1]} : vector<64x64xf32> to vector<64x4xf32>
    %cst_239 = arith.constant dense<0.000000e+00> : vector<4x64xf32>
    %473 = tpu.matmul %448, %472, %cst_239 {dimension_numbers = #tpu.dot_dimension_numbers<[1], [1], [0], [0], [0, 0, 1, 0], [], []>} : vector<4x4xf32>, vector<64x4xf32>, vector<4x64xf32> -> vector<4x64xf32>
    %474 = vector.extract_strided_slice %449 {offsets = [0, 48], sizes = [64, 4], strides = [1, 1]} : vector<64x64xf32> to vector<64x4xf32>
    %cst_240 = arith.constant dense<0.000000e+00> : vector<4x64xf32>
    %475 = tpu.matmul %448, %474, %cst_240 {dimension_numbers = #tpu.dot_dimension_numbers<[1], [1], [0], [0], [0, 0, 1, 0], [], []>} : vector<4x4xf32>, vector<64x4xf32>, vector<4x64xf32> -> vector<4x64xf32>
    %476 = vector.extract_strided_slice %449 {offsets = [0, 52], sizes = [64, 4], strides = [1, 1]} : vector<64x64xf32> to vector<64x4xf32>
    %cst_241 = arith.constant dense<0.000000e+00> : vector<4x64xf32>
    %477 = tpu.matmul %448, %476, %cst_241 {dimension_numbers = #tpu.dot_dimension_numbers<[1], [1], [0], [0], [0, 0, 1, 0], [], []>} : vector<4x4xf32>, vector<64x4xf32>, vector<4x64xf32> -> vector<4x64xf32>
    %478 = vector.extract_strided_slice %449 {offsets = [0, 56], sizes = [64, 4], strides = [1, 1]} : vector<64x64xf32> to vector<64x4xf32>
    %cst_242 = arith.constant dense<0.000000e+00> : vector<4x64xf32>
    %479 = tpu.matmul %448, %478, %cst_242 {dimension_numbers = #tpu.dot_dimension_numbers<[1], [1], [0], [0], [0, 0, 1, 0], [], []>} : vector<4x4xf32>, vector<64x4xf32>, vector<4x64xf32> -> vector<4x64xf32>
    %480 = vector.extract_strided_slice %449 {offsets = [0, 60], sizes = [64, 4], strides = [1, 1]} : vector<64x64xf32> to vector<64x4xf32>
    %cst_243 = arith.constant dense<0.000000e+00> : vector<4x64xf32>
    %481 = tpu.matmul %448, %480, %cst_243 {dimension_numbers = #tpu.dot_dimension_numbers<[1], [1], [0], [0], [0, 0, 1, 0], [], []>} : vector<4x4xf32>, vector<64x4xf32>, vector<4x64xf32> -> vector<4x64xf32>
    %482 = tpu.concatenate %451, %453, %455, %457, %459, %461, %463, %465, %467, %469, %471, %473, %475, %477, %479, %481 in 1 : vector<4x64xf32>, vector<4x64xf32>, vector<4x64xf32>, vector<4x64xf32>, vector<4x64xf32>, vector<4x64xf32>, vector<4x64xf32>, vector<4x64xf32>, vector<4x64xf32>, vector<4x64xf32>, vector<4x64xf32>, vector<4x64xf32>, vector<4x64xf32>, vector<4x64xf32>, vector<4x64xf32>, vector<4x64xf32> -> vector<4x1024xf32>
    %c1_244 = arith.constant 1 : index
    %c0_245 = arith.constant 0 : index
    %c0_246 = arith.constant 0 : index
    %483 = vector.load %arg28[%c1_244, %c0_245, %c0_246] : memref<2x4x1024xf32, #tpu.memory_space<vmem>>, vector<1x4x1024xf32>
    %484 = vector.shape_cast %483 : vector<1x4x1024xf32> to vector<4x1024xf32>
    %485 = vector.shape_cast %482 : vector<4x1024xf32> to vector<1x4x1024xf32>
    tpu.vector_store %arg28[%c1_244, %c0_245, %c0_246], %485 {strides = array<i32>} : memref<2x4x1024xf32, #tpu.memory_space<vmem>>, vector<1x4x1024xf32>,
    return
  }
  func.func @transform_0(%arg0: i32) -> (i32, i32, i32) {
    %c0_i32 = arith.constant 0 : i32
    %c0_i32_0 = arith.constant 0 : i32
    %c0_i32_1 = arith.constant 0 : i32
    return %arg0, %c0_i32, %c0_i32_0 : i32, i32, i32
  }
  func.func @transform_1(%arg0: i32) -> (i32, i32, i32) {
    %c0_i32 = arith.constant 0 : i32
    %c0_i32_0 = arith.constant 0 : i32
    %c0_i32_1 = arith.constant 0 : i32
    return %arg0, %c0_i32, %c0_i32_0 : i32, i32, i32
  }
  func.func @transform_2(%arg0: i32) -> (i32, i32) {
    %c0_i32 = arith.constant 0 : i32
    %c0_i32_0 = arith.constant 0 : i32
    %c0_i32_1 = arith.constant 0 : i32
    return %c0_i32, %c0_i32_0 : i32, i32
  }
  func.func @transform_3(%arg0: i32) -> (i32, i32, i32) {
    %c0_i32 = arith.constant 0 : i32
    %c0_i32_0 = arith.constant 0 : i32
    %c0_i32_1 = arith.constant 0 : i32
    %c0_i32_2 = arith.constant 0 : i32
    return %c0_i32, %c0_i32_0, %c0_i32_1 : i32, i32, i32
  }
  func.func @transform_4(%arg0: i32) -> (i32, i32, i32) {
    %c0_i32 = arith.constant 0 : i32
    %c0_i32_0 = arith.constant 0 : i32
    %c0_i32_1 = arith.constant 0 : i32
    %c0_i32_2 = arith.constant 0 : i32
    return %c0_i32, %c0_i32_0, %c0_i32_1 : i32, i32, i32
  }
  func.func @transform_5(%arg0: i32) -> (i32, i32) {
    %c0_i32 = arith.constant 0 : i32
    %c0_i32_0 = arith.constant 0 : i32
    %c0_i32_1 = arith.constant 0 : i32
    return %c0_i32, %c0_i32_0 : i32, i32
  }
  func.func @transform_6(%arg0: i32) -> (i32, i32) {
    %c0_i32 = arith.constant 0 : i32
    %c0_i32_0 = arith.constant 0 : i32
    %c0_i32_1 = arith.constant 0 : i32
    return %c0_i32, %c0_i32_0 : i32, i32
  }
  func.func @transform_7(%arg0: i32) -> (i32, i32) {
    %c0_i32 = arith.constant 0 : i32
    %c0_i32_0 = arith.constant 0 : i32
    %c0_i32_1 = arith.constant 0 : i32
    return %c0_i32, %c0_i32_0 : i32, i32
  }
  func.func @transform_8(%arg0: i32) -> (i32, i32) {
    %c0_i32 = arith.constant 0 : i32
    %c0_i32_0 = arith.constant 0 : i32
    %c0_i32_1 = arith.constant 0 : i32
    return %c0_i32, %c0_i32_0 : i32, i32
  }
  func.func @transform_9(%arg0: i32) -> (i32, i32) {
    %c0_i32 = arith.constant 0 : i32
    %c0_i32_0 = arith.constant 0 : i32
    %c0_i32_1 = arith.constant 0 : i32
    return %c0_i32, %c0_i32_0 : i32, i32
  }
  func.func @transform_10(%arg0: i32) -> (i32, i32) {
    %c0_i32 = arith.constant 0 : i32
    %c0_i32_0 = arith.constant 0 : i32
    %c0_i32_1 = arith.constant 0 : i32
    return %c0_i32, %c0_i32_0 : i32, i32
  }
  func.func @transform_11(%arg0: i32) -> (i32, i32) {
    %c0_i32 = arith.constant 0 : i32
    %c0_i32_0 = arith.constant 0 : i32
    %c0_i32_1 = arith.constant 0 : i32
    return %c0_i32, %c0_i32_0 : i32, i32
  }
  func.func @transform_12(%arg0: i32) -> (i32, i32) {
    %c0_i32 = arith.constant 0 : i32
    %c0_i32_0 = arith.constant 0 : i32
    %c0_i32_1 = arith.constant 0 : i32
    return %c0_i32, %c0_i32_0 : i32, i32
  }
  func.func @transform_13(%arg0: i32) -> (i32, i32) {
    %c0_i32 = arith.constant 0 : i32
    %c0_i32_0 = arith.constant 0 : i32
    %c0_i32_1 = arith.constant 0 : i32
    return %c0_i32, %c0_i32_0 : i32, i32
  }
  func.func @transform_14(%arg0: i32) -> (i32, i32) {
    %c0_i32 = arith.constant 0 : i32
    %c0_i32_0 = arith.constant 0 : i32
    %c0_i32_1 = arith.constant 0 : i32
    return %c0_i32, %c0_i32_0 : i32, i32
  }
  func.func @transform_15(%arg0: i32) -> (i32, i32) {
    %c0_i32 = arith.constant 0 : i32
    %c0_i32_0 = arith.constant 0 : i32
    %c0_i32_1 = arith.constant 0 : i32
    return %c0_i32, %c0_i32_0 : i32, i32
  }
  func.func @transform_16(%arg0: i32) -> (i32, i32) {
    %c0_i32 = arith.constant 0 : i32
    %c0_i32_0 = arith.constant 0 : i32
    %c0_i32_1 = arith.constant 0 : i32
    return %c0_i32, %c0_i32_0 : i32, i32
  }
  func.func @transform_17(%arg0: i32) -> (i32, i32) {
    %c0_i32 = arith.constant 0 : i32
    %c0_i32_0 = arith.constant 0 : i32
    %c0_i32_1 = arith.constant 0 : i32
    return %c0_i32, %c0_i32_0 : i32, i32
  }
  func.func @transform_18(%arg0: i32) -> (i32, i32) {
    %c0_i32 = arith.constant 0 : i32
    %c0_i32_0 = arith.constant 0 : i32
    %c0_i32_1 = arith.constant 0 : i32
    return %c0_i32, %c0_i32_0 : i32, i32
  }
  func.func @transform_19(%arg0: i32) -> (i32, i32) {
    %c0_i32 = arith.constant 0 : i32
    %c0_i32_0 = arith.constant 0 : i32
    %c0_i32_1 = arith.constant 0 : i32
    return %c0_i32, %c0_i32_0 : i32, i32
  }
  func.func @transform_20(%arg0: i32) -> (i32, i32) {
    %c0_i32 = arith.constant 0 : i32
    %c0_i32_0 = arith.constant 0 : i32
    %c0_i32_1 = arith.constant 0 : i32
    return %c0_i32, %c0_i32_0 : i32, i32
  }
  func.func @transform_21(%arg0: i32) -> (i32, i32) {
    %c0_i32 = arith.constant 0 : i32
    %c0_i32_0 = arith.constant 0 : i32
    %c0_i32_1 = arith.constant 0 : i32
    return %c0_i32, %c0_i32_0 : i32, i32
  }
  func.func @transform_22(%arg0: i32) -> (i32, i32) {
    %c0_i32 = arith.constant 0 : i32
    %c0_i32_0 = arith.constant 0 : i32
    %c0_i32_1 = arith.constant 0 : i32
    return %c0_i32, %c0_i32_0 : i32, i32
  }
  func.func @transform_23(%arg0: i32) -> (i32, i32) {
    %c0_i32 = arith.constant 0 : i32
    %c0_i32_0 = arith.constant 0 : i32
    %c0_i32_1 = arith.constant 0 : i32
    return %c0_i32, %c0_i32_0 : i32, i32
  }
  func.func @transform_24(%arg0: i32) -> (i32, i32) {
    %c0_i32 = arith.constant 0 : i32
    %c0_i32_0 = arith.constant 0 : i32
    %c0_i32_1 = arith.constant 0 : i32
    return %c0_i32, %c0_i32_0 : i32, i32
  }
  func.func @transform_25(%arg0: i32) -> (i32, i32) {
    %c0_i32 = arith.constant 0 : i32
    %c0_i32_0 = arith.constant 0 : i32
    %c0_i32_1 = arith.constant 0 : i32
    return %c0_i32, %c0_i32_0 : i32, i32
  }
  func.func @transform_26(%arg0: i32) -> (i32, i32) {
    %c0_i32 = arith.constant 0 : i32
    %c0_i32_0 = arith.constant 0 : i32
    %c0_i32_1 = arith.constant 0 : i32
    return %c0_i32, %c0_i32_0 : i32, i32
  }
  func.func @transform_27(%arg0: i32) -> (i32, i32, i32) {
    %c0_i32 = arith.constant 0 : i32
    %c0_i32_0 = arith.constant 0 : i32
    %c0_i32_1 = arith.constant 0 : i32
    return %arg0, %c0_i32, %c0_i32_0 : i32, i32, i32
  }
  func.func @transform_28(%arg0: i32) -> (i32, i32, i32) {
    %c0_i32 = arith.constant 0 : i32
    %c0_i32_0 = arith.constant 0 : i32
    %c0_i32_1 = arith.constant 0 : i32
    return %arg0, %c0_i32, %c0_i32_0 : i32, i32, i32
  }
}

module attributes {stable_mosaic.version = 11 : i64} {
  func.func @_resize_kernel(%arg0: i32, %arg1: memref<6x32x32xf32, #tpu.memory_space<vmem>>, %arg2: memref<40x32xf32, #tpu.memory_space<vmem>>, %arg3: memref<32x30xf32, #tpu.memory_space<vmem>>, %arg4: memref<6x40x30xf32, #tpu.memory_space<vmem>>) attributes {dimension_semantics = [#tpu.dimension_semantics<parallel>], iteration_bounds = array<i64: 2>, scalar_prefetch = 0 : i64, scratch_operands = 0 : i64, tpu.core_type = #tpu.core_type<tc>, window_params = [{transform_indices = @transform_0, window_bounds = array<i64: 6, 32, 32>}, {pipeline_mode = #tpu.pipeline_mode<synchronous>, transform_indices = @transform_1, window_bounds = array<i64: 40, 32>}, {pipeline_mode = #tpu.pipeline_mode<synchronous>, transform_indices = @transform_2, window_bounds = array<i64: 32, 30>}, {transform_indices = @transform_3, window_bounds = array<i64: 6, 40, 30>}]} {
    %c0 = arith.constant 0 : index
    %c0_0 = arith.constant 0 : index
    %c0_1 = arith.constant 0 : index
    %0 = vector.load %arg1[%c0, %c0_0, %c0_1] : memref<6x32x32xf32, #tpu.memory_space<vmem>>, vector<1x32x32xf32>
    %1 = vector.shape_cast %0 : vector<1x32x32xf32> to vector<32x32xf32>
    %c1 = arith.constant 1 : index
    %c0_2 = arith.constant 0 : index
    %c0_3 = arith.constant 0 : index
    %2 = vector.load %arg1[%c1, %c0_2, %c0_3] : memref<6x32x32xf32, #tpu.memory_space<vmem>>, vector<1x32x32xf32>
    %3 = vector.shape_cast %2 : vector<1x32x32xf32> to vector<32x32xf32>
    %c2 = arith.constant 2 : index
    %c0_4 = arith.constant 0 : index
    %c0_5 = arith.constant 0 : index
    %4 = vector.load %arg1[%c2, %c0_4, %c0_5] : memref<6x32x32xf32, #tpu.memory_space<vmem>>, vector<1x32x32xf32>
    %5 = vector.shape_cast %4 : vector<1x32x32xf32> to vector<32x32xf32>
    %c3 = arith.constant 3 : index
    %c0_6 = arith.constant 0 : index
    %c0_7 = arith.constant 0 : index
    %6 = vector.load %arg1[%c3, %c0_6, %c0_7] : memref<6x32x32xf32, #tpu.memory_space<vmem>>, vector<1x32x32xf32>
    %7 = vector.shape_cast %6 : vector<1x32x32xf32> to vector<32x32xf32>
    %c4 = arith.constant 4 : index
    %c0_8 = arith.constant 0 : index
    %c0_9 = arith.constant 0 : index
    %8 = vector.load %arg1[%c4, %c0_8, %c0_9] : memref<6x32x32xf32, #tpu.memory_space<vmem>>, vector<1x32x32xf32>
    %9 = vector.shape_cast %8 : vector<1x32x32xf32> to vector<32x32xf32>
    %c5 = arith.constant 5 : index
    %c0_10 = arith.constant 0 : index
    %c0_11 = arith.constant 0 : index
    %10 = vector.load %arg1[%c5, %c0_10, %c0_11] : memref<6x32x32xf32, #tpu.memory_space<vmem>>, vector<1x32x32xf32>
    %11 = vector.shape_cast %10 : vector<1x32x32xf32> to vector<32x32xf32>
    %12 = tpu.concatenate %1, %3, %5, %7, %9, %11 in 0 : vector<32x32xf32>, vector<32x32xf32>, vector<32x32xf32>, vector<32x32xf32>, vector<32x32xf32>, vector<32x32xf32> -> vector<192x32xf32>
    %c0_12 = arith.constant 0 : index
    %c0_13 = arith.constant 0 : index
    %13 = vector.load %arg3[%c0_12, %c0_13] : memref<32x30xf32, #tpu.memory_space<vmem>>, vector<32x30xf32>
    %cst = arith.constant dense<0.000000e+00> : vector<192x30xf32>
    %14 = tpu.matmul %12, %13, %cst {dimension_numbers = #tpu.dot_dimension_numbers<[1], [0], [0], [1], [0, 0, 1, 1], [], []>} : vector<192x32xf32>, vector<32x30xf32>, vector<192x30xf32> -> vector<192x30xf32>
    %c0_14 = arith.constant 0 : index
    %c0_15 = arith.constant 0 : index
    %15 = vector.load %arg2[%c0_14, %c0_15] : memref<40x32xf32, #tpu.memory_space<vmem>>, vector<40x32xf32>
    %16 = vector.extract_strided_slice %14 {offsets = [0, 0], sizes = [32, 30], strides = [1, 1]} : vector<192x30xf32> to vector<32x30xf32>
    %cst_16 = arith.constant dense<0.000000e+00> : vector<40x30xf32>
    %17 = tpu.matmul %15, %16, %cst_16 {dimension_numbers = #tpu.dot_dimension_numbers<[1], [0], [0], [1], [0, 0, 1, 1], [], []>} : vector<40x32xf32>, vector<32x30xf32>, vector<40x30xf32> -> vector<40x30xf32>
    %c0_17 = arith.constant 0 : index
    %c0_18 = arith.constant 0 : index
    %c0_19 = arith.constant 0 : index
    %18 = vector.load %arg4[%c0_17, %c0_18, %c0_19] : memref<6x40x30xf32, #tpu.memory_space<vmem>>, vector<1x40x30xf32>
    %19 = vector.shape_cast %18 : vector<1x40x30xf32> to vector<40x30xf32>
    %20 = vector.shape_cast %17 : vector<40x30xf32> to vector<1x40x30xf32>
    tpu.vector_store %arg4[%c0_17, %c0_18, %c0_19], %20 {strides = array<i32>} : memref<6x40x30xf32, #tpu.memory_space<vmem>>, vector<1x40x30xf32>,
    %21 = vector.extract_strided_slice %14 {offsets = [32, 0], sizes = [32, 30], strides = [1, 1]} : vector<192x30xf32> to vector<32x30xf32>
    %cst_20 = arith.constant dense<0.000000e+00> : vector<40x30xf32>
    %22 = tpu.matmul %15, %21, %cst_20 {dimension_numbers = #tpu.dot_dimension_numbers<[1], [0], [0], [1], [0, 0, 1, 1], [], []>} : vector<40x32xf32>, vector<32x30xf32>, vector<40x30xf32> -> vector<40x30xf32>
    %c1_21 = arith.constant 1 : index
    %c0_22 = arith.constant 0 : index
    %c0_23 = arith.constant 0 : index
    %23 = vector.load %arg4[%c1_21, %c0_22, %c0_23] : memref<6x40x30xf32, #tpu.memory_space<vmem>>, vector<1x40x30xf32>
    %24 = vector.shape_cast %23 : vector<1x40x30xf32> to vector<40x30xf32>
    %25 = vector.shape_cast %22 : vector<40x30xf32> to vector<1x40x30xf32>
    tpu.vector_store %arg4[%c1_21, %c0_22, %c0_23], %25 {strides = array<i32>} : memref<6x40x30xf32, #tpu.memory_space<vmem>>, vector<1x40x30xf32>,
    %26 = vector.extract_strided_slice %14 {offsets = [64, 0], sizes = [32, 30], strides = [1, 1]} : vector<192x30xf32> to vector<32x30xf32>
    %cst_24 = arith.constant dense<0.000000e+00> : vector<40x30xf32>
    %27 = tpu.matmul %15, %26, %cst_24 {dimension_numbers = #tpu.dot_dimension_numbers<[1], [0], [0], [1], [0, 0, 1, 1], [], []>} : vector<40x32xf32>, vector<32x30xf32>, vector<40x30xf32> -> vector<40x30xf32>
    %c2_25 = arith.constant 2 : index
    %c0_26 = arith.constant 0 : index
    %c0_27 = arith.constant 0 : index
    %28 = vector.load %arg4[%c2_25, %c0_26, %c0_27] : memref<6x40x30xf32, #tpu.memory_space<vmem>>, vector<1x40x30xf32>
    %29 = vector.shape_cast %28 : vector<1x40x30xf32> to vector<40x30xf32>
    %30 = vector.shape_cast %27 : vector<40x30xf32> to vector<1x40x30xf32>
    tpu.vector_store %arg4[%c2_25, %c0_26, %c0_27], %30 {strides = array<i32>} : memref<6x40x30xf32, #tpu.memory_space<vmem>>, vector<1x40x30xf32>,
    %31 = vector.extract_strided_slice %14 {offsets = [96, 0], sizes = [32, 30], strides = [1, 1]} : vector<192x30xf32> to vector<32x30xf32>
    %cst_28 = arith.constant dense<0.000000e+00> : vector<40x30xf32>
    %32 = tpu.matmul %15, %31, %cst_28 {dimension_numbers = #tpu.dot_dimension_numbers<[1], [0], [0], [1], [0, 0, 1, 1], [], []>} : vector<40x32xf32>, vector<32x30xf32>, vector<40x30xf32> -> vector<40x30xf32>
    %c3_29 = arith.constant 3 : index
    %c0_30 = arith.constant 0 : index
    %c0_31 = arith.constant 0 : index
    %33 = vector.load %arg4[%c3_29, %c0_30, %c0_31] : memref<6x40x30xf32, #tpu.memory_space<vmem>>, vector<1x40x30xf32>
    %34 = vector.shape_cast %33 : vector<1x40x30xf32> to vector<40x30xf32>
    %35 = vector.shape_cast %32 : vector<40x30xf32> to vector<1x40x30xf32>
    tpu.vector_store %arg4[%c3_29, %c0_30, %c0_31], %35 {strides = array<i32>} : memref<6x40x30xf32, #tpu.memory_space<vmem>>, vector<1x40x30xf32>,
    %36 = vector.extract_strided_slice %14 {offsets = [128, 0], sizes = [32, 30], strides = [1, 1]} : vector<192x30xf32> to vector<32x30xf32>
    %cst_32 = arith.constant dense<0.000000e+00> : vector<40x30xf32>
    %37 = tpu.matmul %15, %36, %cst_32 {dimension_numbers = #tpu.dot_dimension_numbers<[1], [0], [0], [1], [0, 0, 1, 1], [], []>} : vector<40x32xf32>, vector<32x30xf32>, vector<40x30xf32> -> vector<40x30xf32>
    %c4_33 = arith.constant 4 : index
    %c0_34 = arith.constant 0 : index
    %c0_35 = arith.constant 0 : index
    %38 = vector.load %arg4[%c4_33, %c0_34, %c0_35] : memref<6x40x30xf32, #tpu.memory_space<vmem>>, vector<1x40x30xf32>
    %39 = vector.shape_cast %38 : vector<1x40x30xf32> to vector<40x30xf32>
    %40 = vector.shape_cast %37 : vector<40x30xf32> to vector<1x40x30xf32>
    tpu.vector_store %arg4[%c4_33, %c0_34, %c0_35], %40 {strides = array<i32>} : memref<6x40x30xf32, #tpu.memory_space<vmem>>, vector<1x40x30xf32>,
    %41 = vector.extract_strided_slice %14 {offsets = [160, 0], sizes = [32, 30], strides = [1, 1]} : vector<192x30xf32> to vector<32x30xf32>
    %cst_36 = arith.constant dense<0.000000e+00> : vector<40x30xf32>
    %42 = tpu.matmul %15, %41, %cst_36 {dimension_numbers = #tpu.dot_dimension_numbers<[1], [0], [0], [1], [0, 0, 1, 1], [], []>} : vector<40x32xf32>, vector<32x30xf32>, vector<40x30xf32> -> vector<40x30xf32>
    %c5_37 = arith.constant 5 : index
    %c0_38 = arith.constant 0 : index
    %c0_39 = arith.constant 0 : index
    %43 = vector.load %arg4[%c5_37, %c0_38, %c0_39] : memref<6x40x30xf32, #tpu.memory_space<vmem>>, vector<1x40x30xf32>
    %44 = vector.shape_cast %43 : vector<1x40x30xf32> to vector<40x30xf32>
    %45 = vector.shape_cast %42 : vector<40x30xf32> to vector<1x40x30xf32>
    tpu.vector_store %arg4[%c5_37, %c0_38, %c0_39], %45 {strides = array<i32>} : memref<6x40x30xf32, #tpu.memory_space<vmem>>, vector<1x40x30xf32>,
    return
  }
  func.func @transform_0(%arg0: i32) -> (i32, i32, i32) {
    %c0_i32 = arith.constant 0 : i32
    %c0_i32_0 = arith.constant 0 : i32
    %c0_i32_1 = arith.constant 0 : i32
    return %arg0, %c0_i32, %c0_i32_0 : i32, i32, i32
  }
  func.func @transform_1(%arg0: i32) -> (i32, i32) {
    %c0_i32 = arith.constant 0 : i32
    %c0_i32_0 = arith.constant 0 : i32
    %c0_i32_1 = arith.constant 0 : i32
    return %c0_i32, %c0_i32_0 : i32, i32
  }
  func.func @transform_2(%arg0: i32) -> (i32, i32) {
    %c0_i32 = arith.constant 0 : i32
    %c0_i32_0 = arith.constant 0 : i32
    %c0_i32_1 = arith.constant 0 : i32
    return %c0_i32, %c0_i32_0 : i32, i32
  }
  func.func @transform_3(%arg0: i32) -> (i32, i32, i32) {
    %c0_i32 = arith.constant 0 : i32
    %c0_i32_0 = arith.constant 0 : i32
    %c0_i32_1 = arith.constant 0 : i32
    return %arg0, %c0_i32, %c0_i32_0 : i32, i32, i32
  }
}

</mosaic_0001>

<bundles_post_ra>
// kernel: _sam_forward_group.3
= control target key start
LH: loop header
LB: loop body
LE: loop exit
PB: predicated region body
PF: predicated region fallthrough
CT: control target
= control target key end

     0   :  { %s1589_s12 = smov 0   ;;  %s1893_s0 = inlined_call_operand.vmem [shape: f32[12,32,32], index: 0, kind: input, shape index: {}]   ;;  %s1894_s1 = inlined_call_operand.vmem [shape: f32[40,32], index: 1, kind: input, shape index: {}]   ;;  %s1895_s2 = inlined_call_operand.vmem [shape: f32[32,30], index: 2, kind: input, shape index: {}]   ;;  %s1896_s3 = inlined_call_operand.vmem [shape: f32[12,40,30], index: 3, kind: output, shape index: {}]  }
   0x1 LB: > { %s1124_s13 = sadd.s32 4294967295, %s1564_s12   ;;  %p1128_p0 = scmp.ge.s32.totalorder %s1564_s12, 1  ;;  %s1564_s12 = sphi %s1589_s12, %s13_s12  }
   0x2   : > { %p139_p1 = scmp.lt.s32.totalorder %s1564_s12, 3 }
   0x4   : > { %p140_p2 = pnand %p1128_p0, %p139_p1 }
   0x5   : > { %v208_v0 = vld [vmem:[%s1895_s2] sm:$0xff] (!%p140_p2)  ;;  %v209_v1 = vld [vmem:[%s1895_s2 + $0x8] sm:$0xff] (!%p140_p2)  ;;  %v210_v2 = vld [vmem:[%s1895_s2 + $0x10] sm:$0xff] (!%p140_p2)  ;;  %s165_s20 = smul.u32 (!%p140_p2), 6, %s1124_s13  ;;  %vm212_vm0 = vcmask (!%p140_p2), 261120   ;;  %v1566_v30 = vmov (!%p140_p2), 0.0|0.0  }
   0x6   : > { %143 = sbr.rel (%p140_p2) target bundleno = 533 (0x215), region = 32  ;;  %v1498_v3 = vpack.c.bf16 (!%p140_p2), %v209_v1, %v208_v0  ;;  %v211_v4 = vld [vmem:[%s1895_s2 + $0x18] sm:$0xff] (!%p140_p2)  ;;  %1506 = vmatprep.subr.bf16.mxu1 (!%p140_p2), %v1566_v30  ;;  %vm1567_vm1 = vmmov (!%p140_p2), 0   ;;  %v1568_v31 = vmov (!%p140_p2), 0.0   ;;  %v1675_v39 = vld [vmem:[%s1894_s1] sm:$0xff] (!%p140_p2)  ;;  %v1685_v43 = vld [vmem:[%s1894_s1 + $0x8] sm:$0xff] (!%p140_p2) }
   0x7   : > { %v1502_v5 = vpack.c.bf16 (!%p140_p2), %v211_v4, %v210_v2  ;;  %p166_p3 = scmp.lt.s32.totalorder (!%p140_p2), %s165_s20, 11  ;;  %1368 = vmatprep.mubr.msk.f32.mxu1 (!%p140_p2), %vm1567_vm1, %v1568_v31  ;;  %v1695_v47 = vld [vmem:[%s1894_s1 + $0x10] sm:$0xff] (!%p140_p2)  ;;  %v1705_v51 = vld [vmem:[%s1894_s1 + $0x18] sm:$0xff] (!%p140_p2)  ;;  %v1714_v55 = vld [vmem:[%s1894_s1 + $0x20] sm:$0xff] (!%p140_p2)  ;;  %vm580_vm2 = vcmask (!%p140_p2), 244736  }
   0x8   : > { %1499 = vmatprep.subr.bf16.mxu0 (!%p140_p2), %v1498_v3 }
   0x9   : > { %1501 = vmatpush3.bf16.msra.mxu0 (!%p140_p2), %v1498_v3 }
   0xa   : > { %1503 = vmatprep.subr.bf16.mxu0 (!%p140_p2), %v1502_v5 }
   0xd   : > { %s1898_s20 = smov (!%p166_p3, %s165_s20), 11  ;;  %1505 = vmatpush3.bf16.msra.mxu0 %v1502_v5 }
   0xe   : > { %s1233_s23 = sshll.u32 %s1898_s20, 5  ;;  %1524 = vmatprep.subr.bf16.mxu0 %v1566_v30  ;;  %s1546_s10 = smul.u32 40, %s1898_s20 }
   0xf   : > { %s1615_s26 = scalar_lea.vmem %s1893_s0, %s1233_s23 }
  0x10   : > { %v179_v6 = vld [vmem:[%s1615_s26] sm:$0xff]  ;;  %v180_v7 = vld [vmem:[%s1615_s26 + $0x8] sm:$0xff]  ;;  %v181_v8 = vld [vmem:[%s1615_s26 + $0x10] sm:$0xff]  ;;  %s1828_s14 = scalar_lea.vmem %s1896_s3, %s1546_s10 }
  0x11   : > { %1324 = vmatprep.mubr.msk.f32.mxu0 %vm212_vm0, %v179_v6  ;;  %v182_v9 = vld [vmem:[%s1615_s26 + $0x18] sm:$0xff]  ;;  %v1132_v10 = vld [vmem:[%s1615_s26 + $0x20] sm:$0xff]  ;;  %v1133_v11 = vld [vmem:[%s1615_s26 + $0x28] sm:$0xff] }
  0x12   : > { %1325 = vmatmul.mubr.msk.f32.vlgmr.msra.gmra.mrb[0].mxu0 %vm212_vm0, %v180_v7  ;;  %v1134_v12 = vld [vmem:[%s1615_s26 + $0x30] sm:$0xff]  ;;  %v1135_v13 = vld [vmem:[%s1615_s26 + $0x38] sm:$0xff]  ;;  %v1136_v14 = vld [vmem:[%s1615_s26 + $0x40] sm:$0xff] }
  0x13   : > { %1327 = vmatprep.mubr.msk.f32.mxu0 %vm212_vm0, %v181_v8  ;;  %v1137_v15 = vld [vmem:[%s1615_s26 + $0x48] sm:$0xff]  ;;  %v1138_v16 = vld [vmem:[%s1615_s26 + $0x50] sm:$0xff]  ;;  %v1139_v17 = vld [vmem:[%s1615_s26 + $0x58] sm:$0xff] }
  0x14   : > { %v1140_v18 = vld [vmem:[%s1615_s26 + $0x60] sm:$0xff]  ;;  %v1141_v19 = vld [vmem:[%s1615_s26 + $0x68] sm:$0xff]  ;;  %v1142_v20 = vld [vmem:[%s1615_s26 + $0x70] sm:$0xff] }
  0x15   : > { %v1143_v21 = vld [vmem:[%s1615_s26 + $0x78] sm:$0xff]  ;;  %v1144_v22 = vld [vmem:[%s1615_s26 + $0x80] sm:$0xff]  ;;  %v1145_v23 = vld [vmem:[%s1615_s26 + $0x88] sm:$0xff] }
  0x16   : > { %1328 = vmatmul.mubr.msk.f32.gmra.mrb[2].mxu0 %vm212_vm0, %v182_v9  ;;  %v1146_v24 = vld [vmem:[%s1615_s26 + $0x90] sm:$0xff]  ;;  %v1147_v25 = vld [vmem:[%s1615_s26 + $0x98] sm:$0xff]  ;;  %v1148_v26 = vld [vmem:[%s1615_s26 + $0xa0] sm:$0xff] }
  0x17   : > { %1330 = vmatprep.mubr.msk.f32.mxu0 %vm212_vm0, %v1132_v10  ;;  %v1149_v27 = vld [vmem:[%s1615_s26 + $0xa8] sm:$0xff]  ;;  %v1150_v28 = vld [vmem:[%s1615_s26 + $0xb0] sm:$0xff]  ;;  %v1151_v29 = vld [vmem:[%s1615_s26 + $0xb8] sm:$0xff] }
  0x1a   : > { %1331 = vmatmul.mubr.msk.f32.gmra.mrb[4].mxu0 %vm212_vm0, %v1133_v11 }
  0x1b   : > { %1333 = vmatprep.mubr.msk.f32.mxu0 %vm212_vm0, %v1134_v12 }
  0x1e   : > { %1334 = vmatmul.mubr.msk.f32.gmra.mrb[6].mxu0 %vm212_vm0, %v1135_v13 }
  0x1f   : > { %1336 = vmatprep.mubr.msk.f32.mxu0 %vm212_vm0, %v1136_v14 }
  0x22   : > { %1337 = vmatmul.mubr.msk.f32.gmra.mrb[8].mxu0 %vm212_vm0, %v1137_v15 }
  0x23   : > { %1339 = vmatprep.mubr.msk.f32.mxu0 %vm212_vm0, %v1138_v16 }
  0x26   : > { %1340 = vmatmul.mubr.msk.f32.gmra.mrb[10].mxu0 %vm212_vm0, %v1139_v17 }
  0x27   : > { %1342 = vmatprep.mubr.msk.f32.mxu0 %vm212_vm0, %v1140_v18 }
  0x2a   : > { %1343 = vmatmul.mubr.msk.f32.gmra.mrb[12].mxu0 %vm212_vm0, %v1141_v19 }
  0x2b   : > { %1345 = vmatprep.mubr.msk.f32.mxu0 %vm212_vm0, %v1142_v20 }
  0x2e   : > { %1346 = vmatmul.mubr.msk.f32.gmra.mrb[14].mxu0 %vm212_vm0, %v1143_v21 }
  0x2f   : > { %1348 = vmatprep.mubr.msk.f32.mxu0 %vm212_vm0, %v1144_v22 }
  0x32   : > { %1349 = vmatmul.mubr.msk.f32.gmra.mrb[16].mxu0 %vm212_vm0, %v1145_v23 }
  0x33   : > { %1351 = vmatprep.mubr.msk.f32.mxu0 %vm212_vm0, %v1146_v24 }
  0x36   : > { %1352 = vmatmul.mubr.msk.f32.gmra.mrb[18].mxu0 %vm212_vm0, %v1147_v25 }
  0x37   : > { %1354 = vmatprep.mubr.msk.f32.mxu0 %vm212_vm0, %v1148_v26 }
  0x3a   : > { %1355 = vmatmul.mubr.msk.f32.gmra.mrb[20].mxu0 %vm212_vm0, %v1149_v27 }
  0x3b   : > { %1357 = vmatprep.mubr.msk.f32.mxu0 %vm212_vm0, %v1150_v28 }
  0x3e   : > { %1358 = vmatmul.mubr.msk.f32.gmra.mrb[22].mxu0 %vm212_vm0, %v1151_v29 }
  0x3f   : > { %1437 = vmatprep.mubr.msk.f32.mxu0 %vm1567_vm1, %v1568_v31 }
  0xe5   : > { %v1326_v32 = vpop.f32.mrb[0].mxu0 }
  0xe6   : > { %v351_v33 = vpop.f32.mrb[1].mxu0 }
  0xe7   : > { %v1507_v34 = vpack.c.bf16 %v1326_v32, %v351_v33 }
  0xe9   : > { %v1329_v35 = vpop.f32.mrb[2].mxu0  ;;  %1508 = vmatpush3.bf16.msra.mxu1 %v1507_v34 }
  0xea   : > { %v361_v36 = vpop.f32.mrb[3].mxu0  ;;  %1509 = vmatprep.subr.bf16.mxu1 %v1566_v30 }
  0xeb   : > { %v1510_v37 = vpack.c.bf16 %v1329_v35, %v361_v36 }
  0xed   : > { %v1332_v38 = vpop.f32.mrb[4].mxu0  ;;  %1511 = vmatpush3.bf16.msra.mxu1 %v1510_v37 }
  0xee   : > { %v371_v40 = vpop.f32.mrb[5].mxu0  ;;  %1512 = vmatprep.subr.bf16.mxu1 %v1566_v30 }
  0xef   : > { %v1513_v41 = vpack.c.bf16 %v1332_v38, %v371_v40 }
  0xf0   : > { %1369 = vmatmul.mubr.msk.f32.vlgmr.msra.gmra.mrb[0].mxu1 %vm212_vm0, %v1675_v39 }
  0xf1   : > { %v1335_v42 = vpop.f32.mrb[6].mxu0  ;;  %1514 = vmatpush3.bf16.msra.mxu1 %v1513_v41  ;;  %1371 = vmatprep.mubr.msk.f32.mxu1 %vm1567_vm1, %v1568_v31 }
  0xf2   : > { %v381_v44 = vpop.f32.mrb[7].mxu0  ;;  %1515 = vmatprep.subr.bf16.mxu1 %v1566_v30 }
  0xf3   : > { %v1516_v45 = vpack.c.bf16 %v1335_v42, %v381_v44 }
  0xf4   : > { %1372 = vmatmul.mubr.msk.f32.gmra.mrb[2].mxu1 %vm212_vm0, %v1685_v43 }
  0xf5   : > { %v1338_v46 = vpop.f32.mrb[8].mxu0  ;;  %1517 = vmatpush3.bf16.msra.mxu1 %v1516_v45  ;;  %1374 = vmatprep.mubr.msk.f32.mxu1 %vm1567_vm1, %v1568_v31 }
  0xf6   : > { %v391_v48 = vpop.f32.mrb[9].mxu0  ;;  %1518 = vmatprep.subr.bf16.mxu1 %v1566_v30 }
  0xf7   : > { %v1519_v49 = vpack.c.bf16 %v1338_v46, %v391_v48 }
  0xf8   : > { %1375 = vmatmul.mubr.msk.f32.gmra.mrb[4].mxu1 %vm212_vm0, %v1695_v47 }
  0xf9   : > { %v1341_v50 = vpop.f32.mrb[10].mxu0  ;;  %1377 = vmatprep.mubr.msk.f32.mxu1 %vm1567_vm1, %v1568_v31 }
  0xfa   : > { %v401_v52 = vpop.f32.mrb[11].mxu0 }
  0xfb   : > { %v1522_v53 = vpack.c.bf16 %v1341_v50, %v401_v52 }
  0xfc   : > { %1378 = vmatmul.mubr.msk.f32.gmra.mrb[6].mxu1 %vm212_vm0, %v1705_v51 }
  0xfd   : > { %v1344_v54 = vpop.f32.mrb[12].mxu0  ;;  %1380 = vmatprep.mubr.msk.f32.mxu1 %vm1567_vm1, %v1568_v31 }
  0xfe   : > { %v411_v56 = vpop.f32.mrb[13].mxu0 }
  0xff   : > { %v1525_v57 = vpack.c.bf16 %v1344_v54, %v411_v56 }
 0x100   : > { %1381 = vmatmul.mubr.msk.f32.gmra.mrb[8].mxu1 %vm212_vm0, %v1714_v55 }
 0x101   : > { %1526 = vmatpush3.bf16.msra.mxu0 %v1525_v57  ;;  %1391 = vmatprep.mubr.msk.f32.mxu1 %vm1567_vm1, %v1568_v31  ;;  %v1347_v58 = vpop.f32.mrb[14].mxu0 }
 0x102   : > { %v421_v59 = vpop.f32.mrb[15].mxu0  ;;  %1527 = vmatprep.subr.bf16.mxu0 %v1566_v30 }
 0x103   : > { %v1528_v60 = vpack.c.bf16 %v1347_v58, %v421_v59 }
 0x104   : > { %1392 = vmatmul.mubr.msk.f32.vlgmr.msra.gmra.mrb[10].mxu1 %vm212_vm0, %v1675_v39 }
 0x105   : > { %1520 = vmatpush3.bf16.msra.mxu1 %v1519_v49  ;;  %1394 = vmatprep.mubr.msk.f32.mxu1 %vm1567_vm1, %v1568_v31  ;;  %v1350_v61 = vpop.f32.mrb[16].mxu0 }
 0x106   : > { %1521 = vmatprep.subr.bf16.mxu1 %v1566_v30  ;;  %1529 = vmatpush3.bf16.msra.mxu0 %v1528_v60  ;;  %v431_v62 = vpop.f32.mrb[17].mxu0 }
 0x107   : > { %v1531_v63 = vpack.c.bf16 %v1350_v61, %v431_v62  ;;  %1536 = vmatprep.subr.bf16.mxu0 %v1566_v30 }
 0x108   : > { %1395 = vmatmul.mubr.msk.f32.gmra.mrb[12].mxu1 %vm212_vm0, %v1685_v43 }
 0x109   : > { %1523 = vmatpush3.bf16.msra.mxu1 %v1522_v53  ;;  %1397 = vmatprep.mubr.msk.f32.mxu1 %vm1567_vm1, %v1568_v31  ;;  %v1353_v0 = vpop.f32.mrb[18].mxu0 }
 0x10a   : > { %1530 = vmatprep.subr.bf16.mxu1 %v1566_v30  ;;  %v441_v1 = vpop.f32.mrb[19].mxu0  ;;  %1438 = vmatmul.mubr.msk.f32.vlgmr.msra.gmra.mrb[24].mxu0 %vm212_vm0, %v1675_v39 }
 0x10b   : > { %v1534_v2 = vpack.c.bf16 %v1353_v0, %v441_v1  ;;  %1440 = vmatprep.mubr.msk.f32.mxu0 %vm1567_vm1, %v1568_v31 }
 0x10c   : > { %1398 = vmatmul.mubr.msk.f32.gmra.mrb[14].mxu1 %vm212_vm0, %v1695_v47 }
 0x10d   : > { %1400 = vmatprep.mubr.msk.f32.mxu1 %vm1567_vm1, %v1568_v31  ;;  %v1356_v3 = vpop.f32.mrb[20].mxu0 }
 0x10e   : > { %v451_v4 = vpop.f32.mrb[21].mxu0  ;;  %1441 = vmatmul.mubr.msk.f32.gmra.mrb[26].mxu0 %vm212_vm0, %v1685_v43 }
 0x10f   : > { %v1537_v5 = vpack.c.bf16 %v1356_v3, %v451_v4  ;;  %1443 = vmatprep.mubr.msk.f32.mxu0 %vm1567_vm1, %v1568_v31 }
 0x110   : > { %1401 = vmatmul.mubr.msk.f32.gmra.mrb[16].mxu1 %vm212_vm0, %v1705_v51 }
 0x111   : > { %1403 = vmatprep.mubr.msk.f32.mxu1 %vm1567_vm1, %v1568_v31  ;;  %1538 = vmatpush3.bf16.msra.mxu0 %v1537_v5  ;;  %v1359_v6 = vpop.f32.mrb[22].mxu0 }
 0x112   : > { %v461_v7 = vpop.f32.mrb[23].mxu0  ;;  %1444 = vmatmul.mubr.msk.f32.gmra.mrb[28].mxu0 %vm212_vm0, %v1695_v47  ;;  %1539 = vmatprep.subr.bf16.mxu0 %v1566_v30 }
 0x113   : > { %v1540_v8 = vpack.c.bf16 %v1359_v6, %v461_v7  ;;  %1446 = vmatprep.mubr.msk.f32.mxu0 %vm1567_vm1, %v1568_v31 }
 0x114   : > { %1404 = vmatmul.mubr.msk.f32.gmra.mrb[18].mxu1 %vm212_vm0, %v1714_v55 }
 0x115   : > { %1414 = vmatprep.mubr.msk.f32.mxu1 %vm1567_vm1, %v1568_v31  ;;  %1541 = vmatpush3.bf16.msra.mxu0 %v1540_v8 }
 0x116   : > { %1447 = vmatmul.mubr.msk.f32.gmra.mrb[30].mxu0 %vm212_vm0, %v1705_v51 }
 0x117   : > { %1449 = vmatprep.mubr.msk.f32.mxu0 %vm1567_vm1, %v1568_v31 }
 0x118   : > { %1415 = vmatmul.mubr.msk.f32.vlgmr.msra.gmra.mrb[20].mxu1 %vm212_vm0, %v1675_v39 }
 0x119   : > { %1417 = vmatprep.mubr.msk.f32.mxu1 %vm1567_vm1, %v1568_v31  ;;  %1532 = vmatpush3.bf16.msra.mxu1 %v1531_v63 }
 0x11a   : > { %1533 = vmatprep.subr.bf16.mxu1 %v1566_v30  ;;  %1450 = vmatmul.mubr.msk.f32.gmra.mrb[32].mxu0 %vm212_vm0, %v1714_v55 }
 0x11b   : > { %1483 = vmatprep.mubr.msk.f32.mxu0 %vm1567_vm1, %v1568_v31 }
 0x11c   : > { %1418 = vmatmul.mubr.msk.f32.gmra.mrb[22].mxu1 %vm212_vm0, %v1685_v43 }
 0x11d   : > { %1420 = vmatprep.mubr.msk.f32.mxu1 %vm1567_vm1, %v1568_v31  ;;  %1535 = vmatpush3.bf16.msra.mxu1 %v1534_v2 }
 0x11e   : > { %1542 = vmatprep.subr.bf16.mxu1 %v1566_v30  ;;  %1484 = vmatmul.mubr.msk.f32.vlgmr.msra.gmra.mrb[34].mxu0 %vm212_vm0, %v1675_v39 }
 0x11f   : > { %1486 = vmatprep.mubr.msk.f32.mxu0 %vm1567_vm1, %v1568_v31 }
 0x120   : > { %1421 = vmatmul.mubr.msk.f32.gmra.mrb[24].mxu1 %vm212_vm0, %v1695_v47 }
 0x121   : > { %1423 = vmatprep.mubr.msk.f32.mxu1 %vm1567_vm1, %v1568_v31 }
 0x122   : > { %1487 = vmatmul.mubr.msk.f32.gmra.mrb[36].mxu0 %vm212_vm0, %v1685_v43 }
 0x123   : > { %1489 = vmatprep.mubr.msk.f32.mxu0 %vm1567_vm1, %v1568_v31 }
 0x124   : > { %1424 = vmatmul.mubr.msk.f32.gmra.mrb[26].mxu1 %vm212_vm0, %v1705_v51 }
 0x125   : > { %1426 = vmatprep.mubr.msk.f32.mxu1 %vm1567_vm1, %v1568_v31 }
 0x126   : > { %1490 = vmatmul.mubr.msk.f32.gmra.mrb[38].mxu0 %vm212_vm0, %v1695_v47 }
 0x127   : > { %1492 = vmatprep.mubr.msk.f32.mxu0 %vm1567_vm1, %v1568_v31 }
 0x128   : > { %1427 = vmatmul.mubr.msk.f32.gmra.mrb[28].mxu1 %vm212_vm0, %v1714_v55 }
 0x129   : > { %1460 = vmatprep.mubr.msk.f32.mxu1 %vm1567_vm1, %v1568_v31 }
 0x12a   : > { %1493 = vmatmul.mubr.msk.f32.gmra.mrb[40].mxu0 %vm212_vm0, %v1705_v51 }
 0x12c   : > { %1461 = vmatmul.mubr.msk.f32.vlgmr.msra.gmra.mrb[30].mxu1 %vm212_vm0, %v1675_v39 }
 0x12d   : > { %1544 = vmatpush3.bf16.msra.mxu1 %v1537_v5  ;;  %1463 = vmatprep.mubr.msk.f32.mxu1 %vm1567_vm1, %v1568_v31 }
 0x12e   : > { %1543 = vmatprep.subr.bf16.mxu1 %v1566_v30 }
 0x130   : > { %1464 = vmatmul.mubr.msk.f32.gmra.mrb[32].mxu1 %vm212_vm0, %v1685_v43 }
 0x131   : > { %1545 = vmatpush3.bf16.msra.mxu1 %v1540_v8  ;;  %1466 = vmatprep.mubr.msk.f32.mxu1 %vm1567_vm1, %v1568_v31 }
 0x134   : > { %1467 = vmatmul.mubr.msk.f32.gmra.mrb[34].mxu1 %vm212_vm0, %v1695_v47 }
 0x135   : > { %1469 = vmatprep.mubr.msk.f32.mxu1 %vm1567_vm1, %v1568_v31 }
 0x138   : > { %1470 = vmatmul.mubr.msk.f32.gmra.mrb[36].mxu1 %vm212_vm0, %v1705_v51 }
 0x139   : > { %1472 = vmatprep.mubr.msk.f32.mxu1 %vm1567_vm1, %v1568_v31 }
 0x13c   : > { %1473 = vmatmul.mubr.msk.f32.gmra.mrb[38].mxu1 %vm212_vm0, %v1714_v55 }
 0x13d   : > { %1495 = vmatprep.mubr.msk.f32.mxu1 %vm1567_vm1, %v1568_v31 }
 0x140   : > { %1496 = vmatmul.mubr.msk.f32.vlgmr.msra.gmra.mrb[40].mxu1 %vm212_vm0, %v1714_v55 }
 0x1c3   : > { %v556_v9 = vpop.f32.mrb[0].mxu1 }
 0x1c4   : > { %581 = vst.msk [vmem:[%s1828_s14] sm:$0xff] %vm580_vm2, %v556_v9  ;;  %v1370_v10 = vpop.f32.mrb[1].mxu1 }
 0x1c7   : > { %v561_v11 = vpop.f32.mrb[2].mxu1 }
 0x1c8   : > { %582 = vst.msk [vmem:[%s1828_s14 + $0x8] sm:$0xff] %vm580_vm2, %v561_v11  ;;  %v1373_v12 = vpop.f32.mrb[3].mxu1 }
 0x1cb   : > { %v566_v13 = vpop.f32.mrb[4].mxu1 }
 0x1cc   : > { %583 = vst.msk [vmem:[%s1828_s14 + $0x10] sm:$0xff] %vm580_vm2, %v566_v13  ;;  %v1376_v14 = vpop.f32.mrb[5].mxu1 }
 0x1cf   : > { %v571_v15 = vpop.f32.mrb[6].mxu1 }
 0x1d0   : > { %584 = vst.msk [vmem:[%s1828_s14 + $0x18] sm:$0xff] %vm580_vm2, %v571_v15  ;;  %v1379_v16 = vpop.f32.mrb[7].mxu1 }
 0x1d3   : > { %v576_v17 = vpop.f32.mrb[8].mxu1 }
 0x1d4   : > { %585 = vst.msk [vmem:[%s1828_s14 + $0x20] sm:$0xff] %vm580_vm2, %v576_v17  ;;  %v1382_v18 = vpop.f32.mrb[9].mxu1 }
 0x1d7   : > { %v652_v19 = vpop.f32.mrb[10].mxu1 }
 0x1d8   : > { %1186 = vst.msk [vmem:[%s1828_s14 + $0x28] sm:$0xff] %vm580_vm2, %v652_v19  ;;  %v1393_v20 = vpop.f32.mrb[11].mxu1 }
 0x1db   : > { %v657_v21 = vpop.f32.mrb[12].mxu1 }
 0x1dc   : > { %1187 = vst.msk [vmem:[%s1828_s14 + $0x30] sm:$0xff] %vm580_vm2, %v657_v21  ;;  %v1396_v22 = vpop.f32.mrb[13].mxu1 }
 0x1dd   : > { %v844_v23 = vpop.f32.mrb[24].mxu0 }
 0x1de   : > { %1206 = vst.msk [vmem:[%s1828_s14 + $0x78] sm:$0xff] %vm580_vm2, %v844_v23  ;;  %v1439_v24 = vpop.f32.mrb[25].mxu0 }
 0x1df   : > { %v662_v25 = vpop.f32.mrb[14].mxu1 }
 0x1e0   : > { %1188 = vst.msk [vmem:[%s1828_s14 + $0x38] sm:$0xff] %vm580_vm2, %v662_v25  ;;  %v1399_v26 = vpop.f32.mrb[15].mxu1 }
 0x1e1   : > { %v849_v27 = vpop.f32.mrb[26].mxu0 }
 0x1e2   : > { %1207 = vst.msk [vmem:[%s1828_s14 + $0x80] sm:$0xff] %vm580_vm2, %v849_v27  ;;  %v1442_v28 = vpop.f32.mrb[27].mxu0 }
 0x1e3   : > { %v667_v29 = vpop.f32.mrb[16].mxu1 }
 0x1e4   : > { %1189 = vst.msk [vmem:[%s1828_s14 + $0x40] sm:$0xff] %vm580_vm2, %v667_v29  ;;  %v1402_v30 = vpop.f32.mrb[17].mxu1 }
 0x1e5   : > { %v854_v31 = vpop.f32.mrb[28].mxu0 }
 0x1e6   : > { %1208 = vst.msk [vmem:[%s1828_s14 + $0x88] sm:$0xff] %vm580_vm2, %v854_v31  ;;  %v1445_v32 = vpop.f32.mrb[29].mxu0 }
 0x1e7   : > { %v672_v33 = vpop.f32.mrb[18].mxu1 }
 0x1e8   : > { %1190 = vst.msk [vmem:[%s1828_s14 + $0x48] sm:$0xff] %vm580_vm2, %v672_v33  ;;  %v1405_v34 = vpop.f32.mrb[19].mxu1 }
 0x1e9   : > { %v859_v35 = vpop.f32.mrb[30].mxu0 }
 0x1ea   : > { %1209 = vst.msk [vmem:[%s1828_s14 + $0x90] sm:$0xff] %vm580_vm2, %v859_v35  ;;  %v1448_v36 = vpop.f32.mrb[31].mxu0 }
 0x1eb   : > { %v748_v37 = vpop.f32.mrb[20].mxu1 }
 0x1ec   : > { %1196 = vst.msk [vmem:[%s1828_s14 + $0x50] sm:$0xff] %vm580_vm2, %v748_v37  ;;  %v1416_v38 = vpop.f32.mrb[21].mxu1 }
 0x1ed   : > { %v864_v39 = vpop.f32.mrb[32].mxu0 }
 0x1ee   : > { %1210 = vst.msk [vmem:[%s1828_s14 + $0x98] sm:$0xff] %vm580_vm2, %v864_v39  ;;  %v1451_v40 = vpop.f32.mrb[33].mxu0 }
 0x1ef   : > { %v753_v41 = vpop.f32.mrb[22].mxu1 }
 0x1f0   : > { %1197 = vst.msk [vmem:[%s1828_s14 + $0x58] sm:$0xff] %vm580_vm2, %v753_v41  ;;  %v1419_v42 = vpop.f32.mrb[23].mxu1 }
 0x1f1   : > { %v1036_v43 = vpop.f32.mrb[34].mxu0 }
 0x1f2   : > { %1226 = vst.msk [vmem:[%s1828_s14 + $0xc8] sm:$0xff] %vm580_vm2, %v1036_v43  ;;  %v1485_v44 = vpop.f32.mrb[35].mxu0 }
 0x1f3   : > { %v758_v45 = vpop.f32.mrb[24].mxu1 }
 0x1f4   : > { %1198 = vst.msk [vmem:[%s1828_s14 + $0x60] sm:$0xff] %vm580_vm2, %v758_v45  ;;  %v1422_v46 = vpop.f32.mrb[25].mxu1 }
 0x1f5   : > { %v1041_v47 = vpop.f32.mrb[36].mxu0 }
 0x1f6   : > { %1227 = vst.msk [vmem:[%s1828_s14 + $0xd0] sm:$0xff] %vm580_vm2, %v1041_v47  ;;  %v1488_v48 = vpop.f32.mrb[37].mxu0 }
 0x1f7   : > { %v763_v49 = vpop.f32.mrb[26].mxu1 }
 0x1f8   : > { %1199 = vst.msk [vmem:[%s1828_s14 + $0x68] sm:$0xff] %vm580_vm2, %v763_v49  ;;  %v1425_v50 = vpop.f32.mrb[27].mxu1 }
 0x1f9   : > { %v1046_v51 = vpop.f32.mrb[38].mxu0 }
 0x1fa   : > { %1228 = vst.msk [vmem:[%s1828_s14 + $0xd8] sm:$0xff] %vm580_vm2, %v1046_v51  ;;  %v1491_v52 = vpop.f32.mrb[39].mxu0 }
 0x1fb   : > { %v768_v53 = vpop.f32.mrb[28].mxu1 }
 0x1fc   : > { %1200 = vst.msk [vmem:[%s1828_s14 + $0x70] sm:$0xff] %vm580_vm2, %v768_v53  ;;  %v1428_v54 = vpop.f32.mrb[29].mxu1 }
 0x1fd   : > { %v1051_v55 = vpop.f32.mrb[40].mxu0 }
 0x1fe   : > { %1229 = vst.msk [vmem:[%s1828_s14 + $0xe0] sm:$0xff] %vm580_vm2, %v1051_v55  ;;  %v1494_v56 = vpop.f32.mrb[41].mxu0 }
 0x1ff   : > { %v940_v57 = vpop.f32.mrb[30].mxu1 }
 0x200   : > { %1216 = vst.msk [vmem:[%s1828_s14 + $0xa0] sm:$0xff] %vm580_vm2, %v940_v57  ;;  %v1462_v58 = vpop.f32.mrb[31].mxu1 }
 0x203   : > { %v945_v59 = vpop.f32.mrb[32].mxu1 }
 0x204   : > { %1217 = vst.msk [vmem:[%s1828_s14 + $0xa8] sm:$0xff] %vm580_vm2, %v945_v59  ;;  %v1465_v60 = vpop.f32.mrb[33].mxu1 }
 0x207   : > { %v950_v61 = vpop.f32.mrb[34].mxu1 }
 0x208   : > { %1218 = vst.msk [vmem:[%s1828_s14 + $0xb0] sm:$0xff] %vm580_vm2, %v950_v61  ;;  %v1468_v62 = vpop.f32.mrb[35].mxu1 }
 0x20b   : > { %v955_v63 = vpop.f32.mrb[36].mxu1 }
 0x20c   : > { %1219 = vst.msk [vmem:[%s1828_s14 + $0xb8] sm:$0xff] %vm580_vm2, %v955_v63  ;;  %v1471_v0 = vpop.f32.mrb[37].mxu1 }
 0x20f   : > { %v960_v1 = vpop.f32.mrb[38].mxu1 }
 0x210   : > { %1220 = vst.msk [vmem:[%s1828_s14 + $0xc0] sm:$0xff] %vm580_vm2, %v960_v1  ;;  %v1474_v2 = vpop.f32.mrb[39].mxu1 }
 0x213   : > { %v1056_v3 = vpop.f32.mrb[40].mxu1 }
 0x214   : > { %1230 = vst.msk [vmem:[%s1828_s14 + $0xe8] sm:$0xff] %vm580_vm2, %v1056_v3  ;;  %v1497_v4 = vpop.f32.mrb[41].mxu1 }
 0x215 PF: > { %s13_s12 = sadd.s32 1, %s1564_s12  }
 0x216   : > { %p10_p4 = scmp.ge.s32.totalorder %s13_s12, 4  }
 0x218   :  { %12 = sbr.rel (!%p10_p4) target bundleno = 1 (0x1), region = 72 }

// kernel: _sam_forward_group.2
= control target key start
LH: loop header
LB: loop body
LE: loop exit
PB: predicated region body
PF: predicated region fallthrough
CT: control target
= control target key end

     0   :  { %s18266_s0 = inlined_call_operand.vmem [shape: f32[4,7,32], index: 0, kind: input, shape index: {}]   ;;  %s18267_s1 = inlined_call_operand.vmem [shape: f32[4,64,32], index: 1, kind: input, shape index: {}]   ;;  %s18268_s2 = inlined_call_operand.vmem [shape: f32[64,32], index: 2, kind: input, shape index: {}]   ;;  %s18269_s3 = inlined_call_operand.vmem [shape: f32[6,32,32], index: 3, kind: input, shape index: {}]   ;;  %s18270_s4 = inlined_call_operand.vmem [shape: f32[6,1,32], index: 4, kind: input, shape index: {}]   ;;  %s18271_s5 = inlined_call_operand.vmem [shape: f32[32,64], index: 5, kind: input, shape index: {}]   ;;  %s18272_s6 = inlined_call_operand.vmem [shape: f32[1,64], index: 6, kind: input, shape index: {}]   ;;  %s18273_s7 = inlined_call_operand.vmem [shape: f32[64,32], index: 7, kind: input, shape index: {}]   ;;  %s18274_s8 = inlined_call_operand.vmem [shape: f32[1,32], index: 8, kind: input, shape index: {}]   ;;  %s18275_s9 = inlined_call_operand.vmem [shape: f32[128,128], index: 9, kind: input, shape index: {}]   ;;  %s18276_s10 = inlined_call_operand.vmem [shape: f32[1,128], index: 10, kind: input, shape index: {}]   ;;  %s18277_s11 = inlined_call_operand.vmem [shape: f32[128,128], index: 11, kind: input, shape index: {}]   ;;  %s18278_s12 = inlined_call_operand.vmem [shape: f32[1,128], index: 12, kind: input, shape index: {}]   ;;  %s18279_s13 = inlined_call_operand.vmem [shape: f32[128,16], index: 13, kind: input, shape index: {}]   ;;  %s18280_s14 = inlined_call_operand.vmem [shape: f32[1,16], index: 14, kind: input, shape index: {}]   ;;  %s18281_s15 = inlined_call_operand.vmem [shape: f32[32,32], index: 15, kind: input, shape index: {}]   ;;  %s18282_s16 = inlined_call_operand.vmem [shape: f32[1,32], index: 16, kind: input, shape index: {}]   ;;  %s18283_s17 = inlined_call_operand.vmem [shape: f32[32,32], index: 17, kind: input, shape index: {}]   ;;  %s18284_s18 = inlined_call_operand.vmem [shape: f32[1,32], index: 18, kind: input, shape index: {}]   ;;  %s18285_s19 = inlined_call_operand.vmem [shape: f32[32,4], index: 19, kind: input, shape index: {}]   ;;  %s18286_s20 = inlined_call_operand.vmem [shape: f32[1,4], index: 20, kind: input, shape index: {}]   ;;  %s18287_s21 = inlined_call_operand.vmem [shape: f32[32,32], index: 21, kind: input, shape index: {}]   ;;  %s18288_s22 = inlined_call_operand.vmem [shape: f32[1,32], index: 22, kind: input, shape index: {}]   ;;  %s18289_s23 = inlined_call_operand.vmem [shape: f32[1,8], index: 23, kind: input, shape index: {}]   ;;  %s18290_s24 = inlined_call_operand.vmem [shape: f32[1,8], index: 24, kind: input, shape index: {}]   ;;  %s18291_s25 = inlined_call_operand.vmem [shape: f32[32,64], index: 25, kind: input, shape index: {}]   ;;  %s18292_s26 = inlined_call_operand.vmem [shape: f32[1,64], index: 26, kind: input, shape index: {}]   ;;  %s18293_s27 = inlined_call_operand.vmem [shape: f32[4,4,1024], index: 27, kind: output, shape index: {0}]   ;;  %s18294_s28 = inlined_call_operand.vmem [shape: f32[4,1,4], index: 28, kind: output, shape index: {1}]  }
   0x1   :  { %18379 = sst [smem:[#allocation40_spill]] %s18266_s0 }
   0x2   :  { %18380 = sst [smem:[#allocation41_spill]] %s18267_s1 }
   0x3   :  { %18381 = sst [smem:[#allocation42_spill]] %s18268_s2 }
   0x4   :  { %18382 = sst [smem:[#allocation43_spill]] %s18269_s3 }
   0x5   :  { %18383 = sst [smem:[#allocation44_spill]] %s18270_s4 }
   0x6   :  { %18384 = sst [smem:[#allocation45_spill]] %s18271_s5 }
   0x7   :  { %18385 = sst [smem:[#allocation46_spill]] %s18272_s6 }
   0x8   :  { %18386 = sst [smem:[#allocation47_spill]] %s18273_s7 }
   0x9   :  { %18387 = sst [smem:[#allocation48_spill]] %s18274_s8  ;;  %s14252_s8 = smov 0  }
   0xa   :  { %18388 = sst [smem:[#allocation49_spill]] %s18275_s9 }
   0xb   :  { %18389 = sst [smem:[#allocation50_spill]] %s18276_s10 }
   0xc   :  { %18390 = sst [smem:[#allocation51_spill]] %s18277_s11 }
   0xd   :  { %18391 = sst [smem:[#allocation52_spill]] %s18278_s12 }
   0xe LB: > { %18392 = sst [smem:[#allocation2_spill]] %s14081_s8  ;;  %s10032_s5 = sadd.s32 4294967295, %s14081_s8   ;;  %s14081_s8 = sphi %s14252_s8, %s39_s8  }
   0xf   : > { %p10036_p0 = scmp.ge.s32.totalorder %s14081_s8, 1  ;;  %p778_p1 = scmp.lt.s32.totalorder %s14081_s8, 3 }
  0x11   : > { %p779_p2 = pnand %p10036_p0, %p778_p1 }
  0x13   : > { %782 = sbr.rel (%p779_p2) target bundleno = 7047 (0x1b87), region = 128 }
  0x1a   : > { %s18393_s3 = sld [smem:[#allocation43_spill]]  ;;  %s10037_s29 = sshll.u32 %s10032_s5, 1  ;;  %vm943_vm0 = vcmask 261120   ;;  %v18313_v27 = vmov 0.0|0.0   ;;  %vm14084_vm1 = vmmov 0   ;;  %vm1683_vm3 = vcmask 522240  }
  0x1b   : > { %p864_p3 = scmp.lt.s32.totalorder %s10037_s29, 3  ;;  %s18394_s7 = sld [smem:[#allocation42_spill]]  ;;  %vm14483_vm2 = vmpackc.low %vm943_vm0, %vm943_vm0  ;;  %vm1695_vm4 = vcmask 523264   ;;  %vm2367_vm5 = vcmask 1046528   ;;  %vm2254_vm6 = vcmask 56320   ;;  %vm2498_vm7 = vcmask 785408  }
  0x1c   : > { %s18395_s30 = sld [smem:[#allocation41_spill]]  ;;  %s18396_s10 = sld [smem:[#allocation40_spill]]  ;;  %vm3433_vm8 = vcmask 1040384   ;;  %vm3999_vm9 = vcmask 24576   ;;  %vm4206_vm10 = vcmask 64512   ;;  %vm6144_vm11 = vcmask 130048  }
  0x1d   : > { %s18527_s29 = smov (!%p864_p3, %s10037_s29), 3  ;;  %s18397_s1 = sld [smem:[#allocation44_spill]]  ;;  %vm6161_vm12 = vcmask 195584   ;;  %vm6544_vm13 = vcmask 31744   ;;  %vm6540_vm15 = vcmask 1041408  }
  0x1e   : > { %s10532_s0 = sshll.u32 %s18527_s29, 6  ;;  %s10038_s9 = sshll.u32 %s18527_s29, 3  ;;  %vm16631_vm14 = vmpackc.low %vm6544_vm13, %vm6544_vm13 }
  0x1f   : > { %s18305_s8 = smov 64   ;;  %s18408_s4 = sld [smem:[#allocation50_spill]] }
  0x20   : > { %v10046_v0 = vld [vmem:[%s18393_s3 + $0x20] sm:$0xff]  ;;  %v10047_v1 = vld [vmem:[%s18393_s3 + $0x28] sm:$0xff]  ;;  %v10048_v5 = vld [vmem:[%s18393_s3 + $0x30] sm:$0xff]  ;;  %s14090_s12 = smov 8   ;;  %s886_s5 = scalar_lea.vmem %s18294_s28, %s18527_s29 }
  0x21   : > { %v10068_v2 = vld [vmem:[%s18393_s3 + $0x40] sm:$0xff]  ;;  %v12282_v3 = vpack.c.bf16 %v10047_v1, %v10046_v0  ;;  %v10069_v4 = vld [vmem:[%s18393_s3 + $0x48] sm:$0xff]  ;;  %v10049_v6 = vld [vmem:[%s18393_s3 + $0x38] sm:$0xff]  ;;  %v18311_v1 = vmov 0.0   ;;  %s18367_s2 = smov 104  }
  0x22   : > { %v12290_v7 = vpack.c.bf16 %v10069_v4, %v10068_v2  ;;  %v12286_v8 = vpack.c.bf16 %v10049_v6, %v10048_v5  ;;  %v10070_v9 = vld [vmem:[%s18393_s3 + $0x50] sm:$0xff]  ;;  %v10071_v10 = vld [vmem:[%s18393_s3 + $0x58] sm:$0xff]  ;;  %v906_v12 = vld [vmem:[%s18394_s7] sm:$0xff]  ;;  %s14298_s6 = scalar_lea.vmem %s18395_s30, %s10532_s0  ;;  %s14429_s11 = scalar_lea.vmem %s18396_s10, %s10038_s9 }
  0x23   : > { %12283 = vmatprep.subr.bf16.mxu0 %v12282_v3  ;;  %v12294_v11 = vpack.c.bf16 %v10071_v10, %v10070_v9  ;;  %v14293_v13 = vld [vmem:[%s18394_s7 + $0x8] sm:$0xff]  ;;  %v1501_v14 = vld [vmem:[%s18393_s3] sm:$0xff]  ;;  %v14309_v16 = vld [vmem:[%s18394_s7 + $0x10] sm:$0xff]  ;;  %s18400_s0 = sld [smem:[#allocation45_spill]]  ;;  %s18401_s9 = sld [smem:[#allocation47_spill]] }
  0x24   : > { %12285 = vmatpush3.bf16.msra.mxu0 %v12282_v3  ;;  %12291 = vmatprep.subr.bf16.mxu1 %v12290_v7  ;;  %v1502_v15 = vld [vmem:[%s18393_s3 + $0x8] sm:$0xff]  ;;  %v890_v17 = vld [vmem:[%s14298_s6] sm:$0xff]  ;;  %v892_v21 = vld [vmem:[%s14298_s6 + $0x10] sm:$0xff]  ;;  %s18402_s10 = sld [smem:[#allocation46_spill]]  ;;  %s18405_s30 = sld [smem:[#allocation49_spill]] }
  0x25   : > { %12293 = vmatpush3.bf16.msra.mxu1 %v12290_v7  ;;  %12287 = vmatprep.subr.bf16.mxu0 %v12286_v8  ;;  %v891_v18 = vld [vmem:[%s14298_s6 + $0x8] sm:$0xff]  ;;  %v14313_v19 = vadd.f32 %v906_v12, %v890_v17  ;;  %v893_v22 = vld [vmem:[%s14298_s6 + $0x18] sm:$0xff]  ;;  %v14324_v24 = vpack.c.bf16 %v1502_v15, %v1501_v14  ;;  %v14327_v25 = vadd.f32 %v14309_v16, %v892_v21  ;;  %v910_v26 = vld [vmem:[%s18394_s7 + $0x20] sm:$0xff] }
  0x26   : > { %12295 = vmatprep.subr.bf16.mxu1 %v12294_v11  ;;  %v14316_v20 = vadd.f32 %v14293_v13, %v891_v18  ;;  %11158 = vmatprep.mubr.msk.f32.mxu1 %vm943_vm0, %v890_v17  ;;  %v909_v23 = vld [vmem:[%s18394_s7 + $0x18] sm:$0xff]  ;;  %v1503_v28 = vld [vmem:[%s18393_s3 + $0x10] sm:$0xff]  ;;  %v10090_v30 = vld [vmem:[%s18393_s3 + $0x60] sm:$0xff] }
  0x27   : > { %11126 = vmatprep.mubr.msk.f32.mxu0 %vm943_vm0, %v14313_v19  ;;  %v1504_v29 = vld [vmem:[%s18393_s3 + $0x18] sm:$0xff]  ;;  %v14346_v31 = vadd.f32 %v909_v23, %v893_v22  ;;  %v894_v32 = vld [vmem:[%s14298_s6 + $0x20] sm:$0xff]  ;;  %v911_v34 = vld [vmem:[%s18394_s7 + $0x28] sm:$0xff] }
  0x28   : > { %12289 = vmatpush3.bf16.msra.mxu0 %v12286_v8  ;;  %v14352_v33 = vadd.f32 %v910_v26, %v894_v32  ;;  %v10091_v35 = vld [vmem:[%s18393_s3 + $0x68] sm:$0xff]  ;;  %v912_v36 = vld [vmem:[%s18394_s7 + $0x30] sm:$0xff]  ;;  %v14365_v37 = vpack.c.bf16 %v1504_v29, %v1503_v28  ;;  %v10093_v40 = vld [vmem:[%s18393_s3 + $0x78] sm:$0xff] }
  0x29   : > { %12297 = vmatpush3.bf16.msra.mxu1 %v12294_v11  ;;  %v12298_v38 = vpack.c.bf16 %v10091_v35, %v10090_v30  ;;  %v10092_v39 = vld [vmem:[%s18393_s3 + $0x70] sm:$0xff]  ;;  %v895_v41 = vld [vmem:[%s14298_s6 + $0x28] sm:$0xff]  ;;  %v913_v46 = vld [vmem:[%s18394_s7 + $0x38] sm:$0xff]  ;;  %s14088_s7 = smov 32  }
  0x2a   : > { %12306 = vmatprep.subr.bf16.mxu1 %v18313_v27  ;;  %v14377_v42 = vadd.f32 %v911_v34, %v895_v41  ;;  %v896_v43 = vld [vmem:[%s14298_s6 + $0x30] sm:$0xff]  ;;  %v12302_v44 = vpack.c.bf16 %v10093_v40, %v10092_v39  ;;  %v897_v47 = vld [vmem:[%s14298_s6 + $0x38] sm:$0xff]  ;;  %v898_v48 = vld [vmem:[%s14298_s6 + $0x40] sm:$0xff] }
  0x2b   : > { %11127 = vmatmul.mubr.msk.f32.vlgmr.msra.gmra.mrb[0].mxu0 %vm943_vm0, %v14316_v20  ;;  %12299 = vmatprep.subr.bf16.mxu0 %v12298_v38  ;;  %v14381_v45 = vadd.f32 %v912_v36, %v896_v43  ;;  %v921_v49 = vadd.f32 %v913_v46, %v897_v47  ;;  %v922_v50 = vadd.f32 %v906_v12, %v898_v48  ;;  %v899_v51 = vld [vmem:[%s14298_s6 + $0x48] sm:$0xff]  ;;  %v900_v53 = vld [vmem:[%s14298_s6 + $0x50] sm:$0xff]  ;;  %v901_v55 = vld [vmem:[%s14298_s6 + $0x58] sm:$0xff] }
  0x2c   : > { %11159 = vmatmul.mubr.msk.f32.vlgmr.msra.gmra.mrb[0].mxu1 %vm943_vm0, %v891_v18  ;;  %11129 = vmatprep.mubr.msk.f32.mxu0 %vm943_vm0, %v14327_v25  ;;  %v923_v52 = vadd.f32 %v14293_v13, %v899_v51  ;;  %v924_v54 = vadd.f32 %v14309_v16, %v900_v53  ;;  %v925_v56 = vadd.f32 %v909_v23, %v901_v55  ;;  %v902_v57 = vld [vmem:[%s14298_s6 + $0x60] sm:$0xff]  ;;  %v903_v59 = vld [vmem:[%s14298_s6 + $0x68] sm:$0xff]  ;;  %v904_v61 = vld [vmem:[%s14298_s6 + $0x70] sm:$0xff] }
  0x2d   : > { %12308 = vmatpush3.bf16.msra.mxu1 %v14324_v24  ;;  %11161 = vmatprep.mubr.msk.f32.mxu1 %vm943_vm0, %v892_v21  ;;  %v926_v58 = vadd.f32 %v910_v26, %v902_v57  ;;  %v927_v60 = vadd.f32 %v911_v34, %v903_v59  ;;  %v928_v62 = vadd.f32 %v912_v36, %v904_v61  ;;  %v905_v63 = vld [vmem:[%s14298_s6 + $0x78] sm:$0xff]  ;;  %v14438_v2 = vld [vmem:[%s14429_s11] sm:$0x7f] }
  0x2e   : > { %12309 = vmatprep.subr.bf16.mxu1 %v18313_v27  ;;  %12301 = vmatpush3.bf16.msra.mxu0 %v12298_v38  ;;  %v929_v0 = vadd.f32 %v913_v46, %v905_v63  ;;  %v14470_v3 = vld [vmem:[%s18397_s1 + $0x1] ss:$0 sm:$0xff]  ;;  %v14475_v4 = vld [vmem:[%s18397_s1 + $0x2] ss:$0 sm:$0xff] }
  0x2f   : > { %11130 = vmatmul.mubr.msk.f32.gmra.mrb[2].mxu0 %vm943_vm0, %v14346_v31  ;;  %12303 = vmatprep.subr.bf16.mxu0 %v12302_v44 }
  0x30   : > { %11162 = vmatmul.mubr.msk.f32.gmra.mrb[2].mxu1 %vm943_vm0, %v893_v22  ;;  %11132 = vmatprep.mubr.msk.f32.mxu0 %vm943_vm0, %v14352_v33 }
  0x31   : > { %11164 = vmatprep.mubr.msk.f32.mxu1 %vm943_vm0, %v894_v32  ;;  %12311 = vmatpush3.bf16.msra.mxu1 %v14365_v37 }
  0x32   : > { %12328 = vmatprep.subr.bf16.mxu1 %v18313_v27  ;;  %12305 = vmatpush3.bf16.msra.mxu0 %v12302_v44 }
  0x33   : > { %11133 = vmatmul.mubr.msk.f32.gmra.mrb[4].mxu0 %vm943_vm0, %v14377_v42  ;;  %12312 = vmatprep.subr.bf16.mxu0 %v18313_v27 }
  0x34   : > { %11165 = vmatmul.mubr.msk.f32.gmra.mrb[4].mxu1 %vm943_vm0, %v895_v41  ;;  %11135 = vmatprep.mubr.msk.f32.mxu0 %vm943_vm0, %v14381_v45 }
  0x35   : > { %11167 = vmatprep.mubr.msk.f32.mxu1 %vm943_vm0, %v896_v43 }
  0x37   : > { %11136 = vmatmul.mubr.msk.f32.gmra.mrb[6].mxu0 %vm943_vm0, %v921_v49 }
  0x38   : > { %11168 = vmatmul.mubr.msk.f32.gmra.mrb[6].mxu1 %vm943_vm0, %v897_v47  ;;  %11138 = vmatprep.mubr.msk.f32.mxu0 %vm943_vm0, %v922_v50 }
  0x39   : > { %11170 = vmatprep.mubr.msk.f32.mxu1 %vm943_vm0, %v898_v48 }
  0x3b   : > { %11139 = vmatmul.mubr.msk.f32.gmra.mrb[8].mxu0 %vm943_vm0, %v923_v52 }
  0x3c   : > { %11171 = vmatmul.mubr.msk.f32.gmra.mrb[8].mxu1 %vm943_vm0, %v899_v51  ;;  %11141 = vmatprep.mubr.msk.f32.mxu0 %vm943_vm0, %v924_v54 }
  0x3d   : > { %11173 = vmatprep.mubr.msk.f32.mxu1 %vm943_vm0, %v900_v53 }
  0x3f   : > { %11142 = vmatmul.mubr.msk.f32.gmra.mrb[10].mxu0 %vm943_vm0, %v925_v56 }
  0x40   : > { %11174 = vmatmul.mubr.msk.f32.gmra.mrb[10].mxu1 %vm943_vm0, %v901_v55  ;;  %11144 = vmatprep.mubr.msk.f32.mxu0 %vm943_vm0, %v926_v58 }
  0x41   : > { %11176 = vmatprep.mubr.msk.f32.mxu1 %vm943_vm0, %v902_v57 }
  0x43   : > { %11145 = vmatmul.mubr.msk.f32.gmra.mrb[12].mxu0 %vm943_vm0, %v927_v60 }
  0x44   : > { %11177 = vmatmul.mubr.msk.f32.gmra.mrb[12].mxu1 %vm943_vm0, %v903_v59  ;;  %11147 = vmatprep.mubr.msk.f32.mxu0 %vm943_vm0, %v928_v62 }
  0x45   : > { %11179 = vmatprep.mubr.msk.f32.mxu1 %vm943_vm0, %v904_v61 }
  0x47   : > { %11148 = vmatmul.mubr.msk.f32.gmra.mrb[14].mxu0 %vm943_vm0, %v929_v0 }
  0x48   : > { %11180 = vmatmul.mubr.msk.f32.gmra.mrb[14].mxu1 %vm943_vm0, %v905_v63  ;;  %11190 = vmatprep.mubr.msk.f32.mxu0 %vm943_vm0, %v14313_v19 }
  0x49   : > { %11222 = vmatprep.mubr.msk.f32.mxu1 %vm14084_vm1, %v18311_v1 }
  0x4b   : > { %11191 = vmatmul.mubr.msk.f32.vlgmr.msra.gmra.mrb[16].mxu0 %vm943_vm0, %v14316_v20 }
  0x4c   : > { %11223 = vmatmul.mubr.msk.f32.vlgmr.msra.gmra.mrb[16].mxu1 %vm943_vm0, %v14438_v2  ;;  %11193 = vmatprep.mubr.msk.f32.mxu0 %vm943_vm0, %v14327_v25 }
  0x4d   : > { %11260 = vmatprep.mubr.msk.f32.mxu1 %vm14084_vm1, %v18311_v1 }
  0x4f   : > { %11194 = vmatmul.mubr.msk.f32.gmra.mrb[18].mxu0 %vm943_vm0, %v14346_v31 }
  0x50   : > { %11196 = vmatprep.mubr.msk.f32.mxu0 %vm943_vm0, %v14352_v33 }
  0x53   : > { %11197 = vmatmul.mubr.msk.f32.gmra.mrb[20].mxu0 %vm943_vm0, %v14377_v42 }
  0x54   : > { %11199 = vmatprep.mubr.msk.f32.mxu0 %vm943_vm0, %v14381_v45 }
  0x57   : > { %11200 = vmatmul.mubr.msk.f32.gmra.mrb[22].mxu0 %vm943_vm0, %v921_v49 }
  0x58   : > { %11202 = vmatprep.mubr.msk.f32.mxu0 %vm943_vm0, %v922_v50 }
  0x5b   : > { %11203 = vmatmul.mubr.msk.f32.gmra.mrb[24].mxu0 %vm943_vm0, %v923_v52 }
  0x5c   : > { %11205 = vmatprep.mubr.msk.f32.mxu0 %vm943_vm0, %v924_v54 }
  0x5f   : > { %11206 = vmatmul.mubr.msk.f32.gmra.mrb[26].mxu0 %vm943_vm0, %v925_v56 }
  0x60   : > { %11208 = vmatprep.mubr.msk.f32.mxu0 %vm943_vm0, %v926_v58 }
  0x63   : > { %11209 = vmatmul.mubr.msk.f32.gmra.mrb[28].mxu0 %vm943_vm0, %v927_v60 }
  0x64   : > { %11211 = vmatprep.mubr.msk.f32.mxu0 %vm943_vm0, %v928_v62 }
  0x67   : > { %11212 = vmatmul.mubr.msk.f32.gmra.mrb[30].mxu0 %vm943_vm0, %v929_v0 }
  0x68   : > { %11241 = vmatprep.mubr.msk.f32.mxu0 %vm14084_vm1, %v18311_v1 }
  0xfe   : > { %v11128_v5 = vpop.f32.mrb[0].mxu0 }
  0xff   : > { %v1064_v6 = vadd.f32 %v11128_v5, %v14470_v3  ;;  %v1058_v7 = vpop.f32.mrb[1].mxu0  ;;  %v11160_v8 = vpop.f32.mrb[0].mxu1 }
 0x100   : > { %v1059_v9 = vadd.f32 %v14470_v3, %v1058_v7  ;;  %v1270_v10 = vadd.f32 %v11160_v8, %v14475_v4  ;;  %v1264_v11 = vpop.f32.mrb[1].mxu1 }
 0x101   : > { %v1265_v12 = vadd.f32 %v14475_v4, %v1264_v11 }
 0x102   : > { %v12313_v14 = vpack.c.bf16 %v1064_v6, %v1059_v9  ;;  %v11131_v15 = vpop.f32.mrb[2].mxu0 }
 0x103   : > { %v12329_v16 = vpack.c.bf16 %v1270_v10, %v1265_v12  ;;  %v11163_v17 = vpop.f32.mrb[2].mxu1  ;;  %v1074_v18 = vadd.f32 %v11131_v15, %v14470_v3  ;;  %v1068_v19 = vpop.f32.mrb[3].mxu0 }
 0x104   : > { %v1280_v20 = vadd.f32 %v11163_v17, %v14475_v4  ;;  %v1274_v21 = vpop.f32.mrb[3].mxu1  ;;  %12315 = vmatpush3.bf16.xpose.msk.msra.mxu0 %vm14483_vm2, %v12313_v14  ;;  %v1069_v22 = vadd.f32 %v14470_v3, %v1068_v19 }
 0x105   : > { %v1275_v23 = vadd.f32 %v14475_v4, %v1274_v21  ;;  %12330 = vmatpush3.bf16.msra.mxu1 %v12329_v16  ;;  %12316 = vmatprep.subr.bf16.mxu0 %v18313_v27 }
 0x106   : > { %v12317_v25 = vpack.c.bf16 %v1074_v18, %v1069_v22  ;;  %12331 = vmatprep.subr.bf16.mxu1 %v18313_v27  ;;  %v11134_v26 = vpop.f32.mrb[4].mxu0 }
 0x107   : > { %v12332_v28 = vpack.c.bf16 %v1280_v20, %v1275_v23  ;;  %v11166_v29 = vpop.f32.mrb[4].mxu1  ;;  %v1084_v30 = vadd.f32 %v11134_v26, %v14470_v3  ;;  %v1078_v31 = vpop.f32.mrb[5].mxu0 }
 0x108   : > { %v1290_v32 = vadd.f32 %v11166_v29, %v14475_v4  ;;  %v1284_v33 = vpop.f32.mrb[5].mxu1  ;;  %v1079_v34 = vadd.f32 %v14470_v3, %v1078_v31  ;;  %v14574_v29 = vld [vmem:[%s18397_s1 + $0x3] ss:$0 sm:$0xff]  ;;  %v14582_v31 = vld [vmem:[%s18397_s1] ss:$0 sm:$0xff] }
 0x109   : > { %v1285_v35 = vadd.f32 %v14475_v4, %v1284_v33  ;;  %12333 = vmatpush3.bf16.msra.mxu1 %v12332_v28 }
 0x10a   : > { %12334 = vmatprep.subr.bf16.mxu1 %v18313_v27  ;;  %v12321_v36 = vpack.c.bf16 %v1084_v30, %v1079_v34  ;;  %v11137_v38 = vpop.f32.mrb[6].mxu0 }
 0x10b   : > { %v12335_v39 = vpack.c.bf16 %v1290_v32, %v1285_v35  ;;  %v11169_v40 = vpop.f32.mrb[6].mxu1  ;;  %v1094_v41 = vadd.f32 %v11137_v38, %v14470_v3  ;;  %v1088_v42 = vpop.f32.mrb[7].mxu0  ;;  %v10138_v32 = vld [vmem:[%s18393_s3 + $0xb8] sm:$0xff] }
 0x10c   : > { %v1300_v43 = vadd.f32 %v11169_v40, %v14475_v4  ;;  %v1294_v44 = vpop.f32.mrb[7].mxu1  ;;  %12319 = vmatpush3.bf16.xpose.msk.msra.mxu0 %vm14483_vm2, %v12317_v25  ;;  %v1089_v45 = vadd.f32 %v14470_v3, %v1088_v42 }
 0x10d   : > { %v1295_v46 = vadd.f32 %v14475_v4, %v1294_v44  ;;  %12336 = vmatpush3.bf16.msra.mxu1 %v12335_v39  ;;  %12320 = vmatprep.subr.bf16.mxu0 %v18313_v27 }
 0x10e   : > { %12337 = vmatprep.subr.bf16.mxu1 %v18313_v27  ;;  %v12325_v47 = vpack.c.bf16 %v1094_v41, %v1089_v45  ;;  %v11140_v48 = vpop.f32.mrb[8].mxu0 }
 0x10f   : > { %v12338_v49 = vpack.c.bf16 %v1300_v43, %v1295_v46  ;;  %v11172_v50 = vpop.f32.mrb[8].mxu1  ;;  %v14509_v51 = vadd.f32 %v11140_v48, %v14470_v3  ;;  %v1098_v52 = vpop.f32.mrb[9].mxu0 }
 0x110   : > { %v14512_v53 = vadd.f32 %v11172_v50, %v14475_v4  ;;  %v1304_v54 = vpop.f32.mrb[9].mxu1  ;;  %v14515_v55 = vadd.f32 %v14470_v3, %v1098_v52 }
 0x111   : > { %v14518_v56 = vadd.f32 %v14475_v4, %v1304_v54  ;;  %12339 = vmatpush3.bf16.msra.mxu1 %v12338_v49 }
 0x112   : > { %v12377_v57 = vpack.c.bf16 %v14509_v51, %v14515_v55  ;;  %v11143_v58 = vpop.f32.mrb[10].mxu0  ;;  %12340 = vmatprep.subr.bf16.mxu1 %v18313_v27 }
 0x113   : > { %v12393_v59 = vpack.c.bf16 %v14512_v53, %v14518_v56  ;;  %v11175_v60 = vpop.f32.mrb[10].mxu1  ;;  %v14526_v61 = vadd.f32 %v11143_v58, %v14470_v3  ;;  %v1108_v62 = vpop.f32.mrb[11].mxu0 }
 0x114   : > { %v14529_v63 = vadd.f32 %v11175_v60, %v14475_v4  ;;  %v1314_v0 = vpop.f32.mrb[11].mxu1  ;;  %12323 = vmatpush3.bf16.xpose.msk.msra.mxu0 %vm14483_vm2, %v12321_v36  ;;  %v14534_v5 = vadd.f32 %v14470_v3, %v1108_v62 }
 0x115   : > { %v14537_v6 = vadd.f32 %v14475_v4, %v1314_v0  ;;  %12324 = vmatprep.subr.bf16.mxu0 %v18313_v27 }
 0x116   : > { %v12381_v7 = vpack.c.bf16 %v14526_v61, %v14534_v5  ;;  %v11146_v8 = vpop.f32.mrb[12].mxu0 }
 0x117   : > { %v12396_v9 = vpack.c.bf16 %v14529_v63, %v14537_v6  ;;  %v11178_v10 = vpop.f32.mrb[12].mxu1  ;;  %v14545_v11 = vadd.f32 %v11146_v8, %v14470_v3  ;;  %v1118_v12 = vpop.f32.mrb[13].mxu0 }
 0x118   : > { %v14548_v14 = vadd.f32 %v11178_v10, %v14475_v4  ;;  %v1324_v15 = vpop.f32.mrb[13].mxu1  ;;  %v14551_v16 = vadd.f32 %v14470_v3, %v1118_v12 }
 0x119   : > { %v14554_v17 = vadd.f32 %v14475_v4, %v1324_v15 }
 0x11a   : > { %v12385_v18 = vpack.c.bf16 %v14545_v11, %v14551_v16  ;;  %v11149_v19 = vpop.f32.mrb[14].mxu0 }
 0x11b   : > { %v12399_v20 = vpack.c.bf16 %v14548_v14, %v14554_v17  ;;  %v11181_v21 = vpop.f32.mrb[14].mxu1  ;;  %v14561_v22 = vadd.f32 %v11149_v19, %v14470_v3  ;;  %v1128_v23 = vpop.f32.mrb[15].mxu0 }
 0x11c   : > { %v14564_v25 = vadd.f32 %v11181_v21, %v14475_v4  ;;  %v1334_v26 = vpop.f32.mrb[15].mxu1  ;;  %12327 = vmatpush3.bf16.xpose.msk.msra.mxu0 %vm14483_vm2, %v12325_v47  ;;  %v14569_v28 = vadd.f32 %v14470_v3, %v1128_v23 }
 0x11d   : > { %v14577_v30 = vadd.f32 %v14475_v4, %v1334_v26  ;;  %12358 = vmatprep.subr.bf16.mxu0 %v18313_v27 }
 0x11e   : > { %v11192_v3 = vpop.f32.mrb[16].mxu0 }
 0x11f   : > { %v12402_v33 = vpack.c.bf16 %v14564_v25, %v14577_v30  ;;  %v1581_v34 = vpop.f32.mrb[16].mxu1  ;;  %v14590_v35 = vadd.f32 %v11192_v3, %v14574_v29  ;;  %v14592_v4 = vpop.f32.mrb[17].mxu0 }
 0x120   : > { %v1582_v36 = vadd.f32 %v14582_v31, %v1581_v34  ;;  %v11224_v38 = vpop.f32.mrb[17].mxu1 }
 0x122   : > { %v11195_v39 = vpop.f32.mrb[18].mxu0 }
 0x123   : > { %11242 = vmatmul.mubr.msk.f32.vlgmr.msra.gmra.mrb[32].mxu0 %vm943_vm0, %v1582_v36  ;;  %v14597_v40 = vadd.f32 %v11195_v39, %v14574_v29  ;;  %v1432_v41 = vpop.f32.mrb[19].mxu0 }
 0x124   : > { %v14600_v42 = vadd.f32 %v14574_v29, %v1432_v41  ;;  %11301 = vmatprep.mubr.msk.f32.mxu0 %vm14084_vm1, %v18311_v1 }
 0x126   : > { %v11198_v43 = vpop.f32.mrb[20].mxu0 }
 0x127   : > { %v14605_v44 = vadd.f32 %v11198_v43, %v14574_v29  ;;  %v1442_v45 = vpop.f32.mrb[21].mxu0 }
 0x128   : > { %v14608_v46 = vadd.f32 %v14574_v29, %v1442_v45 }
 0x12a   : > { %v11201_v47 = vpop.f32.mrb[22].mxu0 }
 0x12b   : > { %v14611_v48 = vadd.f32 %v11201_v47, %v14574_v29  ;;  %v1452_v49 = vpop.f32.mrb[23].mxu0 }
 0x12c   : > { %v14614_v50 = vadd.f32 %v14574_v29, %v1452_v49 }
 0x12e   : > { %v11204_v52 = vpop.f32.mrb[24].mxu0 }
 0x12f   : > { %v14617_v54 = vadd.f32 %v11204_v52, %v14574_v29  ;;  %v1462_v58 = vpop.f32.mrb[25].mxu0 }
 0x130   : > { %v14620_v60 = vadd.f32 %v14574_v29, %v1462_v58 }
 0x132   : > { %v11207_v62 = vpop.f32.mrb[26].mxu0 }
 0x133   : > { %v14623_v0 = vadd.f32 %v11207_v62, %v14574_v29  ;;  %v1472_v8 = vpop.f32.mrb[27].mxu0  ;;  %v1770_v62 = vld [vmem:[%s18400_s0] sm:$0xff] }
 0x134   : > { %v14626_v10 = vadd.f32 %v14574_v29, %v1472_v8  ;;  %v1771_v8 = vld [vmem:[%s18400_s0 + $0x8] sm:$0xff] }
 0x136   : > { %v11210_v12 = vpop.f32.mrb[28].mxu0 }
 0x137   : > { %v14629_v15 = vadd.f32 %v11210_v12, %v14574_v29  ;;  %v1482_v19 = vpop.f32.mrb[29].mxu0 }
 0x138   : > { %v14632_v21 = vadd.f32 %v14574_v29, %v1482_v19  ;;  %v14648_v19 = vpack.c.bf16 %v1771_v8, %v1770_v62  ;;  %v1860_v8 = vld [vmem:[%s18401_s9 + $0x28] sm:$0xff] }
 0x13a   : > { %v11213_v23 = vpop.f32.mrb[30].mxu0 }
 0x13b   : > { %v14635_v26 = vadd.f32 %v11213_v23, %v14574_v29  ;;  %v1492_v3 = vpop.f32.mrb[31].mxu0 }
 0x13c   : > { %v14638_v34 = vadd.f32 %v14574_v29, %v1492_v3  ;;  %v1772_v3 = vld [vmem:[%s18400_s0 + $0x10] sm:$0xff] }
 0x1f6   : > { %v1678_v36 = vpop.f32.mrb[32].mxu0 }
 0x1f7   : > { %v1682_v38 = vmul.f32 0.17677669, %v1678_v36  ;;  %v11243_v39 = vpop.f32.mrb[33].mxu0  ;;  %v1773_v36 = vld [vmem:[%s18400_s0 + $0x18] sm:$0xff]  ;;  %s18403_s0 = sld [smem:[#allocation48_spill]] }
 0x1f8   : > { %v1855_v39 = vld [vmem:[%s18401_s9] sm:$0xff] }
 0x1f9   : > { %v1684_v41 = vsel %vm1683_vm3, %v1682_v38, -inf }
 0x1fa   : > { %1685 = vmax.xlane.f32.xlu0 %v1684_v41  ;;  %v1856_v41 = vld [vmem:[%s18401_s9 + $0x8] sm:$0xff] }
 0x287   : > { %v1686_v43 = vpop.xlane.xlu0 %1685 }
 0x288   : > { %v1687_v45 = vsub.f32 %v1682_v38, %v1686_v43  ;;  %v14661_v38 = vpack.c.bf16 %v1773_v36, %v1772_v3  ;;  %v1862_v3 = vld [vmem:[%s18401_s9 + $0x38] sm:$0xff] }
 0x28a   : > { %v1688_v47 = vmul.f32 1.442695, %v1687_v45  ;;  %v14671_v45 = vpack.c.bf16 %v1856_v41, %v1855_v39  ;;  %v10128_v39 = vld [vmem:[%s18393_s3 + $0x80] sm:$0xff]  ;;  %v10129_v41 = vld [vmem:[%s18393_s3 + $0x88] sm:$0xff] }
 0x28c   : > { %13694 = vpow2.f32 %v1688_v47 }
 0x296   : > { %v13695_v49 = vpop.eup %13694 }
 0x297   : > { %v1690_v52 = vsel %vm1683_vm3, %v13695_v49, 0.0 }
 0x298   : > { %1691 = vadd.xlane.f32.xlu0 %v1690_v52  ;;  %v1857_v52 = vld [vmem:[%s18401_s9 + $0x10] sm:$0xff] }
 0x325   : > { %v1692_v58 = vpop.xlane.xlu0 %1691 }
 0x326   : > { %13696 = vrcp.f32 %v1692_v58  ;;  %v1858_v58 = vld [vmem:[%s18401_s9 + $0x18] sm:$0xff] }
 0x327   : > { %v14682_v62 = vpack.c.bf16 %v1858_v58, %v1857_v52 }
 0x330   : > { %v13697_v12 = vpop.eup %13696 }
 0x331   : > { %v1694_v23 = vmul.f32 %v13697_v12, %v13695_v49 }
 0x333   : > { %11261 = vmatmul.mubr.msk.f32.vlgmr.msra.gmra.mrb[18].mxu1 %vm1695_vm4, %v1694_v23  ;;  %v1861_v23 = vld [vmem:[%s18401_s9 + $0x30] sm:$0xff] }
 0x334   : > { %12342 = vmatpush3.bf16.msra.mxu1 %v14648_v19  ;;  %11271 = vmatprep.mubr.msk.f32.mxu1 %vm14084_vm1, %v18311_v1  ;;  %v14705_v36 = vpack.c.bf16 %v1862_v3, %v1861_v23  ;;  %v1423_v23 = vadd.f32 %v14574_v29, %v14592_v4  ;;  %v10130_v3 = vld [vmem:[%s18393_s3 + $0x90] sm:$0xff]  ;;  %v10135_v29 = vld [vmem:[%s18393_s3 + $0xa0] sm:$0xff]  ;;  %v10136_v4 = vld [vmem:[%s18393_s3 + $0xa8] sm:$0xff] }
 0x335   : > { %12343 = vmatprep.subr.bf16.mxu1 %v18313_v27 }
 0x338   : > { %12345 = vmatpush3.bf16.msra.mxu1 %v14661_v38 }
 0x339   : > { %12346 = vmatprep.subr.bf16.mxu1 %v18313_v27 }
 0x406   : > { %v1765_v43 = vpop.f32.mrb[18].mxu1 }
 0x407   : > { %v1769_v47 = vadd.f32 %v1765_v43, %v14438_v2  ;;  %v11262_v49 = vpop.f32.mrb[19].mxu1  ;;  %v1859_v2 = vld [vmem:[%s18401_s9 + $0x20] sm:$0xff]  ;;  %v14714_v43 = vpack.c.bf16 %v10129_v41, %v10128_v39  ;;  %v10131_v39 = vld [vmem:[%s18393_s3 + $0x98] sm:$0xff] }
 0x408   : > { %v14694_v12 = vpack.c.bf16 %v1860_v8, %v1859_v2  ;;  %v14721_v49 = vld [vmem:[%s18402_s10] ss:$0 sm:$0xff]  ;;  %v14734_v41 = vpack.c.bf16 %v10131_v39, %v10130_v3  ;;  %v10137_v39 = vld [vmem:[%s18393_s3 + $0xb0] sm:$0xff]  ;;  %s14093_s3 = smov 120   ;;  %s14098_s10 = smov 108  }
 0x409   : > { %11272 = vmatmul.mubr.msk.f32.vlgmr.msra.gmra.mrb[20].mxu1 %vm943_vm0, %v1769_v47  ;;  %12360 = vmatpush3.bf16.msra.mxu0 %v14714_v43 }
 0x40a   : > { %12348 = vmatpush3.bf16.msra.mxu1 %v14671_v45  ;;  %11290 = vmatprep.mubr.msk.f32.mxu1 %vm14084_vm1, %v18311_v1 }
 0x40b   : > { %12349 = vmatprep.subr.bf16.mxu1 %v18313_v27  ;;  %12361 = vmatprep.subr.bf16.mxu0 %v18313_v27 }
 0x40d   : > { %12363 = vmatpush3.bf16.msra.mxu0 %v14734_v41 }
 0x40e   : > { %12351 = vmatpush3.bf16.msra.mxu1 %v14682_v62  ;;  %12364 = vmatprep.subr.bf16.mxu0 %v18313_v27 }
 0x40f   : > { %12352 = vmatprep.subr.bf16.mxu1 %v18313_v27 }
 0x412   : > { %12354 = vmatpush3.bf16.msra.mxu1 %v14694_v12 }
 0x413   : > { %12355 = vmatprep.subr.bf16.mxu1 %v18313_v27 }
 0x416   : > { %12357 = vmatpush3.bf16.msra.mxu1 %v14705_v36 }
 0x4dc   : > { %v1850_v52 = vpop.f32.mrb[20].mxu1 }
 0x4dd   : > { %v1851_v58 = vadd.f32 %v14721_v49, %v1850_v52  ;;  %v11273_v2 = vpop.f32.mrb[21].mxu1 }
 0x4df   : > { %v1854_v8 = vmax.f32 %v1851_v58, 0.0  ;;  %v14747_v58 = vld [vmem:[%s18403_s0] ss:$0 sm:$0xff] }
 0x4e1   : > { %11291 = vmatmul.mubr.msk.f32.vlgmr.msra.gmra.mrb[22].mxu1 %vm1695_vm4, %v1854_v8 }
 0x4e2   : > { %11317 = vmatprep.mubr.msk.f32.mxu1 %vm943_vm0, %v1423_v23  ;;  %v14749_v23 = vpack.c.bf16 %v10136_v4, %v10135_v29  ;;  %v14774_v29 = vld [vmem:[%s18397_s1 + $0x4] ss:$0 sm:$0xff] }
 0x5b4   : > { %v1932_v52 = vpop.f32.mrb[22].mxu1 }
 0x5b5   : > { %v1936_v2 = vadd.f32 %v1932_v52, %v1769_v47  ;;  %v11292_v8 = vpop.f32.mrb[23].mxu1  ;;  %v14763_v47 = vpack.c.bf16 %v10138_v32, %v10137_v39 }
 0x5b7   : > { %v14752_v3 = vadd.f32 %v14747_v58, %v1936_v2  ;;  %v14783_v2 = vld [vmem:[%s18397_s1 + $0x5] ss:$0 sm:$0xff]  ;;  %s18377_s1 = smov 112  }
 0x5b9   : > { %11302 = vmatmul.mubr.msk.f32.vlgmr.msra.gmra.mrb[34].mxu0 %vm943_vm0, %v14752_v3 }
 0x5ba   : > { %12366 = vmatpush3.bf16.msra.mxu0 %v14749_v23  ;;  %11312 = vmatprep.mubr.msk.f32.mxu0 %vm14084_vm1, %v18311_v1 }
 0x5bb   : > { %12367 = vmatprep.subr.bf16.mxu0 %v18313_v27 }
 0x5be   : > { %12369 = vmatpush3.bf16.msra.mxu0 %v14763_v47 }
 0x5c1   : > { %11313 = vmatmul.mubr.msk.f32.vlgmr.msra.gmra.mrb[36].mxu0 %vm943_vm0, %v14752_v3 }
 0x68c   : > { %v2027_v4 = vpop.f32.mrb[34].mxu0 }
 0x68d   : > { %v2028_v52 = vadd.f32 %v14774_v29, %v2027_v4  ;;  %v11303_v32 = vpop.f32.mrb[35].mxu0 }
 0x68f   : > { %11315 = vmatprep.subr.msk.mxu1 %vm943_vm0, %v2028_v52 }
 0x690   : > { %11316 = vmatpush3.xpose.msk.msra.mxu1 %vm943_vm0, %v2028_v52 }
 0x691   : > { %12370 = vmatprep.subr.bf16.mxu1 %v18313_v27 }
 0x693   : > { %11318 = vmatmul.mubr.msk.f32.vlgmr.msra.gmra.mrb[24].mxu1 %vm943_vm0, %v14590_v35 }
 0x694   : > { %v2110_v8 = vpop.f32.mrb[36].mxu0  ;;  %11320 = vmatprep.mubr.msk.f32.mxu1 %vm943_vm0, %v14600_v42  ;;  %12372 = vmatpush3.bf16.msra.mxu1 %v14324_v24  ;;  %v14810_v24 = vld [vmem:[%s14429_s11 + $0x8] sm:$0x7f]  ;;  %s18307_s11 = smov 96  }
 0x695   : > { %v2111_v39 = vadd.f32 %v14783_v2, %v2110_v8  ;;  %v11314_v4 = vpop.f32.mrb[37].mxu0  ;;  %12373 = vmatprep.subr.bf16.mxu1 %v18313_v27 }
 0x697   : > { %11329 = vmatprep.subr.msk.mxu0 %vm2367_vm5, %v2111_v39  ;;  %11321 = vmatmul.mubr.msk.f32.gmra.mrb[26].mxu1 %vm943_vm0, %v14597_v40 }
 0x698   : > { %11330 = vmatpush3.msk.msra.mxu0 %vm2367_vm5, %v2111_v39  ;;  %11323 = vmatprep.mubr.msk.f32.mxu1 %vm943_vm0, %v14608_v46 }
 0x699   : > { %12375 = vmatpush3.bf16.msra.mxu1 %v14365_v37  ;;  %12376 = vmatprep.subr.bf16.mxu0 %v18313_v27 }
 0x69a   : > { %12392 = vmatprep.subr.bf16.mxu1 %v18313_v27 }
 0x69b   : > { %11324 = vmatmul.mubr.msk.f32.gmra.mrb[28].mxu1 %vm943_vm0, %v14605_v44 }
 0x69c   : > { %11326 = vmatprep.mubr.msk.f32.mxu1 %vm943_vm0, %v14614_v50 }
 0x69f   : > { %11327 = vmatmul.mubr.msk.f32.gmra.mrb[30].mxu1 %vm943_vm0, %v14611_v48 }
 0x6a0   : > { %11351 = vmatprep.mubr.msk.f32.mxu1 %vm14084_vm1, %v18311_v1 }
 0x6a3   : > { %11352 = vmatmul.mubr.msk.f32.vlgmr.msra.gmra.mrb[32].mxu1 %vm943_vm0, %v14810_v24 }
 0x6a4   : > { %12394 = vmatpush3.bf16.msra.mxu1 %v12393_v59  ;;  %11389 = vmatprep.mubr.msk.f32.mxu1 %vm14084_vm1, %v18311_v1 }
 0x6a5   : > { %12395 = vmatprep.subr.bf16.mxu1 %v18313_v27 }
 0x6a8   : > { %12397 = vmatpush3.bf16.msra.mxu1 %v12396_v9 }
 0x6a9   : > { %12398 = vmatprep.subr.bf16.mxu1 %v18313_v27 }
 0x6ac   : > { %12400 = vmatpush3.bf16.msra.mxu1 %v12399_v20 }
 0x6ad   : > { %12401 = vmatprep.subr.bf16.mxu1 %v18313_v27 }
 0x6b0   : > { %12403 = vmatpush3.bf16.msra.mxu1 %v12402_v33 }
 0x6b1   : > { %12404 = vmatprep.subr.bf16.mxu1 %v18313_v27 }
 0x766   : > { %v11319_v37 = vpop.f32.mrb[24].mxu1 }
 0x767   : > { %v2207_v53 = vpop.f32.mrb[25].mxu1  ;;  %v2247_v59 = vmul.f32 0.17677669, %v11319_v37 }
 0x768   : > { %v2246_v56 = vmul.f32 0.17677669, %v2207_v53 }
 0x769   : > { %v2258_v35 = vsel %vm2254_vm6, %v2247_v59, -inf }
 0x76a   : > { %v11322_v63 = vpop.f32.mrb[26].mxu1  ;;  %v2255_v6 = vsel %vm2254_vm6, %v2246_v56, -inf }
 0x76b   : > { %2256 = vmax.xlane.f32.xlu1 %v2255_v6  ;;  %v2217_v9 = vpop.f32.mrb[27].mxu1  ;;  %v2249_v17 = vmul.f32 0.17677669, %v11322_v63 }
 0x76c   : > { %v2248_v14 = vmul.f32 0.17677669, %v2217_v9 }
 0x76d   : > { %v2264_v44 = vsel %vm2254_vm6, %v2249_v17, -inf }
 0x76e   : > { %v11325_v20 = vpop.f32.mrb[28].mxu1  ;;  %v2261_v25 = vsel %vm2254_vm6, %v2248_v14, -inf }
 0x76f   : > { %2259 = vmax.xlane.f32.xlu1 %v2258_v35  ;;  %2262 = vmax.xlane.f32.xlu0 %v2261_v25  ;;  %v2227_v30 = vpop.f32.mrb[29].mxu1  ;;  %v2251_v40 = vmul.f32 0.17677669, %v11325_v20 }
 0x770   : > { %v2250_v33 = vmul.f32 0.17677669, %v2227_v30 }
 0x771   : > { %v2270_v32 = vsel %vm2254_vm6, %v2251_v40, -inf }
 0x772   : > { %v11328_v42 = vpop.f32.mrb[30].mxu1  ;;  %v2267_v46 = vsel %vm2254_vm6, %v2250_v33, -inf }
 0x773   : > { %2265 = vmax.xlane.f32.xlu1 %v2264_v44  ;;  %2268 = vmax.xlane.f32.xlu0 %v2267_v46  ;;  %v2237_v48 = vpop.f32.mrb[31].mxu1  ;;  %v2253_v52 = vmul.f32 0.17677669, %v11328_v42 }
 0x774   : > { %v2252_v50 = vmul.f32 0.17677669, %v2237_v48 }
 0x775   : > { %v2276_v39 = vsel %vm2254_vm6, %v2253_v52, -inf }
 0x776   : > { %v2273_v8 = vsel %vm2254_vm6, %v2252_v50, -inf }
 0x777   : > { %2271 = vmax.xlane.f32.xlu1 %v2270_v32  ;;  %2274 = vmax.xlane.f32.xlu0 %v2273_v8 }
 0x77b   : > { %2277 = vmax.xlane.f32.xlu1 %v2276_v39 }
 0x7f8   : > { %v2257_v4 = vpop.xlane.xlu1 %2256 }
 0x7f9   : > { %v2279_v37 = vsub.f32 %v2246_v56, %v2257_v4 }
 0x7fb   : > { %v2287_v53 = vmul.f32 1.442695, %v2279_v37 }
 0x7fc   : > { %v2260_v63 = vpop.xlane.xlu1 %2259  ;;  %v2263_v6 = vpop.xlane.xlu0 %2262 }
 0x7fd   : > { %13698 = vpow2.f32 %v2287_v53  ;;  %v2280_v9 = vsub.f32 %v2247_v59, %v2260_v63  ;;  %v2281_v20 = vsub.f32 %v2248_v14, %v2263_v6 }
 0x7ff   : > { %v2289_v35 = vmul.f32 1.442695, %v2280_v9  ;;  %v2291_v25 = vmul.f32 1.442695, %v2281_v20 }
 0x800   : > { %v2266_v30 = vpop.xlane.xlu1 %2265  ;;  %v2269_v42 = vpop.xlane.xlu0 %2268 }
 0x801   : > { %13700 = vpow2.f32 %v2289_v35  ;;  %v2282_v44 = vsub.f32 %v2249_v17, %v2266_v30  ;;  %v2283_v46 = vsub.f32 %v2250_v33, %v2269_v42 }
 0x802   : > { %13702 = vpow2.f32 %v2291_v25 }
 0x803   : > { %v2293_v48 = vmul.f32 1.442695, %v2282_v44  ;;  %v2295_v32 = vmul.f32 1.442695, %v2283_v46 }
 0x804   : > { %v2272_v8 = vpop.xlane.xlu1 %2271  ;;  %v2275_v39 = vpop.xlane.xlu0 %2274 }
 0x805   : > { %13704 = vpow2.f32 %v2293_v48  ;;  %v2284_v56 = vsub.f32 %v2251_v40, %v2272_v8  ;;  %v2285_v4 = vsub.f32 %v2252_v50, %v2275_v39  ;;  %v2569_v8 = vpop.f32.mrb[32].mxu1 }
 0x806   : > { %13706 = vpow2.f32 %v2295_v32  ;;  %v11353_v39 = vpop.f32.mrb[33].mxu1  ;;  %v2570_v61 = vadd.f32 %v14582_v31, %v2569_v8 }
 0x807   : > { %v13699_v37 = vpop.eup %13698  ;;  %v2297_v53 = vmul.f32 1.442695, %v2284_v56  ;;  %v2299_v59 = vmul.f32 1.442695, %v2285_v4 }
 0x808   : > { %v2278_v14 = vpop.xlane.xlu1 %2277  ;;  %v2303_v63 = vsel %vm2254_vm6, %v13699_v37, 0.0 }
 0x809   : > { %13708 = vpow2.f32 %v2297_v53  ;;  %v2286_v6 = vsub.f32 %v2253_v52, %v2278_v14  ;;  %2304 = vadd.xlane.f32.xlu0 %v2303_v63 }
 0x80a   : > { %13710 = vpow2.f32 %v2299_v59 }
 0x80b   : > { %v13701_v17 = vpop.eup %13700  ;;  %v2301_v33 = vmul.f32 1.442695, %v2286_v6 }
 0x80c   : > { %v13703_v9 = vpop.eup %13702  ;;  %v2306_v20 = vsel %vm2254_vm6, %v13701_v17, 0.0 }
 0x80d   : > { %13712 = vpow2.f32 %v2301_v33  ;;  %2307 = vadd.xlane.f32.xlu1 %v2306_v20  ;;  %v2309_v40 = vsel %vm2254_vm6, %v13703_v9, 0.0 }
 0x80e   : > { %2310 = vadd.xlane.f32.xlu0 %v2309_v40 }
 0x80f   : > { %v13705_v50 = vpop.eup %13704 }
 0x810   : > { %v13707_v35 = vpop.eup %13706  ;;  %v2312_v25 = vsel %vm2254_vm6, %v13705_v50, 0.0 }
 0x811   : > { %2313 = vadd.xlane.f32.xlu1 %v2312_v25  ;;  %v2315_v30 = vsel %vm2254_vm6, %v13707_v35, 0.0 }
 0x812   : > { %2316 = vadd.xlane.f32.xlu0 %v2315_v30 }
 0x813   : > { %v13709_v52 = vpop.eup %13708 }
 0x814   : > { %v13711_v42 = vpop.eup %13710  ;;  %v2318_v44 = vsel %vm2254_vm6, %v13709_v52, 0.0 }
 0x815   : > { %2319 = vadd.xlane.f32.xlu1 %v2318_v44  ;;  %v2321_v46 = vsel %vm2254_vm6, %v13711_v42, 0.0 }
 0x816   : > { %2322 = vadd.xlane.f32.xlu0 %v2321_v46 }
 0x817   : > { %v13713_v48 = vpop.eup %13712 }
 0x818   : > { %v2324_v32 = vsel %vm2254_vm6, %v13713_v48, 0.0 }
 0x819   : > { %2325 = vadd.xlane.f32.xlu1 %v2324_v32 }
 0x896   : > { %v2305_v56 = vpop.xlane.xlu0 %2304 }
 0x897   : > { %13714 = vrcp.f32 %v2305_v56 }
 0x89a   : > { %v2308_v4 = vpop.xlane.xlu1 %2307 }
 0x89b   : > { %13716 = vrcp.f32 %v2308_v4  ;;  %v2311_v53 = vpop.xlane.xlu0 %2310 }
 0x89c   : > { %13718 = vrcp.f32 %v2311_v53 }
 0x89e   : > { %v2314_v59 = vpop.xlane.xlu1 %2313 }
 0x89f   : > { %13720 = vrcp.f32 %v2314_v59  ;;  %v2317_v14 = vpop.xlane.xlu0 %2316 }
 0x8a0   : > { %13722 = vrcp.f32 %v2317_v14 }
 0x8a1   : > { %v13715_v63 = vpop.eup %13714 }
 0x8a2   : > { %v2320_v6 = vpop.xlane.xlu1 %2319  ;;  %v2335_v33 = vmul.f32 %v13715_v63, %v13699_v37 }
 0x8a3   : > { %13724 = vrcp.f32 %v2320_v6  ;;  %v2323_v20 = vpop.xlane.xlu0 %2322 }
 0x8a4   : > { %13726 = vrcp.f32 %v2323_v20  ;;  %11331 = vmatprep.mubr.msk.f32.mxu0 %vm2254_vm6, %v2335_v33 }
 0x8a5   : > { %v13717_v40 = vpop.eup %13716 }
 0x8a6   : > { %v13719_v25 = vpop.eup %13718  ;;  %v2326_v30 = vpop.xlane.xlu1 %2325  ;;  %v2336_v44 = vmul.f32 %v13717_v40, %v13701_v17 }
 0x8a7   : > { %13728 = vrcp.f32 %v2326_v30  ;;  %v2337_v46 = vmul.f32 %v13719_v25, %v13703_v9 }
 0x8a8   : > { %11332 = vmatmul.mubr.msk.f32.vlgmr.msra.gmra.mrb[38].mxu0 %vm2254_vm6, %v2336_v44  ;;  %v2484_v44 = vrot.slane %v14752_v3, 1 }
 0x8a9   : > { %v13721_v32 = vpop.eup %13720  ;;  %12379 = vmatpush3.bf16.xpose.msk.msra.mxu0 %vm14483_vm2, %v12377_v57  ;;  %11334 = vmatprep.mubr.msk.f32.mxu0 %vm2254_vm6, %v2337_v46  ;;  %v18404_v57 = vpack.c.bf16 %v14561_v22, %v14569_v28 }
 0x8aa   : > { %v13723_v37 = vpop.eup %13722  ;;  %v2338_v39 = vmul.f32 %v13721_v32, %v13705_v50  ;;  %12380 = vmatprep.subr.bf16.mxu0 %v18313_v27 }
 0x8ab   : > { %v2339_v56 = vmul.f32 %v13723_v37, %v13707_v35 }
 0x8ac   : > { %11335 = vmatmul.mubr.msk.f32.gmra.mrb[40].mxu0 %vm2254_vm6, %v2338_v39 }
 0x8ad   : > { %v13725_v17 = vpop.eup %13724  ;;  %11337 = vmatprep.mubr.msk.f32.mxu0 %vm2254_vm6, %v2339_v56  ;;  %v3439_v56 = vld [vmem:[%s18405_s30] sm:$0xff] }
 0x8ae   : > { %v13727_v9 = vpop.eup %13726  ;;  %v2340_v4 = vmul.f32 %v13725_v17, %v13709_v52  ;;  %v3440_v17 = vld [vmem:[%s18405_s30 + $0x8] sm:$0xff] }
 0x8af   : > { %v2341_v53 = vmul.f32 %v13727_v9, %v13711_v42  ;;  %v3442_v9 = vld [vmem:[%s18405_s30 + $0x18] sm:$0xff] }
 0x8b0   : > { %11338 = vmatmul.mubr.msk.f32.gmra.mrb[42].mxu0 %vm2254_vm6, %v2340_v4 }
 0x8b1   : > { %v13729_v51 = vpop.eup %13728  ;;  %12383 = vmatpush3.bf16.xpose.msk.msra.mxu0 %vm14483_vm2, %v12381_v7  ;;  %11340 = vmatprep.mubr.msk.f32.mxu0 %vm2254_vm6, %v2341_v53 }
 0x8b2   : > { %v2342_v55 = vmul.f32 %v13729_v51, %v13713_v48  ;;  %12384 = vmatprep.subr.bf16.mxu0 %v18313_v27  ;;  %v2492_v48 = vrot.slane %v14752_v3, 3 }
 0x8b4   : > { %11341 = vmatmul.mubr.msk.f32.gmra.mrb[44].mxu0 %vm2254_vm6, %v2342_v55 }
 0x8b5   : > { %11370 = vmatprep.mubr.msk.f32.mxu0 %vm14084_vm1, %v18311_v1 }
 0x8b9   : > { %12387 = vmatpush3.bf16.xpose.msk.msra.mxu0 %vm14483_vm2, %v12385_v18 }
 0x8ba   : > { %12388 = vmatprep.subr.bf16.mxu0 %v18313_v27 }
 0x8c1   : > { %12391 = vmatpush3.bf16.xpose.msk.msra.mxu0 %vm14483_vm2, %v18404_v57  ;;  %v3443_v57 = vld [vmem:[%s18405_s30 + $0x20] sm:$0xff]  ;;  %vm6542_vm2 = vcmask 1042432  }
 0x8c2   : > { %12410 = vmatprep.subr.bf16.mxu0 %v18313_v27 }
 0x8c8   : > { %11371 = vmatmul.mubr.msk.f32.vlgmr.msra.gmra.mrb[46].mxu0 %vm943_vm0, %v2570_v61  ;;  %v3444_v61 = vld [vmem:[%s18405_s30 + $0x28] sm:$0xff] }
 0x8c9   : > { %12412 = vmatpush3.bf16.msra.mxu0 %v14671_v45  ;;  %11419 = vmatprep.mubr.msk.f32.mxu0 %vm14084_vm1, %v18311_v1 }
 0x8ca   : > { %12413 = vmatprep.subr.bf16.mxu0 %v18313_v27 }
 0x8cd   : > { %12415 = vmatpush3.bf16.msra.mxu0 %v14682_v62 }
 0x8ce   : > { %12416 = vmatprep.subr.bf16.mxu0 %v18313_v27 }
 0x8d1   : > { %12418 = vmatpush3.bf16.msra.mxu0 %v14694_v12 }
 0x8d2   : > { %12419 = vmatprep.subr.bf16.mxu0 %v18313_v27 }
 0x8d5   : > { %12421 = vmatpush3.bf16.msra.mxu0 %v14705_v36 }
 0x97b   : > { %v14893_v13 = vpop.f32.mrb[38].mxu0 }
 0x97c   : > { %v14895_v5 = vpop.f32.mrb[39].mxu0 }
 0x97f   : > { %v14897_v7 = vpop.f32.mrb[40].mxu0 }
 0x980   : > { %v14899_v11 = vpop.f32.mrb[41].mxu0 }
 0x983   : > { %v14901_v16 = vpop.f32.mrb[42].mxu0 }
 0x984   : > { %v14903_v18 = vpop.f32.mrb[43].mxu0 }
 0x987   : > { %v14905_v22 = vpop.f32.mrb[44].mxu0 }
 0x988   : > { %v14907_v28 = vpop.f32.mrb[45].mxu0 }
 0x99b   : > { %v2666_v31 = vpop.f32.mrb[46].mxu0 }
 0x99c   : > { %v2670_v45 = vmul.f32 0.17677669, %v2666_v31  ;;  %v11372_v62 = vpop.f32.mrb[47].mxu0  ;;  %v3447_v31 = vld [vmem:[%s18405_s30 + $0x40] sm:$0xff] }
 0x99e   : > { %v2671_v12 = vsel %vm1683_vm3, %v2670_v45, -inf }
 0x99f   : > { %2672 = vmax.xlane.f32.xlu0 %v2671_v12 }
 0xa2c   : > { %v2673_v36 = vpop.xlane.xlu0 %2672 }
 0xa2d   : > { %v2674_v50 = vsub.f32 %v2670_v45, %v2673_v36  ;;  %v3448_v45 = vld [vmem:[%s18405_s30 + $0x48] sm:$0xff]  ;;  %v3449_v36 = vld [vmem:[%s18405_s30 + $0x50] sm:$0xff] }
 0xa2f   : > { %v2675_v35 = vmul.f32 1.442695, %v2674_v50  ;;  %v3450_v50 = vld [vmem:[%s18405_s30 + $0x58] sm:$0xff] }
 0xa31   : > { %13730 = vpow2.f32 %v2675_v35 }
 0xa3b   : > { %v13731_v52 = vpop.eup %13730 }
 0xa3c   : > { %v2677_v42 = vsel %vm1683_vm3, %v13731_v52, 0.0 }
 0xa3d   : > { %2678 = vadd.xlane.f32.xlu1 %v2677_v42  ;;  %v3451_v42 = vld [vmem:[%s18405_s30 + $0x60] sm:$0xff] }
 0xa4e   : > { %2493 = vrot.lane.b32.xlu1 %v2492_v48, %s18307_s11  ;;  %v3452_v48 = vld [vmem:[%s18405_s30 + $0x68] sm:$0xff] }
 0xaca   : > { %v2679_v8 = vpop.xlane.xlu1 %2678 }
 0xacb   : > { %13732 = vrcp.f32 %v2679_v8 }
 0xad5   : > { %v13733_v59 = vpop.eup %13732 }
 0xad6   : > { %v2681_v14 = vmul.f32 %v13733_v59, %v13731_v52 }
 0xad8   : > { %11390 = vmatmul.mubr.msk.f32.vlgmr.msra.gmra.mrb[34].mxu1 %vm1695_vm4, %v2681_v14  ;;  %v12453_v14 = vpack.c.bf16 %v3452_v48, %v3451_v42 }
 0xad9   : > { %12406 = vmatpush3.bf16.msra.mxu1 %v14648_v19  ;;  %11400 = vmatprep.mubr.msk.f32.mxu1 %vm14084_vm1, %v18311_v1 }
 0xada   : > { %12407 = vmatprep.subr.bf16.mxu1 %v18313_v27 }
 0xadd   : > { %12409 = vmatpush3.bf16.msra.mxu1 %v14661_v38 }
 0xade   : > { %12422 = vmatprep.subr.bf16.mxu1 %v18313_v27 }
 0xbab   : > { %v2751_v63 = vpop.f32.mrb[34].mxu1 }
 0xbac   : > { %v2755_v6 = vadd.f32 %v2751_v63, %v14810_v24  ;;  %v11391_v33 = vpop.f32.mrb[35].mxu1  ;;  %v3453_v63 = vld [vmem:[%s18405_s30 + $0x70] sm:$0xff] }
 0xbae   : > { %11401 = vmatmul.mubr.msk.f32.vlgmr.msra.gmra.mrb[36].mxu1 %vm943_vm0, %v2755_v6 }
 0xbaf   : > { %12424 = vmatpush3.bf16.msra.mxu1 %v14714_v43  ;;  %11430 = vmatprep.mubr.msk.f32.mxu1 %vm14084_vm1, %v18311_v1 }
 0xbb0   : > { %12425 = vmatprep.subr.bf16.mxu1 %v18313_v27 }
 0xbb3   : > { %12427 = vmatpush3.bf16.msra.mxu1 %v14734_v41  ;;  %v2488_v41 = vrot.slane %v14752_v3, 2 }
 0xbb4   : > { %12428 = vmatprep.subr.bf16.mxu1 %v18313_v27 }
 0xc81   : > { %v2825_v19 = vpop.f32.mrb[36].mxu1 }
 0xc82   : > { %v2826_v38 = vadd.f32 %v14721_v49, %v2825_v19  ;;  %v11402_v20 = vpop.f32.mrb[37].mxu1 }
 0xc84   : > { %v2829_v40 = vmax.f32 %v2826_v38, 0.0 }
 0xc86   : > { %11420 = vmatmul.mubr.msk.f32.vlgmr.msra.gmra.mrb[48].mxu0 %vm1695_vm4, %v2829_v40 }
 0xc87   : > { %11446 = vmatprep.mubr.msk.f32.mxu0 %vm943_vm0, %v14620_v60 }
 0xd59   : > { %v2899_v43 = vpop.f32.mrb[48].mxu0 }
 0xd5a   : > { %v2903_v24 = vadd.f32 %v2899_v43, %v2755_v6  ;;  %v11421_v25 = vpop.f32.mrb[49].mxu0  ;;  %v3454_v6 = vld [vmem:[%s18405_s30 + $0x78] sm:$0xff] }
 0xd5b   : > { %v12456_v20 = vpack.c.bf16 %v3454_v6, %v3453_v63 }
 0xd5c   : > { %v14933_v30 = vadd.f32 %v14747_v58, %v2903_v24 }
 0xd5e   : > { %11431 = vmatmul.mubr.msk.f32.vlgmr.msra.gmra.mrb[38].mxu1 %vm943_vm0, %v14933_v30  ;;  %v3420_v49 = vrot.slane %v14933_v30, 2  ;;  %v3416_v46 = vrot.slane %v14933_v30, 1  ;;  %v3424_v32 = vrot.slane %v14933_v30, 3 }
 0xd5f   : > { %12430 = vmatpush3.bf16.msra.mxu1 %v14749_v23  ;;  %11441 = vmatprep.mubr.msk.f32.mxu1 %vm14084_vm1, %v18311_v1 }
 0xd60   : > { %12431 = vmatprep.subr.bf16.mxu1 %v18313_v27  ;;  %v13089_v60 = vpack.i.bf16 %v3420_v49, %v2488_v41  ;;  %v13084_v58 = vpack.i.bf16 %v3416_v46, %v2484_v44 }
 0xd62   : > { %13090 = vrot.lane.b32.xlu1 %v13089_v60, %s18305_s8  ;;  %13085 = vrot.lane.b32.xlu0 %v13084_v58, %s14088_s7  ;;  %s18406_s8 = sld [smem:[#allocation51_spill]]  ;;  %s14089_s7 = smov 16  }
 0xd63   : > { %12433 = vmatpush3.bf16.msra.mxu1 %v14763_v47  ;;  %v12435_v47 = vpack.c.bf16 %v3440_v17, %v3439_v56 }
 0xd66   : > { %11442 = vmatmul.mubr.msk.f32.vlgmr.msra.gmra.mrb[40].mxu1 %vm943_vm0, %v14933_v30  ;;  %3425 = vrot.lane.b32.xlu1 %v3424_v32, %s18307_s11  ;;  %s14099_s11 = smov 100  }
 0xd68   : > { %s18407_s0 = smov %s18406_s8 }
 0xdd4   : > { %v13086_v62 = vpop.permute.xlu0 %13085 }
 0xdd5   : > { %v13087_v12 = vunpack.i.l.bf16 %v13086_v62  ;;  %v13088_v8 = vunpack.i.h.bf16 %v13086_v62 }
 0xdd7   : > { %v2496_v52 = vsel %vm943_vm0, %v14752_v3, %v13087_v12  ;;  %v3428_v38 = vsel %vm943_vm0, %v14933_v30, %v13088_v8 }
 0xe31   : > { %v2974_v23 = vpop.f32.mrb[38].mxu1 }
 0xe32   : > { %v2975_v37 = vadd.f32 %v14774_v29, %v2974_v23  ;;  %v11432_v39 = vpop.f32.mrb[39].mxu1  ;;  %v3441_v29 = vld [vmem:[%s18405_s30 + $0x10] sm:$0xff] }
 0xe33   : > { %v12438_v55 = vpack.c.bf16 %v3442_v9, %v3441_v29 }
 0xe34   : > { %11444 = vmatprep.subr.msk.mxu0 %vm943_vm0, %v2975_v37 }
 0xe35   : > { %11445 = vmatpush3.xpose.msk.msra.mxu0 %vm943_vm0, %v2975_v37 }
 0xe36   : > { %12434 = vmatprep.subr.bf16.mxu0 %v18313_v27 }
 0xe38   : > { %11447 = vmatmul.mubr.msk.f32.vlgmr.msra.gmra.mrb[50].mxu0 %vm943_vm0, %v14617_v54  ;;  %v12441_v54 = vpack.c.bf16 %v3444_v61, %v3443_v57 }
 0xe39   : > { %v3044_v4 = vpop.f32.mrb[40].mxu1  ;;  %11449 = vmatprep.mubr.msk.f32.mxu0 %vm943_vm0, %v14626_v10  ;;  %12436 = vmatpush3.bf16.msra.mxu0 %v12435_v47  ;;  %v3445_v10 = vld [vmem:[%s18405_s30 + $0x30] sm:$0xff] }
 0xe3a   : > { %v3045_v53 = vadd.f32 %v14783_v2, %v3044_v4  ;;  %v11443_v51 = vpop.f32.mrb[41].mxu1  ;;  %12437 = vmatprep.subr.bf16.mxu0 %v18313_v27  ;;  %v3446_v2 = vld [vmem:[%s18405_s30 + $0x38] sm:$0xff] }
 0xe3c   : > { %11458 = vmatprep.subr.msk.mxu1 %vm2367_vm5, %v3045_v53  ;;  %11450 = vmatmul.mubr.msk.f32.gmra.mrb[52].mxu0 %vm943_vm0, %v14623_v0  ;;  %v12444_v0 = vpack.c.bf16 %v3446_v2, %v3445_v10 }
 0xe3d   : > { %11459 = vmatpush3.msk.msra.mxu1 %vm2367_vm5, %v3045_v53  ;;  %11452 = vmatprep.mubr.msk.f32.mxu0 %vm943_vm0, %v14632_v21  ;;  %v2494_v21 = vpop.permute.xlu1 %2493 }
 0xe3e   : > { %12439 = vmatpush3.bf16.msra.mxu0 %v12438_v55  ;;  %12458 = vmatprep.subr.bf16.mxu1 %v18313_v27 }
 0xe3f   : > { %12440 = vmatprep.subr.bf16.mxu0 %v18313_v27 }
 0xe40   : > { %11453 = vmatmul.mubr.msk.f32.gmra.mrb[54].mxu0 %vm943_vm0, %v14629_v15  ;;  %v12447_v15 = vpack.c.bf16 %v3448_v45, %v3447_v31 }
 0xe41   : > { %11455 = vmatprep.mubr.msk.f32.mxu0 %vm943_vm0, %v14638_v34  ;;  %v13091_v34 = vpop.permute.xlu1 %13090 }
 0xe42   : > { %12442 = vmatpush3.bf16.msra.mxu0 %v12441_v54  ;;  %v13092_v35 = vunpack.i.l.bf16 %v13091_v34  ;;  %v13093_v33 = vunpack.i.h.bf16 %v13091_v34 }
 0xe43   : > { %12443 = vmatprep.subr.bf16.mxu0 %v18313_v27 }
 0xe44   : > { %11456 = vmatmul.mubr.msk.f32.gmra.mrb[56].mxu0 %vm943_vm0, %v14635_v26  ;;  %v12450_v26 = vpack.c.bf16 %v3450_v50, %v3449_v36  ;;  %v2497_v59 = vsel %vm1695_vm4, %v2496_v52, %v13092_v35  ;;  %v3429_v43 = vsel %vm1695_vm4, %v3428_v38, %v13093_v33 }
 0xe45   : > { %11504 = vmatprep.mubr.msk.f32.mxu0 %vm14084_vm1, %v18311_v1  ;;  %v2499_v19 = vsel %vm2498_vm7, %v2497_v59, %v2494_v21  ;;  %v3426_v40 = vpop.permute.xlu1 %3425 }
 0xe46   : > { %12445 = vmatpush3.bf16.msra.mxu0 %v12444_v0  ;;  %v3436_v24 = vrot.slane %v2499_v19, 1  ;;  %v3430_v25 = vsel %vm2498_vm7, %v3429_v43, %v3426_v40 }
 0xe47   : > { %12446 = vmatprep.subr.bf16.mxu0 %v18313_v27 }
 0xe48   : > { %v3438_v41 = vsel %vm3433_vm8, %v3436_v24, %v3430_v25 }
 0xe4a   : > { %12448 = vmatpush3.bf16.msra.mxu0 %v12447_v15 }
 0xe4b   : > { %12449 = vmatprep.subr.bf16.mxu0 %v18313_v27 }
 0xe4e   : > { %12451 = vmatpush3.bf16.msra.mxu0 %v12450_v26 }
 0xe4f   : > { %12452 = vmatprep.subr.bf16.mxu0 %v18313_v27 }
 0xe52   : > { %12454 = vmatpush3.bf16.msra.mxu0 %v12453_v14 }
 0xe53   : > { %12455 = vmatprep.subr.bf16.mxu0 %v18313_v27 }
 0xe56   : > { %12457 = vmatpush3.bf16.msra.mxu0 %v12456_v20 }
 0xe57   : > { %12482 = vmatprep.subr.bf16.mxu0 %v18313_v27 }
 0xe59   : > { %11505 = vmatmul.mubr.f32.vlgmr.msra.gmra.mrb[58].mxu0 %v3438_v41 }
 0xe5a   : > { %11574 = vmatprep.mubr.msk.f32.mxu0 %vm14084_vm1, %v18311_v1 }
 0xf0b   : > { %v11448_v49 = vpop.f32.mrb[50].mxu0 }
 0xf0c   : > { %v3181_v44 = vmul.f32 0.17677669, %v11448_v49  ;;  %v3141_v46 = vpop.f32.mrb[51].mxu0 }
 0xf0d   : > { %v3180_v60 = vmul.f32 0.17677669, %v3141_v46 }
 0xf0e   : > { %v3191_v58 = vsel %vm2254_vm6, %v3181_v44, -inf }
 0xf0f   : > { %3192 = vmax.xlane.f32.xlu1 %v3191_v58  ;;  %v11451_v32 = vpop.f32.mrb[52].mxu0  ;;  %v3188_v23 = vsel %vm2254_vm6, %v3180_v60, -inf }
 0xf10   : > { %v3183_v37 = vmul.f32 0.17677669, %v11451_v32  ;;  %3189 = vmax.xlane.f32.xlu0 %v3188_v23  ;;  %v3151_v39 = vpop.f32.mrb[53].mxu0 }
 0xf11   : > { %v3182_v17 = vmul.f32 0.17677669, %v3151_v39 }
 0xf12   : > { %v3197_v56 = vsel %vm2254_vm6, %v3183_v37, -inf }
 0xf13   : > { %v11454_v47 = vpop.f32.mrb[54].mxu0  ;;  %v3194_v55 = vsel %vm2254_vm6, %v3182_v17, -inf }
 0xf14   : > { %v3185_v29 = vmul.f32 0.17677669, %v11454_v47  ;;  %3198 = vmax.xlane.f32.xlu0 %v3197_v56  ;;  %v3161_v9 = vpop.f32.mrb[55].mxu0 }
 0xf15   : > { %v3184_v53 = vmul.f32 0.17677669, %v3161_v9 }
 0xf16   : > { %v3203_v4 = vsel %vm2254_vm6, %v3185_v29, -inf }
 0xf17   : > { %3204 = vmax.xlane.f32.xlu1 %v3203_v4  ;;  %v11457_v51 = vpop.f32.mrb[56].mxu0  ;;  %v3200_v2 = vsel %vm2254_vm6, %v3184_v53, -inf }
 0xf18   : > { %v3187_v57 = vmul.f32 0.17677669, %v11457_v51  ;;  %3195 = vmax.xlane.f32.xlu0 %v3194_v55  ;;  %v3171_v61 = vpop.f32.mrb[57].mxu0 }
 0xf19   : > { %v3186_v10 = vmul.f32 0.17677669, %v3171_v61  ;;  %v3533_v61 = vld [vmem:[%s18406_s8] sm:$0xff]  ;;  %s18409_s8 = sld [smem:[#allocation52_spill]] }
 0xf1a   : > { %v3209_v54 = vsel %vm2254_vm6, %v3187_v57, -inf }
 0xf1b   : > { %3210 = vmax.xlane.f32.xlu1 %v3209_v54  ;;  %v3206_v0 = vsel %vm2254_vm6, %v3186_v10, -inf  ;;  %v3534_v54 = vld [vmem:[%s18407_s0 + $0x8] sm:$0xff] }
 0xf1c   : > { %3201 = vmax.xlane.f32.xlu0 %v3200_v2 }
 0xf20   : > { %3207 = vmax.xlane.f32.xlu0 %v3206_v0 }
 0xf2c   : > { %v15050_v21 = vpop.f32.mrb[58].mxu0 }
 0xf2d   : > { %v11506_v31 = vpop.f32.mrb[59].mxu0 }
 0xf9c   : > { %v3193_v45 = vpop.xlane.xlu1 %3192 }
 0xf9d   : > { %v3213_v62 = vsub.f32 %v3181_v44, %v3193_v45  ;;  %v3190_v15 = vpop.xlane.xlu0 %3189  ;;  %v12459_v45 = vpack.c.bf16 %v3534_v54, %v3533_v61  ;;  %v3431_v61 = vrot.slane %v14933_v30, 7 }
 0xf9e   : > { %v3212_v34 = vsub.f32 %v3180_v60, %v3190_v15 }
 0xf9f   : > { %v3222_v12 = vmul.f32 1.442695, %v3213_v62  ;;  %v3434_v54 = vsel %vm3433_vm8, %v14752_v3, %v3431_v61  ;;  %v3629_v3 = vld [vmem:[%s18279_s13 + $0x10] sm:$0xff]  ;;  %v3893_v61 = vld [vmem:[%s18285_s19 + $0x18] sm:$0xff] }
 0xfa0   : > { %v3220_v36 = vmul.f32 1.442695, %v3212_v34  ;;  %v3535_v34 = vld [vmem:[%s18407_s0 + $0x10] sm:$0xff] }
 0xfa1   : > { %13734 = vpow2.f32 %v3222_v12  ;;  %v3199_v50 = vpop.xlane.xlu0 %3198  ;;  %v3536_v12 = vld [vmem:[%s18407_s0 + $0x18] sm:$0xff] }
 0xfa2   : > { %13736 = vpow2.f32 %v3220_v36  ;;  %v3215_v35 = vsub.f32 %v3183_v37, %v3199_v50  ;;  %v12462_v50 = vpack.c.bf16 %v3536_v12, %v3535_v34  ;;  %v3633_v34 = vld [vmem:[%s18279_s13 + $0x30] sm:$0xff]  ;;  %v3634_v12 = vld [vmem:[%s18279_s13 + $0x38] sm:$0xff] }
 0xfa4   : > { %v3226_v26 = vmul.f32 1.442695, %v3215_v35  ;;  %v3205_v52 = vpop.xlane.xlu1 %3204  ;;  %v3537_v35 = vld [vmem:[%s18407_s0 + $0x20] sm:$0xff] }
 0xfa5   : > { %v3217_v42 = vsub.f32 %v3185_v29, %v3205_v52  ;;  %v3196_v48 = vpop.xlane.xlu0 %3195 }
 0xfa6   : > { %13738 = vpow2.f32 %v3226_v26  ;;  %v3214_v8 = vsub.f32 %v3182_v17, %v3196_v48  ;;  %v3538_v26 = vld [vmem:[%s18407_s0 + $0x28] sm:$0xff] }
 0xfa7   : > { %v3230_v59 = vmul.f32 1.442695, %v3217_v42 }
 0xfa8   : > { %v3224_v14 = vmul.f32 1.442695, %v3214_v8  ;;  %v3211_v63 = vpop.xlane.xlu1 %3210  ;;  %v12465_v8 = vpack.c.bf16 %v3538_v26, %v3537_v35  ;;  %v3636_v35 = vld [vmem:[%s18279_s13 + $0x48] sm:$0xff] }
 0xfa9   : > { %13740 = vpow2.f32 %v3230_v59  ;;  %v3219_v6 = vsub.f32 %v3187_v57, %v3211_v63  ;;  %v3202_v33 = vpop.xlane.xlu0 %3201  ;;  %v3540_v63 = vld [vmem:[%s18407_s0 + $0x38] sm:$0xff] }
 0xfaa   : > { %13742 = vpow2.f32 %v3224_v14  ;;  %v3216_v19 = vsub.f32 %v3184_v53, %v3202_v33  ;;  %v3539_v14 = vld [vmem:[%s18407_s0 + $0x30] sm:$0xff] }
 0xfab   : > { %v13735_v38 = vpop.eup %13734  ;;  %v3234_v20 = vmul.f32 1.442695, %v3219_v6 }
 0xfac   : > { %v13737_v40 = vpop.eup %13736  ;;  %v3228_v43 = vmul.f32 1.442695, %v3216_v19  ;;  %v3239_v24 = vsel %vm2254_vm6, %v13735_v38, 0.0 }
 0xfad   : > { %13744 = vpow2.f32 %v3234_v20  ;;  %3240 = vadd.xlane.f32.xlu1 %v3239_v24  ;;  %v3208_v25 = vpop.xlane.xlu0 %3207  ;;  %v3236_v41 = vsel %vm2254_vm6, %v13737_v40, 0.0  ;;  %v3542_v24 = vld [vmem:[%s18407_s0 + $0x48] sm:$0xff] }
 0xfae   : > { %13746 = vpow2.f32 %v3228_v43  ;;  %v3218_v49 = vsub.f32 %v3186_v10, %v3208_v25  ;;  %3237 = vadd.xlane.f32.xlu0 %v3236_v41  ;;  %v3541_v43 = vld [vmem:[%s18407_s0 + $0x40] sm:$0xff] }
 0xfb0   : > { %v13739_v44 = vpop.eup %13738  ;;  %v3232_v46 = vmul.f32 1.442695, %v3218_v49  ;;  %v12471_v49 = vpack.c.bf16 %v3542_v24, %v3541_v43  ;;  %v3808_v43 = vld [vmem:[%s18283_s17 + $0x18] sm:$0xff] }
 0xfb1   : > { %v3245_v60 = vsel %vm2254_vm6, %v13739_v44, 0.0 }
 0xfb2   : > { %13748 = vpow2.f32 %v3232_v46  ;;  %3246 = vadd.xlane.f32.xlu1 %v3245_v60  ;;  %v3543_v46 = vld [vmem:[%s18407_s0 + $0x50] sm:$0xff]  ;;  %v3544_v60 = vld [vmem:[%s18407_s0 + $0x58] sm:$0xff] }
 0xfb3   : > { %v15055_v58 = vpop.eup %13740 }
 0xfb4   : > { %v13743_v32 = vpop.eup %13742  ;;  %v3251_v23 = vsel %vm2254_vm6, %v15055_v58, 0.0 }
 0xfb5   : > { %v3242_v37 = vsel %vm2254_vm6, %v13743_v32, 0.0 }
 0xfb6   : > { %3252 = vadd.xlane.f32.xlu1 %v3251_v23  ;;  %3243 = vadd.xlane.f32.xlu0 %v3242_v37  ;;  %v3546_v23 = vld [vmem:[%s18407_s0 + $0x68] sm:$0xff] }
 0xfb7   : > { %v15060_v39 = vpop.eup %13744 }
 0xfb8   : > { %v13747_v56 = vpop.eup %13746  ;;  %v3257_v17 = vsel %vm2254_vm6, %v15060_v39, 0.0 }
 0xfb9   : > { %v3248_v47 = vsel %vm2254_vm6, %v13747_v56, 0.0 }
 0xfba   : > { %3258 = vadd.xlane.f32.xlu1 %v3257_v17  ;;  %3249 = vadd.xlane.f32.xlu0 %v3248_v47  ;;  %v10193_v17 = vld [vmem:[%s18408_s4] ss:$0 sm:$0xff]  ;;  %s14101_s4 = smov 84  }
 0xfbc   : > { %v13749_v29 = vpop.eup %13748 }
 0xfbd   : > { %v3254_v9 = vsel %vm2254_vm6, %v13749_v29, 0.0 }
 0xfbe   : > { %3255 = vadd.xlane.f32.xlu0 %v3254_v9  ;;  %v3720_v9 = vld [vmem:[%s18281_s15] sm:$0xff] }
0x103a   : > { %v3241_v4 = vpop.xlane.xlu1 %3240 }
0x103b   : > { %13750 = vrcp.f32 %v3241_v4  ;;  %v3238_v53 = vpop.xlane.xlu0 %3237  ;;  %v3721_v4 = vld [vmem:[%s18281_s15 + $0x8] sm:$0xff] }
0x103c   : > { %13752 = vrcp.f32 %v3238_v53  ;;  %v12507_v53 = vpack.c.bf16 %v3721_v4, %v3720_v9 }
0x103f   : > { %v3247_v51 = vpop.xlane.xlu1 %3246 }
0x1040   : > { %13754 = vrcp.f32 %v3247_v51 }
0x1043   : > { %v3253_v55 = vpop.xlane.xlu1 %3252  ;;  %v3244_v57 = vpop.xlane.xlu0 %3243 }
0x1044   : > { %13756 = vrcp.f32 %v3244_v57 }
0x1045   : > { %v13751_v10 = vpop.eup %13750  ;;  %13758 = vrcp.f32 %v3253_v55  ;;  %v3722_v55 = vld [vmem:[%s18281_s15 + $0x10] sm:$0xff] }
0x1046   : > { %v13753_v2 = vpop.eup %13752  ;;  %v3269_v15 = vmul.f32 %v13751_v10, %v13735_v38  ;;  %v12468_v38 = vpack.c.bf16 %v3540_v63, %v3539_v14  ;;  %v3627_v10 = vld [vmem:[%s18279_s13] sm:$0xff]  ;;  %v3641_v63 = vld [vmem:[%s18279_s13 + $0x70] sm:$0xff] }
0x1047   : > { %v3250_v0 = vpop.xlane.xlu0 %3249  ;;  %v3268_v31 = vmul.f32 %v13753_v2, %v13737_v40  ;;  %v3259_v62 = vpop.xlane.xlu1 %3258  ;;  %v3628_v2 = vld [vmem:[%s18279_s13 + $0x8] sm:$0xff] }
0x1048   : > { %13760 = vrcp.f32 %v3250_v0  ;;  %v12483_v30 = vpack.c.bf16 %v3628_v2, %v3627_v10  ;;  %v3630_v0 = vld [vmem:[%s18279_s13 + $0x18] sm:$0xff]  ;;  %v4002_v10 = vld [vmem:[%s18287_s21] sm:$0xff]  ;;  %v4003_v2 = vld [vmem:[%s18287_s21 + $0x8] sm:$0xff] }
0x1049   : > { %11460 = vmatprep.mubr.msk.f32.mxu1 %vm2254_vm6, %v3268_v31  ;;  %13762 = vrcp.f32 %v3259_v62  ;;  %v12486_v31 = vpack.c.bf16 %v3630_v0, %v3629_v3  ;;  %v3632_v62 = vld [vmem:[%s18279_s13 + $0x28] sm:$0xff]  ;;  %v15276_v3 = vld [vmem:[%s18289_s23] ss:$0 sm:$0xff] }
0x104a   : > { %11461 = vmatmul.mubr.msk.f32.vlgmr.msra.gmra.mrb[42].mxu1 %vm2254_vm6, %v3269_v15  ;;  %v13755_v52 = vpop.eup %13754  ;;  %12484 = vmatpush3.bf16.msra.mxu0 %v12483_v30  ;;  %v12524_v30 = vpack.c.bf16 %v4003_v2, %v4002_v10  ;;  %v15283_v0 = vld [vmem:[%s18290_s24] ss:$0 sm:$0xff] }
0x104b   : > { %12460 = vmatpush3.bf16.msra.mxu1 %v12459_v45  ;;  %v3256_v36 = vpop.xlane.xlu0 %3255  ;;  %v3271_v59 = vmul.f32 %v13755_v52, %v13739_v44  ;;  %12485 = vmatprep.subr.bf16.mxu0 %v18313_v27  ;;  %v3631_v45 = vld [vmem:[%s18279_s13 + $0x20] sm:$0xff]  ;;  %v3637_v52 = vld [vmem:[%s18279_s13 + $0x50] sm:$0xff] }
0x104c   : > { %13764 = vrcp.f32 %v3256_v36  ;;  %12461 = vmatprep.subr.bf16.mxu1 %v18313_v27  ;;  %v12489_v15 = vpack.c.bf16 %v3632_v62, %v3631_v45  ;;  %v12492_v36 = vpack.c.bf16 %v3634_v12, %v3633_v34  ;;  %5444 = vrot.lane.b32.xlu1 %v15276_v3, %s14089_s7  ;;  %v10198_v62 = vld [vmem:[%s18284_s18] ss:$0 sm:$0xff]  ;;  %v4004_v34 = vld [vmem:[%s18287_s21 + $0x10] sm:$0xff]  ;;  %v4005_v12 = vld [vmem:[%s18287_s21 + $0x18] sm:$0xff] }
0x104d   : > { %4942 = vrot.lane.b32.xlu0 %v15276_v3, %s14090_s12 }
0x104e   : > { %v13757_v42 = vpop.eup %13756  ;;  %12487 = vmatpush3.bf16.msra.mxu0 %v12486_v31 }
0x104f   : > { %12463 = vmatpush3.bf16.msra.mxu1 %v12462_v50  ;;  %v3270_v48 = vmul.f32 %v13757_v42, %v13743_v32  ;;  %v13759_v6 = vpop.eup %13758  ;;  %v3545_v32 = vld [vmem:[%s18407_s0 + $0x60] sm:$0xff]  ;;  %12488 = vmatprep.subr.bf16.mxu0 %v18313_v27  ;;  %v3638_v42 = vld [vmem:[%s18279_s13 + $0x58] sm:$0xff] }
0x1050   : > { %12464 = vmatprep.subr.bf16.mxu1 %v18313_v27  ;;  %v3273_v40 = vmul.f32 %v13759_v6, %v15055_v58  ;;  %v12474_v58 = vpack.c.bf16 %v3544_v60, %v3543_v46  ;;  %v12477_v37 = vpack.c.bf16 %v3546_v23, %v3545_v32  ;;  %v3635_v50 = vld [vmem:[%s18279_s13 + $0x40] sm:$0xff]  ;;  %v3642_v6 = vld [vmem:[%s18279_s13 + $0x78] sm:$0xff]  ;;  %4961 = vrot.lane.b32.xlu1 %v15283_v0, %s14090_s12  ;;  %s14097_s12 = smov 116  }
0x1051   : > { %11463 = vmatprep.mubr.msk.f32.mxu1 %vm2254_vm6, %v3270_v48  ;;  %v12495_v26 = vpack.c.bf16 %v3636_v35, %v3635_v50  ;;  %v12498_v48 = vpack.c.bf16 %v3638_v42, %v3637_v52  ;;  %v10194_v23 = vld [vmem:[%s18409_s8] ss:$0 sm:$0xff]  ;;  %5463 = vrot.lane.b32.xlu0 %v15283_v0, %s14089_s7  ;;  %s14091_s7 = smov 24   ;;  %s18369_s8 = smov 76  }
0x1052   : > { %v13761_v33 = vpop.eup %13760  ;;  %11464 = vmatmul.mubr.msk.f32.gmra.mrb[44].mxu1 %vm2254_vm6, %v3271_v59  ;;  %12490 = vmatpush3.bf16.msra.mxu0 %v12489_v15  ;;  %v3640_v59 = vld [vmem:[%s18279_s13 + $0x68] sm:$0xff]  ;;  %v14054_v52 = vld [vmem:[%s14298_s6] sm:$0xff] }
0x1053   : > { %12466 = vmatpush3.bf16.msra.mxu1 %v12465_v8  ;;  %v3272_v19 = vmul.f32 %v13761_v33, %v13747_v56  ;;  %v13763_v20 = vpop.eup %13762  ;;  %v3548_v56 = vld [vmem:[%s18407_s0 + $0x78] sm:$0xff]  ;;  %12491 = vmatprep.subr.bf16.mxu0 %v18313_v27  ;;  %v3639_v8 = vld [vmem:[%s18279_s13 + $0x60] sm:$0xff]  ;;  %v12504_v33 = vpack.c.bf16 %v3642_v6, %v3641_v63  ;;  %v2476_v42 = vadd.f32 %v14054_v52, %v14895_v5 }
0x1054   : > { %12467 = vmatprep.subr.bf16.mxu1 %v18313_v27  ;;  %v3275_v44 = vmul.f32 %v13763_v20, %v15060_v39  ;;  %v3547_v39 = vld [vmem:[%s18407_s0 + $0x70] sm:$0xff]  ;;  %v12501_v14 = vpack.c.bf16 %v3640_v59, %v3639_v8  ;;  %v14057_v5 = vld [vmem:[%s14298_s6 + $0x18] sm:$0xff]  ;;  %v14058_v6 = vld [vmem:[%s14298_s6 + $0x20] sm:$0xff]  ;;  %5946 = vrot.lane.b32.xlu1 %v15276_v3, %s14091_s7 }
0x1055   : > { %11466 = vmatprep.mubr.msk.f32.mxu1 %vm2254_vm6, %v3272_v19  ;;  %v12480_v47 = vpack.c.bf16 %v3548_v56, %v3547_v39  ;;  %v3805_v19 = vld [vmem:[%s18283_s17] sm:$0xff]  ;;  %v14056_v59 = vld [vmem:[%s14298_s6 + $0x10] sm:$0xff]  ;;  %v2479_v63 = vadd.f32 %v14057_v5, %v14897_v7  ;;  %v14061_v7 = vld [vmem:[%s14298_s6 + $0x38] sm:$0xff] }
0x1056   : > { %v13765_v25 = vpop.eup %13764  ;;  %11467 = vmatmul.mubr.msk.f32.gmra.mrb[46].mxu1 %vm2254_vm6, %v3273_v40  ;;  %12493 = vmatpush3.bf16.msra.mxu0 %v12492_v36  ;;  %v3807_v40 = vld [vmem:[%s18283_s17 + $0x10] sm:$0xff] }
0x1057   : > { %v3274_v41 = vmul.f32 %v13765_v25, %v13749_v29  ;;  %12469 = vmatpush3.bf16.msra.mxu1 %v12468_v38  ;;  %v3529_v29 = vadd.f32 %v10193_v17, %v15050_v21  ;;  %v3723_v21 = vld [vmem:[%s18281_s15 + $0x18] sm:$0xff]  ;;  %12494 = vmatprep.subr.bf16.mxu0 %v18313_v27  ;;  %v3806_v38 = vld [vmem:[%s18283_s17 + $0x8] sm:$0xff]  ;;  %v12516_v24 = vpack.c.bf16 %v3808_v43, %v3807_v40  ;;  %v14064_v43 = vld [vmem:[%s14298_s6 + $0x50] sm:$0xff] }
0x1058   : > { %12470 = vmatprep.subr.bf16.mxu1 %v18313_v27  ;;  %v12510_v57 = vpack.c.bf16 %v3723_v21, %v3722_v55  ;;  %v12513_v20 = vpack.c.bf16 %v3806_v38, %v3805_v19  ;;  %v3891_v55 = vld [vmem:[%s18285_s19 + $0x8] sm:$0xff]  ;;  %v14060_v19 = vld [vmem:[%s14298_s6 + $0x30] sm:$0xff]  ;;  %5965 = vrot.lane.b32.xlu1 %v15283_v0, %s14091_s7  ;;  %s14096_s7 = smov 124  }
0x1059   : > { %11469 = vmatprep.mubr.msk.f32.mxu1 %vm2254_vm6, %v3274_v41  ;;  %v3532_v51 = vmax.f32 %v3529_v29, 0.0  ;;  %v2482_v38 = vadd.f32 %v14060_v19, %v14907_v28 }
0x105a   : > { %11470 = vmatmul.mubr.msk.f32.gmra.mrb[48].mxu1 %vm2254_vm6, %v3275_v44  ;;  %12496 = vmatpush3.bf16.msra.mxu0 %v12495_v26  ;;  %v12528_v26 = vpack.c.bf16 %v4005_v12, %v4004_v34 }
0x105b   : > { %12472 = vmatpush3.bf16.msra.mxu1 %v12471_v49  ;;  %11539 = vmatprep.mubr.msk.f32.mxu1 %vm14084_vm1, %v18311_v1 }
0x105c   : > { %12473 = vmatprep.subr.bf16.mxu1 %v18313_v27  ;;  %12497 = vmatprep.subr.bf16.mxu0 %v18313_v27 }
0x105e   : > { %12499 = vmatpush3.bf16.msra.mxu0 %v12498_v48  ;;  %v14055_v48 = vld [vmem:[%s14298_s6 + $0x8] sm:$0xff] }
0x105f   : > { %12475 = vmatpush3.bf16.msra.mxu1 %v12474_v58  ;;  %12500 = vmatprep.subr.bf16.mxu0 %v18313_v27  ;;  %v2477_v8 = vadd.f32 %v14055_v48, %v14893_v13  ;;  %v14059_v13 = vld [vmem:[%s14298_s6 + $0x28] sm:$0xff] }
0x1060   : > { %12476 = vmatprep.subr.bf16.mxu1 %v18313_v27 }
0x1062   : > { %12502 = vmatpush3.bf16.msra.mxu0 %v12501_v14  ;;  %v2478_v14 = vadd.f32 %v14056_v59, %v14899_v11  ;;  %v2481_v11 = vadd.f32 %v14059_v13, %v14901_v16  ;;  %v14063_v16 = vld [vmem:[%s14298_s6 + $0x48] sm:$0xff] }
0x1063   : > { %12478 = vmatpush3.bf16.msra.mxu1 %v12477_v37  ;;  %12503 = vmatprep.subr.bf16.mxu0 %v18313_v27 }
0x1064   : > { %12479 = vmatprep.subr.bf16.mxu1 %v18313_v27 }
0x1066   : > { %12505 = vmatpush3.bf16.msra.mxu0 %v12504_v33  ;;  %v2480_v33 = vadd.f32 %v14058_v6, %v14903_v18  ;;  %v2483_v18 = vadd.f32 %v14061_v7, %v14905_v22  ;;  %v14065_v22 = vld [vmem:[%s14298_s6 + $0x58] sm:$0xff] }
0x1067   : > { %12481 = vmatpush3.bf16.msra.mxu1 %v12480_v47  ;;  %v10196_v47 = vld [vmem:[%s18282_s16] ss:$0 sm:$0xff] }
0x1068   : > { %12506 = vmatprep.subr.bf16.mxu1 %v18313_v27 }
0x106a   : > { %11540 = vmatmul.mubr.f32.vlgmr.msra.gmra.mrb[50].mxu1 %v3532_v51  ;;  %v3890_v51 = vld [vmem:[%s18285_s19] sm:$0xff] }
0x106b   : > { %12508 = vmatpush3.bf16.msra.mxu1 %v12507_v53  ;;  %11585 = vmatprep.mubr.msk.f32.mxu1 %vm14084_vm1, %v18311_v1  ;;  %v12519_v21 = vpack.c.bf16 %v3891_v55, %v3890_v51 }
0x106c   : > { %12509 = vmatprep.subr.bf16.mxu1 %v18313_v27 }
0x106f   : > { %12511 = vmatpush3.bf16.msra.mxu1 %v12510_v57  ;;  %v3892_v57 = vld [vmem:[%s18285_s19 + $0x10] sm:$0xff] }
0x1070   : > { %12512 = vmatprep.subr.bf16.mxu1 %v18313_v27 }
0x1072   : > { %11586 = vmatmul.mubr.msk.f32.vlgmr.msra.gmra.mrb[52].mxu1 %vm943_vm0, %v3434_v54  ;;  %v12522_v54 = vpack.c.bf16 %v3893_v61, %v3892_v57  ;;  %v10202_v61 = vld [vmem:[%s18288_s22] ss:$0 sm:$0xff] }
0x1073   : > { %11596 = vmatprep.mubr.msk.f32.mxu1 %vm14084_vm1, %v18311_v1  ;;  %12514 = vmatpush3.bf16.msra.mxu1 %v12513_v20  ;;  %v14062_v20 = vld [vmem:[%s14298_s6 + $0x40] sm:$0xff] }
0x1074   : > { %12515 = vmatprep.subr.bf16.mxu1 %v18313_v27 }
0x1077   : > { %12517 = vmatpush3.bf16.msra.mxu1 %v12516_v24 }
0x1078   : > { %12518 = vmatprep.subr.bf16.mxu1 %v18313_v27 }
0x111d   : > { %v15229_v25 = vpop.f32.mrb[42].mxu1 }
0x111e   : > { %v15231_v41 = vpop.f32.mrb[43].mxu1  ;;  %v3409_v28 = vadd.f32 %v14063_v16, %v15229_v25 }
0x111f   : > { %v3408_v40 = vadd.f32 %v14062_v20, %v15231_v41  ;;  %v14066_v41 = vld [vmem:[%s14298_s6 + $0x60] sm:$0xff] }
0x1125   : > { %v15233_v49 = vpop.f32.mrb[44].mxu1 }
0x1126   : > { %v15235_v44 = vpop.f32.mrb[45].mxu1 }
0x1127   : > { %v3410_v24 = vadd.f32 %v14064_v43, %v15235_v44 }
0x1129   : > { %v15237_v46 = vpop.f32.mrb[46].mxu1 }
0x112a   : > { %v15239_v60 = vpop.f32.mrb[47].mxu1 }
0x112d   : > { %v15241_v58 = vpop.f32.mrb[48].mxu1 }
0x112e   : > { %v15243_v32 = vpop.f32.mrb[49].mxu1 }
0x113d   : > { %v3622_v37 = vpop.f32.mrb[50].mxu1 }
0x113e   : > { %v3623_v39 = vadd.f32 %v10194_v23, %v3622_v37  ;;  %v11541_v56 = vpop.f32.mrb[51].mxu1  ;;  %v3411_v23 = vadd.f32 %v14065_v22, %v15233_v49  ;;  %v3412_v37 = vadd.f32 %v14066_v41, %v15239_v60 }
0x113f   : > { %v14068_v56 = vld [vmem:[%s14298_s6 + $0x70] sm:$0xff] }
0x1140   : > { %v3626_v17 = vmax.f32 %v3623_v39, 0.0  ;;  %v14067_v39 = vld [vmem:[%s14298_s6 + $0x68] sm:$0xff]  ;;  %v3414_v44 = vadd.f32 %v14068_v56, %v15243_v32  ;;  %v3978_v32 = vlaneseq }
0x1141   : > { %v3413_v25 = vadd.f32 %v14067_v39, %v15237_v46  ;;  %v14092_v46 = vmov 1966171168   ;;  %v15470_v39 = vpop.permute.xlu1 %5444 }
0x1142   : > { %11575 = vmatmul.mubr.f32.vlgmr.msra.gmra.mrb[60].mxu0 %v3626_v17  ;;  %v14069_v17 = vld [vmem:[%s14298_s6 + $0x78] sm:$0xff]  ;;  %v3976_v60 = vunpack.c.l.s4 %v14092_v46  ;;  %18416 = vst [vmem:[#allocation9_spill] sm:$0xff] %v15470_v39  ;;  %s14100_s6 = smov 92  }
0x1143   : > { %v3415_v49 = vadd.f32 %v14069_v17, %v15241_v58  ;;  %v10200_v58 = vld [vmem:[%s18286_s20] ss:$0 sm:$0xff] }
0x1145   : > { %v3800_v29 = vpop.f32.mrb[52].mxu1 }
0x1146   : > { %v3801_v9 = vadd.f32 %v10196_v47, %v3800_v29  ;;  %v11587_v4 = vpop.f32.mrb[53].mxu1  ;;  %v3977_v47 = vunpack.c.0.s8 %v3976_v60  ;;  %v3979_v29 = vshrl.u32 %v3978_v32, 7 }
0x1148   : > { %v3804_v53 = vmax.f32 %v3801_v9, 0.0  ;;  %v3980_v9 = vsub.s32 %v3977_v47, %v3979_v29 }
0x114a   : > { %11597 = vmatmul.mubr.msk.f32.vlgmr.msra.gmra.mrb[54].mxu1 %vm943_vm0, %v3804_v53 }
0x114b   : > { %11607 = vmatprep.mubr.msk.f32.mxu1 %vm14084_vm1, %v18311_v1  ;;  %12520 = vmatpush3.bf16.msra.mxu1 %v12519_v21 }
0x114c   : > { %12521 = vmatprep.subr.bf16.mxu1 %v18313_v27 }
0x114f   : > { %12523 = vmatpush3.bf16.msra.mxu1 %v12522_v54 }
0x1150   : > { %12525 = vmatprep.subr.bf16.mxu1 %v12524_v30 }
0x1215   : > { %v15287_v31 = vpop.f32.mrb[60].mxu0 }
0x1216   : > { %18410 = vst [vmem:[#allocation3_spill] sm:$0xff] %v15287_v31  ;;  %v11576_v45 = vpop.f32.mrb[61].mxu0 }
0x121d   : > { %v3885_v15 = vpop.f32.mrb[54].mxu1 }
0x121e   : > { %v3886_v36 = vadd.f32 %v10198_v62, %v3885_v15  ;;  %v11598_v50 = vpop.f32.mrb[55].mxu1 }
0x1220   : > { %v3889_v35 = vmax.f32 %v3886_v36, 0.0 }
0x1222   : > { %11608 = vmatmul.mubr.msk.f32.vlgmr.msra.gmra.mrb[56].mxu1 %vm943_vm0, %v3889_v35 }
0x1223   : > { %12527 = vmatpush3.bf16.msra.mxu1 %v12524_v30  ;;  %11618 = vmatprep.mubr.msk.f32.mxu1 %vm943_vm0, %v2476_v42 }
0x1224   : > { %12529 = vmatprep.subr.bf16.mxu1 %v12528_v26 }
0x1227   : > { %12531 = vmatpush3.bf16.msra.mxu1 %v12528_v26 }
0x1228   : > { %12540 = vmatprep.subr.bf16.mxu1 %v18313_v27 }
0x122a   : > { %11619 = vmatmul.mubr.msk.f32.vlgmr.msra.gmra.mrb[58].mxu1 %vm943_vm0, %v2477_v8 }
0x122b   : > { %11621 = vmatprep.mubr.msk.f32.mxu1 %vm943_vm0, %v2478_v14 }
0x122e   : > { %11622 = vmatmul.mubr.msk.f32.gmra.mrb[60].mxu1 %vm943_vm0, %v2479_v63 }
0x122f   : > { %11624 = vmatprep.mubr.msk.f32.mxu1 %vm943_vm0, %v2480_v33 }
0x1232   : > { %11625 = vmatmul.mubr.msk.f32.gmra.mrb[62].mxu1 %vm943_vm0, %v2481_v11 }
0x1233   : > { %11627 = vmatprep.mubr.msk.f32.mxu1 %vm943_vm0, %v2482_v38 }
0x1236   : > { %11628 = vmatmul.mubr.msk.f32.gmra.mrb[64].mxu1 %vm943_vm0, %v2483_v18 }
0x1237   : > { %11630 = vmatprep.mubr.msk.f32.mxu1 %vm943_vm0, %v3408_v40 }
0x123a   : > { %11631 = vmatmul.mubr.msk.f32.gmra.mrb[66].mxu1 %vm943_vm0, %v3409_v28 }
0x123b   : > { %11633 = vmatprep.mubr.msk.f32.mxu1 %vm943_vm0, %v3410_v24 }
0x123e   : > { %11634 = vmatmul.mubr.msk.f32.gmra.mrb[68].mxu1 %vm943_vm0, %v3411_v23 }
0x123f   : > { %11636 = vmatprep.mubr.msk.f32.mxu1 %vm943_vm0, %v3412_v37 }
0x1242   : > { %11637 = vmatmul.mubr.msk.f32.gmra.mrb[70].mxu1 %vm943_vm0, %v3413_v25  ;;  %v15480_v25 = vpop.permute.xlu1 %4961 }
0x1243   : > { %11639 = vmatprep.mubr.msk.f32.mxu1 %vm943_vm0, %v3414_v44  ;;  %18417 = vst [vmem:[#allocation10_spill] sm:$0xff] %v15480_v25  ;;  %v15492_v44 = vpop.permute.xlu0 %4942 }
0x1246   : > { %11640 = vmatmul.mubr.msk.f32.gmra.mrb[72].mxu1 %vm943_vm0, %v3415_v49  ;;  %v15486_v56 = vpop.permute.xlu1 %5946 }
0x1247   : > { %11690 = vmatprep.mubr.msk.f32.mxu1 %vm14084_vm1, %v18311_v1  ;;  %18418 = vst [vmem:[#allocation11_spill] sm:$0xff] %v15486_v56  ;;  %v15504_v49 = vpop.permute.xlu0 %5463 }
0x1248   : > { %18420 = vst [vmem:[#allocation13_spill] sm:$0xff] %v15504_v49 }
0x124a   : > { %v15498_v17 = vpop.permute.xlu1 %5965 }
0x124b   : > { %18419 = vst [vmem:[#allocation12_spill] sm:$0xff] %v15498_v17 }
0x12f5   : > { %v3970_v4 = vpop.f32.mrb[56].mxu1 }
0x12f6   : > { %v3971_v53 = vadd.f32 %v10200_v58, %v3970_v4  ;;  %v11609_v51 = vpop.f32.mrb[57].mxu1 }
0x12f8   : > { %v3981_v55 = vrot.slane %v3971_v53, %v3980_v9 }
0x12fa   : > { %v3982_v21 = vcombine.high %v3981_v55, %v3981_v55  ;;  %v3989_v57 = vrot.slane %v3981_v55, %v3980_v9 }
0x12fc   : > { %v3996_v54 = vrot.slane %v3982_v21, %v3980_v9  ;;  %4000 = vst.msk [vmem:[%s886_s5] sm:$0x1] %vm3999_vm9, %v3989_v57 }
0x12fd   : > { %v11620_v10 = vpop.f32.mrb[58].mxu1 }
0x12fe   : > { %4001 = vst.msk [vmem:[%s886_s5 + $0x1] sm:$0x1] %vm3999_vm9, %v3996_v54  ;;  %v15362_v2 = vadd.f32 %v11620_v10, %v10202_v61  ;;  %v4127_v30 = vpop.f32.mrb[59].mxu1  ;;  %s18507_s5 = smov 96  }
0x12ff   : > { %v15364_v3 = vadd.f32 %v10202_v61, %v4127_v30 }
0x1300   : > { %4624 = vrot.lane.b32.xlu1 %v15362_v2, %s14093_s3  ;;  %v4210_v16 = vsel %vm4206_vm10, %v15362_v2, 0.0 }
0x1301   : > { %v11623_v0 = vpop.f32.mrb[60].mxu1  ;;  %4622 = vrot.lane.b32.xlu0 %v15364_v3, %s14093_s3  ;;  %v4207_v40 = vsel %vm4206_vm10, %v15364_v3, 0.0 }
0x1302   : > { %v15370_v45 = vadd.f32 %v11623_v0, %v10202_v61  ;;  %v4137_v62 = vpop.f32.mrb[61].mxu1 }
0x1303   : > { %v15408_v28 = vadd.f32 %v10202_v61, %v4137_v62 }
0x1304   : > { %5126 = vrot.lane.b32.xlu1 %v15362_v2, %s18377_s1  ;;  %v4216_v24 = vsel %vm4206_vm10, %v15370_v45, 0.0 }
0x1305   : > { %v11626_v15 = vpop.f32.mrb[62].mxu1  ;;  %5626 = vrot.lane.b32.xlu0 %v15364_v3, %s18367_s2  ;;  %v4213_v43 = vsel %vm4206_vm10, %v15408_v28, 0.0 }
0x1306   : > { %v15376_v34 = vadd.f32 %v11626_v15, %v10202_v61  ;;  %v4147_v12 = vpop.f32.mrb[63].mxu1 }
0x1307   : > { %v15378_v36 = vadd.f32 %v10202_v61, %v4147_v12 }
0x1308   : > { %5628 = vrot.lane.b32.xlu1 %v15362_v2, %s18367_s2  ;;  %v4222_v23 = vsel %vm4206_vm10, %v15376_v34, 0.0 }
0x1309   : > { %v11629_v50 = vpop.f32.mrb[64].mxu1  ;;  %v4219_v22 = vsel %vm4206_vm10, %v15378_v36, 0.0 }
0x130a   : > { %v15382_v35 = vadd.f32 %v11629_v50, %v10202_v61  ;;  %v4157_v26 = vpop.f32.mrb[65].mxu1 }
0x130b   : > { %v15384_v52 = vadd.f32 %v10202_v61, %v4157_v26 }
0x130c   : > { %5124 = vrot.lane.b32.xlu1 %v15364_v3, %s18377_s1  ;;  %v4228_v37 = vsel %vm4206_vm10, %v15382_v35, 0.0 }
0x130d   : > { %v11632_v42 = vpop.f32.mrb[66].mxu1  ;;  %v4225_v41 = vsel %vm4206_vm10, %v15384_v52, 0.0 }
0x130e   : > { %v15388_v48 = vadd.f32 %v11632_v42, %v10202_v61  ;;  %v4167_v8 = vpop.f32.mrb[67].mxu1 }
0x130f   : > { %v15390_v59 = vadd.f32 %v10202_v61, %v4167_v8 }
0x1311   : > { %18411 = vst [vmem:[#allocation4_spill] sm:$0xff] %v15390_v59  ;;  %v11635_v14 = vpop.f32.mrb[68].mxu1 }
0x1312   : > { %v15392_v5 = vadd.f32 %v11635_v14, %v10202_v61  ;;  %v4177_v63 = vpop.f32.mrb[69].mxu1 }
0x1313   : > { %v15394_v6 = vadd.f32 %v10202_v61, %v4177_v63 }
0x1314   : > { %18412 = vst [vmem:[#allocation5_spill] sm:$0xff] %v15392_v5 }
0x1315   : > { %v11638_v33 = vpop.f32.mrb[70].mxu1 }
0x1316   : > { %v15396_v13 = vadd.f32 %v11638_v33, %v10202_v61  ;;  %v4187_v11 = vpop.f32.mrb[71].mxu1 }
0x1317   : > { %v15398_v19 = vadd.f32 %v10202_v61, %v4187_v11 }
0x1318   : > { %18413 = vst [vmem:[#allocation6_spill] sm:$0xff] %v15396_v13 }
0x1319   : > { %v11641_v38 = vpop.f32.mrb[72].mxu1 }
0x131a   : > { %v15400_v7 = vadd.f32 %v11641_v38, %v10202_v61  ;;  %v4197_v18 = vpop.f32.mrb[73].mxu1 }
0x131b   : > { %v15402_v20 = vadd.f32 %v10202_v61, %v4197_v18 }
0x131c   : > { %18414 = vst [vmem:[#allocation7_spill] sm:$0xff] %v15400_v7 }
0x131d   : > { %18415 = vst [vmem:[#allocation8_spill] sm:$0xff] %v15402_v20 }
0x1324   : > { %4208 = vadd.xlane.f32.xlu0 %v4207_v40 }
0x1330   : > { %4211 = vadd.xlane.f32.xlu1 %v4210_v16 }
0x133a   : > { %4626 = vrot.lane.b32.xlu0 %v15408_v28, %s14093_s3 }
0x133e   : > { %5128 = vrot.lane.b32.xlu0 %v15408_v28, %s18377_s1 }
0x1341   : > { %4628 = vrot.lane.b32.xlu1 %v15370_v45, %s14093_s3 }
0x1342   : > { %5630 = vrot.lane.b32.xlu0 %v15408_v28, %s18367_s2 }
0x1345   : > { %5130 = vrot.lane.b32.xlu1 %v15370_v45, %s18377_s1 }
0x1349   : > { %5632 = vrot.lane.b32.xlu1 %v15370_v45, %s18367_s2 }
0x1361   : > { %4214 = vadd.xlane.f32.xlu0 %v4213_v43 }
0x136d   : > { %4217 = vadd.xlane.f32.xlu1 %v4216_v24 }
0x1372   : > { %v4625_v46 = vpop.permute.xlu1 %4624 }
0x1373   : > { %v4623_v60 = vpop.permute.xlu0 %4622  ;;  %v4673_v12 = vsel %vm4206_vm10, %v4625_v46, 0.0 }
0x1374   : > { %v4670_v10 = vsel %vm4206_vm10, %v4623_v60, 0.0 }
0x1376   : > { %v5127_v32 = vpop.permute.xlu1 %5126 }
0x1377   : > { %4630 = vrot.lane.b32.xlu0 %v15378_v36, %s14093_s3  ;;  %v5627_v47 = vpop.permute.xlu0 %5626  ;;  %v5175_v61 = vsel %vm4206_vm10, %v5127_v32, 0.0 }
0x1378   : > { %v5674_v50 = vsel %vm4206_vm10, %v5627_v47, 0.0 }
0x137a   : > { %v5629_v29 = vpop.permute.xlu1 %5628 }
0x137b   : > { %5132 = vrot.lane.b32.xlu0 %v15378_v36, %s18377_s1  ;;  %v5677_v8 = vsel %vm4206_vm10, %v5629_v29, 0.0 }
0x137e   : > { %4632 = vrot.lane.b32.xlu1 %v15376_v34, %s14093_s3  ;;  %v5125_v9 = vpop.permute.xlu1 %5124 }
0x137f   : > { %5634 = vrot.lane.b32.xlu0 %v15378_v36, %s18367_s2  ;;  %v5172_v62 = vsel %vm4206_vm10, %v5125_v9, 0.0 }
0x1382   : > { %5134 = vrot.lane.b32.xlu1 %v15376_v34, %s18377_s1 }
0x1386   : > { %5636 = vrot.lane.b32.xlu1 %v15376_v34, %s18367_s2 }
0x139e   : > { %4220 = vadd.xlane.f32.xlu0 %v4219_v22 }
0x13aa   : > { %4223 = vadd.xlane.f32.xlu1 %v4222_v23 }
0x13b1   : > { %v15518_v58 = vpop.xlane.xlu0 %4208 }
0x13b4   : > { %4634 = vrot.lane.b32.xlu0 %v15384_v52, %s14093_s3 }
0x13b5   : > { %v4627_v4 = vpop.permute.xlu0 %4626 }
0x13b6   : > { %v4676_v14 = vsel %vm4206_vm10, %v4627_v4, 0.0 }
0x13b8   : > { %5136 = vrot.lane.b32.xlu0 %v15384_v52, %s18377_s1 }
0x13b9   : > { %v5129_v51 = vpop.permute.xlu0 %5128 }
0x13ba   : > { %v5178_v11 = vsel %vm4206_vm10, %v5129_v51, 0.0 }
0x13bb   : > { %4636 = vrot.lane.b32.xlu1 %v15382_v35, %s14093_s3 }
0x13bc   : > { %5638 = vrot.lane.b32.xlu0 %v15384_v52, %s18367_s2 }
0x13bd   : > { %v4212_v53 = vpop.xlane.xlu1 %4211  ;;  %v5631_v21 = vpop.permute.xlu0 %5630 }
0x13be   : > { %v5680_v16 = vsel %vm4206_vm10, %v5631_v21, 0.0  ;;  %v4257_v21 = vmul.f32 0.125, %v4212_v53 }
0x13bf   : > { %5138 = vrot.lane.b32.xlu1 %v15382_v35, %s18377_s1 }
0x13c1   : > { %v4629_v55 = vpop.permute.xlu1 %4628 }
0x13c2   : > { %v4679_v33 = vsel %vm4206_vm10, %v4629_v55, 0.0 }
0x13c3   : > { %5640 = vrot.lane.b32.xlu1 %v15382_v35, %s18367_s2 }
0x13c5   : > { %v5131_v57 = vpop.permute.xlu1 %5130 }
0x13c6   : > { %v5181_v40 = vsel %vm4206_vm10, %v5131_v57, 0.0 }
0x13c9   : > { %v5633_v30 = vpop.permute.xlu1 %5632 }
0x13ca   : > { %v5683_v24 = vsel %vm4206_vm10, %v5633_v30, 0.0  ;;  %v4256_v30 = vmul.f32 0.125, %v15518_v58 }
0x13db   : > { %4226 = vadd.xlane.f32.xlu0 %v4225_v41 }
0x13e7   : > { %4229 = vadd.xlane.f32.xlu1 %v4228_v37 }
0x13ee   : > { %v15521_v54 = vpop.xlane.xlu0 %4214 }
0x13f1   : > { %4638 = vrot.lane.b32.xlu0 %v15390_v59, %s14093_s3 }
0x13f2   : > { %v4631_v0 = vpop.permute.xlu0 %4630 }
0x13f3   : > { %v4682_v22 = vsel %vm4206_vm10, %v4631_v0, 0.0  ;;  %v15545_v0 = vsub.f32 %v15362_v2, %v4257_v21 }
0x13f5   : > { %5140 = vrot.lane.b32.xlu0 %v15390_v59, %s18377_s1  ;;  %v4289_v58 = vmul.f32 %v15545_v0, %v15545_v0 }
0x13f6   : > { %v5133_v26 = vpop.permute.xlu0 %5132 }
0x13f7   : > { %v5184_v46 = vsel %vm4206_vm10, %v5133_v26, 0.0  ;;  %v15550_v26 = vsub.f32 %v15364_v3, %v4256_v30 }
0x13f8   : > { %4640 = vrot.lane.b32.xlu1 %v15388_v48, %s14093_s3 }
0x13f9   : > { %5642 = vrot.lane.b32.xlu0 %v15390_v59, %s18367_s2 }
0x13fa   : > { %v4218_v15 = vpop.xlane.xlu1 %4217  ;;  %v5635_v63 = vpop.permute.xlu0 %5634 }
0x13fb   : > { %v5686_v47 = vsel %vm4206_vm10, %v5635_v63, 0.0  ;;  %v4258_v63 = vmul.f32 0.125, %v15521_v54 }
0x13fc   : > { %5142 = vrot.lane.b32.xlu1 %v15388_v48, %s18377_s1 }
0x13fd   : > { %4642 = vrot.lane.b32.xlu0 %v15394_v6, %s14093_s3 }
0x13fe   : > { %v4633_v42 = vpop.permute.xlu1 %4632 }
0x13ff   : > { %v4685_v37 = vsel %vm4206_vm10, %v4633_v42, 0.0  ;;  %v4259_v42 = vmul.f32 0.125, %v4218_v15  ;;  %v15564_v15 = vsub.f32 %v15408_v28, %v4258_v63 }
0x1400   : > { %5644 = vrot.lane.b32.xlu1 %v15388_v48, %s18367_s2 }
0x1401   : > { %5144 = vrot.lane.b32.xlu0 %v15394_v6, %s18377_s1 }
0x1402   : > { %v5135_v38 = vpop.permute.xlu1 %5134 }
0x1403   : > { %v5187_v32 = vsel %vm4206_vm10, %v5135_v38, 0.0  ;;  %v4288_v38 = vmul.f32 %v15550_v26, %v15550_v26 }
0x1404   : > { %4644 = vrot.lane.b32.xlu1 %v15392_v5, %s14093_s3 }
0x1405   : > { %5646 = vrot.lane.b32.xlu0 %v15394_v6, %s18367_s2 }
0x1406   : > { %v5637_v43 = vpop.permute.xlu1 %5636 }
0x1407   : > { %v5689_v9 = vsel %vm4206_vm10, %v5637_v43, 0.0 }
0x1408   : > { %5146 = vrot.lane.b32.xlu1 %v15392_v5, %s18377_s1 }
0x1409   : > { %4646 = vrot.lane.b32.xlu0 %v15398_v19, %s14093_s3 }
0x140c   : > { %5648 = vrot.lane.b32.xlu1 %v15392_v5, %s18367_s2 }
0x140d   : > { %5148 = vrot.lane.b32.xlu0 %v15398_v19, %s18377_s1 }
0x1410   : > { %4648 = vrot.lane.b32.xlu1 %v15396_v13, %s14093_s3 }
0x1411   : > { %5650 = vrot.lane.b32.xlu0 %v15398_v19, %s18367_s2 }
0x1414   : > { %5150 = vrot.lane.b32.xlu1 %v15396_v13, %s18377_s1 }
0x1415   : > { %4650 = vrot.lane.b32.xlu0 %v15402_v20, %s14093_s3 }
0x1418   : > { %5652 = vrot.lane.b32.xlu1 %v15396_v13, %s18367_s2 }
0x1419   : > { %5152 = vrot.lane.b32.xlu0 %v15402_v20, %s18377_s1 }
0x141c   : > { %4652 = vrot.lane.b32.xlu1 %v15400_v7, %s14093_s3 }
0x141d   : > { %5654 = vrot.lane.b32.xlu0 %v15402_v20, %s18367_s2 }
0x1420   : > { %5154 = vrot.lane.b32.xlu1 %v15400_v7, %s18377_s1 }
0x1424   : > { %5656 = vrot.lane.b32.xlu1 %v15400_v7, %s18367_s2 }
0x142b   : > { %v4221_v18 = vpop.xlane.xlu0 %4220 }
0x142c   : > { %v4260_v54 = vmul.f32 0.125, %v4221_v18 }
0x142f   : > { %v4635_v23 = vpop.permute.xlu0 %4634 }
0x1430   : > { %v4688_v4 = vsel %vm4206_vm10, %v4635_v23, 0.0  ;;  %v4290_v23 = vmul.f32 %v15564_v15, %v15564_v15 }
0x1433   : > { %v5137_v60 = vpop.permute.xlu0 %5136 }
0x1437   : > { %v4224_v41 = vpop.xlane.xlu1 %4223  ;;  %v5639_v51 = vpop.permute.xlu0 %5638 }
0x143b   : > { %v4637_v29 = vpop.permute.xlu1 %4636 }
0x143c   : > { %5176 = vadd.xlane.f32.xlu0 %v5175_v61  ;;  %v4691_v57 = vsel %vm4206_vm10, %v4637_v29, 0.0  ;;  %v5190_v61 = vsel %vm4206_vm10, %v5137_v60, 0.0  ;;  %v4310_v60 = vsel %vm4206_vm10, %v4290_v23, 0.0 }
0x143f   : > { %v5139_v55 = vpop.permute.xlu1 %5138 }
0x1440   : > { %4671 = vadd.xlane.f32.xlu0 %v4670_v10 }
0x1444   : > { %5173 = vadd.xlane.f32.xlu0 %v5172_v62  ;;  %v5193_v62 = vsel %vm4206_vm10, %v5139_v55, 0.0 }
0x1448   : > { %4674 = vadd.xlane.f32.xlu1 %v4673_v12  ;;  %5675 = vadd.xlane.f32.xlu0 %v5674_v50  ;;  %v5692_v12 = vsel %vm4206_vm10, %v5639_v51, 0.0  ;;  %v5641_v50 = vpop.permute.xlu1 %5640 }
0x144c   : > { %5678 = vadd.xlane.f32.xlu1 %v5677_v8  ;;  %4677 = vadd.xlane.f32.xlu0 %v4676_v14  ;;  %v5695_v8 = vsel %vm4206_vm10, %v5641_v50, 0.0 }
0x1450   : > { %4680 = vadd.xlane.f32.xlu1 %v4679_v33  ;;  %5179 = vadd.xlane.f32.xlu0 %v5178_v11  ;;  %v15558_v33 = vsub.f32 %v15370_v45, %v4259_v42  ;;  %v4307_v11 = vsel %vm4206_vm10, %v4289_v58, 0.0 }
0x1452   : > { %v4291_v43 = vmul.f32 %v15558_v33, %v15558_v33 }
0x1454   : > { %5182 = vadd.xlane.f32.xlu1 %v5181_v40  ;;  %5681 = vadd.xlane.f32.xlu0 %v5680_v16  ;;  %v4261_v40 = vmul.f32 0.125, %v4224_v41  ;;  %v4304_v16 = vsel %vm4206_vm10, %v4288_v38, 0.0 }
0x1458   : > { %5684 = vadd.xlane.f32.xlu1 %v5683_v24  ;;  %4683 = vadd.xlane.f32.xlu0 %v4682_v22  ;;  %v15570_v24 = vsub.f32 %v15376_v34, %v4261_v40  ;;  %v4313_v22 = vsel %vm4206_vm10, %v4291_v43, 0.0 }
0x145c   : > { %4686 = vadd.xlane.f32.xlu1 %v4685_v37  ;;  %5185 = vadd.xlane.f32.xlu0 %v5184_v46  ;;  %v15576_v46 = vsub.f32 %v15378_v36, %v4260_v54 }
0x1460   : > { %5188 = vadd.xlane.f32.xlu1 %v5187_v32  ;;  %5687 = vadd.xlane.f32.xlu0 %v5686_v47  ;;  %v4293_v32 = vmul.f32 %v15570_v24, %v15570_v24 }
0x1462   : > { %v4319_v29 = vsel %vm4206_vm10, %v4293_v32, 0.0 }
0x1464   : > { %5690 = vadd.xlane.f32.xlu1 %v5689_v9  ;;  %4689 = vadd.xlane.f32.xlu0 %v4688_v4  ;;  %v4292_v9 = vmul.f32 %v15576_v46, %v15576_v46 }
0x1466   : > { %v4316_v51 = vsel %vm4206_vm10, %v4292_v9, 0.0 }
0x1468   : > { %4692 = vadd.xlane.f32.xlu1 %v4691_v57  ;;  %5191 = vadd.xlane.f32.xlu0 %v5190_v61  ;;  %v4227_v10 = vpop.xlane.xlu0 %4226 }
0x1469   : > { %v4262_v18 = vmul.f32 0.125, %v4227_v10 }
0x146b   : > { %v15588_v4 = vsub.f32 %v15384_v52, %v4262_v18 }
0x146c   : > { %5194 = vadd.xlane.f32.xlu1 %v5193_v62  ;;  %5693 = vadd.xlane.f32.xlu0 %v5692_v12  ;;  %v4639_v53 = vpop.permute.xlu0 %4638 }
0x146d   : > { %v4694_v14 = vsel %vm4206_vm10, %v4639_v53, 0.0  ;;  %v4294_v61 = vmul.f32 %v15588_v4, %v15588_v4 }
0x146f   : > { %v4322_v62 = vsel %vm4206_vm10, %v4294_v61, 0.0 }
0x1470   : > { %5696 = vadd.xlane.f32.xlu1 %v5695_v8  ;;  %4695 = vadd.xlane.f32.xlu0 %v4694_v14  ;;  %v15593_v21 = vpop.permute.xlu0 %5140 }
0x1474   : > { %4308 = vadd.xlane.f32.xlu0 %v4307_v11  ;;  %v4230_v37 = vpop.xlane.xlu1 %4229  ;;  %v15598_v10 = vpop.permute.xlu0 %5642 }
0x1475   : > { %v4263_v41 = vmul.f32 0.125, %v4230_v37 }
0x1477   : > { %v15582_v47 = vsub.f32 %v15382_v35, %v4263_v41 }
0x1478   : > { %4305 = vadd.xlane.f32.xlu0 %v4304_v16  ;;  %v15600_v30 = vpop.permute.xlu1 %4640  ;;  %v15603_v12 = vpop.permute.xlu0 %4642 }
0x1479   : > { %v4295_v55 = vmul.f32 %v15582_v47, %v15582_v47 }
0x147b   : > { %v4325_v57 = vsel %vm4206_vm10, %v4295_v55, 0.0 }
0x147c   : > { %4314 = vadd.xlane.f32.xlu0 %v4313_v22  ;;  %v15605_v50 = vpop.permute.xlu1 %5142  ;;  %v15607_v53 = vpop.permute.xlu0 %5144 }
0x1480   : > { %4311 = vadd.xlane.f32.xlu0 %v4310_v60  ;;  %v15609_v42 = vpop.permute.xlu1 %5644  ;;  %v15611_v8 = vpop.permute.xlu0 %5646 }
0x1484   : > { %4320 = vadd.xlane.f32.xlu0 %v4319_v29  ;;  %v15613_v14 = vpop.permute.xlu1 %4644  ;;  %v15615_v58 = vpop.permute.xlu0 %4646 }
0x1488   : > { %4317 = vadd.xlane.f32.xlu0 %v4316_v51  ;;  %v15617_v63 = vpop.permute.xlu1 %5146  ;;  %v15619_v11 = vpop.permute.xlu0 %5148 }
0x148c   : > { %4326 = vadd.xlane.f32.xlu0 %v4325_v57  ;;  %v15621_v38 = vpop.permute.xlu1 %5648  ;;  %v15623_v40 = vpop.permute.xlu0 %5650 }
0x1490   : > { %4323 = vadd.xlane.f32.xlu0 %v4322_v62  ;;  %v15625_v16 = vpop.permute.xlu1 %4648  ;;  %v15627_v43 = vpop.permute.xlu0 %4650 }
0x1494   : > { %v15629_v54 = vpop.permute.xlu1 %5150  ;;  %v15631_v22 = vpop.permute.xlu0 %5152 }
0x1498   : > { %v15633_v23 = vpop.permute.xlu1 %5652  ;;  %v15635_v37 = vpop.permute.xlu0 %5654 }
0x149c   : > { %v15637_v41 = vpop.permute.xlu1 %4652 }
0x14a0   : > { %v15639_v32 = vpop.permute.xlu1 %5154 }
0x14a4   : > { %v15644_v51 = vpop.permute.xlu1 %5656 }
0x14c9   : > { %v5177_v60 = vpop.xlane.xlu0 %5176 }
0x14ca   : > { %v5221_v61 = vmul.f32 0.125, %v5177_v60 }
0x14cd   : > { %v4672_v18 = vpop.xlane.xlu0 %4671 }
0x14ce   : > { %v4718_v29 = vmul.f32 0.125, %v4672_v18 }
0x14d0   : > { %v15642_v9 = vsub.f32 %v15364_v3, %v4718_v29  ;;  %v15656_v29 = vsub.f32 %v15362_v2, %v5221_v61 }
0x14d1   : > { %v5174_v55 = vpop.xlane.xlu0 %5173 }
0x14d2   : > { %18421 = vst [vmem:[#allocation14_spill] sm:$0xff] %v15642_v9  ;;  %v4750_v57 = vmul.f32 %v15642_v9, %v15642_v9  ;;  %18423 = vst [vmem:[#allocation16_spill] sm:$0xff] %v15656_v29  ;;  %v5253_v9 = vmul.f32 %v15656_v29, %v15656_v29 }
0x14d4   : > { %4782 = vrot.lane.b32.xlu0 %v4750_v57, %s14093_s3 }
0x14d5   : > { %v4675_v62 = vpop.xlane.xlu1 %4674  ;;  %v5676_v1 = vpop.xlane.xlu0 %5675 }
0x14d6   : > { %v4719_v27 = vmul.f32 0.125, %v4675_v62  ;;  %v5722_v31 = vmul.f32 0.125, %v5676_v1 }
0x14d8   : > { %v15650_v17 = vsub.f32 %v15362_v2, %v4719_v27  ;;  %v15653_v18 = vsub.f32 %v15364_v3, %v5722_v31  ;;  %v5220_v27 = vmul.f32 0.125, %v5174_v55 }
0x14d9   : > { %v5679_v56 = vpop.xlane.xlu1 %5678  ;;  %v4678_v49 = vpop.xlane.xlu0 %4677 }
0x14da   : > { %18422 = vst [vmem:[#allocation15_spill] sm:$0xff] %v15653_v18  ;;  %v4751_v39 = vmul.f32 %v15650_v17, %v15650_v17  ;;  %v5754_v60 = vmul.f32 %v15653_v18, %v15653_v18  ;;  %v5723_v57 = vmul.f32 0.125, %v5679_v56  ;;  %v4720_v62 = vmul.f32 0.125, %v4678_v49 }
0x14dc   : > { %v15663_v1 = vsub.f32 %v15408_v28, %v4720_v62  ;;  %4784 = vrot.lane.b32.xlu1 %v4751_v39, %s14093_s3  ;;  %5786 = vrot.lane.b32.xlu0 %v5754_v60, %s18367_s2  ;;  %v15670_v7 = vsub.f32 %v15362_v2, %v5723_v57  ;;  %v15680_v39 = vsub.f32 %v15364_v3, %v5220_v27 }
0x14dd   : > { %v4681_v31 = vpop.xlane.xlu1 %4680  ;;  %v5180_v61 = vpop.xlane.xlu0 %5179 }
0x14de   : > { %18424 = vst [vmem:[#allocation17_spill] sm:$0xff] %v15663_v1  ;;  %18425 = vst [vmem:[#allocation18_spill] sm:$0xff] %v15670_v7  ;;  %v4752_v56 = vmul.f32 %v15663_v1, %v15663_v1  ;;  %v5222_v49 = vmul.f32 0.125, %v5180_v61  ;;  %v5755_v2 = vmul.f32 %v15670_v7, %v15670_v7  ;;  %v4721_v57 = vmul.f32 0.125, %v4681_v31 }
0x14df   : > { %18427 = vst [vmem:[#allocation20_spill] sm:$0xff] %v15680_v39 }
0x14e0   : > { %v15675_v62 = vsub.f32 %v15408_v28, %v5222_v49  ;;  %5286 = vrot.lane.b32.xlu1 %v5253_v9, %s18377_s1  ;;  %4786 = vrot.lane.b32.xlu0 %v4752_v56, %s14093_s3  ;;  %v5252_v56 = vmul.f32 %v15680_v39, %v15680_v39  ;;  %v15694_v7 = vsub.f32 %v15370_v45, %v4721_v57 }
0x14e1   : > { %v5183_v55 = vpop.xlane.xlu1 %5182  ;;  %v5682_v60 = vpop.xlane.xlu0 %5681 }
0x14e2   : > { %18426 = vst [vmem:[#allocation19_spill] sm:$0xff] %v15675_v62  ;;  %v5254_v1 = vmul.f32 %v15675_v62, %v15675_v62  ;;  %v5724_v61 = vmul.f32 0.125, %v5682_v60  ;;  %v5223_v9 = vmul.f32 0.125, %v5183_v55  ;;  %18429 = vst [vmem:[#allocation22_spill] sm:$0xff] %v15694_v7  ;;  %v4753_v57 = vmul.f32 %v15694_v7, %v15694_v7 }
0x14e4   : > { %v15687_v49 = vsub.f32 %v15408_v28, %v5724_v61  ;;  %5788 = vrot.lane.b32.xlu1 %v5755_v2, %s18367_s2  ;;  %5288 = vrot.lane.b32.xlu0 %v5254_v1, %s18377_s1  ;;  %v15704_v1 = vsub.f32 %v15370_v45, %v5223_v9 }
0x14e5   : > { %v5685_v3 = vpop.xlane.xlu1 %5684  ;;  %v4684_v27 = vpop.xlane.xlu0 %4683 }
0x14e6   : > { %18428 = vst [vmem:[#allocation21_spill] sm:$0xff] %v15687_v49  ;;  %v5756_v31 = vmul.f32 %v15687_v49, %v15687_v49  ;;  %v4722_v60 = vmul.f32 0.125, %v4684_v27  ;;  %18431 = vst [vmem:[#allocation24_spill] sm:$0xff] %v15704_v1  ;;  %v5725_v61 = vmul.f32 0.125, %v5685_v3  ;;  %v5255_v9 = vmul.f32 %v15704_v1, %v15704_v1 }
0x14e8   : > { %v15699_v28 = vsub.f32 %v15378_v36, %v4722_v60  ;;  %5284 = vrot.lane.b32.xlu1 %v5252_v56, %s18377_s1  ;;  %5790 = vrot.lane.b32.xlu0 %v5756_v31, %s18367_s2  ;;  %v15718_v62 = vsub.f32 %v15370_v45, %v5725_v61 }
0x14e9   : > { %v4687_v55 = vpop.xlane.xlu1 %4686  ;;  %v5186_v2 = vpop.xlane.xlu0 %5185 }
0x14ea   : > { %18430 = vst [vmem:[#allocation23_spill] sm:$0xff] %v15699_v28  ;;  %v4754_v49 = vmul.f32 %v15699_v28, %v15699_v28  ;;  %v5224_v27 = vmul.f32 0.125, %v5186_v2  ;;  %18433 = vst [vmem:[#allocation26_spill] sm:$0xff] %v15718_v62  ;;  %v4723_v3 = vmul.f32 0.125, %v4687_v55  ;;  %v5757_v7 = vmul.f32 %v15718_v62, %v15718_v62 }
0x14ec   : > { %v15711_v60 = vsub.f32 %v15378_v36, %v5224_v27  ;;  %4788 = vrot.lane.b32.xlu1 %v4753_v57, %s14093_s3  ;;  %4790 = vrot.lane.b32.xlu0 %v4754_v49, %s14093_s3  ;;  %v15730_v45 = vsub.f32 %v15376_v34, %v4723_v3 }
0x14ed   : > { %v5189_v56 = vpop.xlane.xlu1 %5188  ;;  %v5688_v31 = vpop.xlane.xlu0 %5687 }
0x14ee   : > { %18432 = vst [vmem:[#allocation25_spill] sm:$0xff] %v15711_v60  ;;  %v5256_v28 = vmul.f32 %v15711_v60, %v15711_v60  ;;  %v5726_v2 = vmul.f32 0.125, %v5688_v31  ;;  %v5225_v49 = vmul.f32 0.125, %v5189_v56  ;;  %18435 = vst [vmem:[#allocation28_spill] sm:$0xff] %v15730_v45  ;;  %v4755_v31 = vmul.f32 %v15730_v45, %v15730_v45 }
0x14f0   : > { %v15723_v27 = vsub.f32 %v15378_v36, %v5726_v2  ;;  %5290 = vrot.lane.b32.xlu1 %v5255_v9, %s18377_s1  ;;  %5292 = vrot.lane.b32.xlu0 %v5256_v28, %s18377_s1  ;;  %v15740_v28 = vsub.f32 %v15376_v34, %v5225_v49 }
0x14f1   : > { %v5691_v57 = vpop.xlane.xlu1 %5690  ;;  %v4690_v1 = vpop.xlane.xlu0 %4689 }
0x14f2   : > { %18434 = vst [vmem:[#allocation27_spill] sm:$0xff] %v15723_v27  ;;  %v5758_v55 = vmul.f32 %v15723_v27, %v15723_v27  ;;  %v4724_v61 = vmul.f32 0.125, %v4690_v1  ;;  %18437 = vst [vmem:[#allocation30_spill] sm:$0xff] %v15740_v28  ;;  %v5727_v3 = vmul.f32 0.125, %v5691_v57 }
0x14f4   : > { %v15735_v36 = vsub.f32 %v15384_v52, %v4724_v61  ;;  %5792 = vrot.lane.b32.xlu1 %v5757_v7, %s18367_s2  ;;  %5794 = vrot.lane.b32.xlu0 %v5758_v55, %s18367_s2  ;;  %v5257_v7 = vmul.f32 %v15740_v28, %v15740_v28  ;;  %v15754_v27 = vsub.f32 %v15376_v34, %v5727_v3 }
0x14f5   : > { %v4693_v9 = vpop.xlane.xlu1 %4692  ;;  %v5192_v56 = vpop.xlane.xlu0 %5191 }
0x14f6   : > { %18436 = vst [vmem:[#allocation29_spill] sm:$0xff] %v15735_v36  ;;  %v4756_v2 = vmul.f32 %v15735_v36, %v15735_v36  ;;  %v5226_v1 = vmul.f32 0.125, %v5192_v56  ;;  %18439 = vst [vmem:[#allocation32_spill] sm:$0xff] %v15754_v27  ;;  %v4725_v57 = vmul.f32 0.125, %v4693_v9 }
0x14f8   : > { %v15747_v61 = vsub.f32 %v15384_v52, %v5226_v1  ;;  %4792 = vrot.lane.b32.xlu1 %v4755_v31, %s14093_s3  ;;  %4794 = vrot.lane.b32.xlu0 %v4756_v2, %s14093_s3  ;;  %v5759_v31 = vmul.f32 %v15754_v27, %v15754_v27  ;;  %v15766_v2 = vsub.f32 %v15382_v35, %v4725_v57 }
0x14f9   : > { %v5195_v49 = vpop.xlane.xlu1 %5194  ;;  %v5694_v55 = vpop.xlane.xlu0 %5693 }
0x14fa   : > { %18438 = vst [vmem:[#allocation31_spill] sm:$0xff] %v15747_v61  ;;  %v5258_v36 = vmul.f32 %v15747_v61, %v15747_v61  ;;  %v5728_v56 = vmul.f32 0.125, %v5694_v55  ;;  %18441 = vst [vmem:[#allocation34_spill] sm:$0xff] %v15766_v2  ;;  %v5227_v34 = vmul.f32 0.125, %v5195_v49 }
0x14fc   : > { %v15759_v1 = vsub.f32 %v15384_v52, %v5728_v56  ;;  %5294 = vrot.lane.b32.xlu1 %v5257_v7, %s18377_s1  ;;  %5296 = vrot.lane.b32.xlu0 %v5258_v36, %s18377_s1  ;;  %v4757_v52 = vmul.f32 %v15766_v2, %v15766_v2  ;;  %v15775_v36 = vsub.f32 %v15382_v35, %v5227_v34 }
0x14fd   : > { %v5697_v3 = vpop.xlane.xlu1 %5696  ;;  %v15787_v56 = vpop.xlane.xlu0 %4695 }
0x14fe   : > { %18440 = vst [vmem:[#allocation33_spill] sm:$0xff] %v15759_v1  ;;  %v5760_v9 = vmul.f32 %v15759_v1, %v15759_v1  ;;  %18442 = vst [vmem:[#allocation35_spill] sm:$0xff] %v15775_v36  ;;  %v5729_v7 = vmul.f32 0.125, %v5697_v3  ;;  %v5259_v49 = vmul.f32 %v15775_v36, %v15775_v36 }
0x1500   : > { %5796 = vrot.lane.b32.xlu1 %v5759_v31, %s18367_s2  ;;  %5798 = vrot.lane.b32.xlu0 %v5760_v9, %s18367_s2  ;;  %v15781_v55 = vsub.f32 %v15382_v35, %v5729_v7 }
0x1501   : > { %v15789_v31 = vpop.xlane.xlu0 %4308 }
0x1502   : > { %18443 = vst [vmem:[#allocation36_spill] sm:$0xff] %v15781_v55  ;;  %v5761_v57 = vmul.f32 %v15781_v55, %v15781_v55 }
0x1504   : > { %4796 = vrot.lane.b32.xlu1 %v4757_v52, %s14093_s3 }
0x1505   : > { %v15791_v34 = vpop.xlane.xlu0 %4305 }
0x1508   : > { %5298 = vrot.lane.b32.xlu1 %v5259_v49, %s18377_s1 }
0x1509   : > { %v15793_v9 = vpop.xlane.xlu0 %4314 }
0x150c   : > { %5800 = vrot.lane.b32.xlu1 %v5761_v57, %s18367_s2 }
0x150d   : > { %v15795_v3 = vpop.xlane.xlu0 %4311 }
0x1511   : > { %v15797_v52 = vpop.xlane.xlu0 %4320 }
0x1515   : > { %v15799_v35 = vpop.xlane.xlu0 %4317 }
0x1519   : > { %v15801_v7 = vpop.xlane.xlu0 %4326 }
0x151d   : > { %v15803_v49 = vpop.xlane.xlu0 %4323 }
0x1546   : > { %v4783_v55 = vpop.permute.xlu0 %4782 }
0x1547   : > { %v4830_v39 = vsel %vm4206_vm10, %v4783_v55, 0.0 }
0x154e   : > { %v4785_v57 = vpop.permute.xlu1 %4784  ;;  %v5787_v36 = vpop.permute.xlu0 %5786 }
0x154f   : > { %v4833_v1 = vsel %vm4206_vm10, %v4785_v57, 0.0 }
0x1550   : > { %4834 = vadd.xlane.f32.xlu0 %v4833_v1 }
0x1552   : > { %v5287_v2 = vpop.permute.xlu1 %5286  ;;  %v4787_v61 = vpop.permute.xlu0 %4786 }
0x1553   : > { %v5335_v27 = vsel %vm4206_vm10, %v5287_v2, 0.0  ;;  %v5834_v2 = vsel %vm4206_vm10, %v5787_v36, 0.0 }
0x1554   : > { %5336 = vadd.xlane.f32.xlu1 %v5335_v27 }
0x1556   : > { %v5789_v28 = vpop.permute.xlu1 %5788  ;;  %v5289_v45 = vpop.permute.xlu0 %5288 }
0x1557   : > { %v5837_v60 = vsel %vm4206_vm10, %v5789_v28, 0.0 }
0x1558   : > { %5838 = vadd.xlane.f32.xlu1 %v5837_v60  ;;  %v5338_v60 = vsel %vm4206_vm10, %v5289_v45, 0.0 }
0x155a   : > { %v5285_v62 = vpop.permute.xlu1 %5284  ;;  %v5791_v18 = vpop.permute.xlu0 %5790 }
0x155b   : > { %v5332_v29 = vsel %vm4206_vm10, %v5285_v62, 0.0 }
0x155c   : > { %5333 = vadd.xlane.f32.xlu0 %v5332_v29  ;;  %4831 = vadd.xlane.f32.xlu1 %v4830_v39  ;;  %v5840_v39 = vsel %vm4206_vm10, %v5791_v18, 0.0 }
0x155e   : > { %v4789_v57 = vpop.permute.xlu1 %4788  ;;  %v4791_v1 = vpop.permute.xlu0 %4790 }
0x155f   : > { %v4839_v20 = vsel %vm4206_vm10, %v4789_v57, 0.0 }
0x1560   : > { %4840 = vadd.xlane.f32.xlu1 %v4839_v20  ;;  %5835 = vadd.xlane.f32.xlu0 %v5834_v2  ;;  %v4836_v20 = vsel %vm4206_vm10, %v4787_v61, 0.0 }
0x1562   : > { %v5291_v27 = vpop.permute.xlu1 %5290  ;;  %v5293_v25 = vpop.permute.xlu0 %5292 }
0x1563   : > { %v5341_v28 = vsel %vm4206_vm10, %v5291_v27, 0.0  ;;  %v5344_v36 = vsel %vm4206_vm10, %v5293_v25, 0.0 }
0x1564   : > { %5342 = vadd.xlane.f32.xlu1 %v5341_v28  ;;  %5339 = vadd.xlane.f32.xlu0 %v5338_v60 }
0x1566   : > { %v5793_v62 = vpop.permute.xlu1 %5792  ;;  %v5795_v55 = vpop.permute.xlu0 %5794 }
0x1567   : > { %v5843_v29 = vsel %vm4206_vm10, %v5793_v62, 0.0  ;;  %v5846_v27 = vsel %vm4206_vm10, %v5795_v55, 0.0  ;;  %v5196_v62 = vsel %vm4206_vm10, %v15593_v21, 0.0  ;;  %v4842_v55 = vsel %vm4206_vm10, %v4791_v1, 0.0 }
0x1568   : > { %5844 = vadd.xlane.f32.xlu1 %v5843_v29  ;;  %5841 = vadd.xlane.f32.xlu0 %v5840_v39  ;;  %v5199_v29 = vsel %vm4206_vm10, %v15605_v50, 0.0  ;;  %v5698_v50 = vsel %vm4206_vm10, %v15598_v10, 0.0  ;;  %v4697_v10 = vsel %vm4206_vm10, %v15600_v30, 0.0  ;;  %v6179_v30 = vld [vmem:[%s18291_s25 + $0x8] sm:$0xff] }
0x156a   : > { %v4793_v57 = vpop.permute.xlu1 %4792  ;;  %v4795_v28 = vpop.permute.xlu0 %4794 }
0x156b   : > { %v4845_v45 = vsel %vm4206_vm10, %v4793_v57, 0.0 }
0x156c   : > { %4837 = vadd.xlane.f32.xlu1 %v4836_v20  ;;  %5345 = vadd.xlane.f32.xlu0 %v5344_v36 }
0x156e   : > { %v5295_v2 = vpop.permute.xlu1 %5294  ;;  %v5297_v61 = vpop.permute.xlu0 %5296 }
0x156f   : > { %v5347_v18 = vsel %vm4206_vm10, %v5295_v2, 0.0  ;;  %v5350_v57 = vsel %vm4206_vm10, %v5297_v61, 0.0  ;;  %v5704_v61 = vsel %vm4206_vm10, %v15611_v8, 0.0  ;;  %v4703_v8 = vsel %vm4206_vm10, %v15613_v14, 0.0 }
0x1570   : > { %4846 = vadd.xlane.f32.xlu1 %v4845_v45  ;;  %5847 = vadd.xlane.f32.xlu0 %v5846_v27  ;;  %v5710_v14 = vsel %vm4206_vm10, %v15623_v40, 0.0  ;;  %v5214_v40 = vsel %vm4206_vm10, %v15631_v22, 0.0  ;;  %v4237_v22 = vsel %vm4206_vm10, %v15394_v6, 0.0 }
0x1572   : > { %v5797_v60 = vpop.permute.xlu1 %5796  ;;  %v5799_v20 = vpop.permute.xlu0 %5798 }
0x1573   : > { %v5849_v25 = vsel %vm4206_vm10, %v5797_v60, 0.0  ;;  %v5852_v2 = vsel %vm4206_vm10, %v5799_v20, 0.0  ;;  %v4700_v60 = vsel %vm4206_vm10, %v15603_v12, 0.0  ;;  %v5701_v12 = vsel %vm4206_vm10, %v15609_v42, 0.0 }
0x1574   : > { %5348 = vadd.xlane.f32.xlu1 %v5347_v18  ;;  %5197 = vadd.xlane.f32.xlu0 %v5196_v62  ;;  %v4848_v18 = vsel %vm4206_vm10, %v4795_v28, 0.0  ;;  %v5202_v62 = vsel %vm4206_vm10, %v15607_v53, 0.0  ;;  %v6178_v53 = vld [vmem:[%s18291_s25] sm:$0xff]  ;;  %v5208_v42 = vsel %vm4206_vm10, %v15619_v11, 0.0  ;;  %v18444_v11 = vmov 0.0|0.0  }
0x1575   : > { %v12532_v28 = vpack.c.bf16 %v6179_v30, %v6178_v53  ;;  %v4712_v20 = vsel %vm4206_vm10, %v15627_v43, 0.0  ;;  %v4231_v43 = vsel %vm4206_vm10, %v15390_v59, 0.0 }
0x1576   : > { %v4797_v39 = vpop.permute.xlu1 %4796 }
0x1577   : > { %v4851_v21 = vsel %vm4206_vm10, %v4797_v39, 0.0  ;;  %12533 = vmatprep.subr.bf16.mxu0 %v12532_v28 }
0x1578   : > { %5850 = vadd.xlane.f32.xlu1 %v5849_v25  ;;  %5200 = vadd.xlane.f32.xlu0 %v5199_v29  ;;  %v4706_v25 = vsel %vm4206_vm10, %v15615_v58, 0.0  ;;  %v6180_v58 = vld [vmem:[%s18291_s25 + $0x10] sm:$0xff]  ;;  %v6181_v29 = vld [vmem:[%s18291_s25 + $0x18] sm:$0xff] }
0x1579   : > { %12535 = vmatpush3.bf16.msra.mxu0 %v12532_v28  ;;  %v12536_v39 = vpack.c.bf16 %v6181_v29, %v6180_v58  ;;  %v4359_v58 = vmul.f32 0.125, %v15801_v7 }
0x157a   : > { %v5299_v36 = vpop.permute.xlu1 %5298 }
0x157b   : > { %v5353_v45 = vsel %vm4206_vm10, %v5299_v36, 0.0  ;;  %12537 = vmatprep.subr.bf16.mxu0 %v12536_v39  ;;  %v5211_v36 = vsel %vm4206_vm10, %v15629_v54, 0.0  ;;  %v5217_v54 = vsel %vm4206_vm10, %v15639_v32, 0.0  ;;  %v4726_v32 = vmul.f32 0.125, %v15787_v56 }
0x157c   : > { %4843 = vadd.xlane.f32.xlu1 %v4842_v55  ;;  %5351 = vadd.xlane.f32.xlu0 %v5350_v57  ;;  %v5205_v55 = vsel %vm4206_vm10, %v15617_v63, 0.0  ;;  %v5707_v57 = vsel %vm4206_vm10, %v15621_v38, 0.0  ;;  %v4709_v63 = vsel %vm4206_vm10, %v15625_v16, 0.0  ;;  %v5713_v38 = vsel %vm4206_vm10, %v15633_v23, 0.0 }
0x157d   : > { %12539 = vmatpush3.bf16.msra.mxu0 %v12536_v39  ;;  %v4715_v16 = vsel %vm4206_vm10, %v15637_v41, 0.0  ;;  %v5719_v23 = vsel %vm4206_vm10, %v15644_v51, 0.0  ;;  %v4234_v41 = vsel %vm4206_vm10, %v15388_v48, 0.0  ;;  %v4246_v51 = vsel %vm4206_vm10, %v15396_v13, 0.0 }
0x157e   : > { %v5801_v27 = vpop.permute.xlu1 %5800  ;;  %12556 = vmatprep.subr.bf16.mxu0 %v18444_v11 }
0x157f   : > { %v5855_v1 = vsel %vm4206_vm10, %v5801_v27, 0.0 }
0x1580   : > { %4852 = vadd.xlane.f32.xlu1 %v4851_v21  ;;  %5853 = vadd.xlane.f32.xlu0 %v5852_v2  ;;  %v5716_v21 = vsel %vm4206_vm10, %v15635_v37, 0.0  ;;  %v4243_v37 = vsel %vm4206_vm10, %v15398_v19, 0.0  ;;  %v4353_v2 = vmul.f32 0.125, %v15789_v31 }
0x1582   : > { %v4369_v27 = vadd.f32 1e-06, %v4353_v2 }
0x1584   : > { %5354 = vadd.xlane.f32.xlu1 %v5353_v45  ;;  %5699 = vadd.xlane.f32.xlu0 %v5698_v50  ;;  %v4240_v45 = vsel %vm4206_vm10, %v15392_v5, 0.0  ;;  %v4352_v50 = vmul.f32 0.125, %v15791_v34  ;;  %13766 = vrsqrt.f32 %v4369_v27  ;;  %v4357_v34 = vmul.f32 0.125, %v15797_v52 }
0x1585   : > { %v4358_v52 = vmul.f32 0.125, %v15803_v49  ;;  %v15929_v49 = vld [vmem:[%s18290_s24] ss:$0 sm:$0xff] }
0x1586   : > { %v4368_v31 = vadd.f32 1e-06, %v4352_v50 }
0x1588   : > { %5856 = vadd.xlane.f32.xlu1 %v5855_v1  ;;  %4701 = vadd.xlane.f32.xlu0 %v4700_v60  ;;  %v4355_v1 = vmul.f32 0.125, %v15793_v9  ;;  %v15905_v60 = vsub.f32 %v15390_v59, %v4726_v32  ;;  %v4356_v9 = vmul.f32 0.125, %v15799_v35  ;;  %13768 = vrsqrt.f32 %v4368_v31  ;;  %v15919_v35 = vld [vmem:[%s18289_s23] ss:$0 sm:$0xff] }
0x158a   : > { %18445 = vst [vmem:[#allocation37_spill] sm:$0xff] %v15905_v60  ;;  %v4758_v56 = vmul.f32 %v15905_v60, %v15905_v60 }
0x158c   : > { %4849 = vadd.xlane.f32.xlu1 %v4848_v18  ;;  %5203 = vadd.xlane.f32.xlu0 %v5202_v62  ;;  %v4354_v18 = vmul.f32 0.125, %v15795_v3  ;;  %v4371_v62 = vadd.f32 1e-06, %v4355_v1 }
0x158e   : > { %13770 = vrsqrt.f32 %v4371_v62  ;;  %v13767_v3 = vpop.eup %13766 }
0x158f   : > { %v4401_v53 = vmul.f32 %v13767_v3, %v15545_v0 }
0x1590   : > { %4698 = vadd.xlane.f32.xlu1 %v4697_v10  ;;  %5705 = vadd.xlane.f32.xlu0 %v5704_v61  ;;  %v4370_v10 = vadd.f32 1e-06, %v4354_v18  ;;  %v4373_v61 = vadd.f32 1e-06, %v4357_v34 }
0x1592   : > { %13772 = vrsqrt.f32 %v4370_v10 }
0x1593   : > { %13774 = vrsqrt.f32 %v4373_v61 }
0x1594   : > { %5702 = vadd.xlane.f32.xlu1 %v5701_v12  ;;  %4707 = vadd.xlane.f32.xlu0 %v4706_v25  ;;  %v4372_v12 = vadd.f32 1e-06, %v4356_v9  ;;  %v13769_v25 = vpop.eup %13768 }
0x1596   : > { %13776 = vrsqrt.f32 %v4372_v12 }
0x1598   : > { %4704 = vadd.xlane.f32.xlu1 %v4703_v8  ;;  %5209 = vadd.xlane.f32.xlu0 %v5208_v42  ;;  %v13771_v30 = vpop.eup %13770  ;;  %v4400_v8 = vmul.f32 %v13769_v25, %v15550_v26  ;;  %v4424_v42 = vmul.f32 %v15919_v35, %v4401_v53  ;;  %v4374_v26 = vadd.f32 1e-06, %v4358_v52 }
0x1599   : > { %v4403_v29 = vmul.f32 %v13771_v30, %v15558_v33 }
0x159a   : > { %13778 = vrsqrt.f32 %v4374_v26 }
0x159b   : > { %v4426_v7 = vmul.f32 %v15919_v35, %v4403_v29 }
0x159c   : > { %5206 = vadd.xlane.f32.xlu1 %v5205_v55  ;;  %5711 = vadd.xlane.f32.xlu0 %v5710_v14  ;;  %v13773_v28 = vpop.eup %13772  ;;  %v4423_v14 = vmul.f32 %v15919_v35, %v4400_v8 }
0x159d   : > { %v4402_v39 = vmul.f32 %v13773_v28, %v15564_v15  ;;  %v13775_v0 = vpop.eup %13774 }
0x159e   : > { %v4405_v15 = vmul.f32 %v13775_v0, %v15570_v24 }
0x159f   : > { %v4425_v33 = vmul.f32 %v15919_v35, %v4402_v39 }
0x15a0   : > { %5708 = vadd.xlane.f32.xlu1 %v5707_v57  ;;  %4713 = vadd.xlane.f32.xlu0 %v4712_v20  ;;  %v13777_v55 = vpop.eup %13776  ;;  %v15932_v57 = vadd.f32 %v15929_v49, %v4424_v42  ;;  %v4375_v20 = vadd.f32 1e-06, %v4359_v58  ;;  %v4428_v24 = vmul.f32 %v15919_v35, %v4405_v15 }
0x15a2   : > { %13780 = vrsqrt.f32 %v4375_v20  ;;  %v15955_v50 = vadd.f32 %v15929_v49, %v4428_v24 }
0x15a4   : > { %4710 = vadd.xlane.f32.xlu1 %v4709_v63  ;;  %5215 = vadd.xlane.f32.xlu0 %v5214_v40  ;;  %v4404_v40 = vmul.f32 %v13777_v55, %v15576_v46  ;;  %v13779_v18 = vpop.eup %13778  ;;  %v4483_v25 = vmul.f32 0.044715, %v15955_v50 }
0x15a5   : > { %v4406_v28 = vmul.f32 %v13779_v18, %v15588_v4 }
0x15a6   : > { %v4427_v46 = vmul.f32 %v15919_v35, %v4404_v40  ;;  %v4499_v20 = vmul.f32 %v4483_v25, %v15955_v50 }
0x15a8   : > { %5212 = vadd.xlane.f32.xlu1 %v5211_v36  ;;  %5717 = vadd.xlane.f32.xlu0 %v5716_v21  ;;  %v15939_v21 = vadd.f32 %v15929_v49, %v4423_v14  ;;  %v15958_v27 = vadd.f32 %v15929_v49, %v4427_v46 }
0x15aa   : > { %v4482_v3 = vmul.f32 0.044715, %v15958_v27 }
0x15ac   : > { %5714 = vadd.xlane.f32.xlu1 %v5713_v38  ;;  %4232 = vadd.xlane.f32.xlu0 %v4231_v43  ;;  %v4479_v43 = vmul.f32 0.044715, %v15932_v57  ;;  %v13781_v9 = vpop.eup %13780  ;;  %v4498_v26 = vmul.f32 %v4482_v3, %v15958_v27  ;;  %v16008_v3 = vmul.f32 0.5, %v15932_v57 }
0x15ad   : > { %v4407_v58 = vmul.f32 %v13781_v9, %v15582_v47  ;;  %v4429_v47 = vmul.f32 %v15919_v35, %v4406_v28 }
0x15ae   : > { %v4514_v24 = vmul.f32 %v4498_v26, %v15958_v27 }
0x15af   : > { %v4430_v15 = vmul.f32 %v15919_v35, %v4407_v58 }
0x15b0   : > { %4716 = vadd.xlane.f32.xlu1 %v4715_v16  ;;  %4238 = vadd.xlane.f32.xlu0 %v4237_v22  ;;  %v15943_v16 = vadd.f32 %v15929_v49, %v4426_v7  ;;  %v15946_v22 = vadd.f32 %v15929_v49, %v4425_v33 }
0x15b1   : > { %v15987_v35 = vadd.f32 %v15929_v49, %v4430_v15 }
0x15b2   : > { %v4481_v32 = vmul.f32 0.044715, %v15943_v16 }
0x15b3   : > { %18447 = vst [vmem:[#allocation39_spill] sm:$0xff] %v15987_v35  ;;  %v4485_v58 = vmul.f32 0.044715, %v15987_v35 }
0x15b4   : > { %5218 = vadd.xlane.f32.xlu1 %v5217_v54  ;;  %4244 = vadd.xlane.f32.xlu0 %v4243_v37  ;;  %v4478_v37 = vmul.f32 0.044715, %v15939_v21  ;;  %v4497_v34 = vmul.f32 %v4481_v32, %v15943_v16 }
0x15b6   : > { %v4494_v1 = vmul.f32 %v4478_v37, %v15939_v21  ;;  %v4513_v55 = vmul.f32 %v4497_v34, %v15943_v16 }
0x15b8   : > { %5720 = vadd.xlane.f32.xlu1 %v5719_v23  ;;  %v4495_v23 = vmul.f32 %v4479_v43, %v15932_v57  ;;  %v4510_v53 = vmul.f32 %v4494_v1, %v15939_v21  ;;  %v4529_v43 = vadd.f32 %v4513_v55, %v15943_v16 }
0x15ba   : > { %v4526_v7 = vadd.f32 %v4510_v53, %v15939_v21  ;;  %v4545_v32 = vmul.f32 0.7978846, %v4529_v43 }
0x15bc   : > { %4235 = vadd.xlane.f32.xlu1 %v4234_v41  ;;  %v4542_v37 = vmul.f32 0.7978846, %v4526_v7  ;;  %v18454_v7 = vld [vmem:[#allocation9_spill] sm:$0xff] }
0x15c0   : > { %4241 = vadd.xlane.f32.xlu1 %v4240_v45  ;;  %v4480_v45 = vmul.f32 0.044715, %v15946_v22 }
0x15c2   : > { %v4496_v10 = vmul.f32 %v4480_v45, %v15946_v22 }
0x15c4   : > { %4247 = vadd.xlane.f32.xlu1 %v4246_v51  ;;  %v4511_v51 = vmul.f32 %v4495_v23, %v15932_v57  ;;  %v4512_v0 = vmul.f32 %v4496_v10, %v15946_v22  ;;  %v15984_v23 = vadd.f32 %v15929_v49, %v4429_v47  ;;  %v18449_v10 = vld [vmem:[#allocation8_spill] sm:$0xff]  ;;  %v18450_v49 = vld [vmem:[#allocation7_spill] sm:$0xff] }
0x15c5   : > { %v15998_v34 = vsel %vm4206_vm10, %v18449_v10, 0.0  ;;  %v16002_v9 = vsel %vm4206_vm10, %v18450_v49, 0.0 }
0x15c6   : > { %v4527_v42 = vadd.f32 %v4511_v51, %v15932_v57  ;;  %18446 = vst [vmem:[#allocation38_spill] sm:$0xff] %v15984_v23  ;;  %v4530_v51 = vadd.f32 %v4514_v24, %v15958_v27  ;;  %v4484_v25 = vmul.f32 0.044715, %v15984_v23 }
0x15ca   : > { %4798 = vrot.lane.b32.xlu0 %v4758_v56, %s14093_s3 }
0x15dd   : > { %v4835_v63 = vpop.xlane.xlu0 %4834 }
0x15de   : > { %v4879_v36 = vmul.f32 0.125, %v4835_v63 }
0x15e0   : > { %v4895_v38 = vadd.f32 1e-06, %v4879_v36 }
0x15e1   : > { %v5337_v54 = vpop.xlane.xlu1 %5336 }
0x15e2   : > { %13782 = vrsqrt.f32 %v4895_v38  ;;  %v5381_v41 = vmul.f32 0.125, %v5337_v54  ;;  %v4543_v38 = vmul.f32 0.7978846, %v4527_v42  ;;  %v4528_v54 = vadd.f32 %v4512_v0, %v15946_v22 }
0x15e4   : > { %v5397_v31 = vadd.f32 1e-06, %v5381_v41  ;;  %v4544_v1 = vmul.f32 0.7978846, %v4528_v54 }
0x15e5   : > { %v5839_v2 = vpop.xlane.xlu1 %5838 }
0x15e6   : > { %13784 = vrsqrt.f32 %v5397_v31  ;;  %v5883_v33 = vmul.f32 0.125, %v5839_v2 }
0x15e8   : > { %v5899_v41 = vadd.f32 1e-06, %v5883_v33  ;;  %v16021_v33 = vmul.f32 0.5, %v15943_v16  ;;  %v18456_v16 = vld [vmem:[#allocation15_spill] sm:$0xff] }
0x15e9   : > { %v4832_v62 = vpop.xlane.xlu1 %4831  ;;  %v5334_v56 = vpop.xlane.xlu0 %5333 }
0x15ea   : > { %v4878_v61 = vmul.f32 0.125, %v4832_v62  ;;  %v5380_v12 = vmul.f32 0.125, %v5334_v56  ;;  %v18448_v62 = vld [vmem:[#allocation10_spill] sm:$0xff] }
0x15ec   : > { %v13783_v30 = vpop.eup %13782  ;;  %v4894_v8 = vadd.f32 1e-06, %v4878_v61  ;;  %v5396_v52 = vadd.f32 1e-06, %v5380_v12  ;;  %v16005_v12 = vmul.f32 0.5, %v15939_v21 }
0x15ed   : > { %v4841_v29 = vpop.xlane.xlu1 %4840  ;;  %v5836_v39 = vpop.xlane.xlu0 %5835  ;;  %v4927_v4 = vmul.f32 %v13783_v30, %v15650_v17  ;;  %v4515_v17 = vmul.f32 %v4499_v20, %v15955_v50  ;;  %v18451_v30 = vld [vmem:[#allocation14_spill] sm:$0xff]  ;;  %v4546_v21 = vmul.f32 0.7978846, %v4530_v51 }
0x15ee   : > { %13786 = vrsqrt.f32 %v4894_v8  ;;  %v5882_v14 = vmul.f32 0.125, %v5836_v39  ;;  %v4881_v8 = vmul.f32 0.125, %v4841_v29  ;;  %v18452_v39 = vld [vmem:[#allocation20_spill] sm:$0xff] }
0x15ef   : > { %13788 = vrsqrt.f32 %v5396_v52  ;;  %v4946_v46 = vmul.f32 %v15492_v44, %v4927_v4  ;;  %v4531_v18 = vadd.f32 %v4515_v17, %v15955_v50  ;;  %v16032_v17 = vmul.f32 0.5, %v15946_v22 }
0x15f0   : > { %v5898_v63 = vadd.f32 1e-06, %v5882_v14  ;;  %v13785_v31 = vpop.eup %13784  ;;  %v18453_v14 = vld [vmem:[#allocation16_spill] sm:$0xff]  ;;  %v4897_v43 = vadd.f32 1e-06, %v4881_v8 }
0x15f1   : > { %v5343_v40 = vpop.xlane.xlu1 %5342  ;;  %v5340_v36 = vpop.xlane.xlu0 %5339  ;;  %v15994_v56 = vadd.f32 %v18448_v62, %v4946_v46  ;;  %v4547_v55 = vmul.f32 0.7978846, %v4531_v18  ;;  %v5429_v57 = vmul.f32 %v13785_v31, %v18453_v14  ;;  %v4501_v46 = vmul.f32 %v4485_v58, %v15987_v35 }
0x15f2   : > { %13790 = vrsqrt.f32 %v5898_v63  ;;  %v5383_v47 = vmul.f32 0.125, %v5343_v40  ;;  %v4500_v63 = vmul.f32 %v4484_v25, %v15984_v23  ;;  %v18455_v40 = vld [vmem:[#allocation13_spill] sm:$0xff] }
0x15f3   : > { %13792 = vtanh.f32 %v4543_v38  ;;  %v4997_v4 = vmul.f32 0.044715, %v15994_v56  ;;  %v5448_v51 = vmul.f32 %v18454_v7, %v5429_v57  ;;  %v4517_v57 = vmul.f32 %v4501_v46, %v15987_v35 }
0x15f4   : > { %13794 = vtanh.f32 %v4542_v37  ;;  %v5399_v22 = vadd.f32 1e-06, %v5383_v47  ;;  %v18458_v47 = vld [vmem:[#allocation12_spill] sm:$0xff] }
0x15f5   : > { %v5845_v2 = vpop.xlane.xlu1 %5844  ;;  %v15989_v45 = vpop.xlane.xlu0 %5841  ;;  %13796 = vrsqrt.f32 %v5899_v41  ;;  %v5013_v31 = vmul.f32 %v4997_v4, %v15994_v56 }
0x15f6   : > { %13798 = vtanh.f32 %v4545_v32  ;;  %v5382_v32 = vmul.f32 0.125, %v5340_v36  ;;  %v5885_v8 = vmul.f32 0.125, %v5845_v2 }
0x15f7   : > { %13800 = vtanh.f32 %v4544_v1  ;;  %v5029_v4 = vmul.f32 %v5013_v31, %v15994_v56  ;;  %v4533_v31 = vadd.f32 %v4517_v57, %v15987_v35 }
0x15f8   : > { %v13787_v61 = vpop.eup %13786  ;;  %13802 = vtanh.f32 %v4547_v55  ;;  %v5884_v55 = vmul.f32 0.125, %v15989_v45  ;;  %v5901_v46 = vadd.f32 1e-06, %v5885_v8 }
0x15f9   : > { %v13789_v53 = vpop.eup %13788  ;;  %v4926_v28 = vmul.f32 %v13787_v61, %v18451_v30  ;;  %v4838_v52 = vpop.xlane.xlu1 %4837  ;;  %13804 = vtanh.f32 %v4546_v21  ;;  %v18457_v61 = vld [vmem:[#allocation11_spill] sm:$0xff]  ;;  %v4516_v30 = vmul.f32 %v4500_v63, %v15984_v23  ;;  %v5398_v21 = vadd.f32 1e-06, %v5382_v32 }
0x15fa   : > { %v16012_v42 = vpop.xlane.xlu0 %5345  ;;  %v5428_v0 = vmul.f32 %v13789_v53, %v18452_v39  ;;  %v4880_v20 = vmul.f32 0.125, %v4838_v52  ;;  %13806 = vrsqrt.f32 %v4897_v43  ;;  %v16050_v39 = vmul.f32 0.5, %v15955_v50 }
0x15fb   : > { %v4945_v26 = vmul.f32 %v15492_v44, %v4926_v28  ;;  %v4532_v45 = vadd.f32 %v4516_v30, %v15984_v23  ;;  %v18473_v23 = vld [vmem:[#allocation27_spill] sm:$0xff] }
0x15fc   : > { %v5447_v29 = vmul.f32 %v18454_v7, %v5428_v0  ;;  %v13791_v15 = vpop.eup %13790  ;;  %v4896_v18 = vadd.f32 1e-06, %v4880_v20  ;;  %v16055_v20 = vadd.f32 %v18455_v40, %v5448_v51  ;;  %v5900_v51 = vadd.f32 1e-06, %v5884_v55 }
0x15fd   : > { %v16025_v38 = vadd.f32 %v18448_v62, %v4945_v26  ;;  %v16027_v54 = vpop.xlane.xlu1 %4846  ;;  %v5930_v41 = vmul.f32 %v13791_v15, %v18456_v16  ;;  %v13793_v1 = vpop.eup %13792  ;;  %v18459_v15 = vld [vmem:[#allocation18_spill] sm:$0xff] }
0x15fe   : > { %v16029_v24 = vpop.xlane.xlu0 %5847  ;;  %v16036_v37 = vadd.f32 %v18455_v40, %v5447_v29  ;;  %v13795_v28 = vpop.eup %13794  ;;  %v4575_v14 = vadd.f32 1.0, %v13793_v1  ;;  %13808 = vrsqrt.f32 %v4896_v18 }
0x15ff   : > { %v5949_v25 = vmul.f32 %v18457_v61, %v5930_v41  ;;  %v4996_v53 = vmul.f32 0.044715, %v16025_v38  ;;  %v13797_v0 = vpop.eup %13796  ;;  %13810 = vrsqrt.f32 %v5399_v22  ;;  %v4574_v32 = vadd.f32 1.0, %v13795_v28 }
0x1600   : > { %v5498_v58 = vmul.f32 0.044715, %v16036_v37  ;;  %v13799_v26 = vpop.eup %13798  ;;  %v5931_v43 = vmul.f32 %v13797_v0, %v18459_v15  ;;  %13812 = vrsqrt.f32 %v5398_v21  ;;  %v5045_v22 = vadd.f32 %v5029_v4, %v15994_v56 }
0x1601   : > { %v16044_v52 = vpop.xlane.xlu1 %5348  ;;  %v5012_v2 = vmul.f32 %v4996_v53, %v16025_v38  ;;  %v13801_v29 = vpop.eup %13800  ;;  %v16060_v50 = vadd.f32 %v18458_v47, %v5949_v25  ;;  %v4577_v18 = vadd.f32 1.0, %v13799_v26  ;;  %v5499_v53 = vmul.f32 0.044715, %v16055_v20 }
0x1602   : > { %v16046_v36 = vpop.xlane.xlu0 %5197  ;;  %v5514_v63 = vmul.f32 %v5498_v58, %v16036_v37  ;;  %v4576_v30 = vadd.f32 1.0, %v13801_v29  ;;  %v13803_v8 = vpop.eup %13802  ;;  %v5384_v58 = vmul.f32 0.125, %v16012_v42  ;;  %v5950_v55 = vmul.f32 %v18457_v61, %v5931_v43 }
0x1603   : > { %v5028_v1 = vmul.f32 %v5012_v2, %v16025_v38  ;;  %v6000_v28 = vmul.f32 0.044715, %v16060_v50  ;;  %v4548_v2 = vmul.f32 0.7978846, %v4532_v45  ;;  %v13805_v21 = vpop.eup %13804  ;;  %13814 = vrsqrt.f32 %v5901_v46 }
0x1604   : > { %v5530_v0 = vmul.f32 %v5514_v63, %v16036_v37  ;;  %v16083_v15 = vmul.f32 0.5, %v15958_v27  ;;  %13816 = vrsqrt.f32 %v5900_v51  ;;  %v16086_v42 = vmul.f32 %v4574_v32, %v16005_v12  ;;  %v13807_v45 = vpop.eup %13806 }
0x1605   : > { %v16065_v16 = vpop.xlane.xlu1 %5850  ;;  %v5044_v25 = vadd.f32 %v5028_v1, %v16025_v38  ;;  %v16089_v29 = vmul.f32 %v4575_v14, %v16008_v3  ;;  %v16092_v63 = vmul.f32 %v4577_v18, %v16021_v33  ;;  %v5061_v43 = vmul.f32 0.7978846, %v5045_v22  ;;  %v18460_v22 = vld [vmem:[#allocation22_spill] sm:$0xff] }
0x1606   : > { %v16067_v41 = vpop.xlane.xlu0 %5200  ;;  %v5515_v46 = vmul.f32 %v5499_v53, %v16055_v20  ;;  %v16096_v1 = vmul.f32 %v4576_v30, %v16032_v17  ;;  %v5400_v27 = vadd.f32 1e-06, %v5384_v58  ;;  %v5546_v51 = vadd.f32 %v5530_v0, %v16036_v37 }
0x1607   : > { %v5060_v4 = vmul.f32 0.7978846, %v5044_v25  ;;  %v16098_v25 = vmul.f32 0.7978846, %v4533_v31  ;;  %v6016_v12 = vmul.f32 %v6000_v28, %v16060_v50  ;;  %13818 = vtanh.f32 %v4548_v2 }
0x1608   : > { %v13809_v3 = vpop.eup %13808  ;;  %v16103_v14 = vadd.f32 %v18458_v47, %v5950_v55  ;;  %v4883_v33 = vmul.f32 0.125, %v16027_v54  ;;  %v16110_v17 = vadd.f32 1.0, %v13803_v8  ;;  %v4929_v53 = vmul.f32 %v13807_v45, %v18460_v22  ;;  %v18461_v8 = vld [vmem:[#allocation17_spill] sm:$0xff]  ;;  %v18462_v22 = vld [vmem:[#allocation24_spill] sm:$0xff] }
0x1609   : > { %v16078_v57 = vpop.xlane.xlu1 %4843  ;;  %13820 = vtanh.f32 %v5060_v4  ;;  %v13811_v31 = vpop.eup %13810  ;;  %v5886_v30 = vmul.f32 0.125, %v16029_v24  ;;  %v16115_v58 = vmul.f32 0.5, %v15994_v56  ;;  %v16117_v0 = vadd.f32 1.0, %v13805_v21 }
0x160a   : > { %v16080_v26 = vpop.xlane.xlu0 %5351  ;;  %v5562_v28 = vmul.f32 0.7978846, %v5546_v51  ;;  %13822 = vtanh.f32 %v5061_v43  ;;  %v16120_v54 = vmul.f32 0.5, %v16055_v20  ;;  %v5531_v2 = vmul.f32 %v5515_v46, %v16055_v20  ;;  %v13813_v55 = vpop.eup %13812 }
0x160b   : > { %v4928_v4 = vmul.f32 %v13809_v3, %v18461_v8  ;;  %13824 = vrsqrt.f32 %v5400_v27  ;;  %v5385_v45 = vmul.f32 0.125, %v16044_v52  ;;  %v6032_v24 = vmul.f32 %v6016_v12, %v16060_v50  ;;  %v18463_v52 = vld [vmem:[#allocation19_spill] sm:$0xff] }
0x160c   : > { %v5431_v56 = vmul.f32 %v13811_v31, %v18462_v22  ;;  %v4899_v60 = vadd.f32 1e-06, %v4883_v33  ;;  %13826 = vtanh.f32 %v5562_v28  ;;  %v16130_v43 = vmul.f32 0.5, %v16103_v14 }
0x160d   : > { %v16106_v32 = vpop.xlane.xlu1 %4852  ;;  %v4948_v46 = vmul.f32 %v15492_v44, %v4929_v53  ;;  %v5902_v11 = vadd.f32 1e-06, %v5886_v30  ;;  %v4980_v27 = vmul.f32 0.5, %v16025_v38  ;;  %v13815_v3 = vpop.eup %13814  ;;  %v5430_v8 = vmul.f32 %v13813_v55, %v18463_v52 }
0x160e   : > { %v16108_v18 = vpop.xlane.xlu0 %5853  ;;  %v5228_v12 = vmul.f32 0.125, %v16046_v36  ;;  %v6048_v33 = vadd.f32 %v6032_v24, %v16060_v50  ;;  %v5547_v31 = vadd.f32 %v5531_v2, %v16055_v20  ;;  %v13817_v22 = vpop.eup %13816  ;;  %v4947_v28 = vmul.f32 %v15492_v44, %v4928_v4  ;;  %v18466_v24 = vld [vmem:[#allocation26_spill] sm:$0xff] }
0x160f   : > { %v5401_v35 = vadd.f32 1e-06, %v5385_v45  ;;  %v6001_v53 = vmul.f32 0.044715, %v16103_v14  ;;  %v5450_v38 = vmul.f32 %v18454_v7, %v5431_v56  ;;  %13828 = vrsqrt.f32 %v4899_v60  ;;  %v18467_v45 = vld [vmem:[#allocation21_spill] sm:$0xff] }
0x1610   : > { %v6064_v55 = vmul.f32 0.7978846, %v6048_v33  ;;  %v5563_v36 = vmul.f32 0.7978846, %v5547_v31  ;;  %v5933_v20 = vmul.f32 %v13815_v3, %v18466_v24  ;;  %13830 = vrsqrt.f32 %v5902_v11 }
0x1611   : > { %v16127_v21 = vpop.xlane.xlu1 %5354  ;;  %v5887_v2 = vmul.f32 0.125, %v16065_v16  ;;  %v5932_v52 = vmul.f32 %v13817_v22, %v18467_v45  ;;  %v4882_v56 = vmul.f32 0.125, %v16078_v57  ;;  %v6017_v60 = vmul.f32 %v6001_v53, %v16103_v14 }
0x1612   : > { %v5700_v51 = vpop.xlane.xlu0 %5699  ;;  %13832 = vtanh.f32 %v6064_v55  ;;  %v5449_v33 = vmul.f32 %v18454_v7, %v5430_v8  ;;  %v16157_v31 = vadd.f32 %v18448_v62, %v4947_v28  ;;  %v16160_v11 = vsub.f32 %v15390_v59, %v5228_v12 }
0x1613   : > { %v5730_v49 = vmul.f32 0.125, %v5700_v51  ;;  %v16146_v51 = vpop.eup %13818  ;;  %13834 = vrsqrt.f32 %v5401_v35  ;;  %v5229_v3 = vmul.f32 0.125, %v16067_v41  ;;  %v5482_v57 = vmul.f32 0.5, %v16036_v37 }
0x1614   : > { %18465 = vst [vmem:[#allocation14_spill] sm:$0xff] %v16146_v51  ;;  %v13821_v4 = vpop.eup %13820  ;;  %18468 = vst [vmem:[#allocation20_spill] sm:$0xff] %v16160_v11  ;;  %13836 = vtanh.f32 %v5563_v36  ;;  %v6033_v53 = vmul.f32 %v6017_v60, %v16103_v14  ;;  %v16167_v8 = vadd.f32 %v18448_v62, %v4948_v46  ;;  %v5903_v28 = vadd.f32 1e-06, %v5887_v2 }
0x1615   : > { %v16140_v13 = vsub.f32 %v15390_v59, %v5730_v49  ;;  %v16144_v30 = vpop.xlane.xlu1 %5856  ;;  %v13823_v16 = vpop.eup %13822  ;;  %v5092_v35 = vadd.f32 1.0, %v13821_v4  ;;  %v5984_v12 = vmul.f32 0.5, %v16060_v50  ;;  %v5951_v45 = vmul.f32 %v18457_v61, %v5932_v52 }
0x1616   : > { %v13825_v55 = vpop.eup %13824  ;;  %v4898_v41 = vadd.f32 1e-06, %v4882_v56  ;;  %v16174_v37 = vadd.f32 %v18455_v40, %v5450_v38  ;;  %v16177_v36 = vadd.f32 %v18455_v40, %v5449_v33  ;;  %v5260_v46 = vmul.f32 %v16160_v11, %v16160_v11  ;;  %v18470_v38 = vld [vmem:[#allocation25_spill] sm:$0xff] }
0x1617   : > { %18464 = vst [vmem:[#allocation10_spill] sm:$0xff] %v16140_v13  ;;  %v5762_v49 = vmul.f32 %v16140_v13, %v16140_v13  ;;  %v13827_v24 = vpop.eup %13826  ;;  %v6049_v13 = vadd.f32 %v6033_v53, %v16103_v14  ;;  %v4998_v50 = vmul.f32 0.044715, %v16157_v31  ;;  %v16183_v2 = vsub.f32 %v15388_v48, %v5229_v3 }
0x1618   : > { %v5594_v52 = vadd.f32 1.0, %v13827_v24  ;;  %v5432_v56 = vmul.f32 %v13825_v55, %v18470_v38  ;;  %13838 = vrsqrt.f32 %v5903_v28  ;;  %v5108_v33 = vmul.f32 %v5092_v35, %v4980_v27 }
0x1619   : > { %5802 = vrot.lane.b32.xlu0 %v5762_v49, %s18367_s2  ;;  %v4850_v22 = vpop.xlane.xlu1 %4849  ;;  %v5952_v49 = vmul.f32 %v18457_v61, %v5933_v20  ;;  %18469 = vst [vmem:[#allocation16_spill] sm:$0xff] %v16183_v2  ;;  %v5386_v20 = vmul.f32 0.125, %v16080_v26  ;;  %v6065_v14 = vmul.f32 0.7978846, %v6049_v13  ;;  %v13829_v53 = vpop.eup %13828  ;;  %v16191_v59 = vadd.f32 %v18458_v47, %v5951_v45 }
0x161a   : > { %13840 = vrsqrt.f32 %v4898_v41  ;;  %v4885_v3 = vmul.f32 0.125, %v16106_v32  ;;  %v13831_v26 = vpop.eup %13830  ;;  %v5888_v24 = vmul.f32 0.125, %v16108_v18  ;;  %v5014_v55 = vmul.f32 %v4998_v50, %v16157_v31  ;;  %v18472_v50 = vld [vmem:[#allocation28_spill] sm:$0xff] }
0x161b   : > { %v16188_v11 = vadd.f32 %v18458_v47, %v5952_v49  ;;  %13842 = vtanh.f32 %v6065_v14  ;;  %v5261_v28 = vmul.f32 %v16183_v2, %v16183_v2  ;;  %v5402_v35 = vadd.f32 1e-06, %v5386_v20 }
0x161c   : > { %v13833_v27 = vpop.eup %13832  ;;  %v5387_v49 = vmul.f32 0.125, %v16127_v21  ;;  %v5610_v45 = vmul.f32 %v5594_v52, %v5482_v57  ;;  %v5451_v32 = vmul.f32 %v18454_v7, %v5432_v56  ;;  %v6128_v14 = vsel %vm4206_vm10, %v16086_v42, %v5108_v33 }
0x161d   : > { %v4699_v4 = vpop.xlane.xlu1 %4698  ;;  %v13835_v41 = vpop.eup %13834  ;;  %v5934_v10 = vmul.f32 %v13831_v26, %v18473_v23  ;;  %v4901_v2 = vadd.f32 1e-06, %v4885_v3  ;;  %v5093_v20 = vadd.f32 1.0, %v13823_v16  ;;  %v5904_v21 = vadd.f32 1e-06, %v5888_v24 }
0x161e   : > { %v4727_v60 = vmul.f32 0.125, %v4699_v4  ;;  %v6096_v4 = vadd.f32 1.0, %v13833_v27  ;;  %v13837_v38 = vpop.eup %13836  ;;  %v4884_v57 = vmul.f32 0.125, %v4850_v22  ;;  %v5030_v56 = vmul.f32 %v5014_v55, %v16157_v31 }
0x161f   : > { %13844 = vrsqrt.f32 %v5402_v35  ;;  %v5403_v51 = vadd.f32 1e-06, %v5387_v49  ;;  %v6145_v42 = vsel %vm6144_vm11, %v6128_v14, %v5610_v45  ;;  %v5889_v33 = vmul.f32 0.125, %v16144_v30 }
0x1620   : > { %v16196_v13 = vsub.f32 %v15388_v48, %v4727_v60  ;;  %v4931_v60 = vmul.f32 %v13829_v53, %v18472_v50  ;;  %v6112_v52 = vmul.f32 %v6096_v4, %v5984_v12  ;;  %v4702_v53 = vpop.xlane.xlu0 %4701  ;;  %v5595_v16 = vadd.f32 1.0, %v13837_v38 }
0x1621   : > { %v5703_v5 = vpop.xlane.xlu1 %5702  ;;  %v16216_v22 = vadd.f32 %v18455_v40, %v5451_v32  ;;  %13846 = vrsqrt.f32 %v4901_v2  ;;  %v5109_v12 = vmul.f32 %v5093_v20, %v16115_v58  ;;  %v5046_v26 = vadd.f32 %v5030_v56, %v16157_v31 }
0x1622   : > { %18471 = vst [vmem:[#allocation9_spill] sm:$0xff] %v16196_v13  ;;  %v4759_v18 = vmul.f32 %v16196_v13, %v16196_v13  ;;  %v18474_v13 = vld [vmem:[#allocation30_spill] sm:$0xff]  ;;  %v6162_v23 = vsel %vm6161_vm12, %v6145_v42, %v6112_v52  ;;  %v5731_v3 = vmul.f32 0.125, %v5703_v5  ;;  %v13839_v24 = vpop.eup %13838  ;;  %13848 = vrsqrt.f32 %v5904_v21 }
0x1623   : > { %v5433_v27 = vmul.f32 %v13835_v41, %v18474_v13  ;;  %11650 = vmatprep.mubr.msk.f32.mxu0 %vm943_vm0, %v6162_v23  ;;  %v4950_v13 = vmul.f32 %v15492_v44, %v4931_v60  ;;  %v4900_v30 = vadd.f32 1e-06, %v4884_v57  ;;  %v5500_v55 = vmul.f32 0.044715, %v16177_v36 }
0x1624   : > { %4800 = vrot.lane.b32.xlu1 %v4759_v18, %s14093_s3  ;;  %v13841_v5 = vpop.eup %13840  ;;  %v5953_v35 = vmul.f32 %v18457_v61, %v5934_v10  ;;  %13850 = vrsqrt.f32 %v5403_v51  ;;  %v5062_v2 = vmul.f32 0.7978846, %v5046_v26  ;;  %v6002_v49 = vmul.f32 0.044715, %v16191_v59  ;;  %v18475_v51 = vld [vmem:[#allocation32_spill] sm:$0xff]  ;;  %v5204_v50 = vpop.xlane.xlu0 %5203 }
0x1625   : > { %v13843_v45 = vpop.eup %13842  ;;  %v5452_v58 = vmul.f32 %v18454_v7, %v5433_v27  ;;  %v5905_v41 = vadd.f32 1e-06, %v5889_v33  ;;  %v5611_v32 = vmul.f32 %v5595_v16, %v16120_v54  ;;  %v16229_v18 = vsub.f32 %v15388_v48, %v5731_v3  ;;  %v18476_v54 = vld [vmem:[#allocation23_spill] sm:$0xff] }
0x1626   : > { %v6097_v4 = vadd.f32 1.0, %v13843_v45  ;;  %13852 = vtanh.f32 %v5062_v2  ;;  %v5516_v10 = vmul.f32 %v5500_v55, %v16177_v36  ;;  %v5935_v14 = vmul.f32 %v13839_v24, %v18475_v51  ;;  %v18477_v51 = vld [vmem:[#allocation31_spill] sm:$0xff] }
0x1627   : > { %v4728_v38 = vmul.f32 0.125, %v4702_v53  ;;  %13854 = vrsqrt.f32 %v4900_v30  ;;  %v6018_v60 = vmul.f32 %v6002_v49, %v16191_v59  ;;  %v4930_v20 = vmul.f32 %v13841_v5, %v18476_v54 }
0x1628   : > { %5300 = vrot.lane.b32.xlu1 %v5260_v46, %s18377_s1  ;;  %v6129_v46 = vsel %vm4206_vm10, %v16089_v29, %v5109_v12  ;;  %v6113_v21 = vmul.f32 %v6097_v4, %v16130_v43  ;;  %v5532_v57 = vmul.f32 %v5516_v10, %v16177_v36  ;;  %v4999_v29 = vmul.f32 0.044715, %v16167_v8  ;;  %v5706_v49 = vpop.xlane.xlu0 %5705 }
0x1629   : > { %13856 = vrsqrt.f32 %v5905_v41  ;;  %v6146_v52 = vsel %vm6144_vm11, %v6129_v46, %v5611_v32  ;;  %v5763_v56 = vmul.f32 %v16229_v18, %v16229_v18  ;;  %v6034_v27 = vmul.f32 %v6018_v60, %v16191_v59  ;;  %v13845_v42 = vpop.eup %13844 }
0x162a   : > { %v6163_v33 = vsel %vm6161_vm12, %v6146_v52, %v6113_v21  ;;  %v5015_v53 = vmul.f32 %v4999_v29, %v16167_v8  ;;  %v5501_v43 = vmul.f32 0.044715, %v16174_v37  ;;  %v16250_v23 = vadd.f32 %v18448_v62, %v4950_v13  ;;  %v18478_v21 = vld [vmem:[#allocation34_spill] sm:$0xff] }
0x162b   : > { %v16253_v16 = vadd.f32 %v18458_v47, %v5953_v35  ;;  %11651 = vmatmul.mubr.msk.f32.vlgmr.msra.gmra.mrb[62].mxu0 %vm943_vm0, %v6163_v33  ;;  %v6050_v3 = vadd.f32 %v6034_v27, %v16191_v59  ;;  %v6003_v12 = vmul.f32 0.044715, %v16188_v11  ;;  %v13847_v26 = vpop.eup %13846  ;;  %v4949_v24 = vmul.f32 %v15492_v44, %v4930_v20  ;;  %v18480_v33 = vld [vmem:[#allocation35_spill] sm:$0xff] }
0x162c   : > { %5302 = vrot.lane.b32.xlu1 %v5261_v28, %s18377_s1  ;;  %v5548_v28 = vadd.f32 %v5532_v57, %v16177_v36  ;;  %v5031_v55 = vmul.f32 %v5015_v53, %v16167_v8  ;;  %v5517_v13 = vmul.f32 %v5501_v43, %v16174_v37  ;;  %v13849_v5 = vpop.eup %13848  ;;  %v16263_v35 = vadd.f32 %v18455_v40, %v5452_v58 }
0x162d   : > { %v5954_v2 = vmul.f32 %v18457_v61, %v5935_v14  ;;  %v6066_v45 = vmul.f32 0.7978846, %v6050_v3  ;;  %v6019_v41 = vmul.f32 %v6003_v12, %v16188_v11  ;;  %v16268_v4 = vsub.f32 %v15394_v6, %v4728_v38 }
0x162e   : > { %v5564_v30 = vmul.f32 0.7978846, %v5548_v28  ;;  %v13851_v32 = vpop.eup %13850  ;;  %v5047_v46 = vadd.f32 %v5031_v55, %v16167_v8  ;;  %v5533_v10 = vmul.f32 %v5517_v13, %v16174_v37  ;;  %v5434_v60 = vmul.f32 %v13845_v42, %v18477_v51  ;;  %v4708_v55 = vpop.xlane.xlu0 %4707 }
0x162f   : > { %v5230_v54 = vmul.f32 0.125, %v5204_v50  ;;  %v6035_v58 = vmul.f32 %v6019_v41, %v16188_v11  ;;  %v16275_v20 = vadd.f32 %v18448_v62, %v4949_v24  ;;  %v4933_v57 = vmul.f32 %v13847_v26, %v18478_v21 }
0x1630   : > { %5804 = vrot.lane.b32.xlu1 %v5763_v56, %s18367_s2  ;;  %13858 = vtanh.f32 %v5564_v30  ;;  %v13853_v14 = vpop.eup %13852  ;;  %v5063_v29 = vmul.f32 0.7978846, %v5047_v46  ;;  %v5549_v38 = vadd.f32 %v5533_v10, %v16174_v37  ;;  %v18479_v56 = vld [vmem:[#allocation33_spill] sm:$0xff]  ;;  %v5435_v28 = vmul.f32 %v13851_v32, %v18480_v33 }
0x1631   : > { %13860 = vtanh.f32 %v6066_v45  ;;  %v13855_v52 = vpop.eup %13854  ;;  %v5936_v27 = vmul.f32 %v13849_v5, %v18479_v56  ;;  %v5732_v53 = vmul.f32 0.125, %v5706_v49  ;;  %v6051_v50 = vadd.f32 %v6035_v58, %v16188_v11 }
0x1632   : > { %v4982_v42 = vmul.f32 0.5, %v16157_v31  ;;  %v5094_v43 = vadd.f32 1.0, %v13853_v14  ;;  %13862 = vtanh.f32 %v5063_v29  ;;  %v5565_v3 = vmul.f32 0.7978846, %v5549_v38  ;;  %v18481_v31 = vld [vmem:[#allocation29_spill] sm:$0xff] }
0x1633   : > { %v13857_v12 = vpop.eup %13856  ;;  %v16285_v26 = vadd.f32 %v18458_v47, %v5954_v2  ;;  %v16288_v24 = vmul.f32 %v18454_v7, %v5434_v60  ;;  %v16291_v30 = vsub.f32 %v15394_v6, %v5230_v54  ;;  %v6067_v13 = vmul.f32 0.7978846, %v6051_v50  ;;  %v18482_v60 = vld [vmem:[#allocation36_spill] sm:$0xff] }
0x1634   : > { %v16294_v5 = vmul.f32 %v15492_v44, %v4933_v57  ;;  %v4932_v49 = vmul.f32 %v13855_v52, %v18481_v31  ;;  %13864 = vtanh.f32 %v5565_v3  ;;  %v16299_v45 = vmul.f32 %v18457_v61, %v5936_v27 }
0x1635   : > { %v16302_v2 = vmul.f32 %v18454_v7, %v5435_v28  ;;  %v16305_v41 = vsub.f32 %v15394_v6, %v5732_v53  ;;  %13866 = vtanh.f32 %v6067_v13  ;;  %v4730_v32 = vmul.f32 0.125, %v4708_v55 }
0x1636   : > { %v5110_v46 = vmul.f32 %v5094_v43, %v4982_v42  ;;  %v5484_v10 = vmul.f32 0.5, %v16177_v36  ;;  %v5937_v54 = vmul.f32 %v13857_v12, %v18482_v60  ;;  %v5986_v58 = vmul.f32 0.5, %v16191_v59 }
0x1637   : > { %v5502_v14 = vmul.f32 0.044715, %v16216_v22  ;;  %v6004_v21 = vmul.f32 0.044715, %v16253_v16  ;;  %v4951_v29 = vmul.f32 %v15492_v44, %v4932_v49  ;;  %v4983_v38 = vmul.f32 0.5, %v16167_v8 }
0x1638   : > { %4250 = vadd.xlane.f32.xlu0 %v15998_v34  ;;  %v5000_v34 = vmul.f32 0.044715, %v16275_v20  ;;  %v5001_v56 = vmul.f32 0.044715, %v16250_v23  ;;  %v5485_v33 = vmul.f32 0.5, %v16174_v37  ;;  %v6130_v50 = vsel %vm4206_vm10, %v16096_v1, %v5110_v46 }
0x1639   : > { %v5518_v28 = vmul.f32 %v5502_v14, %v16216_v22  ;;  %v6020_v59 = vmul.f32 %v6004_v21, %v16253_v16  ;;  %v5503_v55 = vmul.f32 0.044715, %v16263_v35  ;;  %v5987_v31 = vmul.f32 0.5, %v16188_v11 }
0x163a   : > { %v5016_v51 = vmul.f32 %v5000_v34, %v16275_v20  ;;  %v13859_v57 = vpop.eup %13858  ;;  %v5017_v8 = vmul.f32 %v5001_v56, %v16250_v23 }
0x163b   : > { %v13861_v36 = vpop.eup %13860  ;;  %v5596_v27 = vadd.f32 1.0, %v13859_v57  ;;  %v5534_v3 = vmul.f32 %v5518_v28, %v16216_v22  ;;  %v6036_v12 = vmul.f32 %v6020_v59, %v16253_v16 }
0x163c   : > { %v5032_v52 = vmul.f32 %v5016_v51, %v16275_v20  ;;  %v6098_v53 = vadd.f32 1.0, %v13861_v36  ;;  %v13863_v37 = vpop.eup %13862  ;;  %v5033_v34 = vmul.f32 %v5017_v8, %v16250_v23 }
0x163d   : > { %v5612_v43 = vmul.f32 %v5596_v27, %v5484_v10  ;;  %v5095_v46 = vadd.f32 1.0, %v13863_v37  ;;  %v5550_v51 = vadd.f32 %v5534_v3, %v16216_v22  ;;  %v6052_v10 = vadd.f32 %v6036_v12, %v16253_v16  ;;  %v5210_v27 = vpop.xlane.xlu0 %5209  ;;  %v16348_v37 = vpop.xlane.xlu1 %4704 }
0x163e   : > { %v5048_v42 = vadd.f32 %v5032_v52, %v16275_v20  ;;  %v6114_v13 = vmul.f32 %v6098_v53, %v5986_v58  ;;  %v13865_v60 = vpop.eup %13864  ;;  %v5049_v21 = vadd.f32 %v5033_v34, %v16250_v23  ;;  %v5519_v58 = vmul.f32 %v5503_v55, %v16263_v35 }
0x163f   : > { %v6147_v1 = vsel %vm6144_vm11, %v6130_v50, %v5612_v43  ;;  %v13867_v57 = vpop.eup %13866  ;;  %v5111_v11 = vmul.f32 %v5095_v46, %v4983_v38  ;;  %v5597_v52 = vadd.f32 1.0, %v13865_v60  ;;  %v5566_v56 = vmul.f32 0.7978846, %v5550_v51 }
0x1640   : > { %v5064_v49 = vmul.f32 0.7978846, %v5048_v42  ;;  %v6164_v14 = vsel %vm6161_vm12, %v6147_v1, %v6114_v13  ;;  %v6068_v36 = vmul.f32 0.7978846, %v6052_v10  ;;  %v6099_v28 = vadd.f32 1.0, %v13867_v57 }
0x1641   : > { %11653 = vmatprep.mubr.msk.f32.mxu0 %vm943_vm0, %v6164_v14  ;;  %v5065_v59 = vmul.f32 0.7978846, %v5049_v21  ;;  %v5535_v53 = vmul.f32 %v5519_v58, %v16263_v35  ;;  %v6005_v50 = vmul.f32 0.044715, %v16285_v26  ;;  %v16339_v42 = vsub.f32 %v15398_v19, %v4730_v32 }
0x1642   : > { %13868 = vtanh.f32 %v5064_v49  ;;  %v5613_v8 = vmul.f32 %v5597_v52, %v5485_v33  ;;  %v6131_v43 = vsel %vm4206_vm10, %v16092_v63, %v5111_v11  ;;  %v6115_v3 = vmul.f32 %v6099_v28, %v5987_v31 }
0x1643   : > { %13870 = vtanh.f32 %v5566_v56  ;;  %v5551_v38 = vadd.f32 %v5535_v53, %v16263_v35  ;;  %v6021_v12 = vmul.f32 %v6005_v50, %v16285_v26  ;;  %v16346_v55 = vadd.f32 %v18448_v62, %v4951_v29 }
0x1644   : > { %13872 = vtanh.f32 %v6068_v36  ;;  %v5232_v13 = vmul.f32 0.125, %v5210_v27  ;;  %v6148_v32 = vsel %vm6144_vm11, %v6131_v43, %v5613_v8  ;;  %v5956_v33 = vmul.f32 %v18457_v61, %v5937_v54 }
0x1645   : > { %13874 = vtanh.f32 %v5065_v59  ;;  %v6165_v63 = vsel %vm6161_vm12, %v6148_v32, %v6115_v3  ;;  %v5567_v49 = vmul.f32 0.7978846, %v5551_v38  ;;  %v6037_v31 = vmul.f32 %v6021_v12, %v16285_v26 }
0x1646   : > { %v16356_v34 = vadd.f32 %v18455_v40, %v16288_v24  ;;  %v4760_v29 = vmul.f32 %v16268_v4, %v16268_v4  ;;  %11654 = vmatmul.mubr.msk.f32.gmra.mrb[64].mxu0 %vm943_vm0, %v6165_v63  ;;  %v4594_v1 = vmul.f32 %v16117_v0, %v16083_v15  ;;  %v16365_v54 = vmul.f32 %v16110_v17, %v16050_v39  ;;  %v5712_v17 = vpop.xlane.xlu0 %5711 }
0x1647   : > { %v16369_v46 = vadd.f32 %v18458_v47, %v16299_v45  ;;  %v5262_v24 = vmul.f32 %v16291_v30, %v16291_v30  ;;  %13876 = vtanh.f32 %v5567_v49  ;;  %v6053_v51 = vadd.f32 %v6037_v31, %v16285_v26 }
0x1648   : > { %v16376_v10 = vadd.f32 %v18448_v62, %v16294_v5  ;;  %v16380_v15 = vadd.f32 %v18455_v40, %v16302_v2  ;;  %v5764_v39 = vmul.f32 %v16305_v41, %v16305_v41  ;;  %v5002_v0 = vmul.f32 0.044715, %v16346_v55  ;;  %v16396_v2 = vpop.xlane.xlu1 %5206 }
0x1649   : > { %v16386_v60 = vadd.f32 %v18458_v47, %v5956_v33  ;;  %v16390_v14 = vmul.f32 %v16339_v42, %v16339_v42  ;;  %v16393_v5 = vsub.f32 %v15398_v19, %v5232_v13  ;;  %v6069_v21 = vmul.f32 0.7978846, %v6053_v51 }
0x164a   : > { %v4984_v58 = vmul.f32 0.5, %v16275_v20  ;;  %v5018_v11 = vmul.f32 %v5002_v0, %v16346_v55  ;;  %v5504_v52 = vmul.f32 0.044715, %v16356_v34  ;;  %v5734_v56 = vmul.f32 0.125, %v5712_v17 }
0x164b   : > { %v5486_v36 = vmul.f32 0.5, %v16216_v22  ;;  %13878 = vtanh.f32 %v6069_v21  ;;  %v6006_v27 = vmul.f32 0.044715, %v16369_v46  ;;  %v5003_v8 = vmul.f32 0.044715, %v16376_v10  ;;  %v4714_v21 = vpop.xlane.xlu0 %4713 }
0x164c   : > { %v13869_v45 = vpop.eup %13868  ;;  %v5034_v53 = vmul.f32 %v5018_v11, %v16346_v55  ;;  %v5520_v50 = vmul.f32 %v5504_v52, %v16356_v34  ;;  %v5988_v3 = vmul.f32 0.5, %v16253_v16  ;;  %v5505_v12 = vmul.f32 0.044715, %v16380_v15  ;;  %v16415_v51 = vpop.xlane.xlu1 %5708 }
0x164d   : > { %v5096_v57 = vadd.f32 1.0, %v13869_v45  ;;  %v13871_v28 = vpop.eup %13870  ;;  %v6022_v38 = vmul.f32 %v6006_v27, %v16369_v46  ;;  %v5019_v16 = vmul.f32 %v5003_v8, %v16376_v10 }
0x164e   : > { %4802 = vrot.lane.b32.xlu0 %v4760_v29, %s14093_s3  ;;  %v13873_v20 = vpop.eup %13872  ;;  %v5598_v43 = vadd.f32 1.0, %v13871_v28  ;;  %v5050_v33 = vadd.f32 %v5034_v53, %v16346_v55  ;;  %v5536_v63 = vmul.f32 %v5520_v50, %v16356_v34  ;;  %v5521_v45 = vmul.f32 %v5505_v12, %v16380_v15 }
0x164f   : > { %v5112_v59 = vmul.f32 %v5096_v57, %v4984_v58  ;;  %v13875_v22 = vpop.eup %13874  ;;  %v6100_v13 = vadd.f32 1.0, %v13873_v20  ;;  %v6038_v29 = vmul.f32 %v6022_v38, %v16369_v46  ;;  %v4985_v57 = vmul.f32 0.5, %v16250_v23 }
0x1650   : > { %v5614_v49 = vmul.f32 %v5598_v43, %v5486_v36  ;;  %v5097_v31 = vadd.f32 1.0, %v13875_v22  ;;  %v5066_v0 = vmul.f32 0.7978846, %v5050_v33  ;;  %v5035_v52 = vmul.f32 %v5019_v16, %v16376_v10  ;;  %v4711_v12 = vpop.xlane.xlu1 %4710  ;;  %v18483_v16 = vld [vmem:[#allocation14_spill] sm:$0xff] }
0x1651   : > { %v6132_v32 = vsel %vm4206_vm10, %v4594_v1, %v5112_v59  ;;  %v6116_v17 = vmul.f32 %v6100_v13, %v5988_v3  ;;  %v13877_v1 = vpop.eup %13876  ;;  %v6054_v11 = vadd.f32 %v6038_v29, %v16369_v46  ;;  %v5537_v23 = vmul.f32 %v5521_v45, %v16380_v15 }
0x1652   : > { %5304 = vrot.lane.b32.xlu0 %v5262_v24, %s18377_s1  ;;  %v5552_v24 = vadd.f32 %v5536_v63, %v16356_v34  ;;  %v6149_v58 = vsel %vm6144_vm11, %v6132_v32, %v5614_v49  ;;  %v5599_v27 = vadd.f32 1.0, %v13877_v1  ;;  %13880 = vtanh.f32 %v5066_v0  ;;  %v5216_v63 = vpop.xlane.xlu0 %5215  ;;  %v18485_v1 = vld [vmem:[#allocation8_spill] sm:$0xff] }
0x1653   : > { %v6166_v36 = vsel %vm6161_vm12, %v6149_v58, %v6116_v17  ;;  %v6070_v59 = vmul.f32 0.7978846, %v6054_v11  ;;  %v5051_v53 = vadd.f32 %v5035_v52, %v16376_v10  ;;  %v4729_v50 = vmul.f32 0.125, %v16348_v37  ;;  %v18487_v58 = vld [vmem:[#allocation38_spill] sm:$0xff] }
0x1654   : > { %4253 = vadd.xlane.f32.xlu1 %v16002_v9  ;;  %v5568_v28 = vmul.f32 0.7978846, %v5552_v24  ;;  %11656 = vmatprep.mubr.msk.f32.mxu0 %vm943_vm0, %v6166_v36  ;;  %v5487_v9 = vmul.f32 0.5, %v16263_v35  ;;  %v5113_v8 = vmul.f32 %v5097_v31, %v4985_v57  ;;  %v5553_v38 = vadd.f32 %v5537_v23, %v16380_v15  ;;  %v5213_v36 = vpop.xlane.xlu1 %5212 }
0x1655   : > { %v13879_v20 = vpop.eup %13878  ;;  %v5067_v3 = vmul.f32 0.7978846, %v5051_v53  ;;  %v5264_v35 = vmul.f32 %v16393_v5, %v16393_v5  ;;  %v5989_v22 = vmul.f32 0.5, %v16285_v26  ;;  %v16440_v32 = vsub.f32 %v15398_v19, %v5734_v56  ;;  %v18484_v56 = vld [vmem:[#allocation5_spill] sm:$0xff] }
0x1656   : > { %5806 = vrot.lane.b32.xlu0 %v5764_v39, %s18367_s2  ;;  %13882 = vtanh.f32 %v5568_v28  ;;  %v6007_v39 = vmul.f32 0.044715, %v16386_v60  ;;  %v5615_v43 = vmul.f32 %v5599_v27, %v5487_v9  ;;  %v6101_v37 = vadd.f32 1.0, %v13879_v20  ;;  %v5718_v28 = vpop.xlane.xlu0 %5717 }
0x1657   : > { %13884 = vtanh.f32 %v6070_v59  ;;  %v4732_v33 = vmul.f32 0.125, %v4714_v21  ;;  %v5569_v49 = vmul.f32 0.7978846, %v5553_v38  ;;  %v4580_v17 = vadd.f32 1.0, %v18483_v16 }
0x1658   : > { %v6023_v13 = vmul.f32 %v6007_v39, %v16386_v60  ;;  %13886 = vtanh.f32 %v5067_v3  ;;  %v6117_v31 = vmul.f32 %v6101_v37, %v5989_v22  ;;  %v16450_v0 = vsub.f32 %v18484_v56, %v4729_v50 }
0x1659   : > { %13888 = vtanh.f32 %v16098_v25  ;;  %v5231_v24 = vmul.f32 0.125, %v16396_v2  ;;  %v5766_v25 = vmul.f32 %v16440_v32, %v16440_v32  ;;  %v16458_v21 = vsub.f32 %v18485_v1, %v4732_v33 }
0x165a   : > { %4806 = vrot.lane.b32.xlu0 %v16390_v14, %s14093_s3  ;;  %v6133_v14 = vsel %vm4206_vm10, %v16365_v54, %v5113_v8  ;;  %v6039_v29 = vmul.f32 %v6023_v13, %v16386_v60  ;;  %13890 = vtanh.f32 %v5569_v49  ;;  %v4468_v57 = vmul.f32 0.5, %v18487_v58  ;;  %v18488_v58 = vld [vmem:[#allocation6_spill] sm:$0xff] }
0x165b   : > { %v6150_v26 = vsel %vm6144_vm11, %v6133_v14, %v5615_v43  ;;  %18486 = vst [vmem:[#allocation13_spill] sm:$0xff] %v16458_v21  ;;  %v5234_v52 = vmul.f32 0.125, %v5216_v63  ;;  %v4986_v9 = vmul.f32 0.5, %v16346_v55  ;;  %v4761_v23 = vmul.f32 %v16450_v0, %v16450_v0 }
0x165c   : > { %v6167_v45 = vsel %vm6161_vm12, %v6150_v26, %v6117_v31  ;;  %v6055_v54 = vadd.f32 %v6039_v29, %v16386_v60  ;;  %v13881_v11 = vpop.eup %13880  ;;  %v4596_v2 = vmul.f32 %v4580_v17, %v4468_v57  ;;  %v16467_v50 = vsub.f32 %v18484_v56, %v5231_v24  ;;  %v5715_v31 = vpop.xlane.xlu1 %5714 }
0x165d   : > { %11657 = vmatmul.mubr.msk.f32.gmra.mrb[66].mxu0 %vm943_vm0, %v6167_v45  ;;  %v5098_v59 = vadd.f32 1.0, %v13881_v11  ;;  %v5733_v8 = vmul.f32 0.125, %v16415_v51  ;;  %v4764_v20 = vmul.f32 %v16458_v21, %v16458_v21  ;;  %v5488_v55 = vmul.f32 0.5, %v16356_v34 }
0x165e   : > { %5308 = vrot.lane.b32.xlu0 %v5264_v35, %s18377_s1  ;;  %v6071_v27 = vmul.f32 0.7978846, %v6055_v54  ;;  %v16474_v38 = vsub.f32 %v18485_v1, %v5234_v52  ;;  %v5736_v35 = vmul.f32 0.125, %v5718_v28  ;;  %v5990_v22 = vmul.f32 0.5, %v16369_v46  ;;  %v18489_v28 = vld [vmem:[#allocation39_spill] sm:$0xff] }
0x165f   : > { %v5114_v43 = vmul.f32 %v5098_v59, %v4986_v9  ;;  %v4731_v49 = vmul.f32 0.125, %v4711_v12  ;;  %v5263_v29 = vmul.f32 %v16467_v50, %v16467_v50  ;;  %v16483_v26 = vsub.f32 %v18484_v56, %v5733_v8 }
0x1660   : > { %v13883_v53 = vpop.eup %13882  ;;  %13892 = vtanh.f32 %v6071_v27  ;;  %v5266_v17 = vmul.f32 %v16474_v38, %v16474_v38  ;;  %v16489_v24 = vsub.f32 %v18485_v1, %v5736_v35  ;;  %v5489_v11 = vmul.f32 0.5, %v16380_v15 }
0x1661   : > { %v13885_v39 = vpop.eup %13884  ;;  %v5600_v3 = vadd.f32 1.0, %v13883_v53  ;;  %v6134_v51 = vsel %vm4206_vm10, %v4596_v2, %v5114_v43  ;;  %v16496_v57 = vsub.f32 %v18488_v58, %v4731_v49  ;;  %v5765_v52 = vmul.f32 %v16483_v26, %v16483_v26  ;;  %v4717_v53 = vpop.xlane.xlu1 %4716 }
0x1662   : > { %5810 = vrot.lane.b32.xlu0 %v5766_v25, %s18367_s2  ;;  %v6102_v37 = vadd.f32 1.0, %v13885_v39  ;;  %v13887_v13 = vpop.eup %13886  ;;  %v4987_v25 = vmul.f32 0.5, %v16376_v10  ;;  %v5233_v27 = vmul.f32 0.125, %v5213_v36  ;;  %v4469_v2 = vmul.f32 0.5, %v18489_v28 }
0x1663   : > { %v5616_v33 = vmul.f32 %v5600_v3, %v5488_v55  ;;  %v13889_v63 = vpop.eup %13888  ;;  %v5099_v16 = vadd.f32 1.0, %v13887_v13  ;;  %v5768_v10 = vmul.f32 %v16489_v24, %v16489_v24  ;;  %v5991_v39 = vmul.f32 0.5, %v16386_v60 }
0x1664   : > { %v6118_v34 = vmul.f32 %v6102_v37, %v5990_v22  ;;  %v13891_v14 = vpop.eup %13890  ;;  %v4581_v54 = vadd.f32 1.0, %v13889_v63  ;;  %v4763_v15 = vmul.f32 %v16496_v57, %v16496_v57  ;;  %v16511_v36 = vsub.f32 %v18488_v58, %v5233_v27  ;;  %v18490_v63 = vld [vmem:[#allocation7_spill] sm:$0xff] }
0x1665   : > { %4804 = vrot.lane.b32.xlu1 %v4761_v23, %s14093_s3  ;;  %v6151_v46 = vsel %vm6144_vm11, %v6134_v51, %v5616_v33  ;;  %v5601_v45 = vadd.f32 1.0, %v13891_v14  ;;  %v5115_v9 = vmul.f32 %v5099_v16, %v4987_v25  ;;  %v5735_v43 = vmul.f32 0.125, %v5715_v31  ;;  %v5219_v60 = vpop.xlane.xlu1 %5218  ;;  %v4233_v16 = vpop.xlane.xlu0 %4232 }
0x1666   : > { %4810 = vrot.lane.b32.xlu0 %v4764_v20, %s14093_s3  ;;  %v6168_v12 = vsel %vm6161_vm12, %v6151_v46, %v6118_v34  ;;  %v4597_v8 = vmul.f32 %v4581_v54, %v4469_v2  ;;  %v5265_v37 = vmul.f32 %v16511_v36, %v16511_v36  ;;  %v4733_v33 = vmul.f32 0.125, %v4717_v53 }
0x1667   : > { %11659 = vmatprep.mubr.msk.f32.mxu0 %vm943_vm0, %v6168_v12  ;;  %v5617_v23 = vmul.f32 %v5601_v45, %v5489_v11  ;;  %v16521_v13 = vsub.f32 %v18488_v58, %v5735_v43  ;;  %v5235_v31 = vmul.f32 0.125, %v5219_v60  ;;  %v4264_v45 = vmul.f32 0.125, %v4233_v16  ;;  %v18492_v11 = vld [vmem:[#allocation4_spill] sm:$0xff] }
0x1668   : > { %v6135_v3 = vsel %vm4206_vm10, %v4597_v8, %v5115_v9  ;;  %v16527_v49 = vsub.f32 %v18490_v63, %v4733_v33 }
0x1669   : > { %5306 = vrot.lane.b32.xlu1 %v5263_v29, %s18377_s1  ;;  %v6152_v35 = vsel %vm6144_vm11, %v6135_v3, %v5617_v23  ;;  %v5767_v51 = vmul.f32 %v16521_v13, %v16521_v13  ;;  %v5721_v34 = vpop.xlane.xlu1 %5720  ;;  %v16533_v29 = vsub.f32 %v18490_v63, %v5235_v31  ;;  %v4239_v28 = vpop.xlane.xlu0 %4238 }
0x166a   : > { %5312 = vrot.lane.b32.xlu0 %v5266_v17, %s18377_s1  ;;  %v13893_v59 = vpop.eup %13892  ;;  %v4765_v14 = vmul.f32 %v16527_v49, %v16527_v49  ;;  %v5737_v46 = vmul.f32 0.125, %v5721_v34  ;;  %v4266_v2 = vmul.f32 0.125, %v4239_v28 }
0x166b   : > { %v6103_v20 = vadd.f32 1.0, %v13893_v59  ;;  %v5267_v17 = vmul.f32 %v16533_v29, %v16533_v29 }
0x166c   : > { %v16539_v12 = vsub.f32 %v18490_v63, %v5737_v46  ;;  %v16554_v53 = vsub.f32 %v15394_v6, %v4266_v2 }
0x166d   : > { %5808 = vrot.lane.b32.xlu1 %v5765_v52, %s18367_s2  ;;  %v6119_v55 = vmul.f32 %v6103_v20, %v5991_v39  ;;  %v4236_v54 = vpop.xlane.xlu1 %4235  ;;  %v16545_v52 = vsub.f32 %v18492_v11, %v4264_v45  ;;  %v4245_v20 = vpop.xlane.xlu0 %4244 }
0x166e   : > { %5814 = vrot.lane.b32.xlu0 %v5768_v10, %s18367_s2  ;;  %18491 = vst [vmem:[#allocation15_spill] sm:$0xff] %v16539_v12  ;;  %v5769_v25 = vmul.f32 %v16539_v12, %v16539_v12  ;;  %v4265_v27 = vmul.f32 0.125, %v4236_v54 }
0x166f   : > { %v6169_v22 = vsel %vm6161_vm12, %v6152_v35, %v6119_v55  ;;  %v4296_v59 = vmul.f32 %v16545_v52, %v16545_v52  ;;  %v4298_v55 = vmul.f32 %v16554_v53, %v16554_v53 }
0x1670   : > { %11660 = vmatmul.mubr.msk.f32.gmra.mrb[68].mxu0 %vm943_vm0, %v6169_v22  ;;  %v16549_v9 = vsub.f32 %v15388_v48, %v4265_v27 }
0x1671   : > { %4808 = vrot.lane.b32.xlu1 %v4763_v15, %s14093_s3  ;;  %v4242_v10 = vpop.xlane.xlu1 %4241  ;;  %v4328_v8 = vsel %vm4206_vm10, %v4296_v59, 0.0  ;;  %v4268_v15 = vmul.f32 0.125, %v4245_v20  ;;  %v4334_v22 = vsel %vm4206_vm10, %v4298_v55, 0.0  ;;  %v4799_v45 = vpop.permute.xlu0 %4798 }
0x1672   : > { %v4267_v23 = vmul.f32 0.125, %v4242_v10  ;;  %v4297_v39 = vmul.f32 %v16549_v9, %v16549_v9  ;;  %v4854_v54 = vsel %vm4206_vm10, %v4799_v45, 0.0 }
0x1673   : > { %v16566_v6 = vsub.f32 %v15398_v19, %v4268_v15 }
0x1674   : > { %v16560_v43 = vsub.f32 %v18484_v56, %v4267_v23  ;;  %v4331_v48 = vsel %vm4206_vm10, %v4297_v39, 0.0 }
0x1675   : > { %5310 = vrot.lane.b32.xlu1 %v5265_v37, %s18377_s1  ;;  %v4248_v3 = vpop.xlane.xlu1 %4247 }
0x1676   : > { %v4269_v35 = vmul.f32 0.125, %v4248_v3  ;;  %v4299_v60 = vmul.f32 %v16560_v43, %v16560_v43 }
0x1678   : > { %v16572_v56 = vsub.f32 %v18488_v58, %v4269_v35  ;;  %v4337_v33 = vsel %vm4206_vm10, %v4299_v60, 0.0 }
0x1679   : > { %5812 = vrot.lane.b32.xlu1 %v5767_v51, %s18367_s2  ;;  %v4300_v51 = vmul.f32 %v16566_v6, %v16566_v6 }
0x167a   : > { %v4301_v31 = vmul.f32 %v16572_v56, %v16572_v56 }
0x167b   : > { %v4340_v19 = vsel %vm4206_vm10, %v4300_v51, 0.0 }
0x167d   : > { %4812 = vrot.lane.b32.xlu1 %v4765_v14, %s14093_s3  ;;  %v4343_v14 = vsel %vm4206_vm10, %v4301_v31, 0.0 }
0x1681   : > { %5314 = vrot.lane.b32.xlu1 %v5267_v17, %s18377_s1 }
0x1685   : > { %5816 = vrot.lane.b32.xlu1 %v5769_v25, %s18367_s2 }
0x168b   : > { %v5803_v25 = vpop.permute.xlu0 %5802 }
0x168d   : > { %4329 = vadd.xlane.f32.xlu0 %v4328_v8 }
0x1691   : > { %4332 = vadd.xlane.f32.xlu0 %v4331_v48 }
0x1695   : > { %4335 = vadd.xlane.f32.xlu0 %v4334_v22 }
0x1696   : > { %v4801_v37 = vpop.permute.xlu1 %4800 }
0x1699   : > { %4338 = vadd.xlane.f32.xlu0 %v4337_v33  ;;  %v4857_v33 = vsel %vm4206_vm10, %v4801_v37, 0.0 }
0x169a   : > { %v5301_v34 = vpop.permute.xlu1 %5300 }
0x169d   : > { %4341 = vadd.xlane.f32.xlu0 %v4340_v19  ;;  %v5356_v19 = vsel %vm4206_vm10, %v5301_v34, 0.0 }
0x169e   : > { %v5303_v46 = vpop.permute.xlu1 %5302 }
0x169f   : > { %v5359_v58 = vsel %vm4206_vm10, %v5303_v46, 0.0 }
0x16a1   : > { %4344 = vadd.xlane.f32.xlu0 %v4343_v14 }
0x16a2   : > { %v5805_v16 = vpop.permute.xlu1 %5804 }
0x16a3   : > { %v5861_v17 = vsel %vm4206_vm10, %v5805_v16, 0.0 }
0x16a9   : > { %5360 = vadd.xlane.f32.xlu1 %v5359_v58  ;;  %v5858_v58 = vsel %vm4206_vm10, %v5803_v25, 0.0 }
0x16ad   : > { %5862 = vadd.xlane.f32.xlu1 %v5861_v17 }
0x16b1   : > { %4855 = vadd.xlane.f32.xlu1 %v4854_v54 }
0x16c5   : > { %v4251_v11 = vpop.xlane.xlu0 %4250 }
0x16c6   : > { %v4270_v27 = vmul.f32 0.125, %v4251_v11 }
0x16c8   : > { %v16585_v28 = vsub.f32 %v18485_v1, %v4270_v27 }
0x16c9   : > { %v4803_v10 = vpop.permute.xlu0 %4802 }
0x16ca   : > { %v4302_v2 = vmul.f32 %v16585_v28, %v16585_v28  ;;  %v4860_v46 = vsel %vm4206_vm10, %v4803_v10, 0.0 }
0x16cc   : > { %v4346_v59 = vsel %vm4206_vm10, %v4302_v2, 0.0 }
0x16cd   : > { %4347 = vadd.xlane.f32.xlu0 %v4346_v59  ;;  %v5305_v23 = vpop.permute.xlu0 %5304  ;;  %v16612_v59 = vld [vmem:[%s18292_s26] ss:$0 sm:$0xff] }
0x16ce   : > { %v5362_v45 = vsel %vm4206_vm10, %v5305_v23, 0.0 }
0x16d1   : > { %v5807_v15 = vpop.permute.xlu0 %5806 }
0x16d2   : > { %v5864_v11 = vsel %vm4206_vm10, %v5807_v15, 0.0 }
0x16d5   : > { %v4807_v60 = vpop.permute.xlu0 %4806 }
0x16d6   : > { %v4866_v23 = vsel %vm4206_vm10, %v4807_v60, 0.0 }
0x16d9   : > { %v5309_v31 = vpop.permute.xlu0 %5308 }
0x16da   : > { %v5368_v25 = vsel %vm4206_vm10, %v5309_v31, 0.0 }
0x16dd   : > { %v5811_v37 = vpop.permute.xlu0 %5810 }
0x16e1   : > { %v4254_v8 = vpop.xlane.xlu1 %4253  ;;  %v4811_v27 = vpop.permute.xlu0 %4810 }
0x16e2   : > { %v4271_v39 = vmul.f32 0.125, %v4254_v8 }
0x16e4   : > { %v16591_v20 = vsub.f32 %v18490_v63, %v4271_v39 }
0x16e5   : > { %v4805_v48 = vpop.permute.xlu1 %4804  ;;  %v5313_v8 = vpop.permute.xlu0 %5312 }
0x16e6   : > { %v4863_v55 = vsel %vm4206_vm10, %v4805_v48, 0.0  ;;  %v4303_v1 = vmul.f32 %v16591_v20, %v16591_v20  ;;  %v5374_v60 = vsel %vm4206_vm10, %v5313_v8, 0.0 }
0x16e7   : > { %4864 = vadd.xlane.f32.xlu1 %v4863_v55  ;;  %v5870_v55 = vsel %vm4206_vm10, %v5811_v37, 0.0 }
0x16e8   : > { %v4349_v3 = vsel %vm4206_vm10, %v4303_v1, 0.0 }
0x16e9   : > { %v5307_v35 = vpop.permute.xlu1 %5306  ;;  %4350 = vadd.xlane.f32.xlu0 %v4349_v3 }
0x16ea   : > { %v5365_v22 = vsel %vm4206_vm10, %v5307_v35, 0.0 }
0x16eb   : > { %5366 = vadd.xlane.f32.xlu1 %v5365_v22 }
0x16ed   : > { %v5809_v63 = vpop.permute.xlu1 %5808  ;;  %4858 = vadd.xlane.f32.xlu0 %v4857_v33 }
0x16ee   : > { %v5867_v51 = vsel %vm4206_vm10, %v5809_v63, 0.0 }
0x16ef   : > { %5868 = vadd.xlane.f32.xlu1 %v5867_v51  ;;  %v5815_v51 = vpop.permute.xlu0 %5814 }
0x16f1   : > { %v4809_v14 = vpop.permute.xlu1 %4808  ;;  %5357 = vadd.xlane.f32.xlu0 %v5356_v19 }
0x16f2   : > { %v4869_v17 = vsel %vm4206_vm10, %v4809_v14, 0.0 }
0x16f3   : > { %4861 = vadd.xlane.f32.xlu1 %v4860_v46 }
0x16f5   : > { %v5311_v16 = vpop.permute.xlu1 %5310  ;;  %5859 = vadd.xlane.f32.xlu0 %v5858_v58 }
0x16f6   : > { %v5371_v54 = vsel %vm4206_vm10, %v5311_v16, 0.0  ;;  %v5876_v16 = vsel %vm4206_vm10, %v5815_v51, 0.0  ;;  %v18495_v51 = vld [vmem:[#allocation3_spill] sm:$0xff] }
0x16f7   : > { %4870 = vadd.xlane.f32.xlu1 %v4869_v17 }
0x16f9   : > { %5363 = vadd.xlane.f32.xlu0 %v5362_v45  ;;  %v5813_v34 = vpop.permute.xlu1 %5812  ;;  %v4872_v45 = vsel %vm4206_vm10, %v4811_v27, 0.0  ;;  %v10195_v27 = vld [vmem:[%s18280_s14] ss:$0 sm:$0xff] }
0x16fa   : > { %v5873_v2 = vsel %vm4206_vm10, %v5813_v34, 0.0 }
0x16fb   : > { %5372 = vadd.xlane.f32.xlu1 %v5371_v54 }
0x16fd   : > { %5865 = vadd.xlane.f32.xlu0 %v5864_v11  ;;  %v4813_v10 = vpop.permute.xlu1 %4812 }
0x16fe   : > { %v11652_v39 = vpop.f32.mrb[62].mxu0  ;;  %v4875_v35 = vsel %vm4206_vm10, %v4813_v10, 0.0 }
0x16ff   : > { %5874 = vadd.xlane.f32.xlu1 %v5873_v2  ;;  %v6309_v15 = vadd.f32 %v11652_v39, %v16612_v59  ;;  %v6303_v48 = vpop.f32.mrb[63].mxu0 }
0x1700   : > { %v6304_v1 = vadd.f32 %v16612_v59, %v6303_v48 }
0x1701   : > { %5369 = vadd.xlane.f32.xlu0 %v5368_v25  ;;  %v6399_v3 = vmul.f32 0.044715, %v6309_v15  ;;  %v5315_v33 = vpop.permute.xlu1 %5314  ;;  %v6383_v10 = vmul.f32 0.5, %v6309_v15 }
0x1702   : > { %v6398_v22 = vmul.f32 0.044715, %v6304_v1  ;;  %v5377_v14 = vsel %vm4206_vm10, %v5315_v33, 0.0  ;;  %v6382_v8 = vmul.f32 0.5, %v6304_v1 }
0x1703   : > { %4867 = vadd.xlane.f32.xlu1 %v4866_v23  ;;  %v6415_v63 = vmul.f32 %v6399_v3, %v6309_v15 }
0x1704   : > { %v6414_v19 = vmul.f32 %v6398_v22, %v6304_v1 }
0x1705   : > { %5871 = vadd.xlane.f32.xlu0 %v5870_v55  ;;  %v6431_v31 = vmul.f32 %v6415_v63, %v6309_v15  ;;  %v5817_v34 = vpop.permute.xlu1 %5816 }
0x1706   : > { %v6430_v46 = vmul.f32 %v6414_v19, %v6304_v1  ;;  %v5879_v11 = vsel %vm4206_vm10, %v5817_v34, 0.0  ;;  %v16638_v19 = vadd.f32 %v10195_v27, %v18495_v51 }
0x1707   : > { %4876 = vadd.xlane.f32.xlu1 %v4875_v35  ;;  %v6447_v58 = vadd.f32 %v6431_v31, %v6309_v15 }
0x1708   : > { %v6446_v17 = vadd.f32 %v6430_v46, %v6304_v1  ;;  %18496 = vst [vmem:[#allocation11_spill] sm:$0xff] %v16638_v19 }
0x1709   : > { %5375 = vadd.xlane.f32.xlu0 %v5374_v60  ;;  %v6463_v37 = vmul.f32 0.7978846, %v6447_v58  ;;  %v18497_v58 = vmov 0.0|0.0  }
0x170a   : > { %v6462_v54 = vmul.f32 0.7978846, %v6446_v17 }
0x170b   : > { %5378 = vadd.xlane.f32.xlu1 %v5377_v14  ;;  %13894 = vtanh.f32 %v6463_v37  ;;  %v18360_v37 = vrot.slane %v16638_v19, 7 }
0x170c   : > { %13896 = vtanh.f32 %v6462_v54 }
0x170d   : > { %5877 = vadd.xlane.f32.xlu0 %v5876_v16 }
0x170f   : > { %4873 = vadd.xlane.f32.xlu1 %v4872_v45 }
0x1713   : > { %5880 = vadd.xlane.f32.xlu1 %v5879_v11 }
0x1715   : > { %v13895_v2 = vpop.eup %13894 }
0x1716   : > { %v13897_v25 = vpop.eup %13896  ;;  %v6495_v23 = vadd.f32 1.0, %v13895_v2 }
0x1717   : > { %v6494_v39 = vadd.f32 1.0, %v13897_v25 }
0x1718   : > { %v6511_v48 = vmul.f32 %v6495_v23, %v6383_v10 }
0x1719   : > { %v11655_v55 = vpop.f32.mrb[64].mxu0  ;;  %v6510_v3 = vmul.f32 %v6494_v39, %v6382_v8 }
0x171a   : > { %v6319_v35 = vadd.f32 %v11655_v55, %v16612_v59  ;;  %v6313_v22 = vpop.f32.mrb[65].mxu0  ;;  %v4330_v54 = vpop.xlane.xlu0 %4329 }
0x171b   : > { %v6314_v33 = vadd.f32 %v16612_v59, %v6313_v22  ;;  %v12541_v63 = vpack.c.bf16 %v6511_v48, %v6510_v3  ;;  %v16635_v60 = vpack.i.bf16 %v6511_v48, %v6510_v3  ;;  %v4360_v27 = vmul.f32 0.125, %v4330_v54 }
0x171c   : > { %v6401_v1 = vmul.f32 0.044715, %v6319_v35  ;;  %v6385_v22 = vmul.f32 0.5, %v6319_v35 }
0x171d   : > { %v6400_v31 = vmul.f32 0.044715, %v6314_v33  ;;  %12543 = vmatpush3.bf16.xpose.msk.msra.mxu1 %vm16631_vm14, %v12541_v63  ;;  %v6384_v51 = vmul.f32 0.5, %v6314_v33 }
0x171e   : > { %v6417_v14 = vmul.f32 %v6401_v1, %v6319_v35  ;;  %12544 = vmatprep.subr.bf16.mxu1 %v18497_v58  ;;  %v4333_v25 = vpop.xlane.xlu0 %4332 }
0x171f   : > { %v6416_v46 = vmul.f32 %v6400_v31, %v6314_v33 }
0x1720   : > { %v6433_v16 = vmul.f32 %v6417_v14, %v6319_v35 }
0x1721   : > { %v6432_v17 = vmul.f32 %v6416_v46, %v6314_v33  ;;  %v4361_v46 = vmul.f32 0.125, %v4333_v25 }
0x1722   : > { %v6449_v45 = vadd.f32 %v6433_v16, %v6319_v35  ;;  %v4336_v23 = vpop.xlane.xlu0 %4335 }
0x1723   : > { %13095 = vrot.lane.b32.xlu0 %v16635_v60, %s14096_s7  ;;  %v6448_v34 = vadd.f32 %v6432_v17, %v6314_v33 }
0x1724   : > { %v6465_v11 = vmul.f32 0.7978846, %v6449_v45 }
0x1725   : > { %v6464_v2 = vmul.f32 0.7978846, %v6448_v34 }
0x1726   : > { %13898 = vtanh.f32 %v6465_v11 }
0x1727   : > { %6528 = vrot.lane.b32.xlu0 %v18360_v37, %s14096_s7  ;;  %13900 = vtanh.f32 %v6464_v2  ;;  %v4376_v2 = vadd.f32 1e-06, %v4360_v27 }
0x1729   : > { %13902 = vrsqrt.f32 %v4376_v2 }
0x172b   : > { %13115 = vrot.lane.b32.xlu0 %v16635_v60, %s14097_s12 }
0x1730   : > { %v11658_v10 = vpop.f32.mrb[66].mxu0  ;;  %v13899_v48 = vpop.eup %13898 }
0x1731   : > { %v16652_v8 = vadd.f32 %v11658_v10, %v16612_v59  ;;  %v6323_v39 = vpop.f32.mrb[67].mxu0  ;;  %v13901_v3 = vpop.eup %13900  ;;  %v6497_v1 = vadd.f32 1.0, %v13899_v48 }
0x1732   : > { %v16655_v55 = vadd.f32 %v16612_v59, %v6323_v39  ;;  %v6496_v31 = vadd.f32 1.0, %v13901_v3  ;;  %v4339_v10 = vpop.xlane.xlu0 %4338  ;;  %v4377_v39 = vadd.f32 1e-06, %v4361_v46 }
0x1733   : > { %v6403_v63 = vmul.f32 0.044715, %v16652_v8  ;;  %v6513_v17 = vmul.f32 %v6497_v1, %v6385_v22  ;;  %v4362_v1 = vmul.f32 0.125, %v4336_v23 }
0x1734   : > { %v6402_v14 = vmul.f32 0.044715, %v16655_v55  ;;  %v6512_v34 = vmul.f32 %v6496_v31, %v6384_v51  ;;  %13904 = vrsqrt.f32 %v4377_v39  ;;  %v4363_v31 = vmul.f32 0.125, %v4339_v10 }
0x1735   : > { %v6419_v45 = vmul.f32 %v6403_v63, %v16652_v8 }
0x1736   : > { %v5361_v16 = vpop.xlane.xlu1 %5360  ;;  %v6418_v11 = vmul.f32 %v6402_v14, %v16655_v55  ;;  %v12545_v48 = vpack.c.bf16 %v6513_v17, %v6512_v34  ;;  %v16663_v33 = vpack.i.bf16 %v6513_v17, %v6512_v34  ;;  %v4342_v51 = vpop.xlane.xlu0 %4341  ;;  %v4378_v14 = vadd.f32 1e-06, %v4362_v1 }
0x1737   : > { %v6435_v54 = vmul.f32 %v6419_v45, %v16652_v8  ;;  %v4364_v46 = vmul.f32 0.125, %v4342_v51  ;;  %v5389_v45 = vmul.f32 0.125, %v5361_v16  ;;  %v4379_v23 = vadd.f32 1e-06, %v4363_v31 }
0x1738   : > { %v6434_v35 = vmul.f32 %v6418_v11, %v16655_v55  ;;  %12547 = vmatpush3.bf16.xpose.msk.msra.mxu1 %vm16631_vm14, %v12545_v48  ;;  %13100 = vrot.lane.b32.xlu1 %v16663_v33, %s14096_s7 }
0x1739   : > { %v6451_v3 = vadd.f32 %v6435_v54, %v16652_v8  ;;  %12548 = vmatprep.subr.bf16.mxu1 %v18497_v58  ;;  %13120 = vrot.lane.b32.xlu0 %v16663_v33, %s14097_s12  ;;  %v4380_v54 = vadd.f32 1e-06, %v4364_v46  ;;  %v5405_v39 = vadd.f32 1e-06, %v5389_v45 }
0x173a   : > { %v5863_v25 = vpop.xlane.xlu1 %5862  ;;  %v6450_v22 = vadd.f32 %v6434_v35, %v16655_v55  ;;  %v13903_v35 = vpop.eup %13902 }
0x173b   : > { %v6467_v27 = vmul.f32 0.7978846, %v6451_v3  ;;  %v5891_v34 = vmul.f32 0.125, %v5863_v25 }
0x173c   : > { %v6466_v63 = vmul.f32 0.7978846, %v6450_v22 }
0x173d   : > { %13906 = vtanh.f32 %v6467_v27  ;;  %v5907_v10 = vadd.f32 1e-06, %v5891_v34 }
0x173e   : > { %13908 = vtanh.f32 %v6466_v63  ;;  %v4856_v17 = vpop.xlane.xlu1 %4855  ;;  %v13905_v1 = vpop.eup %13904  ;;  %v4408_v63 = vmul.f32 %v13903_v35, %v16545_v52  ;;  %v16693_v35 = vld [vmem:[%s18289_s23] ss:$0 sm:$0xff] }
0x173f   : > { %v4886_v11 = vmul.f32 0.125, %v4856_v17  ;;  %13910 = vrsqrt.f32 %v4378_v14  ;;  %v6387_v14 = vmul.f32 0.5, %v16652_v8  ;;  %v4345_v8 = vpop.xlane.xlu0 %4344 }
0x1740   : > { %13912 = vrsqrt.f32 %v4379_v23 }
0x1741   : > { %v4902_v27 = vadd.f32 1e-06, %v4886_v11  ;;  %13914 = vrsqrt.f32 %v4380_v54  ;;  %v4409_v11 = vmul.f32 %v13905_v1, %v16549_v9 }
0x1742   : > { %13916 = vrsqrt.f32 %v5405_v39 }
0x1743   : > { %v11661_v2 = vpop.f32.mrb[68].mxu0  ;;  %13918 = vrsqrt.f32 %v5907_v10 }
0x1744   : > { %v16675_v48 = vadd.f32 %v11661_v2, %v16612_v59  ;;  %v6333_v3 = vpop.f32.mrb[69].mxu0  ;;  %13920 = vrsqrt.f32 %v4902_v27 }
0x1745   : > { %v16678_v22 = vadd.f32 %v16612_v59, %v6333_v3  ;;  %v6386_v59 = vmul.f32 0.5, %v16655_v55  ;;  %v4431_v55 = vmul.f32 %v16693_v35, %v4408_v63 }
0x1746   : > { %v6405_v16 = vmul.f32 0.044715, %v16675_v48 }
0x1747   : > { %v13907_v25 = vpop.eup %13906  ;;  %v6404_v51 = vmul.f32 0.044715, %v16678_v22 }
0x1748   : > { %v13909_v31 = vpop.eup %13908  ;;  %v6499_v46 = vadd.f32 1.0, %v13907_v25  ;;  %v6421_v17 = vmul.f32 %v6405_v16, %v16675_v48  ;;  %v4432_v16 = vmul.f32 %v16693_v35, %v4409_v11  ;;  %v4365_v25 = vmul.f32 0.125, %v4345_v8 }
0x1749   : > { %v6498_v45 = vadd.f32 1.0, %v13909_v31  ;;  %v6420_v23 = vmul.f32 %v6404_v51, %v16678_v22  ;;  %v13911_v39 = vpop.eup %13910 }
0x174a   : > { %v6515_v34 = vmul.f32 %v6499_v46, %v6387_v14  ;;  %v6437_v52 = vmul.f32 %v6421_v17, %v16675_v48  ;;  %v13913_v51 = vpop.eup %13912  ;;  %v4410_v63 = vmul.f32 %v13911_v39, %v16554_v53  ;;  %v18499_v39 = vld [vmem:[#allocation37_spill] sm:$0xff] }
0x174b   : > { %v6514_v2 = vmul.f32 %v6498_v45, %v6386_v59  ;;  %v6436_v54 = vmul.f32 %v6420_v23, %v16678_v22  ;;  %v13915_v14 = vpop.eup %13914  ;;  %v4411_v17 = vmul.f32 %v13913_v51, %v16560_v43  ;;  %v16711_v23 = vld [vmem:[%s18290_s24] ss:$0 sm:$0xff] }
0x174c   : > { %v6453_v3 = vadd.f32 %v6437_v52, %v16675_v48  ;;  %v13917_v46 = vpop.eup %13916  ;;  %v16717_v11 = vadd.f32 %v16711_v23, %v4432_v16  ;;  %v4433_v53 = vmul.f32 %v16693_v35, %v4410_v63  ;;  %v4381_v52 = vadd.f32 1e-06, %v4365_v25 }
0x174d   : > { %v6452_v10 = vadd.f32 %v6436_v54, %v16678_v22  ;;  %v12549_v9 = vpack.c.bf16 %v6515_v34, %v6514_v2  ;;  %v16698_v1 = vpack.i.bf16 %v6515_v34, %v6514_v2  ;;  %v13919_v59 = vpop.eup %13918  ;;  %v16714_v34 = vadd.f32 %v16711_v23, %v4431_v55  ;;  %v18498_v54 = vld [vmem:[#allocation16_spill] sm:$0xff] }
0x174e   : > { %v6469_v27 = vmul.f32 0.7978846, %v6453_v3  ;;  %v13921_v45 = vpop.eup %13920  ;;  %v4434_v2 = vmul.f32 %v16693_v35, %v4411_v17  ;;  %v4412_v43 = vmul.f32 %v13915_v14, %v16566_v6  ;;  %v5437_v8 = vmul.f32 %v13917_v46, %v18498_v54 }
0x174f   : > { %v6468_v31 = vmul.f32 0.7978846, %v6452_v10  ;;  %12551 = vmatpush3.bf16.xpose.msk.msra.mxu1 %vm16631_vm14, %v12549_v9  ;;  %13105 = vrot.lane.b32.xlu1 %v16698_v1, %s14096_s7  ;;  %v5939_v3 = vmul.f32 %v13919_v59, %v16229_v18  ;;  %v4934_v10 = vmul.f32 %v13921_v45, %v18499_v39  ;;  %v16726_v55 = vadd.f32 %v16711_v23, %v4433_v53 }
0x1750   : > { %13922 = vtanh.f32 %v6469_v27  ;;  %12552 = vmatprep.subr.bf16.mxu1 %v18497_v58  ;;  %v4486_v16 = vmul.f32 0.044715, %v16714_v34  ;;  %v4487_v25 = vmul.f32 0.044715, %v16717_v11  ;;  %v16732_v6 = vadd.f32 %v16711_v23, %v4434_v2 }
0x1751   : > { %13924 = vtanh.f32 %v6468_v31  ;;  %v6389_v31 = vmul.f32 0.5, %v16675_v48  ;;  %v4435_v18 = vmul.f32 %v16693_v35, %v4412_v43  ;;  %v5456_v63 = vmul.f32 %v18454_v7, %v5437_v8 }
0x1752   : > { %13926 = vrsqrt.f32 %v4381_v52  ;;  %v5958_v17 = vmul.f32 %v18457_v61, %v5939_v3  ;;  %v4953_v59 = vmul.f32 %v15492_v44, %v4934_v10  ;;  %v6388_v53 = vmul.f32 0.5, %v16678_v22 }
0x1753   : > { %v4502_v48 = vmul.f32 %v4486_v16, %v16714_v34  ;;  %v4503_v2 = vmul.f32 %v4487_v25, %v16717_v11  ;;  %v16742_v43 = vadd.f32 %v16711_v23, %v4435_v18  ;;  %v4488_v8 = vmul.f32 0.044715, %v16726_v55 }
0x1754   : > { %v16747_v3 = vadd.f32 %v18455_v40, %v5456_v63  ;;  %v16750_v10 = vadd.f32 %v18458_v47, %v5958_v17  ;;  %v16753_v22 = vadd.f32 %v18448_v62, %v4953_v59  ;;  %v4473_v37 = vmul.f32 0.5, %v16732_v6 }
0x1755   : > { %v4490_v25 = vmul.f32 0.044715, %v16742_v43  ;;  %v4504_v63 = vmul.f32 %v4488_v8, %v16726_v55 }
0x1756   : > { %v5507_v18 = vmul.f32 0.044715, %v16747_v3 }
0x1757   : > { %v4506_v59 = vmul.f32 %v4490_v25, %v16742_v43 }
0x1759   : > { %v4522_v25 = vmul.f32 %v4506_v59, %v16742_v43 }
0x175a   : > { %v4348_v9 = vpop.xlane.xlu0 %4347  ;;  %v13923_v51 = vpop.eup %13922 }
0x175b   : > { %v4366_v27 = vmul.f32 0.125, %v4348_v9  ;;  %v13925_v14 = vpop.eup %13924  ;;  %v6501_v46 = vadd.f32 1.0, %v13923_v51  ;;  %v4489_v9 = vmul.f32 0.044715, %v16732_v6 }
0x175c   : > { %v6500_v52 = vadd.f32 1.0, %v13925_v14  ;;  %v13927_v51 = vpop.eup %13926  ;;  %v4518_v14 = vmul.f32 %v4502_v48, %v16714_v34  ;;  %v5523_v48 = vmul.f32 %v5507_v18, %v16747_v3 }
0x175d   : > { %v4382_v45 = vadd.f32 1e-06, %v4366_v27  ;;  %v6517_v54 = vmul.f32 %v6501_v46, %v6389_v31  ;;  %v18359_v31 = vrot.slane %v16638_v19, 6  ;;  %v5004_v46 = vmul.f32 0.044715, %v16753_v22 }
0x175e   : > { %v6516_v39 = vmul.f32 %v6500_v52, %v6388_v53  ;;  %v4505_v17 = vmul.f32 %v4489_v9, %v16732_v6  ;;  %v4519_v53 = vmul.f32 %v4503_v2, %v16717_v11  ;;  %v6009_v52 = vmul.f32 0.044715, %v16750_v10 }
0x175f   : > { %13928 = vrsqrt.f32 %v4382_v45  ;;  %v4413_v45 = vmul.f32 %v13927_v51, %v16572_v56  ;;  %v4534_v9 = vadd.f32 %v4518_v14, %v16714_v34  ;;  %v5539_v14 = vmul.f32 %v5523_v48, %v16747_v3 }
0x1760   : > { %v12553_v27 = vpack.c.bf16 %v6517_v54, %v6516_v39  ;;  %v16755_v16 = vpack.i.bf16 %v6517_v54, %v6516_v39  ;;  %v6535_v54 = vrot.slane %v16638_v19, 5  ;;  %v4520_v39 = vmul.f32 %v4504_v63, %v16726_v55 }
0x1761   : > { %v4521_v56 = vmul.f32 %v4505_v17, %v16732_v6  ;;  %v4436_v2 = vmul.f32 %v16693_v35, %v4413_v45  ;;  %v4535_v51 = vadd.f32 %v4519_v53, %v16717_v11  ;;  %v6025_v18 = vmul.f32 %v6009_v52, %v16750_v10 }
0x1762   : > { %12555 = vmatpush3.bf16.xpose.msk.msra.mxu1 %vm16631_vm14, %v12553_v27  ;;  %13110 = vrot.lane.b32.xlu1 %v16755_v16, %s14096_s7  ;;  %v5020_v27 = vmul.f32 %v5004_v46, %v16753_v22  ;;  %v4536_v46 = vadd.f32 %v4520_v39, %v16726_v55  ;;  %v4550_v17 = vmul.f32 0.7978846, %v4534_v9  ;;  %v4538_v45 = vadd.f32 %v4522_v25, %v16742_v43 }
0x1763   : > { %13130 = vrot.lane.b32.xlu0 %v16755_v16, %s14097_s12  ;;  %12572 = vmatprep.subr.bf16.mxu1 %v18497_v58  ;;  %v4537_v59 = vadd.f32 %v4521_v56, %v16732_v6  ;;  %v16802_v53 = vadd.f32 %v16711_v23, %v4436_v2  ;;  %v6041_v52 = vmul.f32 %v6025_v18, %v16750_v10  ;;  %v5491_v6 = vmul.f32 0.5, %v16747_v3 }
0x1764   : > { %v5555_v39 = vadd.f32 %v5539_v14, %v16747_v3  ;;  %13930 = vtanh.f32 %v4550_v17  ;;  %v4554_v25 = vmul.f32 0.7978846, %v4538_v45 }
0x1765   : > { %18500 = vst [vmem:[#allocation12_spill] sm:$0xff] %v16802_v53  ;;  %v4491_v18 = vmul.f32 0.044715, %v16802_v53 }
0x1766   : > { %6532 = vrot.lane.b32.xlu1 %v18359_v31, %s14093_s3 }
0x1767   : > { %13140 = vrot.lane.b32.xlu0 %v16663_v33, %s14098_s10 }
0x1769   : > { %v13929_v8 = vpop.eup %13928 }
0x176a   : > { %6536 = vrot.lane.b32.xlu1 %v6535_v54, %s14097_s12  ;;  %v4414_v63 = vmul.f32 %v13929_v8, %v16585_v28  ;;  %v5036_v54 = vmul.f32 %v5020_v27, %v16753_v22  ;;  %v4551_v28 = vmul.f32 0.7978846, %v4535_v51  ;;  %v4552_v8 = vmul.f32 0.7978846, %v4536_v46 }
0x176b   : > { %13150 = vrot.lane.b32.xlu0 %v16755_v16, %s14098_s10  ;;  %v4553_v27 = vmul.f32 0.7978846, %v4537_v59  ;;  %v6057_v51 = vadd.f32 %v6041_v52, %v16750_v10  ;;  %v5571_v46 = vmul.f32 0.7978846, %v5555_v39 }
0x176c   : > { %v4437_v48 = vmul.f32 %v16693_v35, %v4414_v63  ;;  %v5052_v9 = vadd.f32 %v5036_v54, %v16753_v22  ;;  %13932 = vtanh.f32 %v4551_v28 }
0x176d   : > { %13934 = vtanh.f32 %v4552_v8  ;;  %v6073_v52 = vmul.f32 0.7978846, %v6057_v51 }
0x176e   : > { %13125 = vrot.lane.b32.xlu1 %v16698_v1, %s14097_s12  ;;  %v16817_v63 = vadd.f32 %v16711_v23, %v4437_v48  ;;  %v5068_v54 = vmul.f32 0.7978846, %v5052_v9  ;;  %13936 = vtanh.f32 %v4553_v27  ;;  %v4507_v48 = vmul.f32 %v4491_v18, %v16802_v53 }
0x176f   : > { %13160 = vrot.lane.b32.xlu0 %v16635_v60, %s14099_s11  ;;  %13938 = vtanh.f32 %v4554_v25 }
0x1770   : > { %18501 = vst [vmem:[#allocation18_spill] sm:$0xff] %v16817_v63  ;;  %v4492_v39 = vmul.f32 0.044715, %v16817_v63  ;;  %v4523_v18 = vmul.f32 %v4507_v48, %v16802_v53 }
0x1772   : > { %13135 = vrot.lane.b32.xlu1 %v16635_v60, %s14098_s10 }
0x1773   : > { %13170 = vrot.lane.b32.xlu0 %v16663_v33, %s14099_s11 }
0x1774   : > { %v4865_v56 = vpop.xlane.xlu1 %4864 }
0x1775   : > { %v4889_v2 = vmul.f32 0.125, %v4865_v56 }
0x1776   : > { %v4351_v14 = vpop.xlane.xlu0 %4350  ;;  %13145 = vrot.lane.b32.xlu1 %v16698_v1, %s14098_s10 }
0x1777   : > { %v4905_v17 = vadd.f32 1e-06, %v4889_v2  ;;  %v4367_v59 = vmul.f32 0.125, %v4351_v14  ;;  %13180 = vrot.lane.b32.xlu0 %v16698_v1, %s14099_s11  ;;  %v13931_v2 = vpop.eup %13930 }
0x1778   : > { %v5367_v45 = vpop.xlane.xlu1 %5366 }
0x1779   : > { %13940 = vrsqrt.f32 %v4905_v17  ;;  %v5391_v28 = vmul.f32 0.125, %v5367_v45  ;;  %v4383_v27 = vadd.f32 1e-06, %v4367_v59  ;;  %v4508_v17 = vmul.f32 %v4492_v39, %v16817_v63  ;;  %v13933_v45 = vpop.eup %13932 }
0x177a   : > { %v4859_v56 = vpop.xlane.xlu0 %4858  ;;  %13942 = vtanh.f32 %v5571_v46  ;;  %13155 = vrot.lane.b32.xlu1 %v16635_v60, %s14093_s3  ;;  %v4583_v21 = vadd.f32 1.0, %v13933_v45 }
0x177b   : > { %v5407_v8 = vadd.f32 1e-06, %v5391_v28  ;;  %v4887_v9 = vmul.f32 0.125, %v4859_v56  ;;  %13944 = vtanh.f32 %v5068_v54  ;;  %13190 = vrot.lane.b32.xlu0 %v16755_v16, %s14099_s11  ;;  %v13935_v28 = vpop.eup %13934  ;;  %v4470_v56 = vmul.f32 0.5, %v16714_v34 }
0x177c   : > { %v5869_v25 = vpop.xlane.xlu1 %5868  ;;  %13946 = vtanh.f32 %v6073_v52  ;;  %v4471_v52 = vmul.f32 0.5, %v16717_v11  ;;  %v4474_v34 = vmul.f32 0.5, %v16742_v43  ;;  %v4524_v11 = vmul.f32 %v4508_v17, %v16817_v63 }
0x177d   : > { %v4903_v14 = vadd.f32 1e-06, %v4887_v9  ;;  %v5893_v51 = vmul.f32 0.125, %v5869_v25  ;;  %13948 = vrsqrt.f32 %v5407_v8  ;;  %v4582_v9 = vadd.f32 1.0, %v13931_v2  ;;  %v13937_v25 = vpop.eup %13936 }
0x177e   : > { %v5358_v46 = vpop.xlane.xlu0 %5357  ;;  %13165 = vrot.lane.b32.xlu1 %v16663_v33, %s14093_s3  ;;  %v4584_v17 = vadd.f32 1.0, %v13935_v28 }
0x177f   : > { %13950 = vrsqrt.f32 %v4903_v14  ;;  %v5388_v54 = vmul.f32 0.125, %v5358_v46  ;;  %13200 = vrot.lane.b32.xlu0 %v16635_v60, %s14100_s6  ;;  %v5909_v48 = vadd.f32 1e-06, %v5893_v51  ;;  %v4539_v14 = vadd.f32 %v4523_v18, %v16802_v53  ;;  %v13939_v46 = vpop.eup %13938 }
0x1780   : > { %13952 = vrsqrt.f32 %v4383_v27  ;;  %v4862_v59 = vpop.xlane.xlu1 %4861  ;;  %v4472_v27 = vmul.f32 0.5, %v16726_v55  ;;  %v4988_v55 = vmul.f32 0.5, %v16753_v22  ;;  %v4586_v3 = vadd.f32 1.0, %v13939_v46 }
0x1781   : > { %v5404_v39 = vadd.f32 1e-06, %v5388_v54  ;;  %v4888_v8 = vmul.f32 0.125, %v4862_v59  ;;  %v16845_v59 = vmul.f32 %v4582_v9, %v4470_v56  ;;  %v4555_v45 = vmul.f32 0.7978846, %v4539_v14 }
0x1782   : > { %v5860_v31 = vpop.xlane.xlu0 %5859  ;;  %13175 = vrot.lane.b32.xlu1 %v16698_v1, %s14093_s3  ;;  %v4540_v56 = vadd.f32 %v4524_v11, %v16817_v63 }
0x1783   : > { %v13941_v2 = vpop.eup %13940  ;;  %13954 = vrsqrt.f32 %v5404_v39  ;;  %v4904_v19 = vadd.f32 1e-06, %v4888_v8  ;;  %v5890_v12 = vmul.f32 0.125, %v5860_v31  ;;  %13210 = vrot.lane.b32.xlu0 %v16663_v33, %s14100_s6  ;;  %v5993_v8 = vmul.f32 0.5, %v16750_v10 }
0x1784   : > { %v13943_v51 = vpop.eup %13942  ;;  %v4937_v18 = vmul.f32 %v13941_v2, %v16450_v0  ;;  %v4871_v54 = vpop.xlane.xlu1 %4870  ;;  %13956 = vrsqrt.f32 %v5909_v48  ;;  %v4585_v0 = vadd.f32 1.0, %v13937_v25  ;;  %v16853_v2 = vmul.f32 %v4583_v21, %v4471_v52  ;;  %v18503_v52 = vld [vmem:[#allocation9_spill] sm:$0xff] }
0x1785   : > { %v13945_v43 = vpop.eup %13944  ;;  %v5906_v31 = vadd.f32 1e-06, %v5890_v12  ;;  %13958 = vrsqrt.f32 %v4904_v19  ;;  %v4891_v28 = vmul.f32 0.125, %v4871_v54  ;;  %v5603_v14 = vadd.f32 1.0, %v13943_v51 }
0x1786   : > { %v5364_v39 = vpop.xlane.xlu0 %5363  ;;  %v13947_v9 = vpop.eup %13946  ;;  %18502 = vst [vmem:[#allocation22_spill] sm:$0xff] %v16853_v2  ;;  %13185 = vrot.lane.b32.xlu1 %v16755_v16, %s14093_s3  ;;  %v4956_v12 = vmul.f32 %v15492_v44, %v4937_v18  ;;  %v5100_v48 = vadd.f32 1.0, %v13945_v43  ;;  %v16863_v2 = vmul.f32 %v4585_v0, %v4473_v37  ;;  %v4556_v18 = vmul.f32 0.7978846, %v4540_v56 }
0x1787   : > { %13960 = vrsqrt.f32 %v5906_v31  ;;  %v5390_v22 = vmul.f32 0.125, %v5364_v39  ;;  %v13949_v53 = vpop.eup %13948  ;;  %13220 = vrot.lane.b32.xlu0 %v16698_v1, %s14100_s6  ;;  %v16860_v31 = vmul.f32 %v4584_v17, %v4472_v27  ;;  %v6105_v63 = vadd.f32 1.0, %v13947_v9  ;;  %v18504_v9 = vld [vmem:[#allocation20_spill] sm:$0xff] }
0x1788   : > { %v5373_v19 = vpop.xlane.xlu1 %5372  ;;  %13962 = vtanh.f32 %v4555_v45  ;;  %v5439_v54 = vmul.f32 %v13949_v53, %v16467_v50  ;;  %v16866_v43 = vmul.f32 %v4586_v3, %v4474_v34  ;;  %v16871_v27 = vadd.f32 %v18448_v62, %v4956_v12 }
0x1789   : > { %v13951_v10 = vpop.eup %13950  ;;  %v5406_v25 = vadd.f32 1e-06, %v5390_v22  ;;  %v5393_v11 = vmul.f32 0.125, %v5373_v19  ;;  %v4907_v17 = vadd.f32 1e-06, %v4891_v28  ;;  %v5116_v22 = vmul.f32 %v5100_v48, %v4988_v55 }
0x178a   : > { %v13953_v21 = vpop.eup %13952  ;;  %v4935_v46 = vmul.f32 %v13951_v10, %v18503_v52  ;;  %v5866_v39 = vpop.xlane.xlu0 %5865  ;;  %13195 = vrot.lane.b32.xlu1 %v16635_v60, %s18377_s1  ;;  %v16873_v19 = vmul.f32 %v5603_v14, %v5491_v6  ;;  %v16880_v10 = vmul.f32 %v6105_v63, %v5993_v8  ;;  %v5458_v6 = vmul.f32 %v18454_v7, %v5439_v54  ;;  %v18505_v54 = vld [vmem:[#allocation10_spill] sm:$0xff] }
0x178b   : > { %13964 = vrsqrt.f32 %v5406_v25  ;;  %v5892_v51 = vmul.f32 0.125, %v5866_v39  ;;  %13230 = vrot.lane.b32.xlu0 %v16755_v16, %s14100_s6  ;;  %v4415_v50 = vmul.f32 %v13953_v21, %v16591_v20  ;;  %v5409_v53 = vadd.f32 1e-06, %v5393_v11 }
0x178c   : > { %v5875_v45 = vpop.xlane.xlu1 %5874  ;;  %v4954_v56 = vmul.f32 %v15492_v44, %v4935_v46  ;;  %13966 = vtanh.f32 %v4556_v18  ;;  %v16888_v11 = vsel %vm4206_vm10, %v16845_v59, %v5116_v22  ;;  %v5007_v63 = vmul.f32 0.044715, %v16871_v27 }
0x178d   : > { %v13955_v37 = vpop.eup %13954  ;;  %v5908_v34 = vadd.f32 1e-06, %v5892_v51  ;;  %v5895_v0 = vmul.f32 0.125, %v5875_v45  ;;  %v4438_v21 = vmul.f32 %v16693_v35, %v4415_v50  ;;  %v16905_v22 = vadd.f32 %v18455_v40, %v5458_v6 }
0x178e   : > { %v5436_v3 = vmul.f32 %v13955_v37, %v18504_v9  ;;  %v5370_v12 = vpop.xlane.xlu0 %5369  ;;  %v13957_v55 = vpop.eup %13956  ;;  %13205 = vrot.lane.b32.xlu1 %v16663_v33, %s18377_s1  ;;  %v16895_v39 = vadd.f32 %v18448_v62, %v4954_v56 }
0x178f   : > { %13968 = vrsqrt.f32 %v5908_v34  ;;  %v5911_v28 = vadd.f32 1e-06, %v5895_v0  ;;  %v5392_v48 = vmul.f32 0.125, %v5370_v12  ;;  %v13959_v14 = vpop.eup %13958  ;;  %13240 = vrot.lane.b32.xlu0 %v16635_v60, %s14101_s4  ;;  %v5941_v18 = vmul.f32 %v13957_v55, %v16483_v26 }
0x1790   : > { %v5455_v20 = vmul.f32 %v18454_v7, %v5436_v3  ;;  %13970 = vrsqrt.f32 %v4907_v17  ;;  %v4868_v25 = vpop.xlane.xlu1 %4867  ;;  %v4936_v50 = vmul.f32 %v13959_v14, %v16268_v4  ;;  %v5023_v34 = vmul.f32 %v5007_v63, %v16871_v27 }
0x1791   : > { %v13961_v8 = vpop.eup %13960  ;;  %13972 = vrsqrt.f32 %v5409_v53  ;;  %v5408_v52 = vadd.f32 1e-06, %v5392_v48  ;;  %v4890_v46 = vmul.f32 0.125, %v4868_v25  ;;  %v16916_v12 = vadd.f32 %v16711_v23, %v4438_v21 }
0x1792   : > { %v16899_v59 = vadd.f32 %v18455_v40, %v5455_v20  ;;  %v5938_v51 = vmul.f32 %v13961_v8, %v18505_v54  ;;  %v5872_v17 = vpop.xlane.xlu0 %5871  ;;  %v16902_v45 = vpop.eup %13962  ;;  %13974 = vrsqrt.f32 %v5911_v28  ;;  %13215 = vrot.lane.b32.xlu1 %v16698_v1, %s18377_s1  ;;  %v5960_v4 = vmul.f32 %v18457_v61, %v5941_v18 }
0x1793   : > { %v4906_v35 = vadd.f32 1e-06, %v4890_v46  ;;  %v5894_v37 = vmul.f32 0.125, %v5872_v17  ;;  %13976 = vrsqrt.f32 %v5408_v52  ;;  %13250 = vrot.lane.b32.xlu0 %v16663_v33, %s14101_s4  ;;  %v5005_v28 = vmul.f32 0.044715, %v16895_v39 }
0x1794   : > { %v5957_v26 = vmul.f32 %v18457_v61, %v5938_v51  ;;  %v4877_v53 = vpop.xlane.xlu1 %4876  ;;  %v5506_v3 = vmul.f32 0.044715, %v16899_v59  ;;  %v16925_v25 = vmul.f32 0.5, %v16871_v27  ;;  %v4955_v23 = vmul.f32 %v15492_v44, %v4936_v50 }
0x1795   : > { %v13965_v0 = vpop.eup %13964  ;;  %13978 = vrsqrt.f32 %v4906_v35  ;;  %v5910_v56 = vadd.f32 1e-06, %v5894_v37  ;;  %v4893_v9 = vmul.f32 0.125, %v4877_v53  ;;  %v16934_v52 = vmul.f32 0.5, %v16905_v22 }
0x1796   : > { %v16920_v55 = vadd.f32 %v18458_v47, %v5957_v26  ;;  %v5376_v6 = vpop.xlane.xlu0 %5375  ;;  %v5522_v20 = vmul.f32 %v5506_v3, %v16899_v59  ;;  %v16927_v63 = vpop.eup %13966  ;;  %13225 = vrot.lane.b32.xlu1 %v16755_v16, %s18377_s1  ;;  %v5438_v8 = vmul.f32 %v13965_v0, %v16291_v30  ;;  %v5039_v17 = vmul.f32 %v5023_v34, %v16871_v27  ;;  %s18518_s1 = smov 112  }
0x1797   : > { %v4909_v48 = vadd.f32 1e-06, %v4893_v9  ;;  %v5394_v14 = vmul.f32 0.125, %v5376_v6  ;;  %18506 = vst [vmem:[#allocation17_spill] sm:$0xff] %v16927_v63  ;;  %13980 = vrsqrt.f32 %v5910_v56  ;;  %13260 = vrot.lane.b32.xlu0 %v16698_v1, %s14101_s4  ;;  %v16941_v37 = vadd.f32 %v18458_v47, %v5960_v4 }
0x1798   : > { %v5379_v21 = vpop.xlane.xlu1 %5378  ;;  %v5538_v51 = vmul.f32 %v5522_v20, %v16899_v59  ;;  %v6008_v50 = vmul.f32 0.044715, %v16920_v55  ;;  %v5021_v26 = vmul.f32 %v5005_v28, %v16895_v39  ;;  %v16949_v34 = vadd.f32 %v18448_v62, %v4955_v23 }
0x1799   : > { %v13969_v46 = vpop.eup %13968  ;;  %v5410_v18 = vadd.f32 1e-06, %v5394_v14  ;;  %v5395_v54 = vmul.f32 0.125, %v5379_v21  ;;  %13982 = vrsqrt.f32 %v4909_v48  ;;  %v5457_v3 = vmul.f32 %v18454_v7, %v5438_v8 }
0x179a   : > { %v13971_v35 = vpop.eup %13970  ;;  %v5878_v30 = vpop.xlane.xlu0 %5877  ;;  %v5554_v9 = vadd.f32 %v5538_v51, %v16899_v59  ;;  %13235 = vrot.lane.b32.xlu1 %v16635_v60, %s18367_s2  ;;  %v5940_v4 = vmul.f32 %v13969_v46, %v16305_v41  ;;  %v6024_v48 = vmul.f32 %v6008_v50, %v16920_v55  ;;  %v5037_v41 = vmul.f32 %v5021_v26, %v16895_v39 }
0x179b   : > { %v13973_v53 = vpop.eup %13972  ;;  %13984 = vrsqrt.f32 %v5410_v18  ;;  %v5411_v0 = vadd.f32 1e-06, %v5395_v54  ;;  %v5896_v56 = vmul.f32 0.125, %v5878_v30  ;;  %13270 = vrot.lane.b32.xlu0 %v16755_v16, %s14101_s4  ;;  %v4939_v14 = vmul.f32 %v13971_v35, %v16496_v57 }
0x179c   : > { %v4874_v6 = vpop.xlane.xlu1 %4873  ;;  %v13975_v28 = vpop.eup %13974  ;;  %v5570_v18 = vmul.f32 0.7978846, %v5554_v9  ;;  %v5441_v23 = vmul.f32 %v13973_v53, %v16511_v36  ;;  %v6040_v8 = vmul.f32 %v6024_v48, %v16920_v55  ;;  %v16963_v57 = vadd.f32 %v18455_v40, %v5457_v3 }
0x179d   : > { %v5912_v20 = vadd.f32 1e-06, %v5896_v56  ;;  %v4892_v21 = vmul.f32 0.125, %v4874_v6  ;;  %v13977_v54 = vpop.eup %13976  ;;  %13986 = vrsqrt.f32 %v5411_v0  ;;  %v5959_v35 = vmul.f32 %v18457_v61, %v5940_v4 }
0x179e   : > { %v13096_v51 = vpop.permute.xlu0 %13095  ;;  %13245 = vrot.lane.b32.xlu1 %v16663_v33, %s18367_s2  ;;  %v5943_v36 = vmul.f32 %v13975_v28, %v16521_v13  ;;  %v6056_v56 = vadd.f32 %v6040_v8, %v16920_v55  ;;  %v5440_v6 = vmul.f32 %v13977_v54, %v16393_v5  ;;  %v16973_v4 = vmul.f32 0.5, %v16895_v39 }
0x179f   : > { %v13979_v46 = vpop.eup %13978  ;;  %13988 = vrsqrt.f32 %v5912_v20  ;;  %v4908_v30 = vadd.f32 1e-06, %v4892_v21  ;;  %v13098_v50 = vunpack.i.h.bf16 %v13096_v51  ;;  %v13097_v63 = vunpack.i.l.bf16 %v13096_v51  ;;  %13280 = vrot.lane.b32.xlu0 %v16635_v60, %s18369_s8 }
0x17a0   : > { %v5881_v53 = vpop.xlane.xlu1 %5880  ;;  %13990 = vtanh.f32 %v5570_v18  ;;  %v4938_v3 = vmul.f32 %v13979_v46, %v16339_v42  ;;  %v5053_v13 = vadd.f32 %v5037_v41, %v16895_v39  ;;  %v4958_v48 = vmul.f32 %v15492_v44, %v4939_v14 }
0x17a1   : > { %13992 = vrsqrt.f32 %v4908_v30  ;;  %v12557_v26 = vpack.c.bf16 %v13098_v50, %v13097_v63  ;;  %v5897_v0 = vmul.f32 0.125, %v5881_v53  ;;  %v13981_v9 = vpop.eup %13980  ;;  %v6072_v63 = vmul.f32 0.7978846, %v6056_v56 }
0x17a2   : > { %v5055_v20 = vadd.f32 %v5039_v17, %v16871_v27  ;;  %13255 = vrot.lane.b32.xlu1 %v16698_v1, %s18367_s2  ;;  %v5460_v42 = vmul.f32 %v18454_v7, %v5441_v23  ;;  %v16984_v5 = vadd.f32 %v18458_v47, %v5959_v35  ;;  %v5962_v39 = vmul.f32 %v18457_v61, %v5943_v36 }
0x17a3   : > { %v5913_v28 = vadd.f32 1e-06, %v5897_v0  ;;  %12559 = vmatpush3.bf16.xpose.msk.msra.mxu0 %vm16631_vm14, %v12557_v26  ;;  %v13983_v21 = vpop.eup %13982  ;;  %v5069_v14 = vmul.f32 0.7978846, %v5053_v13  ;;  %13290 = vrot.lane.b32.xlu0 %v16663_v33, %s18369_s8  ;;  %v5942_v27 = vmul.f32 %v13981_v9, %v16440_v32  ;;  %v5006_v17 = vmul.f32 0.044715, %v16949_v34 }
0x17a4   : > { %12560 = vmatprep.subr.bf16.mxu0 %v18497_v58  ;;  %v5508_v54 = vmul.f32 0.044715, %v16963_v57  ;;  %v5459_v23 = vmul.f32 %v18454_v7, %v5440_v6  ;;  %v4957_v51 = vmul.f32 %v15492_v44, %v4938_v3  ;;  %v5490_v8 = vmul.f32 0.5, %v16899_v59 }
0x17a5   : > { %v13985_v18 = vpop.eup %13984  ;;  %13994 = vrsqrt.f32 %v5913_v28  ;;  %v16997_v41 = vadd.f32 %v18448_v62, %v4958_v48  ;;  %v4941_v46 = vmul.f32 %v13983_v21, %v16527_v49  ;;  %v5022_v32 = vmul.f32 %v5006_v17, %v16949_v34 }
0x17a6   : > { %13996 = vtanh.f32 %v6072_v63  ;;  %13265 = vrot.lane.b32.xlu1 %v16755_v16, %s18367_s2  ;;  %v17004_v50 = vadd.f32 %v18455_v40, %v5460_v42  ;;  %v5442_v35 = vmul.f32 %v13985_v18, %v16474_v38  ;;  %v5992_v59 = vmul.f32 0.5, %v16920_v55  ;;  %s18375_s2 = smov 68  }
0x17a7   : > { %13998 = vtanh.f32 %v5069_v14  ;;  %v13987_v30 = vpop.eup %13986  ;;  %v5524_v36 = vmul.f32 %v5508_v54, %v16963_v57  ;;  %13300 = vrot.lane.b32.xlu0 %v16698_v1, %s18369_s8  ;;  %v17012_v49 = vadd.f32 %v18458_v47, %v5962_v39  ;;  %v5961_v26 = vmul.f32 %v18457_v61, %v5942_v27 }
0x17a8   : > { %v5038_v0 = vmul.f32 %v5022_v32, %v16949_v34  ;;  %v6010_v56 = vmul.f32 0.044715, %v16984_v5  ;;  %v17018_v38 = vadd.f32 %v18455_v40, %v5459_v23  ;;  %v17021_v55 = vadd.f32 %v18448_v62, %v4957_v51  ;;  %v18508_v51 = vld [vmem:[#allocation13_spill] sm:$0xff] }
0x17a9   : > { %v13989_v53 = vpop.eup %13988  ;;  %v17024_v6 = vmul.f32 0.5, %v16949_v34  ;;  %v5540_v3 = vmul.f32 %v5524_v36, %v16963_v57  ;;  %v4960_v48 = vmul.f32 %v15492_v44, %v4941_v46  ;;  %v5461_v42 = vmul.f32 %v18454_v7, %v5442_v35 }
0x17aa   : > { %v13991_v9 = vpop.eup %13990  ;;  %v5054_v63 = vadd.f32 %v5038_v0, %v16949_v34  ;;  %v6026_v21 = vmul.f32 %v6010_v56, %v16984_v5  ;;  %13275 = vrot.lane.b32.xlu1 %v16635_v60, %s18507_s5  ;;  %v5443_v39 = vmul.f32 %v13987_v30, %v16533_v29  ;;  %v5071_v18 = vmul.f32 0.7978846, %v5055_v20  ;;  %v13101_v29 = vpop.permute.xlu1 %13100 }
0x17ab   : > { %v13993_v13 = vpop.eup %13992  ;;  %v5602_v28 = vadd.f32 1.0, %v13991_v9  ;;  %v5556_v14 = vadd.f32 %v5540_v3, %v16963_v57  ;;  %13310 = vrot.lane.b32.xlu0 %v16755_v16, %s18369_s8  ;;  %v17038_v27 = vadd.f32 %v18458_v47, %v5961_v26  ;;  %v17041_v34 = vmul.f32 0.5, %v16963_v57  ;;  %s18371_s8 = smov 88  }
0x17ac   : > { %v5070_v17 = vmul.f32 0.7978846, %v5054_v63  ;;  %v6042_v54 = vmul.f32 %v6026_v21, %v16984_v5  ;;  %v5944_v23 = vmul.f32 %v13989_v53, %v16489_v24  ;;  %v4940_v46 = vmul.f32 %v13993_v13, %v18508_v51 }
0x17ad   : > { %v5572_v32 = vmul.f32 0.7978846, %v5556_v14  ;;  %v5509_v20 = vmul.f32 0.044715, %v16905_v22  ;;  %v13103_v35 = vunpack.i.h.bf16 %v13101_v29  ;;  %v13102_v36 = vunpack.i.l.bf16 %v13101_v29  ;;  %v18509_v14 = vld [vmem:[#allocation15_spill] sm:$0xff] }
0x17ae   : > { %v5618_v0 = vmul.f32 %v5602_v28, %v5490_v8  ;;  %14000 = vtanh.f32 %v5070_v17  ;;  %13285 = vrot.lane.b32.xlu1 %v16663_v33, %s18507_s5  ;;  %v17050_v57 = vadd.f32 %v18448_v62, %v4960_v48  ;;  %v17053_v24 = vadd.f32 %v18455_v40, %v5461_v42 }
0x17af   : > { %v13995_v30 = vpop.eup %13994  ;;  %v5462_v53 = vmul.f32 %v18454_v7, %v5443_v39  ;;  %14002 = vtanh.f32 %v5071_v18  ;;  %13320 = vrot.lane.b32.xlu0 %v16635_v60, %s18375_s2  ;;  %v12561_v8 = vpack.c.bf16 %v13103_v35, %v13102_v36  ;;  %v6058_v3 = vadd.f32 %v6042_v54, %v16984_v5 }
0x17b0   : > { %v13997_v26 = vpop.eup %13996  ;;  %14004 = vtanh.f32 %v5572_v32  ;;  %v5963_v13 = vmul.f32 %v18457_v61, %v5944_v23  ;;  %v4959_v48 = vmul.f32 %v15492_v44, %v4940_v46  ;;  %v5525_v63 = vmul.f32 %v5509_v20, %v16905_v22 }
0x17b1   : > { %v13999_v56 = vpop.eup %13998  ;;  %v6104_v9 = vadd.f32 1.0, %v13997_v26  ;;  %12563 = vmatpush3.bf16.xpose.msk.msra.mxu0 %vm16631_vm14, %v12561_v8  ;;  %v6153_v21 = vsel %vm6144_vm11, %v16888_v11, %v5618_v0  ;;  %v6074_v42 = vmul.f32 0.7978846, %v6058_v3  ;;  %v6011_v39 = vmul.f32 0.044715, %v16941_v37 }
0x17b2   : > { %v5101_v28 = vadd.f32 1.0, %v13999_v56  ;;  %13295 = vrot.lane.b32.xlu1 %v16698_v1, %s18507_s5  ;;  %v5945_v18 = vmul.f32 %v13995_v30, %v18509_v14  ;;  %12564 = vmatprep.subr.bf16.mxu0 %v18497_v58  ;;  %v17073_v17 = vmul.f32 0.5, %v16984_v5  ;;  %v5008_v23 = vmul.f32 0.044715, %v17021_v55 }
0x17b3   : > { %v6120_v7 = vmul.f32 %v6104_v9, %v5992_v59  ;;  %v5541_v59 = vmul.f32 %v5525_v63, %v16905_v22  ;;  %13330 = vrot.lane.b32.xlu0 %v16663_v33, %s18375_s2  ;;  %14006 = vtanh.f32 %v6074_v42  ;;  %v6027_v54 = vmul.f32 %v6011_v39, %v16941_v37 }
0x17b4   : > { %v5117_v44 = vmul.f32 %v5101_v28, %v16973_v4  ;;  %v17082_v51 = vadd.f32 %v18455_v40, %v5462_v53  ;;  %v18510_v4 = vld [vmem:[#allocation22_spill] sm:$0xff]  ;;  %v5510_v29 = vmul.f32 0.044715, %v17018_v38  ;;  %v17090_v32 = vadd.f32 %v18458_v47, %v5963_v13 }
0x17b5   : > { %v6170_v11 = vsel %vm6161_vm12, %v6153_v21, %v6120_v7  ;;  %v5557_v46 = vadd.f32 %v5541_v59, %v16905_v22  ;;  %v6043_v30 = vmul.f32 %v6027_v54, %v16941_v37  ;;  %v5024_v40 = vmul.f32 %v5008_v23, %v17021_v55 }
0x17b6   : > { %11662 = vmatprep.mubr.msk.f32.mxu0 %vm943_vm0, %v6170_v11  ;;  %v6137_v5 = vsel %vm4206_vm10, %v18510_v4, %v5117_v44  ;;  %13305 = vrot.lane.b32.xlu1 %v16755_v16, %s18507_s5  ;;  %v5964_v35 = vmul.f32 %v18457_v61, %v5945_v18  ;;  %v5526_v0 = vmul.f32 %v5510_v29, %v17018_v38  ;;  %v6012_v61 = vmul.f32 0.044715, %v17038_v27 }
0x17b7   : > { %v6154_v20 = vsel %vm6144_vm11, %v6137_v5, %v16873_v19  ;;  %v5573_v36 = vmul.f32 0.7978846, %v5557_v46  ;;  %13340 = vrot.lane.b32.xlu0 %v16698_v1, %s18375_s2  ;;  %v17105_v19 = vadd.f32 %v18448_v62, %v4959_v48  ;;  %v6059_v53 = vadd.f32 %v6043_v30, %v16941_v37 }
0x17b8   : > { %v6171_v22 = vsel %vm6161_vm12, %v6154_v20, %v16880_v10  ;;  %v14001_v26 = vpop.eup %14000  ;;  %v5040_v56 = vmul.f32 %v5024_v40, %v17021_v55  ;;  %v17112_v9 = vmul.f32 0.5, %v16941_v37  ;;  %v5542_v3 = vmul.f32 %v5526_v0, %v17018_v38 }
0x17b9   : > { %11663 = vmatmul.mubr.msk.f32.gmra.mrb[70].mxu0 %vm943_vm0, %v6171_v22  ;;  %v14003_v8 = vpop.eup %14002  ;;  %v5102_v10 = vadd.f32 1.0, %v14001_v26  ;;  %14008 = vtanh.f32 %v5573_v36  ;;  %v6075_v28 = vmul.f32 0.7978846, %v6059_v53  ;;  %v6028_v48 = vmul.f32 %v6012_v61, %v17038_v27 }
0x17ba   : > { %v14005_v13 = vpop.eup %14004  ;;  %v5056_v62 = vadd.f32 %v5040_v56, %v17021_v55  ;;  %v5009_v63 = vmul.f32 0.044715, %v16997_v41  ;;  %13315 = vrot.lane.b32.xlu1 %v16635_v60, %s18371_s8  ;;  %v17121_v7 = vadd.f32 %v18458_v47, %v5964_v35  ;;  %v5558_v42 = vadd.f32 %v5542_v3, %v17018_v38 }
0x17bb   : > { %v5118_v37 = vmul.f32 %v5102_v10, %v17024_v6  ;;  %v5604_v21 = vadd.f32 1.0, %v14005_v13  ;;  %13350 = vrot.lane.b32.xlu0 %v16755_v16, %s18375_s2  ;;  %14010 = vtanh.f32 %v6075_v28  ;;  %v6044_v14 = vmul.f32 %v6028_v48, %v17038_v27  ;;  %s18519_s2 = smov 76  }
0x17bc   : > { %v5072_v39 = vmul.f32 0.7978846, %v5056_v62  ;;  %v5025_v18 = vmul.f32 %v5009_v63, %v16997_v41  ;;  %v5103_v59 = vadd.f32 1.0, %v14003_v8  ;;  %v17131_v47 = vmul.f32 0.5, %v17021_v55 }
0x17bd   : > { %v5620_v44 = vmul.f32 %v5604_v21, %v17041_v34  ;;  %v5574_v11 = vmul.f32 0.7978846, %v5558_v42  ;;  %v14007_v6 = vpop.eup %14006  ;;  %v6060_v54 = vadd.f32 %v6044_v14, %v17038_v27  ;;  %v5511_v4 = vmul.f32 0.044715, %v17004_v50 }
0x17be   : > { %14012 = vtanh.f32 %v5072_v39  ;;  %v5041_v23 = vmul.f32 %v5025_v18, %v16997_v41  ;;  %13325 = vrot.lane.b32.xlu1 %v16663_v33, %s18371_s8  ;;  %v6106_v5 = vadd.f32 1.0, %v14007_v6  ;;  %v6138_v34 = vsel %vm4206_vm10, %v16860_v31, %v5118_v37 }
0x17bf   : > { %v17141_v46 = vmul.f32 0.5, %v17018_v38  ;;  %14014 = vtanh.f32 %v5574_v11  ;;  %v6076_v55 = vmul.f32 0.7978846, %v6060_v54  ;;  %v5527_v20 = vmul.f32 %v5511_v4, %v17004_v50 }
0x17c0   : > { %v5057_v29 = vadd.f32 %v5041_v23, %v16997_v41  ;;  %v6013_v30 = vmul.f32 0.044715, %v17012_v49  ;;  %v6122_v40 = vmul.f32 %v6106_v5, %v17073_v17  ;;  %v6155_v35 = vsel %vm6144_vm11, %v6138_v34, %v5620_v44 }
0x17c1   : > { %v5119_v22 = vmul.f32 %v5103_v59, %v16925_v25  ;;  %v5010_v36 = vmul.f32 0.044715, %v17105_v19  ;;  %v13106_v31 = vpop.permute.xlu1 %13105  ;;  %14016 = vtanh.f32 %v6076_v55  ;;  %v5543_v0 = vmul.f32 %v5527_v20, %v17004_v50 }
0x17c2   : > { %v5073_v38 = vmul.f32 0.7978846, %v5057_v29  ;;  %v6029_v26 = vmul.f32 %v6013_v30, %v17012_v49  ;;  %13335 = vrot.lane.b32.xlu1 %v16698_v1, %s18371_s8  ;;  %v13108_v56 = vunpack.i.h.bf16 %v13106_v31  ;;  %v13107_v61 = vunpack.i.l.bf16 %v13106_v31 }
0x17c3   : > { %v14009_v53 = vpop.eup %14008  ;;  %v6172_v17 = vsel %vm6161_vm12, %v6155_v35, %v6122_v40  ;;  %v5026_v8 = vmul.f32 %v5010_v36, %v17105_v19  ;;  %v5559_v10 = vadd.f32 %v5543_v0, %v17004_v50  ;;  %v6139_v28 = vsel %vm4206_vm10, %v16863_v2, %v5119_v22 }
0x17c4   : > { %11665 = vmatprep.mubr.msk.f32.mxu0 %vm943_vm0, %v6172_v17  ;;  %v5605_v25 = vadd.f32 1.0, %v14009_v53  ;;  %14018 = vtanh.f32 %v5073_v38  ;;  %v6045_v3 = vmul.f32 %v6029_v26, %v17012_v49  ;;  %v12565_v13 = vpack.c.bf16 %v13108_v56, %v13107_v61 }
0x17c5   : > { %v5042_v62 = vmul.f32 %v5026_v8, %v17105_v19  ;;  %v5512_v48 = vmul.f32 0.044715, %v17053_v24  ;;  %v14011_v63 = vpop.eup %14010  ;;  %v5575_v21 = vmul.f32 0.7978846, %v5559_v10  ;;  %v6014_v39 = vmul.f32 0.044715, %v17090_v32 }
0x17c6   : > { %v5621_v37 = vmul.f32 %v5605_v25, %v16934_v52  ;;  %v6061_v42 = vadd.f32 %v6045_v3, %v17012_v49  ;;  %13345 = vrot.lane.b32.xlu1 %v16755_v16, %s18371_s8  ;;  %12567 = vmatpush3.bf16.xpose.msk.msra.mxu0 %vm16631_vm14, %v12565_v13  ;;  %v6107_v14 = vadd.f32 1.0, %v14011_v63  ;;  %v4493_v44 = vmul.f32 0.044715, %v16916_v12  ;;  %s18373_s8 = smov 80  }
0x17c7   : > { %v5058_v2 = vadd.f32 %v5042_v62, %v17105_v19  ;;  %v5528_v18 = vmul.f32 %v5512_v48, %v17053_v24  ;;  %12568 = vmatprep.subr.bf16.mxu0 %v18497_v58  ;;  %14020 = vtanh.f32 %v5575_v21  ;;  %v6030_v6 = vmul.f32 %v6014_v39, %v17090_v32 }
0x17c8   : > { %v14013_v59 = vpop.eup %14012  ;;  %v6156_v52 = vsel %vm6144_vm11, %v6139_v28, %v5621_v37  ;;  %v6077_v11 = vmul.f32 0.7978846, %v6061_v42  ;;  %v6123_v23 = vmul.f32 %v6107_v14, %v17112_v9  ;;  %v4509_v20 = vmul.f32 %v4493_v44, %v16916_v12 }
0x17c9   : > { %v14015_v54 = vpop.eup %14014  ;;  %v5104_v4 = vadd.f32 1.0, %v14013_v59  ;;  %v5074_v5 = vmul.f32 0.7978846, %v5058_v2  ;;  %v5544_v34 = vmul.f32 %v5528_v18, %v17053_v24  ;;  %v6046_v29 = vmul.f32 %v6030_v6, %v17090_v32 }
0x17ca   : > { %v5606_v55 = vadd.f32 1.0, %v14015_v54  ;;  %14022 = vtanh.f32 %v6077_v11  ;;  %13355 = vrot.lane.b32.xlu1 %v16635_v60, %s18373_s8  ;;  %v6173_v30 = vsel %vm6161_vm12, %v6156_v52, %v6123_v23  ;;  %v5996_v36 = vmul.f32 0.5, %v17038_v27  ;;  %v18512_v52 = vld [vmem:[#allocation17_spill] sm:$0xff] }
0x17cb   : > { %v5120_v40 = vmul.f32 %v5104_v4, %v17131_v47  ;;  %14024 = vtanh.f32 %v5074_v5  ;;  %v5560_v9 = vadd.f32 %v5544_v34, %v17053_v24  ;;  %v14017_v35 = vpop.eup %14016  ;;  %11666 = vmatmul.mubr.msk.f32.gmra.mrb[72].mxu0 %vm943_vm0, %v6173_v30  ;;  %v6062_v31 = vadd.f32 %v6046_v29, %v17090_v32 }
0x17cc   : > { %v5622_v22 = vmul.f32 %v5606_v55, %v17141_v46  ;;  %v4525_v38 = vmul.f32 %v4509_v20, %v16916_v12  ;;  %v6108_v0 = vadd.f32 1.0, %v14017_v35  ;;  %v5011_v47 = vmul.f32 0.044715, %v17050_v57 }
0x17cd   : > { %v6140_v26 = vsel %vm4206_vm10, %v16866_v43, %v5120_v40  ;;  %v5576_v53 = vmul.f32 0.7978846, %v5560_v9  ;;  %v4587_v17 = vadd.f32 1.0, %v16902_v45  ;;  %v6078_v8 = vmul.f32 0.7978846, %v6062_v31  ;;  %v18511_v43 = vld [vmem:[#allocation12_spill] sm:$0xff] }
0x17ce   : > { %v14019_v56 = vpop.eup %14018  ;;  %v6157_v61 = vsel %vm6144_vm11, %v6140_v26, %v5622_v22  ;;  %v4541_v46 = vadd.f32 %v4525_v38, %v16916_v12  ;;  %13365 = vrot.lane.b32.xlu1 %v16663_v33, %s18373_s8  ;;  %v6124_v27 = vmul.f32 %v6108_v0, %v5996_v36  ;;  %v5027_v10 = vmul.f32 %v5011_v47, %v17050_v57  ;;  %v18513_v9 = vld [vmem:[#allocation18_spill] sm:$0xff]  ;;  %v6529_v0 = vpop.permute.xlu0 %6528 }
0x17cf   : > { %v5105_v25 = vadd.f32 1.0, %v14019_v56  ;;  %14026 = vtanh.f32 %v5576_v53  ;;  %v4475_v3 = vmul.f32 0.5, %v18511_v43  ;;  %v5513_v13 = vmul.f32 0.044715, %v17082_v51 }
0x17d0   : > { %14028 = vtanh.f32 %v6078_v8  ;;  %v6174_v28 = vsel %vm6161_vm12, %v6157_v61, %v6124_v27  ;;  %v4993_v45 = vmul.f32 0.5, %v16997_v41  ;;  %v5043_v62 = vmul.f32 %v5027_v10, %v17050_v57 }
0x17d1   : > { %v6015_v48 = vmul.f32 0.044715, %v17121_v7  ;;  %v14021_v63 = vpop.eup %14020  ;;  %11668 = vmatprep.mubr.msk.f32.mxu0 %vm943_vm0, %v6174_v28  ;;  %v4603_v37 = vmul.f32 %v4587_v17, %v4475_v3  ;;  %v5495_v21 = vmul.f32 0.5, %v17004_v50  ;;  %v4557_v42 = vmul.f32 0.7978846, %v4541_v46  ;;  %v18514_v3 = vld [vmem:[#allocation11_spill] sm:$0xff] }
0x17d2   : > { %v5529_v39 = vmul.f32 %v5513_v13, %v17082_v51  ;;  %13375 = vrot.lane.b32.xlu1 %v16698_v1, %s18373_s8  ;;  %v5121_v14 = vmul.f32 %v5105_v25, %v4993_v45  ;;  %v5607_v2 = vadd.f32 1.0, %v14021_v63  ;;  %v5059_v41 = vadd.f32 %v5043_v62, %v17050_v57 }
0x17d3   : > { %v6031_v18 = vmul.f32 %v6015_v48, %v17121_v7  ;;  %v5997_v59 = vmul.f32 0.5, %v17012_v49  ;;  %v4588_v11 = vadd.f32 1.0, %v18512_v52  ;;  %v4994_v6 = vmul.f32 0.5, %v17105_v19 }
0x17d4   : > { %v14023_v44 = vpop.eup %14022  ;;  %v5545_v50 = vmul.f32 %v5529_v39, %v17082_v51  ;;  %v13111_v23 = vpop.permute.xlu1 %13110  ;;  %v5623_v4 = vmul.f32 %v5607_v2, %v5495_v21  ;;  %v5075_v34 = vmul.f32 0.7978846, %v5059_v41  ;;  %v6141_v19 = vsel %vm4206_vm10, %v4603_v37, %v5121_v14 }
0x17d5   : > { %v14025_v54 = vpop.eup %14024  ;;  %v6109_v5 = vadd.f32 1.0, %v14023_v44  ;;  %v6047_v55 = vmul.f32 %v6031_v18, %v17121_v7  ;;  %v13113_v29 = vunpack.i.h.bf16 %v13111_v23  ;;  %v13112_v20 = vunpack.i.l.bf16 %v13111_v23 }
0x17d6   : > { %v5106_v30 = vadd.f32 1.0, %v14025_v54  ;;  %v5561_v40 = vadd.f32 %v5545_v50, %v17082_v51  ;;  %13385 = vrot.lane.b32.xlu1 %v16755_v16, %s18373_s8  ;;  %v4476_v35 = vmul.f32 0.5, %v18513_v9  ;;  %14030 = vtanh.f32 %v4557_v42  ;;  %s14106_s8 = smov 72  }
0x17d7   : > { %v6125_v49 = vmul.f32 %v6109_v5, %v5997_v59  ;;  %v12569_v22 = vpack.c.bf16 %v13113_v29, %v13112_v20  ;;  %14032 = vtanh.f32 %v5075_v34  ;;  %v6158_v53 = vsel %vm6144_vm11, %v6141_v19, %v5623_v4 }
0x17d8   : > { %v5122_v36 = vmul.f32 %v5106_v30, %v4994_v6  ;;  %v5577_v31 = vmul.f32 0.7978846, %v5561_v40  ;;  %v6533_v26 = vpop.permute.xlu1 %6532  ;;  %v4604_v47 = vmul.f32 %v4588_v11, %v4476_v35  ;;  %v6063_v56 = vadd.f32 %v6047_v55, %v17121_v7  ;;  %v13116_v55 = vpop.permute.xlu0 %13115 }
0x17d9   : > { %v14027_v38 = vpop.eup %14026  ;;  %12571 = vmatpush3.bf16.xpose.msk.msra.mxu0 %vm16631_vm14, %v12569_v22  ;;  %v6175_v17 = vsel %vm6161_vm12, %v6158_v53, %v6125_v49  ;;  %v5496_v8 = vmul.f32 0.5, %v17053_v24  ;;  %v5998_v27 = vmul.f32 0.5, %v17090_v32  ;;  %v6539_v13 = vsel %vm3433_vm8, %v18514_v3, %v6529_v0 }
0x17da   : > { %v14029_v61 = vpop.eup %14028  ;;  %v5608_v46 = vadd.f32 1.0, %v14027_v38  ;;  %14034 = vtanh.f32 %v5577_v31  ;;  %13390 = vrot.lane.b32.xlu1 %v16635_v60, %s14106_s8  ;;  %11669 = vmatmul.mubr.msk.f32.gmra.mrb[74].mxu0 %vm943_vm0, %v6175_v17  ;;  %v6142_v10 = vsel %vm4206_vm10, %v4604_v47, %v5122_v36  ;;  %v6079_v43 = vmul.f32 0.7978846, %v6063_v56 }
0x17db   : > { %v6110_v25 = vadd.f32 1.0, %v14029_v61  ;;  %12588 = vmatprep.subr.bf16.mxu0 %v18497_v58  ;;  %v6541_v24 = vsel %vm6540_vm15, %v6539_v13, %v6533_v26  ;;  %v18515_v48 = vrot.slane %v18514_v3, 7  ;;  %v18516_v37 = vmov 0.0  }
0x17dc   : > { %v5624_v28 = vmul.f32 %v5608_v46, %v5496_v8  ;;  %v6537_v45 = vpop.permute.xlu1 %6536  ;;  %14036 = vtanh.f32 %v6079_v43  ;;  %v18517_v14 = vrot.slane %v18514_v3, 6  ;;  %v4995_v44 = vmul.f32 0.5, %v17050_v57  ;;  %v13121_v22 = vpop.permute.xlu0 %13120 }
0x17dd   : > { %v6126_v62 = vmul.f32 %v6110_v25, %v5998_v27  ;;  %v17238_v60 = vsel %vm6542_vm2, %v6541_v24, %v6537_v45  ;;  %v5497_v52 = vmul.f32 0.5, %v17082_v51  ;;  %v4477_v6 = vmul.f32 0.5, %v16916_v12 }
0x17de   : > { %v6159_v32 = vsel %vm6144_vm11, %v6142_v10, %v5624_v28  ;;  %8237 = vrot.lane.b32.xlu1 %v18515_v48, %s14093_s3  ;;  %11691 = vmatmul.mubr.msk.f32.vlgmr.msra.gmra.mrb[74].mxu1 %vm6544_vm13, %v17238_v60  ;;  %v5999_v5 = vmul.f32 0.5, %v17121_v7  ;;  %v13118_v40 = vunpack.i.h.bf16 %v13116_v55  ;;  %v13117_v51 = vunpack.i.l.bf16 %v13116_v55 }
0x17df   : > { %v6176_v63 = vsel %vm6161_vm12, %v6159_v32, %v6126_v62  ;;  %11728 = vmatprep.mubr.msk.f32.mxu1 %vm14084_vm1, %v18516_v37  ;;  %v13123_v31 = vunpack.i.h.bf16 %v13121_v22  ;;  %v13122_v38 = vunpack.i.l.bf16 %v13121_v22 }
0x17e0   : > { %11671 = vmatprep.mubr.msk.f32.mxu0 %vm943_vm0, %v6176_v63  ;;  %v14031_v21 = vpop.eup %14030  ;;  %v13126_v42 = vpop.permute.xlu1 %13125  ;;  %v12589_v7 = vpack.c.bf16 %v13118_v40, %v13117_v51 }
0x17e1   : > { %v14033_v39 = vpop.eup %14032  ;;  %v4589_v18 = vadd.f32 1.0, %v14031_v21  ;;  %v12593_v53 = vpack.c.bf16 %v13123_v31, %v13122_v38  ;;  %v13128_v61 = vunpack.i.h.bf16 %v13126_v42  ;;  %v13127_v17 = vunpack.i.l.bf16 %v13126_v42  ;;  %v13131_v10 = vpop.permute.xlu0 %13130 }
0x17e2   : > { %8240 = vrot.lane.b32.xlu1 %v18517_v14, %s14097_s12  ;;  %v5107_v2 = vadd.f32 1.0, %v14033_v39  ;;  %v13133_v13 = vunpack.i.h.bf16 %v13131_v10  ;;  %v13132_v28 = vunpack.i.l.bf16 %v13131_v10 }
0x17e3   : > { %v4605_v4 = vmul.f32 %v4589_v18, %v4477_v6  ;;  %v12597_v27 = vpack.c.bf16 %v13128_v61, %v13127_v17 }
0x17e4   : > { %v14035_v41 = vpop.eup %14034  ;;  %v17254_v59 = vpop.permute.xlu1 %13135  ;;  %v5123_v50 = vmul.f32 %v5107_v2, %v4995_v44  ;;  %v12601_v62 = vpack.c.bf16 %v13133_v13, %v13132_v28 }
0x17e5   : > { %v5609_v11 = vadd.f32 1.0, %v14035_v41  ;;  %v13138_v63 = vunpack.i.h.bf16 %v17254_v59  ;;  %v13137_v21 = vunpack.i.l.bf16 %v17254_v59  ;;  %v13141_v41 = vpop.permute.xlu0 %13140 }
0x17e6   : > { %v14037_v54 = vpop.eup %14036  ;;  %v6143_v57 = vsel %vm4206_vm10, %v4605_v4, %v5123_v50  ;;  %v13143_v44 = vunpack.i.h.bf16 %v13141_v41  ;;  %v13142_v59 = vunpack.i.l.bf16 %v13141_v41 }
0x17e7   : > { %v5625_v23 = vmul.f32 %v5609_v11, %v5497_v52  ;;  %v6111_v34 = vadd.f32 1.0, %v14037_v54  ;;  %v12621_v14 = vpack.c.bf16 %v13138_v63, %v13137_v21 }
0x17e8   : > { %v17259_v29 = vpop.permute.xlu1 %13145  ;;  %v12625_v6 = vpack.c.bf16 %v13143_v44, %v13142_v59 }
0x17e9   : > { %v6127_v20 = vmul.f32 %v6111_v34, %v5999_v5  ;;  %v6160_v30 = vsel %vm6144_vm11, %v6143_v57, %v5625_v23  ;;  %v13148_v23 = vunpack.i.h.bf16 %v17259_v29  ;;  %v13147_v4 = vunpack.i.l.bf16 %v17259_v29  ;;  %v13151_v57 = vpop.permute.xlu0 %13150 }
0x17ea   : > { %v13153_v40 = vunpack.i.h.bf16 %v13151_v57  ;;  %v13152_v51 = vunpack.i.l.bf16 %v13151_v57 }
0x17eb   : > { %v6177_v49 = vsel %vm6161_vm12, %v6160_v30, %v6127_v20  ;;  %v12629_v55 = vpack.c.bf16 %v13148_v23, %v13147_v4 }
0x17ec   : > { %v13156_v12 = vpop.permute.xlu1 %13155  ;;  %11672 = vmatmul.mubr.msk.f32.gmra.mrb[76].mxu0 %vm943_vm0, %v6177_v49 }
0x17ed   : > { %v13158_v19 = vunpack.i.h.bf16 %v13156_v12  ;;  %v13157_v9 = vunpack.i.l.bf16 %v13156_v12  ;;  %11709 = vmatprep.mubr.msk.f32.mxu0 %vm14084_vm1, %v18516_v37  ;;  %v12633_v12 = vpack.c.bf16 %v13153_v40, %v13152_v51 }
0x17ef   : > { %v12573_v35 = vpack.c.bf16 %v13158_v19, %v13157_v9  ;;  %v13161_v9 = vpop.permute.xlu0 %13160 }
0x17f0   : > { %v13166_v36 = vpop.permute.xlu1 %13165  ;;  %11710 = vmatmul.mubr.msk.f32.vlgmr.msra.gmra.mrb[78].mxu0 %vm6544_vm13, %v17238_v60  ;;  %v13162_v22 = vunpack.i.l.bf16 %v13161_v9 }
0x17f1   : > { %12575 = vmatpush3.bf16.xpose.msk.msra.mxu1 %vm16631_vm14, %v12573_v35  ;;  %12591 = vmatpush3.bf16.xpose.msk.msra.mxu0 %vm16631_vm14, %v12589_v7  ;;  %v13168_v0 = vunpack.i.h.bf16 %v13166_v36  ;;  %v13167_v26 = vunpack.i.l.bf16 %v13166_v36  ;;  %v13163_v35 = vunpack.i.h.bf16 %v13161_v9 }
0x17f2   : > { %12576 = vmatprep.subr.bf16.mxu1 %v18497_v58  ;;  %12592 = vmatprep.subr.bf16.mxu0 %v18497_v58 }
0x17f3   : > { %11747 = vmatprep.mubr.msk.f32.mxu0 %vm14084_vm1, %v18516_v37  ;;  %v12577_v47 = vpack.c.bf16 %v13168_v0, %v13167_v26  ;;  %v12653_v38 = vpack.c.bf16 %v13163_v35, %v13162_v22  ;;  %v13171_v26 = vpop.permute.xlu0 %13170 }
0x17f4   : > { %v13176_v56 = vpop.permute.xlu1 %13175 }
0x17f5   : > { %v13178_v8 = vunpack.i.h.bf16 %v13176_v56  ;;  %v13177_v46 = vunpack.i.l.bf16 %v13176_v56  ;;  %v13172_v56 = vunpack.i.l.bf16 %v13171_v26 }
0x17f7   : > { %v12581_v25 = vpack.c.bf16 %v13178_v8, %v13177_v46 }
0x17f8   : > { %v13186_v43 = vpop.permute.xlu1 %13185 }
0x17f9   : > { %12579 = vmatpush3.bf16.xpose.msk.msra.mxu1 %vm16631_vm14, %v12577_v47  ;;  %12595 = vmatpush3.bf16.xpose.msk.msra.mxu0 %vm16631_vm14, %v12593_v53  ;;  %v13188_v24 = vunpack.i.h.bf16 %v13186_v43  ;;  %v13187_v45 = vunpack.i.l.bf16 %v13186_v43  ;;  %v13173_v47 = vunpack.i.h.bf16 %v13171_v26 }
0x17fa   : > { %12580 = vmatprep.subr.bf16.mxu1 %v18497_v58  ;;  %12596 = vmatprep.subr.bf16.mxu0 %v18497_v58 }
0x17fb   : > { %v12585_v32 = vpack.c.bf16 %v13188_v24, %v13187_v45  ;;  %v12657_v8 = vpack.c.bf16 %v13173_v47, %v13172_v56 }
0x17fc   : > { %v13196_v48 = vpop.permute.xlu1 %13195 }
0x17fd   : > { %v13198_v42 = vunpack.i.h.bf16 %v13196_v48  ;;  %v13197_v39 = vunpack.i.l.bf16 %v13196_v48 }
0x17ff   : > { %v12605_v2 = vpack.c.bf16 %v13198_v42, %v13197_v39 }
0x1800   : > { %v13206_v18 = vpop.permute.xlu1 %13205 }
0x1801   : > { %12583 = vmatpush3.bf16.xpose.msk.msra.mxu1 %vm16631_vm14, %v12581_v25  ;;  %12599 = vmatpush3.bf16.xpose.msk.msra.mxu0 %vm16631_vm14, %v12597_v27  ;;  %v13208_v52 = vunpack.i.h.bf16 %v13206_v18  ;;  %v13207_v11 = vunpack.i.l.bf16 %v13206_v18  ;;  %v13181_v27 = vpop.permute.xlu0 %13180 }
0x1802   : > { %12584 = vmatprep.subr.bf16.mxu1 %v18497_v58  ;;  %12600 = vmatprep.subr.bf16.mxu0 %v18497_v58  ;;  %v13183_v10 = vunpack.i.h.bf16 %v13181_v27  ;;  %v13182_v43 = vunpack.i.l.bf16 %v13181_v27 }
0x1803   : > { %v12609_v50 = vpack.c.bf16 %v13208_v52, %v13207_v11 }
0x1804   : > { %v13216_v54 = vpop.permute.xlu1 %13215  ;;  %v12661_v24 = vpack.c.bf16 %v13183_v10, %v13182_v43 }
0x1805   : > { %v13218_v5 = vunpack.i.h.bf16 %v13216_v54  ;;  %v13217_v34 = vunpack.i.l.bf16 %v13216_v54 }
0x1807   : > { %v12613_v20 = vpack.c.bf16 %v13218_v5, %v13217_v34 }
0x1808   : > { %v13226_v30 = vpop.permute.xlu1 %13225 }
0x1809   : > { %12587 = vmatpush3.bf16.xpose.msk.msra.mxu1 %vm16631_vm14, %v12585_v32  ;;  %12603 = vmatpush3.bf16.xpose.msk.msra.mxu0 %vm16631_vm14, %v12601_v62  ;;  %v13228_v49 = vunpack.i.h.bf16 %v13226_v30  ;;  %v13227_v29 = vunpack.i.l.bf16 %v13226_v30  ;;  %v13191_v62 = vpop.permute.xlu0 %13190 }
0x180a   : > { %12604 = vmatprep.subr.bf16.mxu1 %v18497_v58  ;;  %12620 = vmatprep.subr.bf16.mxu0 %v18497_v58  ;;  %v13193_v48 = vunpack.i.h.bf16 %v13191_v62  ;;  %v13192_v63 = vunpack.i.l.bf16 %v13191_v62 }
0x180b   : > { %v12617_v19 = vpack.c.bf16 %v13228_v49, %v13227_v29 }
0x180c   : > { %v13236_v7 = vpop.permute.xlu1 %13235  ;;  %v12665_v39 = vpack.c.bf16 %v13193_v48, %v13192_v63 }
0x180d   : > { %v13238_v36 = vunpack.i.h.bf16 %v13236_v7  ;;  %v13237_v31 = vunpack.i.l.bf16 %v13236_v7 }
0x180f   : > { %v12637_v0 = vpack.c.bf16 %v13238_v36, %v13237_v31 }
0x1810   : > { %11729 = vmatmul.mubr.msk.f32.vlgmr.msra.gmra.mrb[76].mxu1 %vm6544_vm13, %v17238_v60  ;;  %11748 = vmatmul.mubr.msk.f32.vlgmr.msra.gmra.mrb[80].mxu0 %vm6544_vm13, %v17238_v60  ;;  %v13246_v53 = vpop.permute.xlu1 %13245 }
0x1811   : > { %12607 = vmatpush3.bf16.xpose.msk.msra.mxu1 %vm16631_vm14, %v12605_v2  ;;  %12623 = vmatpush3.bf16.xpose.msk.msra.mxu0 %vm16631_vm14, %v12621_v14  ;;  %v13248_v61 = vunpack.i.h.bf16 %v13246_v53  ;;  %v13247_v17 = vunpack.i.l.bf16 %v13246_v53  ;;  %v13201_v2 = vpop.permute.xlu0 %13200 }
0x1812   : > { %12608 = vmatprep.subr.bf16.mxu1 %v18497_v58  ;;  %12624 = vmatprep.subr.bf16.mxu0 %v18497_v58  ;;  %v13203_v18 = vunpack.i.h.bf16 %v13201_v2  ;;  %v13202_v44 = vunpack.i.l.bf16 %v13201_v2 }
0x1813   : > { %11766 = vmatprep.mubr.msk.f32.mxu1 %vm14084_vm1, %v18516_v37  ;;  %11785 = vmatprep.mubr.msk.f32.mxu0 %vm14084_vm1, %v18516_v37  ;;  %v12641_v46 = vpack.c.bf16 %v13248_v61, %v13247_v17 }
0x1814   : > { %v13256_v25 = vpop.permute.xlu1 %13255  ;;  %v12685_v11 = vpack.c.bf16 %v13203_v18, %v13202_v44 }
0x1815   : > { %v13258_v13 = vunpack.i.h.bf16 %v13256_v25  ;;  %v13257_v28 = vunpack.i.l.bf16 %v13256_v25 }
0x1817   : > { %v12645_v45 = vpack.c.bf16 %v13258_v13, %v13257_v28 }
0x1818   : > { %v13266_v32 = vpop.permute.xlu1 %13265 }
0x1819   : > { %12611 = vmatpush3.bf16.xpose.msk.msra.mxu1 %vm16631_vm14, %v12609_v50  ;;  %12627 = vmatpush3.bf16.xpose.msk.msra.mxu0 %vm16631_vm14, %v12625_v6  ;;  %v13268_v21 = vunpack.i.h.bf16 %v13266_v32  ;;  %v13267_v42 = vunpack.i.l.bf16 %v13266_v32  ;;  %v13211_v50 = vpop.permute.xlu0 %13210 }
0x181a   : > { %12612 = vmatprep.subr.bf16.mxu1 %v18497_v58  ;;  %12628 = vmatprep.subr.bf16.mxu0 %v18497_v58  ;;  %v13213_v23 = vunpack.i.h.bf16 %v13211_v50  ;;  %v13212_v4 = vunpack.i.l.bf16 %v13211_v50 }
0x181b   : > { %v12649_v14 = vpack.c.bf16 %v13268_v21, %v13267_v42 }
0x181c   : > { %v13276_v41 = vpop.permute.xlu1 %13275 }
0x181d   : > { %v13278_v59 = vunpack.i.h.bf16 %v13276_v41  ;;  %v13277_v52 = vunpack.i.l.bf16 %v13276_v41  ;;  %v13221_v57 = vpop.permute.xlu0 %13220 }
0x181e   : > { %v13223_v40 = vunpack.i.h.bf16 %v13221_v57  ;;  %v13222_v51 = vunpack.i.l.bf16 %v13221_v57 }
0x181f   : > { %v12669_v6 = vpack.c.bf16 %v13278_v59, %v13277_v52 }
0x1820   : > { %v13286_v54 = vpop.permute.xlu1 %13285 }
0x1821   : > { %12615 = vmatpush3.bf16.xpose.msk.msra.mxu1 %vm16631_vm14, %v12613_v20  ;;  %12631 = vmatpush3.bf16.xpose.msk.msra.mxu0 %vm16631_vm14, %v12629_v55  ;;  %v13288_v5 = vunpack.i.h.bf16 %v13286_v54  ;;  %v13287_v34 = vunpack.i.l.bf16 %v13286_v54  ;;  %v12689_v55 = vpack.c.bf16 %v13213_v23, %v13212_v4  ;;  %v13231_v9 = vpop.permute.xlu0 %13230 }
0x1822   : > { %12616 = vmatprep.subr.bf16.mxu1 %v18497_v58  ;;  %12632 = vmatprep.subr.bf16.mxu0 %v18497_v58  ;;  %v13233_v35 = vunpack.i.h.bf16 %v13231_v9  ;;  %v13232_v22 = vunpack.i.l.bf16 %v13231_v9 }
0x1823   : > { %v12673_v20 = vpack.c.bf16 %v13288_v5, %v13287_v34 }
0x1824   : > { %v13296_v30 = vpop.permute.xlu1 %13295 }
0x1825   : > { %v13298_v49 = vunpack.i.h.bf16 %v13296_v30  ;;  %v13297_v29 = vunpack.i.l.bf16 %v13296_v30  ;;  %v13241_v26 = vpop.permute.xlu0 %13240 }
0x1826   : > { %v13243_v47 = vunpack.i.h.bf16 %v13241_v26  ;;  %v13242_v56 = vunpack.i.l.bf16 %v13241_v26 }
0x1828   : > { %v13306_v7 = vpop.permute.xlu1 %13305 }
0x1829   : > { %12619 = vmatpush3.bf16.xpose.msk.msra.mxu1 %vm16631_vm14, %v12617_v19  ;;  %12635 = vmatpush3.bf16.xpose.msk.msra.mxu0 %vm16631_vm14, %v12633_v12  ;;  %v12693_v12 = vpack.c.bf16 %v13223_v40, %v13222_v51  ;;  %v12677_v19 = vpack.c.bf16 %v13298_v49, %v13297_v29  ;;  %v13308_v36 = vunpack.i.h.bf16 %v13306_v7  ;;  %v13307_v31 = vunpack.i.l.bf16 %v13306_v7  ;;  %v13251_v27 = vpop.permute.xlu0 %13250 }
0x182a   : > { %12636 = vmatprep.subr.bf16.mxu1 %v18497_v58  ;;  %12652 = vmatprep.subr.bf16.mxu0 %v18497_v58  ;;  %v13253_v10 = vunpack.i.h.bf16 %v13251_v27  ;;  %v13252_v43 = vunpack.i.l.bf16 %v13251_v27 }
0x182c   : > { %v13316_v53 = vpop.permute.xlu1 %13315 }
0x182d   : > { %v13318_v61 = vunpack.i.h.bf16 %v13316_v53  ;;  %v13317_v17 = vunpack.i.l.bf16 %v13316_v53  ;;  %v13261_v62 = vpop.permute.xlu0 %13260 }
0x182e   : > { %v13263_v48 = vunpack.i.h.bf16 %v13261_v62  ;;  %v13262_v63 = vunpack.i.l.bf16 %v13261_v62 }
0x1830   : > { %11767 = vmatmul.mubr.msk.f32.vlgmr.msra.gmra.mrb[78].mxu1 %vm6544_vm13, %v17238_v60  ;;  %11786 = vmatmul.mubr.msk.f32.vlgmr.msra.gmra.mrb[82].mxu0 %vm6544_vm13, %v17238_v60  ;;  %v13326_v25 = vpop.permute.xlu1 %13325 }
0x1831   : > { %12639 = vmatpush3.bf16.xpose.msk.msra.mxu1 %vm16631_vm14, %v12637_v0  ;;  %12655 = vmatpush3.bf16.xpose.msk.msra.mxu0 %vm16631_vm14, %v12653_v38  ;;  %v12697_v38 = vpack.c.bf16 %v13233_v35, %v13232_v22  ;;  %v12681_v0 = vpack.c.bf16 %v13308_v36, %v13307_v31  ;;  %v13328_v13 = vunpack.i.h.bf16 %v13326_v25  ;;  %v13327_v28 = vunpack.i.l.bf16 %v13326_v25  ;;  %v13271_v2 = vpop.permute.xlu0 %13270 }
0x1832   : > { %12640 = vmatprep.subr.bf16.mxu1 %v18497_v58  ;;  %12656 = vmatprep.subr.bf16.mxu0 %v18497_v58  ;;  %v13273_v18 = vunpack.i.h.bf16 %v13271_v2  ;;  %v13272_v44 = vunpack.i.l.bf16 %v13271_v2 }
0x1833   : > { %11804 = vmatprep.mubr.msk.f32.mxu1 %vm14084_vm1, %v18516_v37  ;;  %11823 = vmatprep.mubr.msk.f32.mxu0 %vm14084_vm1, %v18516_v37 }
0x1834   : > { %v13336_v32 = vpop.permute.xlu1 %13335 }
0x1835   : > { %v13338_v21 = vunpack.i.h.bf16 %v13336_v32  ;;  %v13337_v42 = vunpack.i.l.bf16 %v13336_v32 }
0x1838   : > { %v13346_v41 = vpop.permute.xlu1 %13345 }
0x1839   : > { %12643 = vmatpush3.bf16.xpose.msk.msra.mxu1 %vm16631_vm14, %v12641_v46  ;;  %12659 = vmatpush3.bf16.xpose.msk.msra.mxu0 %vm16631_vm14, %v12657_v8  ;;  %v12717_v8 = vpack.c.bf16 %v13243_v47, %v13242_v56  ;;  %v12701_v46 = vpack.c.bf16 %v13318_v61, %v13317_v17  ;;  %v13348_v59 = vunpack.i.h.bf16 %v13346_v41  ;;  %v13347_v52 = vunpack.i.l.bf16 %v13346_v41 }
0x183a   : > { %12644 = vmatprep.subr.bf16.mxu1 %v18497_v58  ;;  %12660 = vmatprep.subr.bf16.mxu0 %v18497_v58 }
0x183b   : > { %v12713_v50 = vpack.c.bf16 %v13348_v59, %v13347_v52 }
0x183c   : > { %v13356_v54 = vpop.permute.xlu1 %13355 }
0x183d   : > { %v13358_v34 = vunpack.i.h.bf16 %v13356_v54 }
0x1840   : > { %v13366_v7 = vpop.permute.xlu1 %13365 }
0x1841   : > { %12647 = vmatpush3.bf16.xpose.msk.msra.mxu1 %vm16631_vm14, %v12645_v45  ;;  %12663 = vmatpush3.bf16.xpose.msk.msra.mxu0 %vm16631_vm14, %v12661_v24  ;;  %v12721_v24 = vpack.c.bf16 %v13253_v10, %v13252_v43  ;;  %v12705_v45 = vpack.c.bf16 %v13328_v13, %v13327_v28  ;;  %v13367_v26 = vunpack.i.l.bf16 %v13366_v7 }
0x1842   : > { %12648 = vmatprep.subr.bf16.mxu1 %v18497_v58  ;;  %12664 = vmatprep.subr.bf16.mxu0 %v18497_v58 }
0x1844   : > { %v13376_v27 = vpop.permute.xlu1 %13375 }
0x1845   : > { %v13378_v43 = vunpack.i.h.bf16 %v13376_v27  ;;  %v13377_v13 = vunpack.i.l.bf16 %v13376_v27 }
0x1847   : > { %v12741_v32 = vpack.c.bf16 %v13378_v43, %v13377_v13 }
0x1849   : > { %12651 = vmatpush3.bf16.xpose.msk.msra.mxu1 %vm16631_vm14, %v12649_v14  ;;  %12667 = vmatpush3.bf16.xpose.msk.msra.mxu0 %vm16631_vm14, %v12665_v39  ;;  %v12725_v39 = vpack.c.bf16 %v13263_v48, %v13262_v63  ;;  %v12709_v14 = vpack.c.bf16 %v13338_v21, %v13337_v42 }
0x184a   : > { %12668 = vmatprep.subr.bf16.mxu1 %v18497_v58  ;;  %12684 = vmatprep.subr.bf16.mxu0 %v18497_v58 }
0x1850   : > { %11805 = vmatmul.mubr.msk.f32.vlgmr.msra.gmra.mrb[80].mxu1 %vm6544_vm13, %v17238_v60  ;;  %11824 = vmatmul.mubr.msk.f32.vlgmr.msra.gmra.mrb[84].mxu0 %vm6544_vm13, %v17238_v60 }
0x1851   : > { %12671 = vmatpush3.bf16.xpose.msk.msra.mxu1 %vm16631_vm14, %v12669_v6  ;;  %12687 = vmatpush3.bf16.xpose.msk.msra.mxu0 %vm16631_vm14, %v12685_v11  ;;  %v12729_v11 = vpack.c.bf16 %v13273_v18, %v13272_v44  ;;  %v13281_v6 = vpop.permute.xlu0 %13280 }
0x1852   : > { %12672 = vmatprep.subr.bf16.mxu1 %v18497_v58  ;;  %12688 = vmatprep.subr.bf16.mxu0 %v18497_v58  ;;  %v13283_v23 = vunpack.i.h.bf16 %v13281_v6  ;;  %v13282_v5 = vunpack.i.l.bf16 %v13281_v6 }
0x1853   : > { %11842 = vmatprep.mubr.msk.f32.mxu1 %vm14084_vm1, %v18516_v37  ;;  %11861 = vmatprep.mubr.msk.f32.mxu0 %vm14084_vm1, %v18516_v37 }
0x1854   : > { %v12749_v29 = vpack.c.bf16 %v13283_v23, %v13282_v5 }
0x1859   : > { %12675 = vmatpush3.bf16.xpose.msk.msra.mxu1 %vm16631_vm14, %v12673_v20  ;;  %12691 = vmatpush3.bf16.xpose.msk.msra.mxu0 %vm16631_vm14, %v12689_v55  ;;  %v13357_v55 = vunpack.i.l.bf16 %v13356_v54  ;;  %v17430_v20 = vld [vmem:[%s18292_s26] ss:$0 sm:$0xff] }
0x185a   : > { %12676 = vmatprep.subr.bf16.mxu1 %v18497_v58  ;;  %12692 = vmatprep.subr.bf16.mxu0 %v18497_v58 }
0x1861   : > { %12679 = vmatpush3.bf16.xpose.msk.msra.mxu1 %vm16631_vm14, %v12677_v19  ;;  %12695 = vmatpush3.bf16.xpose.msk.msra.mxu0 %vm16631_vm14, %v12693_v12  ;;  %v13291_v12 = vpop.permute.xlu0 %13290  ;;  %v12733_v19 = vpack.c.bf16 %v13358_v34, %v13357_v55 }
0x1862   : > { %12680 = vmatprep.subr.bf16.mxu1 %v18497_v58  ;;  %12696 = vmatprep.subr.bf16.mxu0 %v18497_v58  ;;  %v13293_v36 = vunpack.i.h.bf16 %v13291_v12 }
0x1865   : > { %v13301_v61 = vpop.permute.xlu0 %13300 }
0x1866   : > { %v13303_v25 = vunpack.i.h.bf16 %v13301_v61  ;;  %v13302_v10 = vunpack.i.l.bf16 %v13301_v61 }
0x1868   : > { %v12757_v62 = vpack.c.bf16 %v13303_v25, %v13302_v10 }
0x1869   : > { %12683 = vmatpush3.bf16.xpose.msk.msra.mxu1 %vm16631_vm14, %v12681_v0  ;;  %12699 = vmatpush3.bf16.xpose.msk.msra.mxu0 %vm16631_vm14, %v12697_v38  ;;  %v13292_v38 = vunpack.i.l.bf16 %v13291_v12  ;;  %v13368_v0 = vunpack.i.h.bf16 %v13366_v7  ;;  %v13311_v28 = vpop.permute.xlu0 %13310 }
0x186a   : > { %12700 = vmatprep.subr.bf16.mxu1 %v18497_v58  ;;  %12716 = vmatprep.subr.bf16.mxu0 %v18497_v58  ;;  %v13313_v21 = vunpack.i.h.bf16 %v13311_v28  ;;  %v13312_v42 = vunpack.i.l.bf16 %v13311_v28 }
0x186c   : > { %v12761_v5 = vpack.c.bf16 %v13313_v21, %v13312_v42 }
0x186d   : > { %v13321_v44 = vpop.permute.xlu0 %13320 }
0x1870   : > { %11843 = vmatmul.mubr.msk.f32.vlgmr.msra.gmra.mrb[82].mxu1 %vm6544_vm13, %v17238_v60  ;;  %11862 = vmatmul.mubr.msk.f32.vlgmr.msra.gmra.mrb[86].mxu0 %vm6544_vm13, %v17238_v60 }
0x1871   : > { %12703 = vmatpush3.bf16.xpose.msk.msra.mxu1 %vm16631_vm14, %v12701_v46  ;;  %12719 = vmatpush3.bf16.xpose.msk.msra.mxu0 %vm16631_vm14, %v12717_v8  ;;  %v12753_v8 = vpack.c.bf16 %v13293_v36, %v13292_v38  ;;  %v12737_v46 = vpack.c.bf16 %v13368_v0, %v13367_v26  ;;  %v13331_v61 = vpop.permute.xlu0 %13330 }
0x1872   : > { %12704 = vmatprep.subr.bf16.mxu1 %v18497_v58  ;;  %12720 = vmatprep.subr.bf16.mxu0 %v18497_v58  ;;  %v13333_v10 = vunpack.i.h.bf16 %v13331_v61  ;;  %v13332_v43 = vunpack.i.l.bf16 %v13331_v61 }
0x1873   : > { %11880 = vmatprep.mubr.msk.f32.mxu1 %vm14084_vm1, %v18516_v37  ;;  %11899 = vmatprep.mubr.msk.f32.mxu0 %vm14084_vm1, %v18516_v37 }
0x1874   : > { %v12785_v42 = vpack.c.bf16 %v13333_v10, %v13332_v43 }
0x1879   : > { %12707 = vmatpush3.bf16.xpose.msk.msra.mxu1 %vm16631_vm14, %v12705_v45  ;;  %12723 = vmatpush3.bf16.xpose.msk.msra.mxu0 %vm16631_vm14, %v12721_v24  ;;  %v13386_v24 = vpop.permute.xlu1 %13385 }
0x187a   : > { %12708 = vmatprep.subr.bf16.mxu1 %v18497_v58  ;;  %12724 = vmatprep.subr.bf16.mxu0 %v18497_v58  ;;  %v13388_v2 = vunpack.i.h.bf16 %v13386_v24  ;;  %v13387_v59 = vunpack.i.l.bf16 %v13386_v24 }
0x1881   : > { %12711 = vmatpush3.bf16.xpose.msk.msra.mxu1 %vm16631_vm14, %v12709_v14  ;;  %12727 = vmatpush3.bf16.xpose.msk.msra.mxu0 %vm16631_vm14, %v12725_v39 }
0x1882   : > { %12712 = vmatprep.subr.bf16.mxu1 %v18497_v58  ;;  %12728 = vmatprep.subr.bf16.mxu0 %v18497_v58 }
0x1889   : > { %12715 = vmatpush3.bf16.xpose.msk.msra.mxu1 %vm16631_vm14, %v12713_v50  ;;  %12731 = vmatpush3.bf16.xpose.msk.msra.mxu0 %vm16631_vm14, %v12729_v11  ;;  %v13391_v50 = vpop.permute.xlu1 %13390 }
0x188a   : > { %12732 = vmatprep.subr.bf16.mxu1 %v18497_v58  ;;  %12748 = vmatprep.subr.bf16.mxu0 %v18497_v58  ;;  %v13393_v12 = vunpack.i.h.bf16 %v13391_v50 }
0x188c   : > { %v11664_v4 = vpop.f32.mrb[70].mxu0 }
0x188d   : > { %v6349_v57 = vadd.f32 %v17430_v20, %v11664_v4  ;;  %v6343_v30 = vpop.f32.mrb[71].mxu0 }
0x188e   : > { %v17434_v40 = vadd.f32 %v17430_v20, %v6343_v30  ;;  %v13323_v30 = vunpack.i.h.bf16 %v13321_v44 }
0x188f   : > { %v6407_v51 = vmul.f32 0.044715, %v6349_v57  ;;  %v6391_v52 = vmul.f32 0.5, %v6349_v57 }
0x1890   : > { %v6406_v49 = vmul.f32 0.044715, %v17434_v40  ;;  %11881 = vmatmul.mubr.msk.f32.vlgmr.msra.gmra.mrb[84].mxu1 %vm6544_vm13, %v17238_v60  ;;  %11900 = vmatmul.mubr.msk.f32.vlgmr.msra.gmra.mrb[88].mxu0 %vm6544_vm13, %v17238_v60  ;;  %v6390_v54 = vmul.f32 0.5, %v17434_v40 }
0x1891   : > { %v6423_v9 = vmul.f32 %v6407_v51, %v6349_v57  ;;  %12735 = vmatpush3.bf16.xpose.msk.msra.mxu1 %vm16631_vm14, %v12733_v19  ;;  %12751 = vmatpush3.bf16.xpose.msk.msra.mxu0 %vm16631_vm14, %v12749_v29  ;;  %v13322_v51 = vunpack.i.l.bf16 %v13321_v44  ;;  %v12745_v29 = vpack.c.bf16 %v13388_v2, %v13387_v59  ;;  %v13392_v19 = vunpack.i.l.bf16 %v13391_v50 }
0x1892   : > { %v6422_v35 = vmul.f32 %v6406_v49, %v17434_v40  ;;  %12736 = vmatprep.subr.bf16.mxu1 %v18497_v58  ;;  %12752 = vmatprep.subr.bf16.mxu0 %v18497_v58 }
0x1893   : > { %v6439_v22 = vmul.f32 %v6423_v9, %v6349_v57  ;;  %11918 = vmatprep.mubr.msk.f32.mxu1 %vm14084_vm1, %v18516_v37  ;;  %11937 = vmatprep.mubr.msk.f32.mxu0 %vm14084_vm1, %v18516_v37 }
0x1894   : > { %v6438_v31 = vmul.f32 %v6422_v35, %v17434_v40 }
0x1895   : > { %v6455_v53 = vadd.f32 %v6439_v22, %v6349_v57 }
0x1896   : > { %v6454_v47 = vadd.f32 %v6438_v31, %v17434_v40 }
0x1897   : > { %v6471_v56 = vmul.f32 0.7978846, %v6455_v53  ;;  %v12781_v53 = vpack.c.bf16 %v13323_v30, %v13322_v51 }
0x1898   : > { %v6470_v17 = vmul.f32 0.7978846, %v6454_v47  ;;  %v12765_v47 = vpack.c.bf16 %v13393_v12, %v13392_v19 }
0x1899   : > { %14038 = vtanh.f32 %v6471_v56  ;;  %12739 = vmatpush3.bf16.xpose.msk.msra.mxu1 %vm16631_vm14, %v12737_v46  ;;  %12755 = vmatpush3.bf16.xpose.msk.msra.mxu0 %vm16631_vm14, %v12753_v8 }
0x189a   : > { %14040 = vtanh.f32 %v6470_v17  ;;  %12740 = vmatprep.subr.bf16.mxu1 %v18497_v58  ;;  %12756 = vmatprep.subr.bf16.mxu0 %v18497_v58 }
0x189e   : > { %v11667_v45 = vpop.f32.mrb[72].mxu0 }
0x189f   : > { %v17461_v48 = vadd.f32 %v17430_v20, %v11667_v45  ;;  %v6353_v63 = vpop.f32.mrb[73].mxu0 }
0x18a0   : > { %v17464_v39 = vadd.f32 %v17430_v20, %v6353_v63 }
0x18a1   : > { %12743 = vmatpush3.bf16.xpose.msk.msra.mxu1 %vm16631_vm14, %v12741_v32  ;;  %12759 = vmatpush3.bf16.xpose.msk.msra.mxu0 %vm16631_vm14, %v12757_v62  ;;  %v6409_v41 = vmul.f32 0.044715, %v17461_v48  ;;  %v6393_v32 = vmul.f32 0.5, %v17461_v48 }
0x18a2   : > { %12744 = vmatprep.subr.bf16.mxu1 %v18497_v58  ;;  %12760 = vmatprep.subr.bf16.mxu0 %v18497_v58  ;;  %v6408_v6 = vmul.f32 0.044715, %v17464_v39  ;;  %v6392_v2 = vmul.f32 0.5, %v17464_v39 }
0x18a3   : > { %v14039_v14 = vpop.eup %14038  ;;  %v6425_v4 = vmul.f32 %v6409_v41, %v17461_v48 }
0x18a4   : > { %v14041_v18 = vpop.eup %14040  ;;  %v6503_v11 = vadd.f32 1.0, %v14039_v14  ;;  %v6424_v55 = vmul.f32 %v6408_v6, %v17464_v39  ;;  %v13341_v14 = vpop.permute.xlu0 %13340 }
0x18a5   : > { %v6502_v23 = vadd.f32 1.0, %v14041_v18  ;;  %v6441_v57 = vmul.f32 %v6425_v4, %v17461_v48  ;;  %v13342_v6 = vunpack.i.l.bf16 %v13341_v14 }
0x18a6   : > { %v17476_v34 = vmul.f32 %v6503_v11, %v6391_v52  ;;  %v6440_v9 = vmul.f32 %v6424_v55, %v17464_v39 }
0x18a7   : > { %v17479_v49 = vmul.f32 %v6502_v23, %v6390_v54  ;;  %v6457_v40 = vadd.f32 %v6441_v57, %v17461_v48  ;;  %v13343_v48 = vunpack.i.h.bf16 %v13341_v14 }
0x18a8   : > { %v6456_v35 = vadd.f32 %v6440_v9, %v17464_v39  ;;  %v13351_v4 = vpop.permute.xlu0 %13350 }
0x18a9   : > { %v17486_v7 = vpack.i.bf16 %v17476_v34, %v17479_v49  ;;  %12747 = vmatpush3.bf16.xpose.msk.msra.mxu1 %vm16631_vm14, %v12745_v29  ;;  %12763 = vmatpush3.bf16.xpose.msk.msra.mxu0 %vm16631_vm14, %v12761_v5  ;;  %v6473_v22 = vmul.f32 0.7978846, %v6457_v40  ;;  %v12797_v31 = vpack.c.bf16 %v17476_v34, %v17479_v49  ;;  %v12789_v50 = vpack.c.bf16 %v13343_v48, %v13342_v6 }
0x18aa   : > { %12764 = vmatprep.subr.bf16.mxu1 %v18497_v58  ;;  %v6472_v36 = vmul.f32 0.7978846, %v6456_v35  ;;  %12780 = vmatprep.subr.bf16.mxu0 %v18497_v58  ;;  %v13353_v57 = vunpack.i.h.bf16 %v13351_v4  ;;  %v13352_v29 = vunpack.i.l.bf16 %v13351_v4 }
0x18ab   : > { %14042 = vtanh.f32 %v6473_v22  ;;  %13360 = vrot.lane.b32.xlu0 %v17486_v7, %s14096_s7 }
0x18ac   : > { %14044 = vtanh.f32 %v6472_v36  ;;  %v12793_v61 = vpack.c.bf16 %v13353_v57, %v13352_v29 }
0x18ad   : > { %v11670_v38 = vpop.f32.mrb[74].mxu0 }
0x18ae   : > { %v17500_v0 = vadd.f32 %v17430_v20, %v11670_v38  ;;  %v6363_v26 = vpop.f32.mrb[75].mxu0 }
0x18af   : > { %v17503_v56 = vadd.f32 %v17430_v20, %v6363_v26 }
0x18b0   : > { %11919 = vmatmul.mubr.msk.f32.vlgmr.msra.gmra.mrb[86].mxu1 %vm6544_vm13, %v17238_v60  ;;  %11938 = vmatmul.mubr.msk.f32.vlgmr.msra.gmra.mrb[90].mxu0 %vm6544_vm13, %v17238_v60  ;;  %v6411_v17 = vmul.f32 0.044715, %v17500_v0  ;;  %v6395_v36 = vmul.f32 0.5, %v17500_v0 }
0x18b1   : > { %v17510_v8 = vpop.f32.mrb[74].mxu1  ;;  %12767 = vmatpush3.bf16.xpose.msk.msra.mxu1 %vm16631_vm14, %v12765_v47  ;;  %12783 = vmatpush3.bf16.xpose.msk.msra.mxu0 %vm16631_vm14, %v12781_v53  ;;  %v6410_v46 = vmul.f32 0.044715, %v17503_v56 }
0x18b2   : > { %v11692_v27 = vpop.f32.mrb[75].mxu1  ;;  %v6427_v25 = vmul.f32 %v6411_v17, %v17500_v0  ;;  %12784 = vmatprep.subr.bf16.mxu0 %v18497_v58  ;;  %11975 = vmatprep.mubr.msk.f32.mxu0 %vm14084_vm1, %v18516_v37 }
0x18b3   : > { %v6426_v13 = vmul.f32 %v6410_v46, %v17503_v56  ;;  %12768 = vmatprep.subr.bf16.mxu1 %v18497_v58  ;;  %11956 = vmatprep.mubr.msk.f32.mxu1 %vm14084_vm1, %v18516_v37 }
0x18b4   : > { %v6443_v28 = vmul.f32 %v6427_v25, %v17500_v0 }
0x18b5   : > { %v14043_v24 = vpop.eup %14042  ;;  %v6442_v45 = vmul.f32 %v6426_v13, %v17503_v56 }
0x18b6   : > { %v14045_v62 = vpop.eup %14044  ;;  %v6505_v63 = vadd.f32 1.0, %v14043_v24  ;;  %v6459_v21 = vadd.f32 %v6443_v28, %v17500_v0 }
0x18b7   : > { %v6504_v41 = vadd.f32 1.0, %v14045_v62  ;;  %v6458_v18 = vadd.f32 %v6442_v45, %v17503_v56 }
0x18b8   : > { %v17531_v44 = vmul.f32 %v6505_v63, %v6393_v32  ;;  %v6475_v59 = vmul.f32 0.7978846, %v6459_v21 }
0x18b9   : > { %v17533_v52 = vmul.f32 %v6504_v41, %v6392_v2  ;;  %v6474_v11 = vmul.f32 0.7978846, %v6458_v18  ;;  %12787 = vmatpush3.bf16.xpose.msk.msra.mxu0 %vm16631_vm14, %v12785_v42 }
0x18ba   : > { %14046 = vtanh.f32 %v6475_v59  ;;  %12788 = vmatprep.subr.bf16.mxu0 %v18497_v58 }
0x18bb   : > { %14048 = vtanh.f32 %v6474_v11  ;;  %v17540_v39 = vpack.i.bf16 %v17531_v44, %v17533_v52  ;;  %v12801_v23 = vpack.c.bf16 %v17531_v44, %v17533_v52 }
0x18bd   : > { %13410 = vrot.lane.b32.xlu1 %v17540_v39, %s14097_s12  ;;  %13370 = vrot.lane.b32.xlu0 %v17540_v39, %s14096_s7 }
0x18bf   : > { %v11673_v54 = vpop.f32.mrb[76].mxu0 }
0x18c0   : > { %v6379_v5 = vadd.f32 %v17430_v20, %v11673_v54  ;;  %v6373_v55 = vpop.f32.mrb[77].mxu0 }
0x18c1   : > { %v6374_v30 = vadd.f32 %v17430_v20, %v6373_v55  ;;  %12791 = vmatpush3.bf16.xpose.msk.msra.mxu0 %vm16631_vm14, %v12789_v50  ;;  %v6394_v20 = vmul.f32 0.5, %v17503_v56 }
0x18c2   : > { %v6413_v51 = vmul.f32 0.044715, %v6379_v5  ;;  %12792 = vmatprep.subr.bf16.mxu0 %v18497_v58  ;;  %v6397_v45 = vmul.f32 0.5, %v6379_v5 }
0x18c3   : > { %v6412_v12 = vmul.f32 0.044715, %v6374_v30  ;;  %v17553_v19 = vpop.f32.mrb[78].mxu0  ;;  %v6396_v32 = vmul.f32 0.5, %v6374_v30 }
0x18c4   : > { %v14047_v9 = vpop.eup %14046  ;;  %v6429_v40 = vmul.f32 %v6413_v51, %v6379_v5  ;;  %v11711_v35 = vpop.f32.mrb[79].mxu0 }
0x18c5   : > { %v14049_v22 = vpop.eup %14048  ;;  %v6507_v38 = vadd.f32 1.0, %v14047_v9  ;;  %v6428_v26 = vmul.f32 %v6412_v12, %v6374_v30 }
0x18c6   : > { %v6506_v53 = vadd.f32 1.0, %v14049_v22  ;;  %v6445_v47 = vmul.f32 %v6429_v40, %v6379_v5  ;;  %v8238_v40 = vpop.permute.xlu1 %8237 }
0x18c7   : > { %v17557_v17 = vmul.f32 %v6507_v38, %v6395_v36  ;;  %v6444_v46 = vmul.f32 %v6428_v26, %v6374_v30 }
0x18c8   : > { %v17559_v27 = vmul.f32 %v6506_v53, %v6394_v20  ;;  %v6461_v25 = vadd.f32 %v6445_v47, %v6379_v5 }
0x18c9   : > { %v6460_v10 = vadd.f32 %v6444_v46, %v6374_v30  ;;  %12795 = vmatpush3.bf16.xpose.msk.msra.mxu0 %vm16631_vm14, %v12793_v61 }
0x18ca   : > { %v6477_v43 = vmul.f32 0.7978846, %v6461_v25  ;;  %v17565_v0 = vpack.i.bf16 %v17557_v17, %v17559_v27  ;;  %12812 = vmatprep.subr.bf16.mxu0 %v18497_v58  ;;  %v12805_v13 = vpack.c.bf16 %v17557_v17, %v17559_v27  ;;  %v8241_v26 = vpop.permute.xlu1 %8240 }
0x18cb   : > { %v6476_v56 = vmul.f32 0.7978846, %v6460_v10 }
0x18cc   : > { %14050 = vtanh.f32 %v6477_v43  ;;  %13420 = vrot.lane.b32.xlu1 %v17565_v0, %s14097_s12  ;;  %13380 = vrot.lane.b32.xlu0 %v17565_v0, %s14096_s7 }
0x18cd   : > { %14052 = vtanh.f32 %v6476_v56 }
0x18d0   : > { %11976 = vmatmul.mubr.msk.f32.vlgmr.msra.gmra.mrb[92].mxu0 %vm6544_vm13, %v17238_v60 }
0x18d1   : > { %12013 = vmatprep.mubr.msk.f32.mxu0 %vm14084_vm1, %v18516_v37 }
0x18d6   : > { %v14051_v28 = vpop.eup %14050 }
0x18d7   : > { %v14053_v24 = vpop.eup %14052  ;;  %v6509_v62 = vadd.f32 1.0, %v14051_v28 }
0x18d8   : > { %v6508_v63 = vadd.f32 1.0, %v14053_v24  ;;  %v8232_v24 = vrot.slane %v18514_v3, 1 }
0x18d9   : > { %v17578_v21 = vmul.f32 %v6509_v62, %v6397_v45 }
0x18da   : > { %v17580_v42 = vmul.f32 %v6508_v63, %v6396_v32 }
0x18dc   : > { %v17584_v14 = vpack.i.bf16 %v17578_v21, %v17580_v42  ;;  %v12809_v2 = vpack.c.bf16 %v17578_v21, %v17580_v42 }
0x18de   : > { %13430 = vrot.lane.b32.xlu1 %v17584_v14, %s14097_s12  ;;  %13395 = vrot.lane.b32.xlu0 %v17584_v14, %s14096_s7 }
0x18e2   : > { %13440 = vrot.lane.b32.xlu1 %v17540_v39, %s14098_s10  ;;  %8234 = vrot.lane.b32.xlu0 %v18514_v3, %s14096_s7  ;;  %s18521_s7 = smov 68  }
0x18e3   : > { %v17596_v41 = vpop.f32.mrb[76].mxu1  ;;  %v17598_v18 = vpop.f32.mrb[80].mxu0 }
0x18e4   : > { %v11730_v59 = vpop.f32.mrb[77].mxu1  ;;  %v11749_v11 = vpop.f32.mrb[81].mxu0 }
0x18e6   : > { %13450 = vrot.lane.b32.xlu1 %v17584_v14, %s14098_s10  ;;  %13400 = vrot.lane.b32.xlu0 %v17486_v7, %s14097_s12  ;;  %s18522_s12 = smov 80  }
0x18ea   : > { %13460 = vrot.lane.b32.xlu1 %v17486_v7, %s14099_s11  ;;  %13405 = vrot.lane.b32.xlu0 %v16663_v33, %s14106_s8 }
0x18ee   : > { %13470 = vrot.lane.b32.xlu1 %v17540_v39, %s14099_s11  ;;  %13415 = vrot.lane.b32.xlu0 %v16698_v1, %s14106_s8 }
0x18f2   : > { %13480 = vrot.lane.b32.xlu1 %v17565_v0, %s14099_s11  ;;  %13425 = vrot.lane.b32.xlu0 %v16755_v16, %s14106_s8 }
0x18f6   : > { %13490 = vrot.lane.b32.xlu1 %v17584_v14, %s14099_s11  ;;  %13435 = vrot.lane.b32.xlu0 %v17486_v7, %s14098_s10  ;;  %s18524_s11 = smov 64  }
0x18fa   : > { %13500 = vrot.lane.b32.xlu1 %v17486_v7, %s14100_s6  ;;  %13445 = vrot.lane.b32.xlu0 %v17565_v0, %s14098_s10  ;;  %s18523_s10 = smov 88  }
0x18fe   : > { %13510 = vrot.lane.b32.xlu1 %v17540_v39, %s14100_s6  ;;  %13455 = vrot.lane.b32.xlu0 %v17486_v7, %s14093_s3 }
0x1902   : > { %13520 = vrot.lane.b32.xlu1 %v17565_v0, %s14100_s6  ;;  %13465 = vrot.lane.b32.xlu0 %v17540_v39, %s14093_s3 }
0x1903   : > { %v17632_v33 = vpop.f32.mrb[78].mxu1  ;;  %v17634_v1 = vpop.f32.mrb[82].mxu0 }
0x1904   : > { %v11768_v16 = vpop.f32.mrb[79].mxu1  ;;  %v11787_v48 = vpop.f32.mrb[83].mxu0 }
0x1906   : > { %13530 = vrot.lane.b32.xlu1 %v17584_v14, %s14100_s6  ;;  %13475 = vrot.lane.b32.xlu0 %v17565_v0, %s14093_s3  ;;  %s10533_s6 = sshll.u32 %s18527_s29, 5 }
0x190a   : > { %13540 = vrot.lane.b32.xlu1 %v17486_v7, %s14101_s4  ;;  %13485 = vrot.lane.b32.xlu0 %v17584_v14, %s14093_s3  ;;  %s18520_s3 = smov 104  }
0x190e   : > { %13550 = vrot.lane.b32.xlu1 %v17540_v39, %s14101_s4  ;;  %13495 = vrot.lane.b32.xlu0 %v17486_v7, %s18518_s1 }
0x1912   : > { %13560 = vrot.lane.b32.xlu1 %v17565_v0, %s14101_s4  ;;  %13505 = vrot.lane.b32.xlu0 %v17540_v39, %s18518_s1 }
0x1916   : > { %13570 = vrot.lane.b32.xlu1 %v17584_v14, %s14101_s4  ;;  %13515 = vrot.lane.b32.xlu0 %v17565_v0, %s18518_s1 }
0x191a   : > { %13580 = vrot.lane.b32.xlu1 %v17486_v7, %s18519_s2  ;;  %13525 = vrot.lane.b32.xlu0 %v17584_v14, %s18518_s1 }
0x191d   : > { %v13361_v6 = vpop.permute.xlu0 %13360 }
0x191e   : > { %13590 = vrot.lane.b32.xlu1 %v17540_v39, %s18519_s2  ;;  %13535 = vrot.lane.b32.xlu0 %v17486_v7, %s18520_s3  ;;  %v13363_v50 = vunpack.i.h.bf16 %v13361_v6  ;;  %v13362_v54 = vunpack.i.l.bf16 %v13361_v6 }
0x1920   : > { %v12813_v4 = vpack.c.bf16 %v13363_v50, %v13362_v54 }
0x1922   : > { %13600 = vrot.lane.b32.xlu1 %v17565_v0, %s18519_s2  ;;  %13545 = vrot.lane.b32.xlu0 %v17540_v39, %s18520_s3 }
0x1923   : > { %v17668_v5 = vpop.f32.mrb[80].mxu1  ;;  %v7352_v55 = vpop.f32.mrb[84].mxu0  ;;  %12815 = vmatpush3.bf16.xpose.msk.msra.mxu0 %vm16631_vm14, %v12813_v4 }
0x1924   : > { %v11806_v30 = vpop.f32.mrb[81].mxu1  ;;  %v11825_v51 = vpop.f32.mrb[85].mxu0  ;;  %12816 = vmatprep.subr.bf16.mxu0 %v18497_v58 }
0x1926   : > { %13610 = vrot.lane.b32.xlu1 %v17584_v14, %s18519_s2  ;;  %13555 = vrot.lane.b32.xlu0 %v17565_v0, %s18520_s3 }
0x192a   : > { %13620 = vrot.lane.b32.xlu1 %v17486_v7, %s18521_s7  ;;  %13565 = vrot.lane.b32.xlu0 %v17584_v14, %s18520_s3 }
0x192e   : > { %13630 = vrot.lane.b32.xlu1 %v17540_v39, %s18521_s7  ;;  %13575 = vrot.lane.b32.xlu0 %v17486_v7, %s18507_s5 }
0x192f   : > { %v13371_v57 = vpop.permute.xlu0 %13370  ;;  %v13411_v46 = vpop.permute.xlu1 %13410 }
0x1930   : > { %v13373_v29 = vunpack.i.h.bf16 %v13371_v57  ;;  %v13372_v12 = vunpack.i.l.bf16 %v13371_v57  ;;  %v13412_v54 = vunpack.i.l.bf16 %v13411_v46 }
0x1932   : > { %13640 = vrot.lane.b32.xlu1 %v17565_v0, %s18521_s7  ;;  %13585 = vrot.lane.b32.xlu0 %v17540_v39, %s18507_s5  ;;  %v12817_v9 = vpack.c.bf16 %v13373_v29, %v13372_v12 }
0x1934   : > { %12819 = vmatpush3.bf16.xpose.msk.msra.mxu0 %vm16631_vm14, %v12817_v9 }
0x1935   : > { %12820 = vmatprep.subr.bf16.mxu0 %v18497_v58 }
0x1936   : > { %13650 = vrot.lane.b32.xlu1 %v17584_v14, %s18521_s7  ;;  %13595 = vrot.lane.b32.xlu0 %v17565_v0, %s18507_s5 }
0x193a   : > { %13660 = vrot.lane.b32.xlu1 %v17540_v39, %s18522_s12  ;;  %13605 = vrot.lane.b32.xlu0 %v17584_v14, %s18507_s5  ;;  %s18026_s5 = scalar_lea.vmem %s18293_s27, %s10533_s6 }
0x193e   : > { %13670 = vrot.lane.b32.xlu1 %v17584_v14, %s18522_s12  ;;  %13615 = vrot.lane.b32.xlu0 %v17486_v7, %s18523_s10  ;;  %v13381_v35 = vpop.permute.xlu0 %13380 }
0x193f   : > { %v13383_v22 = vunpack.i.h.bf16 %v13381_v35  ;;  %v13382_v36 = vunpack.i.l.bf16 %v13381_v35 }
0x1941   : > { %v12821_v38 = vpack.c.bf16 %v13383_v22, %v13382_v36 }
0x1942   : > { %13680 = vrot.lane.b32.xlu1 %v17540_v39, %s14106_s8  ;;  %13625 = vrot.lane.b32.xlu0 %v17540_v39, %s18523_s10  ;;  %v13421_v39 = vpop.permute.xlu1 %13420 }
0x1943   : > { %v17708_v20 = vpop.f32.mrb[82].mxu1  ;;  %v7556_v53 = vpop.f32.mrb[86].mxu0  ;;  %12823 = vmatpush3.bf16.xpose.msk.msra.mxu0 %vm16631_vm14, %v12821_v38  ;;  %v13422_v36 = vunpack.i.l.bf16 %v13421_v39 }
0x1944   : > { %v11844_v47 = vpop.f32.mrb[83].mxu1  ;;  %v11863_v61 = vpop.f32.mrb[87].mxu0  ;;  %12824 = vmatprep.subr.bf16.mxu0 %v18497_v58 }
0x1946   : > { %13690 = vrot.lane.b32.xlu1 %v17584_v14, %s14106_s8  ;;  %13635 = vrot.lane.b32.xlu0 %v17565_v0, %s18523_s10 }
0x194a   : > { %13645 = vrot.lane.b32.xlu0 %v17584_v14, %s18523_s10  ;;  %8177 = vrot.lane.b32.xlu1 %v17598_v18, %s18524_s11 }
0x194e   : > { %13655 = vrot.lane.b32.xlu0 %v17486_v7, %s18522_s12  ;;  %8185 = vrot.lane.b32.xlu1 %v7352_v55, %s18524_s11 }
0x1950   : > { %v17724_v25 = vpop.permute.xlu1 %13430  ;;  %v13396_v10 = vpop.permute.xlu0 %13395 }
0x1951   : > { %v13398_v43 = vunpack.i.h.bf16 %v13396_v10  ;;  %v13397_v56 = vunpack.i.l.bf16 %v13396_v10 }
0x1952   : > { %13665 = vrot.lane.b32.xlu0 %v17565_v0, %s18522_s12 }
0x1953   : > { %v12825_v28 = vpack.c.bf16 %v13398_v43, %v13397_v56 }
0x1954   : > { %v17729_v45 = vpop.permute.xlu1 %13440  ;;  %v8235_v62 = vpop.permute.xlu0 %8234 }
0x1955   : > { %v8243_v32 = vsel %vm3433_vm8, %v8232_v24, %v8235_v62  ;;  %12827 = vmatpush3.bf16.xpose.msk.msra.mxu0 %vm16631_vm14, %v12825_v28  ;;  %v13443_v34 = vunpack.i.h.bf16 %v17729_v45  ;;  %v13442_v49 = vunpack.i.l.bf16 %v17729_v45 }
0x1956   : > { %13675 = vrot.lane.b32.xlu0 %v17486_v7, %s14106_s8  ;;  %12844 = vmatprep.subr.bf16.mxu0 %v18497_v58  ;;  %v8244_v63 = vsel %vm6540_vm15, %v8243_v32, %v8238_v40 }
0x1957   : > { %v17743_v11 = vsel %vm6542_vm2, %v8244_v63, %v8241_v26 }
0x1958   : > { %v17738_v14 = vpop.permute.xlu1 %13450  ;;  %v13401_v18 = vpop.permute.xlu0 %13400 }
0x1959   : > { %v13403_v59 = vunpack.i.h.bf16 %v13401_v18  ;;  %v13402_v3 = vunpack.i.l.bf16 %v13401_v18 }
0x195a   : > { %13685 = vrot.lane.b32.xlu0 %v17565_v0, %s14106_s8  ;;  %v13413_v0 = vunpack.i.h.bf16 %v13411_v46 }
0x195b   : > { %v12845_v16 = vpack.c.bf16 %v13403_v59, %v13402_v3 }
0x195c   : > { %v17745_v48 = vpop.permute.xlu1 %13460  ;;  %v13406_v6 = vpop.permute.xlu0 %13405  ;;  %12014 = vmatmul.mubr.msk.f32.vlgmr.msra.gmra.mrb[94].mxu0 %vm6544_vm13, %v17743_v11  ;;  %v12849_v51 = vpack.c.bf16 %v13413_v0, %v13412_v54  ;;  %v12881_v0 = vpack.c.bf16 %v13443_v34, %v13442_v49 }
0x195d   : > { %v13408_v7 = vunpack.i.h.bf16 %v13406_v6  ;;  %v13407_v50 = vunpack.i.l.bf16 %v13406_v6  ;;  %12847 = vmatpush3.bf16.xpose.msk.msra.mxu0 %vm16631_vm14, %v12845_v16  ;;  %12051 = vmatprep.mubr.msk.f32.mxu0 %vm14084_vm1, %v18516_v37  ;;  %v13463_v21 = vunpack.i.h.bf16 %v17745_v48  ;;  %v13462_v42 = vunpack.i.l.bf16 %v17745_v48 }
0x195e   : > { %8173 = vrot.lane.b32.xlu0 %v17553_v19, %s18524_s11  ;;  %12848 = vmatprep.subr.bf16.mxu0 %v18497_v58 }
0x195f   : > { %v12769_v4 = vpack.c.bf16 %v13408_v7, %v13407_v50 }
0x1960   : > { %v17756_v55 = vpop.permute.xlu1 %13470  ;;  %v13416_v30 = vpop.permute.xlu0 %13415 }
0x1961   : > { %12771 = vmatpush3.bf16.xpose.msk.msra.mxu1 %vm16631_vm14, %v12769_v4  ;;  %v13418_v19 = vunpack.i.h.bf16 %v13416_v30  ;;  %v13417_v29 = vunpack.i.l.bf16 %v13416_v30 }
0x1962   : > { %8181 = vrot.lane.b32.xlu0 %v17634_v1, %s18524_s11  ;;  %12772 = vmatprep.subr.bf16.mxu1 %v18497_v58  ;;  %v13423_v1 = vunpack.i.h.bf16 %v13421_v39  ;;  %v13432_v39 = vunpack.i.l.bf16 %v17724_v25 }
0x1963   : > { %v17763_v57 = vpop.f32.mrb[84].mxu1  ;;  %v7760_v12 = vpop.f32.mrb[88].mxu0  ;;  %v12773_v38 = vpack.c.bf16 %v13418_v19, %v13417_v29 }
0x1964   : > { %v11882_v9 = vpop.f32.mrb[85].mxu1  ;;  %8193 = vrot.lane.b32.xlu1 %v7760_v12, %s18524_s11  ;;  %v11901_v40 = vpop.f32.mrb[89].mxu0  ;;  %v12853_v61 = vpack.c.bf16 %v13423_v1, %v13422_v36  ;;  %v13452_v1 = vunpack.i.l.bf16 %v17738_v14 }
0x1965   : > { %v17766_v35 = vpop.permute.xlu1 %13480  ;;  %v13426_v22 = vpop.permute.xlu0 %13425  ;;  %12851 = vmatpush3.bf16.xpose.msk.msra.mxu0 %vm16631_vm14, %v12849_v51 }
0x1966   : > { %8189 = vrot.lane.b32.xlu0 %v7556_v53, %s18524_s11  ;;  %12852 = vmatprep.subr.bf16.mxu0 %v18497_v58  ;;  %v13428_v46 = vunpack.i.h.bf16 %v13426_v22  ;;  %v13427_v10 = vunpack.i.l.bf16 %v13426_v22  ;;  %v13433_v53 = vunpack.i.h.bf16 %v17724_v25  ;;  %v13453_v22 = vunpack.i.h.bf16 %v17738_v14 }
0x1968   : > { %v12777_v28 = vpack.c.bf16 %v13428_v46, %v13427_v10  ;;  %v12857_v32 = vpack.c.bf16 %v13433_v53, %v13432_v39  ;;  %v12909_v10 = vpack.c.bf16 %v13463_v21, %v13462_v42 }
0x1969   : > { %v17772_v26 = vpop.permute.xlu1 %13490  ;;  %v13436_v47 = vpop.permute.xlu0 %13435  ;;  %12775 = vmatpush3.bf16.xpose.msk.msra.mxu1 %vm16631_vm14, %v12773_v38 }
0x196a   : > { %12776 = vmatprep.subr.bf16.mxu1 %v18497_v58  ;;  %v13438_v25 = vunpack.i.h.bf16 %v13436_v47  ;;  %v13437_v59 = vunpack.i.l.bf16 %v13436_v47 }
0x196c   : > { %v12877_v6 = vpack.c.bf16 %v13438_v25, %v13437_v59 }
0x196d   : > { %v17777_v43 = vpop.permute.xlu1 %13500  ;;  %v13446_v56 = vpop.permute.xlu0 %13445  ;;  %12855 = vmatpush3.bf16.xpose.msk.msra.mxu0 %vm16631_vm14, %v12853_v61 }
0x196e   : > { %12856 = vmatprep.subr.bf16.mxu0 %v18497_v58  ;;  %v13448_v44 = vunpack.i.h.bf16 %v13446_v56  ;;  %v13447_v52 = vunpack.i.l.bf16 %v13446_v56 }
0x1970   : > { %v12885_v12 = vpack.c.bf16 %v13448_v44, %v13447_v52 }
0x1971   : > { %v17784_v24 = vpop.permute.xlu1 %13510  ;;  %v17786_v62 = vpop.permute.xlu0 %13455  ;;  %12779 = vmatpush3.bf16.xpose.msk.msra.mxu1 %vm16631_vm14, %v12777_v28  ;;  %v13473_v28 = vunpack.i.h.bf16 %v17756_v55 }
0x1972   : > { %12796 = vmatprep.subr.bf16.mxu1 %v18497_v58  ;;  %v13458_v36 = vunpack.i.h.bf16 %v17786_v62  ;;  %v13457_v38 = vunpack.i.l.bf16 %v17786_v62  ;;  %v13472_v62 = vunpack.i.l.bf16 %v17756_v55 }
0x1974   : > { %v12913_v25 = vpack.c.bf16 %v13473_v28, %v13472_v62 }
0x1975   : > { %v17791_v63 = vpop.permute.xlu1 %13520  ;;  %v17793_v18 = vpop.permute.xlu0 %13465  ;;  %12859 = vmatpush3.bf16.xpose.msk.msra.mxu0 %vm16631_vm14, %v12857_v32 }
0x1976   : > { %12876 = vmatprep.subr.bf16.mxu0 %v18497_v58  ;;  %v13468_v56 = vunpack.i.h.bf16 %v17793_v18  ;;  %v13467_v48 = vunpack.i.l.bf16 %v17793_v18 }
0x1978   : > { %11957 = vmatmul.mubr.msk.f32.vlgmr.msra.gmra.mrb[88].mxu1 %vm6544_vm13, %v17238_v60  ;;  %v12833_v32 = vpack.c.bf16 %v13468_v56, %v13467_v48  ;;  %v13502_v48 = vunpack.i.l.bf16 %v17777_v43 }
0x1979   : > { %v17800_v3 = vpop.permute.xlu1 %13530  ;;  %v17802_v16 = vpop.permute.xlu0 %13475  ;;  %12799 = vmatpush3.bf16.xpose.msk.msra.mxu1 %vm16631_vm14, %v12797_v31  ;;  %11994 = vmatprep.mubr.msk.f32.mxu1 %vm14084_vm1, %v18516_v37 }
0x197a   : > { %12800 = vmatprep.subr.bf16.mxu1 %v18497_v58  ;;  %v13478_v59 = vunpack.i.h.bf16 %v17802_v16 }
0x197c   : > { %12052 = vmatmul.mubr.msk.f32.vlgmr.msra.gmra.mrb[96].mxu0 %vm6544_vm13, %v17743_v11 }
0x197d   : > { %v17814_v60 = vpop.permute.xlu1 %13540  ;;  %v17816_v7 = vpop.permute.xlu0 %13485  ;;  %12879 = vmatpush3.bf16.xpose.msk.msra.mxu0 %vm16631_vm14, %v12877_v6  ;;  %12089 = vmatprep.mubr.msk.f32.mxu0 %vm14084_vm1, %v18516_v37  ;;  %v13477_v6 = vunpack.i.l.bf16 %v17802_v16 }
0x197e   : > { %12880 = vmatprep.subr.bf16.mxu0 %v18497_v58 }
0x1981   : > { %v17825_v31 = vpop.permute.xlu1 %13550  ;;  %v17827_v50 = vpop.permute.xlu0 %13495  ;;  %12803 = vmatpush3.bf16.xpose.msk.msra.mxu1 %vm16631_vm14, %v12801_v23 }
0x1982   : > { %12804 = vmatprep.subr.bf16.mxu1 %v18497_v58  ;;  %v13498_v42 = vunpack.i.h.bf16 %v17827_v50 }
0x1983   : > { %v17835_v54 = vpop.f32.mrb[86].mxu1  ;;  %v7964_v4 = vpop.f32.mrb[90].mxu0 }
0x1984   : > { %v11920_v30 = vpop.f32.mrb[87].mxu1  ;;  %8197 = vrot.lane.b32.xlu0 %v7964_v4, %s18524_s11  ;;  %v11939_v45 = vpop.f32.mrb[91].mxu0  ;;  %v13483_v4 = vunpack.i.h.bf16 %v17766_v35 }
0x1985   : > { %v17838_v51 = vpop.permute.xlu1 %13560  ;;  %v17840_v19 = vpop.permute.xlu0 %13505  ;;  %12883 = vmatpush3.bf16.xpose.msk.msra.mxu0 %vm16631_vm14, %v12881_v0  ;;  %v13482_v30 = vunpack.i.l.bf16 %v17766_v35  ;;  %v12837_v45 = vpack.c.bf16 %v13478_v59, %v13477_v6  ;;  %v13493_v35 = vunpack.i.h.bf16 %v17772_v26  ;;  %v13513_v6 = vunpack.i.h.bf16 %v17784_v24 }
0x1986   : > { %12884 = vmatprep.subr.bf16.mxu0 %v18497_v58 }
0x1987   : > { %v12917_v52 = vpack.c.bf16 %v13483_v4, %v13482_v30 }
0x1989   : > { %v17845_v23 = vpop.permute.xlu1 %13570  ;;  %v17847_v29 = vpop.permute.xlu0 %13515  ;;  %12807 = vmatpush3.bf16.xpose.msk.msra.mxu1 %vm16631_vm14, %v12805_v13  ;;  %v12889_v13 = vpack.c.bf16 %v13453_v22, %v13452_v1  ;;  %v13487_v22 = vunpack.i.l.bf16 %v17816_v7 }
0x198a   : > { %12808 = vmatprep.subr.bf16.mxu1 %v18497_v58 }
0x198d   : > { %v17855_v9 = vpop.permute.xlu1 %13580  ;;  %v17857_v40 = vpop.permute.xlu0 %13525  ;;  %12887 = vmatpush3.bf16.xpose.msk.msra.mxu0 %vm16631_vm14, %v12885_v12  ;;  %v13488_v12 = vunpack.i.h.bf16 %v17816_v7 }
0x198e   : > { %12888 = vmatprep.subr.bf16.mxu0 %v18497_v58 }
0x1991   : > { %v17864_v17 = vpop.permute.xlu1 %13590  ;;  %v17866_v27 = vpop.permute.xlu0 %13535  ;;  %12811 = vmatpush3.bf16.xpose.msk.msra.mxu1 %vm16631_vm14, %v12809_v2  ;;  %v12829_v2 = vpack.c.bf16 %v13458_v36, %v13457_v38  ;;  %v12841_v36 = vpack.c.bf16 %v13488_v12, %v13487_v22  ;;  %v13522_v22 = vunpack.i.l.bf16 %v17791_v63 }
0x1992   : > { %12828 = vmatprep.subr.bf16.mxu1 %v18497_v58 }
0x1995   : > { %v17876_v47 = vpop.permute.xlu1 %13600  ;;  %v17878_v14 = vpop.permute.xlu0 %13545  ;;  %12891 = vmatpush3.bf16.xpose.msk.msra.mxu0 %vm16631_vm14, %v12889_v13  ;;  %v13492_v13 = vunpack.i.l.bf16 %v17772_v26  ;;  %v13503_v26 = vunpack.i.h.bf16 %v17777_v43 }
0x1996   : > { %12908 = vmatprep.subr.bf16.mxu0 %v18497_v58 }
0x1997   : > { %v12921_v7 = vpack.c.bf16 %v13493_v35, %v13492_v13 }
0x1998   : > { %11995 = vmatmul.mubr.msk.f32.vlgmr.msra.gmra.mrb[90].mxu1 %vm6544_vm13, %v17743_v11 }
0x1999   : > { %v17887_v61 = vpop.permute.xlu1 %13610  ;;  %v17889_v46 = vpop.permute.xlu0 %13555  ;;  %12831 = vmatpush3.bf16.xpose.msk.msra.mxu1 %vm16631_vm14, %v12829_v2  ;;  %12032 = vmatprep.mubr.msk.f32.mxu1 %vm14084_vm1, %v18516_v37  ;;  %v13497_v2 = vunpack.i.l.bf16 %v17827_v50  ;;  %v12941_v50 = vpack.c.bf16 %v13503_v26, %v13502_v48  ;;  %v13532_v48 = vunpack.i.l.bf16 %v17800_v3 }
0x199a   : > { %12832 = vmatprep.subr.bf16.mxu1 %v18497_v58 }
0x199b   : > { %v12861_v28 = vpack.c.bf16 %v13498_v42, %v13497_v2  ;;  %v13527_v42 = vunpack.i.l.bf16 %v17857_v40 }
0x199c   : > { %12090 = vmatmul.mubr.msk.f32.vlgmr.msra.gmra.mrb[98].mxu0 %vm6544_vm13, %v17743_v11 }
0x199d   : > { %v17900_v53 = vpop.permute.xlu1 %13620  ;;  %v17902_v39 = vpop.permute.xlu0 %13565  ;;  %12911 = vmatpush3.bf16.xpose.msk.msra.mxu0 %vm16631_vm14, %v12909_v10  ;;  %12127 = vmatprep.mubr.msk.f32.mxu0 %vm14084_vm1, %v18516_v37 }
0x199e   : > { %12912 = vmatprep.subr.bf16.mxu0 %v18497_v58 }
0x19a1   : > { %v17911_v18 = vpop.permute.xlu0 %13575  ;;  %12835 = vmatpush3.bf16.xpose.msk.msra.mxu1 %vm16631_vm14, %v12833_v32  ;;  %v17918_v34 = vpop.permute.xlu1 %13630  ;;  %v13508_v32 = vunpack.i.h.bf16 %v17840_v19 }
0x19a2   : > { %12836 = vmatprep.subr.bf16.mxu1 %v18497_v58 }
0x19a3   : > { %v8168_v49 = vpop.f32.mrb[92].mxu0 }
0x19a4   : > { %8201 = vrot.lane.b32.xlu1 %v8168_v49, %s18524_s11  ;;  %v11977_v0 = vpop.f32.mrb[93].mxu0  ;;  %v13512_v49 = vunpack.i.l.bf16 %v17784_v24  ;;  %v13523_v24 = vunpack.i.h.bf16 %v17791_v63  ;;  %v13533_v63 = vunpack.i.h.bf16 %v17800_v3 }
0x19a5   : > { %v17921_v55 = vpop.permute.xlu0 %13585  ;;  %12915 = vmatpush3.bf16.xpose.msk.msra.mxu0 %vm16631_vm14, %v12913_v25  ;;  %v17928_v44 = vpop.permute.xlu1 %13640  ;;  %v13507_v25 = vunpack.i.l.bf16 %v17840_v19 }
0x19a6   : > { %12916 = vmatprep.subr.bf16.mxu0 %v18497_v58  ;;  %v12945_v30 = vpack.c.bf16 %v13513_v6, %v13512_v49  ;;  %v12953_v3 = vpack.c.bf16 %v13533_v63, %v13532_v48  ;;  %v13537_v6 = vunpack.i.l.bf16 %v17866_v27  ;;  %v13558_v63 = vunpack.i.h.bf16 %v17889_v46 }
0x19a7   : > { %v12865_v19 = vpack.c.bf16 %v13508_v32, %v13507_v25  ;;  %v13538_v25 = vunpack.i.h.bf16 %v17866_v27  ;;  %v13557_v48 = vunpack.i.l.bf16 %v17889_v46  ;;  %v13567_v46 = vunpack.i.l.bf16 %v17902_v39 }
0x19a9   : > { %v17930_v16 = vpop.permute.xlu0 %13595  ;;  %12839 = vmatpush3.bf16.xpose.msk.msra.mxu1 %vm16631_vm14, %v12837_v45  ;;  %v17944_v38 = vpop.permute.xlu1 %13650  ;;  %v13518_v45 = vunpack.i.h.bf16 %v17847_v29  ;;  %v12893_v27 = vpack.c.bf16 %v13538_v25, %v13537_v6 }
0x19aa   : > { %12840 = vmatprep.subr.bf16.mxu1 %v18497_v58 }
0x19ad   : > { %v17937_v1 = vpop.permute.xlu0 %13605  ;;  %12919 = vmatpush3.bf16.xpose.msk.msra.mxu0 %vm16631_vm14, %v12917_v52  ;;  %v17953_v10 = vpop.permute.xlu1 %13660  ;;  %v13517_v52 = vunpack.i.l.bf16 %v17847_v29  ;;  %v12949_v29 = vpack.c.bf16 %v13523_v24, %v13522_v22 }
0x19ae   : > { %12920 = vmatprep.subr.bf16.mxu0 %v18497_v58 }
0x19af   : > { %v12869_v35 = vpack.c.bf16 %v13518_v45, %v13517_v52  ;;  %v13543_v45 = vunpack.i.h.bf16 %v17814_v60  ;;  %v13542_v52 = vunpack.i.l.bf16 %v17814_v60 }
0x19b1   : > { %v17946_v21 = vpop.permute.xlu0 %13615  ;;  %12843 = vmatpush3.bf16.xpose.msk.msra.mxu1 %vm16631_vm14, %v12841_v36  ;;  %v17973_v43 = vpop.permute.xlu1 %13670  ;;  %v12973_v60 = vpack.c.bf16 %v13543_v45, %v13542_v52  ;;  %v13592_v45 = vunpack.i.l.bf16 %v17864_v17 }
0x19b2   : > { %12860 = vmatprep.subr.bf16.mxu1 %v18497_v58 }
0x19b5   : > { %v17955_v56 = vpop.permute.xlu0 %13625  ;;  %12923 = vmatpush3.bf16.xpose.msk.msra.mxu0 %vm16631_vm14, %v12921_v7  ;;  %v17986_v0 = vpop.permute.xlu1 %13680  ;;  %v13528_v7 = vunpack.i.h.bf16 %v17857_v40 }
0x19b6   : > { %12940 = vmatprep.subr.bf16.mxu0 %v18497_v58 }
0x19b8   : > { %12033 = vmatmul.mubr.msk.f32.vlgmr.msra.gmra.mrb[92].mxu1 %vm6544_vm13, %v17743_v11 }
0x19b9   : > { %v17964_v62 = vpop.permute.xlu0 %13635  ;;  %12863 = vmatpush3.bf16.xpose.msk.msra.mxu1 %vm16631_vm14, %v12861_v28  ;;  %12070 = vmatprep.mubr.msk.f32.mxu1 %vm14084_vm1, %v18516_v37  ;;  %v18002_v13 = vpop.permute.xlu1 %13690  ;;  %v12873_v28 = vpack.c.bf16 %v13528_v7, %v13527_v42  ;;  %v13547_v7 = vunpack.i.l.bf16 %v17878_v14 }
0x19ba   : > { %12864 = vmatprep.subr.bf16.mxu1 %v18497_v58 }
0x19bc   : > { %12128 = vmatmul.mubr.msk.f32.vlgmr.msra.gmra.mrb[100].mxu0 %vm6544_vm13, %v17743_v11 }
0x19bd   : > { %v17977_v59 = vpop.permute.xlu0 %13645  ;;  %12943 = vmatpush3.bf16.xpose.msk.msra.mxu0 %vm16631_vm14, %v12941_v50  ;;  %12165 = vmatprep.mubr.msk.f32.mxu0 %vm14084_vm1, %v18516_v37  ;;  %v8178_v2 = vpop.permute.xlu1 %8177 }
0x19be   : > { %12944 = vmatprep.subr.bf16.mxu0 %v18497_v58  ;;  %v8205_v40 = vsel %vm1695_vm4, %v17596_v41, %v8178_v2 }
0x19c1   : > { %v17988_v4 = vpop.permute.xlu0 %13655  ;;  %12867 = vmatpush3.bf16.xpose.msk.msra.mxu1 %vm16631_vm14, %v12865_v19  ;;  %v8186_v49 = vpop.permute.xlu1 %8185 }
0x19c2   : > { %12868 = vmatprep.subr.bf16.mxu1 %v18497_v58 }
0x19c5   : > { %v17995_v12 = vpop.permute.xlu0 %13665  ;;  %12947 = vmatpush3.bf16.xpose.msk.msra.mxu0 %vm16631_vm14, %v12945_v30  ;;  %v8207_v30 = vsel %vm1695_vm4, %v17668_v5, %v8186_v49  ;;  %v13578_v49 = vunpack.i.h.bf16 %v17911_v18 }
0x19c6   : > { %12948 = vmatprep.subr.bf16.mxu0 %v18497_v58 }
0x19c9   : > { %v18004_v36 = vpop.permute.xlu0 %13675  ;;  %12871 = vmatpush3.bf16.xpose.msk.msra.mxu1 %vm16631_vm14, %v12869_v35 }
0x19ca   : > { %12872 = vmatprep.subr.bf16.mxu1 %v18497_v58 }
0x19cd   : > { %v18011_v26 = vpop.permute.xlu0 %13685  ;;  %12951 = vmatpush3.bf16.xpose.msk.msra.mxu0 %vm16631_vm14, %v12949_v29  ;;  %v13548_v29 = vunpack.i.h.bf16 %v17878_v14 }
0x19ce   : > { %12952 = vmatprep.subr.bf16.mxu0 %v18497_v58 }
0x19cf   : > { %v12897_v2 = vpack.c.bf16 %v13548_v29, %v13547_v7 }
0x19d1   : > { %v8174_v50 = vpop.permute.xlu0 %8173  ;;  %12875 = vmatpush3.bf16.xpose.msk.msra.mxu1 %vm16631_vm14, %v12873_v28  ;;  %v13563_v28 = vunpack.i.h.bf16 %v17838_v51 }
0x19d2   : > { %v8204_v32 = vsel %vm1695_vm4, %v17510_v8, %v8174_v50  ;;  %12892 = vmatprep.subr.bf16.mxu1 %v18497_v58  ;;  %v12901_v50 = vpack.c.bf16 %v13558_v63, %v13557_v48  ;;  %v13632_v63 = vunpack.i.l.bf16 %v17918_v34 }
0x19d3   : > { %v8220_v19 = vcombine.low %v8204_v32, %v8205_v40  ;;  %v13568_v32 = vunpack.i.h.bf16 %v17902_v39  ;;  %v13577_v39 = vunpack.i.l.bf16 %v17911_v18 }
0x19d5   : > { %8228 = vst [vmem:[%s18026_s5] sm:$0xff] %v8220_v19  ;;  %v8182_v41 = vpop.permute.xlu0 %8181  ;;  %12955 = vmatpush3.bf16.xpose.msk.msra.mxu0 %vm16631_vm14, %v12953_v3  ;;  %v13573_v3 = vunpack.i.h.bf16 %v17845_v23  ;;  %v12905_v25 = vpack.c.bf16 %v13568_v32, %v13567_v46  ;;  %v13583_v19 = vunpack.i.h.bf16 %v17855_v9  ;;  %v13648_v46 = vunpack.i.h.bf16 %v17977_v59 }
0x19d6   : > { %v8206_v8 = vsel %vm1695_vm4, %v17632_v33, %v8182_v41  ;;  %12972 = vmatprep.subr.bf16.mxu0 %v18497_v58  ;;  %v8194_v22 = vpop.permute.xlu1 %8193  ;;  %v12925_v41 = vpack.c.bf16 %v13578_v49, %v13577_v39  ;;  %v13658_v49 = vunpack.i.h.bf16 %v17988_v4  ;;  %v13657_v39 = vunpack.i.l.bf16 %v17988_v4 }
0x19d7   : > { %v8221_v24 = vcombine.low %v8206_v8, %v8207_v30  ;;  %v8209_v33 = vsel %vm1695_vm4, %v17763_v57, %v8194_v22  ;;  %v13552_v57 = vunpack.i.l.bf16 %v17825_v31  ;;  %v13588_v30 = vunpack.i.h.bf16 %v17921_v55 }
0x19d8   : > { %12071 = vmatmul.mubr.msk.f32.vlgmr.msra.gmra.mrb[94].mxu1 %vm6544_vm13, %v17743_v11  ;;  %v13587_v8 = vunpack.i.l.bf16 %v17921_v55  ;;  %v13603_v22 = vunpack.i.h.bf16 %v17876_v47 }
0x19d9   : > { %8229 = vst [vmem:[%s18026_s5 + $0x8] sm:$0xff] %v8221_v24  ;;  %v8190_v35 = vpop.permute.xlu0 %8189  ;;  %12895 = vmatpush3.bf16.xpose.msk.msra.mxu1 %vm16631_vm14, %v12893_v27  ;;  %12108 = vmatprep.mubr.msk.f32.mxu1 %vm14084_vm1, %v18516_v37  ;;  %v13598_v27 = vunpack.i.h.bf16 %v17930_v16  ;;  %v13597_v24 = vunpack.i.l.bf16 %v17930_v16  ;;  %v13607_v16 = vunpack.i.l.bf16 %v17937_v1 }
0x19da   : > { %v8208_v5 = vsel %vm1695_vm4, %v17708_v20, %v8190_v35  ;;  %12896 = vmatprep.subr.bf16.mxu1 %v18497_v58  ;;  %v13553_v20 = vunpack.i.h.bf16 %v17825_v31  ;;  %v13562_v31 = vunpack.i.l.bf16 %v17838_v51  ;;  %v13572_v51 = vunpack.i.l.bf16 %v17845_v23 }
0x19db   : > { %v8222_v42 = vcombine.low %v8208_v5, %v8209_v33  ;;  %v13582_v23 = vunpack.i.l.bf16 %v17855_v9  ;;  %v13593_v9 = vunpack.i.h.bf16 %v17864_v17  ;;  %v12929_v52 = vpack.c.bf16 %v13588_v30, %v13587_v8 }
0x19dc   : > { %12166 = vmatmul.mubr.msk.f32.vlgmr.msra.gmra.mrb[102].mxu0 %vm6544_vm13, %v17743_v11  ;;  %v12977_v14 = vpack.c.bf16 %v13553_v20, %v13552_v57  ;;  %v12981_v40 = vpack.c.bf16 %v13563_v28, %v13562_v31  ;;  %v12985_v6 = vpack.c.bf16 %v13573_v3, %v13572_v51  ;;  %v13602_v17 = vunpack.i.l.bf16 %v17876_v47 }
0x19dd   : > { %8230 = vst [vmem:[%s18026_s5 + $0x10] sm:$0xff] %v8222_v42  ;;  %12975 = vmatpush3.bf16.xpose.msk.msra.mxu0 %vm16631_vm14, %v12973_v60  ;;  %12203 = vmatprep.mubr.msk.f32.mxu0 %vm14084_vm1, %v18516_v37  ;;  %v13005_v18 = vpack.c.bf16 %v13583_v19, %v13582_v23  ;;  %v13009_v55 = vpack.c.bf16 %v13593_v9, %v13592_v45  ;;  %v13608_v5 = vunpack.i.h.bf16 %v17937_v1  ;;  %v13613_v60 = vunpack.i.h.bf16 %v17887_v61 }
0x19de   : > { %12976 = vmatprep.subr.bf16.mxu0 %v18497_v58  ;;  %v12933_v35 = vpack.c.bf16 %v13598_v27, %v13597_v24  ;;  %v13013_v33 = vpack.c.bf16 %v13603_v22, %v13602_v17  ;;  %v13612_v47 = vunpack.i.l.bf16 %v17887_v61  ;;  %v13618_v42 = vunpack.i.h.bf16 %v17946_v21 }
0x19df   : > { %v12937_v29 = vpack.c.bf16 %v13608_v5, %v13607_v16  ;;  %v13617_v1 = vunpack.i.l.bf16 %v17946_v21  ;;  %v13623_v20 = vunpack.i.h.bf16 %v17900_v53  ;;  %v13622_v61 = vunpack.i.l.bf16 %v17900_v53 }
0x19e0   : > { %v13017_v7 = vpack.c.bf16 %v13613_v60, %v13612_v47  ;;  %v13633_v53 = vunpack.i.h.bf16 %v17918_v34  ;;  %v13638_v28 = vunpack.i.h.bf16 %v17964_v62  ;;  %v13637_v31 = vunpack.i.l.bf16 %v17964_v62 }
0x19e1   : > { %12899 = vmatpush3.bf16.xpose.msk.msra.mxu1 %vm16631_vm14, %v12897_v2  ;;  %v12957_v57 = vpack.c.bf16 %v13618_v42, %v13617_v1  ;;  %v13037_v21 = vpack.c.bf16 %v13623_v20, %v13622_v61  ;;  %v13628_v2 = vunpack.i.h.bf16 %v17955_v56  ;;  %v13642_v34 = vunpack.i.l.bf16 %v17928_v44 }
0x19e2   : > { %12900 = vmatprep.subr.bf16.mxu1 %v18497_v58  ;;  %v13647_v62 = vunpack.i.l.bf16 %v17977_v59  ;;  %v13653_v3 = vunpack.i.h.bf16 %v17944_v38  ;;  %v12989_v19 = vpack.c.bf16 %v13658_v49, %v13657_v39  ;;  %v13662_v23 = vunpack.i.l.bf16 %v17953_v10 }
0x19e3   : > { %v13672_v9 = vunpack.i.l.bf16 %v17973_v43  ;;  %v13683_v5 = vunpack.i.h.bf16 %v17986_v0  ;;  %v13682_v16 = vunpack.i.l.bf16 %v17986_v0  ;;  %v13687_v47 = vunpack.i.l.bf16 %v18011_v26 }
0x19e4   : > { %v12969_v51 = vpack.c.bf16 %v13648_v46, %v13647_v62  ;;  %v13692_v0 = vunpack.i.l.bf16 %v18002_v13 }
0x19e5   : > { %12979 = vmatpush3.bf16.xpose.msk.msra.mxu0 %vm16631_vm14, %v12977_v14  ;;  %v13627_v14 = vunpack.i.l.bf16 %v17955_v56  ;;  %v13041_v56 = vpack.c.bf16 %v13633_v53, %v13632_v63  ;;  %v13025_v60 = vpack.c.bf16 %v13683_v5, %v13682_v16 }
0x19e6   : > { %12980 = vmatprep.subr.bf16.mxu0 %v18497_v58 }
0x19e7   : > { %v12961_v48 = vpack.c.bf16 %v13628_v2, %v13627_v14 }
0x19e9   : > { %12903 = vmatpush3.bf16.xpose.msk.msra.mxu1 %vm16631_vm14, %v12901_v50  ;;  %v13643_v50 = vunpack.i.h.bf16 %v17928_v44  ;;  %v13652_v44 = vunpack.i.l.bf16 %v17944_v38  ;;  %v13663_v38 = vunpack.i.h.bf16 %v17953_v10  ;;  %v13673_v10 = vunpack.i.h.bf16 %v17973_v43 }
0x19ea   : > { %12904 = vmatprep.subr.bf16.mxu1 %v18497_v58  ;;  %v13678_v43 = vunpack.i.h.bf16 %v18004_v36 }
0x19eb   : > { %v13045_v32 = vpack.c.bf16 %v13643_v50, %v13642_v34  ;;  %v13049_v59 = vpack.c.bf16 %v13653_v3, %v13652_v44  ;;  %v12993_v4 = vpack.c.bf16 %v13663_v38, %v13662_v23  ;;  %v13001_v22 = vpack.c.bf16 %v13673_v10, %v13672_v9 }
0x19ed   : > { %12983 = vmatpush3.bf16.xpose.msk.msra.mxu0 %vm16631_vm14, %v12981_v40  ;;  %v12965_v40 = vpack.c.bf16 %v13638_v28, %v13637_v31 }
0x19ee   : > { %12984 = vmatprep.subr.bf16.mxu0 %v18497_v58 }
0x19f1   : > { %12907 = vmatpush3.bf16.xpose.msk.msra.mxu1 %vm16631_vm14, %v12905_v25 }
0x19f2   : > { %12924 = vmatprep.subr.bf16.mxu1 %v18497_v58 }
0x19f5   : > { %12987 = vmatpush3.bf16.xpose.msk.msra.mxu0 %vm16631_vm14, %v12985_v6 }
0x19f6   : > { %13004 = vmatprep.subr.bf16.mxu0 %v18497_v58  ;;  %v8198_v8 = vpop.permute.xlu0 %8197 }
0x19f8   : > { %12109 = vmatmul.mubr.msk.f32.vlgmr.msra.gmra.mrb[96].mxu1 %vm6544_vm13, %v17743_v11 }
0x19f9   : > { %12927 = vmatpush3.bf16.xpose.msk.msra.mxu1 %vm16631_vm14, %v12925_v41  ;;  %12146 = vmatprep.mubr.msk.f32.mxu1 %vm14084_vm1, %v18516_v37  ;;  %v13668_v41 = vunpack.i.h.bf16 %v17995_v12 }
0x19fa   : > { %12928 = vmatprep.subr.bf16.mxu1 %v18497_v58 }
0x19fc   : > { %12204 = vmatmul.mubr.msk.f32.vlgmr.msra.gmra.mrb[104].mxu0 %vm6544_vm13, %v17743_v11 }
0x19fd   : > { %13007 = vmatpush3.bf16.xpose.msk.msra.mxu0 %vm16631_vm14, %v13005_v18  ;;  %12241 = vmatprep.mubr.msk.f32.mxu0 %vm14084_vm1, %v18516_v37  ;;  %v13667_v18 = vunpack.i.l.bf16 %v17995_v12 }
0x19fe   : > { %13008 = vmatprep.subr.bf16.mxu0 %v18497_v58 }
0x19ff   : > { %v12997_v30 = vpack.c.bf16 %v13668_v41, %v13667_v18 }
0x1a01   : > { %12931 = vmatpush3.bf16.xpose.msk.msra.mxu1 %vm16631_vm14, %v12929_v52 }
0x1a02   : > { %12932 = vmatprep.subr.bf16.mxu1 %v18497_v58 }
0x1a05   : > { %13011 = vmatpush3.bf16.xpose.msk.msra.mxu0 %vm16631_vm14, %v13009_v55  ;;  %v8210_v55 = vsel %vm1695_vm4, %v17835_v54, %v8198_v8 }
0x1a06   : > { %13012 = vmatprep.subr.bf16.mxu0 %v18497_v58 }
0x1a09   : > { %12935 = vmatpush3.bf16.xpose.msk.msra.mxu1 %vm16631_vm14, %v12933_v35 }
0x1a0a   : > { %12936 = vmatprep.subr.bf16.mxu1 %v18497_v58 }
0x1a0d   : > { %13015 = vmatpush3.bf16.xpose.msk.msra.mxu0 %vm16631_vm14, %v13013_v33  ;;  %v13677_v33 = vunpack.i.l.bf16 %v18004_v36  ;;  %v13688_v36 = vunpack.i.h.bf16 %v18011_v26 }
0x1a0e   : > { %13016 = vmatprep.subr.bf16.mxu0 %v18497_v58 }
0x1a0f   : > { %v13021_v54 = vpack.c.bf16 %v13678_v43, %v13677_v33 }
0x1a11   : > { %12939 = vmatpush3.bf16.xpose.msk.msra.mxu1 %vm16631_vm14, %v12937_v29  ;;  %v13029_v29 = vpack.c.bf16 %v13688_v36, %v13687_v47 }
0x1a12   : > { %12956 = vmatprep.subr.bf16.mxu1 %v18497_v58 }
0x1a15   : > { %13019 = vmatpush3.bf16.xpose.msk.msra.mxu0 %vm16631_vm14, %v13017_v7 }
0x1a16   : > { %13036 = vmatprep.subr.bf16.mxu0 %v18497_v58  ;;  %v8202_v45 = vpop.permute.xlu1 %8201 }
0x1a18   : > { %12147 = vmatmul.mubr.msk.f32.vlgmr.msra.gmra.mrb[98].mxu1 %vm6544_vm13, %v17743_v11 }
0x1a19   : > { %12959 = vmatpush3.bf16.xpose.msk.msra.mxu1 %vm16631_vm14, %v12957_v57  ;;  %12184 = vmatprep.mubr.msk.f32.mxu1 %vm14084_vm1, %v18516_v37 }
0x1a1a   : > { %12960 = vmatprep.subr.bf16.mxu1 %v18497_v58 }
0x1a1c   : > { %12242 = vmatmul.mubr.msk.f32.vlgmr.msra.gmra.mrb[106].mxu0 %vm6544_vm13, %v17743_v11 }
0x1a1d   : > { %13039 = vmatpush3.bf16.xpose.msk.msra.mxu0 %vm16631_vm14, %v13037_v21  ;;  %12279 = vmatprep.mubr.msk.f32.mxu0 %vm14084_vm1, %v18516_v37 }
0x1a1e   : > { %13040 = vmatprep.subr.bf16.mxu0 %v18497_v58 }
0x1a21   : > { %12963 = vmatpush3.bf16.xpose.msk.msra.mxu1 %vm16631_vm14, %v12961_v48 }
0x1a22   : > { %12964 = vmatprep.subr.bf16.mxu1 %v18497_v58 }
0x1a25   : > { %13043 = vmatpush3.bf16.xpose.msk.msra.mxu0 %vm16631_vm14, %v13041_v56 }
0x1a26   : > { %13044 = vmatprep.subr.bf16.mxu0 %v18497_v58 }
0x1a29   : > { %12967 = vmatpush3.bf16.xpose.msk.msra.mxu1 %vm16631_vm14, %v12965_v40 }
0x1a2a   : > { %12968 = vmatprep.subr.bf16.mxu1 %v18497_v58 }
0x1a2d   : > { %13047 = vmatpush3.bf16.xpose.msk.msra.mxu0 %vm16631_vm14, %v13045_v32 }
0x1a2e   : > { %13048 = vmatprep.subr.bf16.mxu0 %v18497_v58 }
0x1a2f   : > { %v8441_v25 = vpop.f32.mrb[94].mxu0 }
0x1a30   : > { %9874 = vrot.lane.b32.xlu0 %v8441_v25, %s18524_s11  ;;  %v12015_v6 = vpop.f32.mrb[95].mxu0 }
0x1a31   : > { %12971 = vmatpush3.bf16.xpose.msk.msra.mxu1 %vm16631_vm14, %v12969_v51 }
0x1a32   : > { %12988 = vmatprep.subr.bf16.mxu1 %v18497_v58 }
0x1a35   : > { %13051 = vmatpush3.bf16.xpose.msk.msra.mxu0 %vm16631_vm14, %v13049_v59 }
0x1a38   : > { %12185 = vmatmul.mubr.msk.f32.vlgmr.msra.gmra.mrb[100].mxu1 %vm6544_vm13, %v17743_v11 }
0x1a39   : > { %12991 = vmatpush3.bf16.xpose.msk.msra.mxu1 %vm16631_vm14, %v12989_v19  ;;  %12222 = vmatprep.mubr.msk.f32.mxu1 %vm14084_vm1, %v18516_v37 }
0x1a3a   : > { %12992 = vmatprep.subr.bf16.mxu1 %v18497_v58 }
0x1a3c   : > { %12280 = vmatmul.mubr.msk.f32.vlgmr.msra.gmra.mrb[108].mxu0 %vm6544_vm13, %v17743_v11 }
0x1a41   : > { %12995 = vmatpush3.bf16.xpose.msk.msra.mxu1 %vm16631_vm14, %v12993_v4 }
0x1a42   : > { %12996 = vmatprep.subr.bf16.mxu1 %v18497_v58 }
0x1a49   : > { %12999 = vmatpush3.bf16.xpose.msk.msra.mxu1 %vm16631_vm14, %v12997_v30 }
0x1a4a   : > { %13000 = vmatprep.subr.bf16.mxu1 %v18497_v58 }
0x1a4b   : > { %v8066_v52 = vpop.f32.mrb[88].mxu1 }
0x1a4c   : > { %v8211_v27 = vsel %vm1695_vm4, %v8066_v52, %v8202_v45  ;;  %v11958_v24 = vpop.f32.mrb[89].mxu1 }
0x1a4d   : > { %v8223_v12 = vcombine.low %v8210_v55, %v8211_v27 }
0x1a4f   : > { %8231 = vst [vmem:[%s18026_s5 + $0x18] sm:$0xff] %v8223_v12  ;;  %v8645_v17 = vpop.f32.mrb[96].mxu0 }
0x1a50   : > { %9878 = vrot.lane.b32.xlu1 %v8645_v17, %s18524_s11  ;;  %v12053_v35 = vpop.f32.mrb[97].mxu0 }
0x1a51   : > { %13003 = vmatpush3.bf16.xpose.msk.msra.mxu1 %vm16631_vm14, %v13001_v22 }
0x1a52   : > { %13020 = vmatprep.subr.bf16.mxu1 %v18497_v58 }
0x1a58   : > { %12223 = vmatmul.mubr.msk.f32.vlgmr.msra.gmra.mrb[102].mxu1 %vm6544_vm13, %v17743_v11 }
0x1a59   : > { %13023 = vmatpush3.bf16.xpose.msk.msra.mxu1 %vm16631_vm14, %v13021_v54  ;;  %12260 = vmatprep.mubr.msk.f32.mxu1 %vm14084_vm1, %v18516_v37  ;;  %v13693_v37 = vunpack.i.h.bf16 %v18002_v13 }
0x1a5a   : > { %13024 = vmatprep.subr.bf16.mxu1 %v18497_v58 }
0x1a5b   : > { %v13033_v1 = vpack.c.bf16 %v13693_v37, %v13692_v0 }
0x1a61   : > { %13027 = vmatpush3.bf16.xpose.msk.msra.mxu1 %vm16631_vm14, %v13025_v60 }
0x1a62   : > { %13028 = vmatprep.subr.bf16.mxu1 %v18497_v58 }
0x1a69   : > { %13031 = vmatpush3.bf16.xpose.msk.msra.mxu1 %vm16631_vm14, %v13029_v29 }
0x1a6a   : > { %13032 = vmatprep.subr.bf16.mxu1 %v18497_v58 }
0x1a6b   : > { %v8339_v7 = vpop.f32.mrb[90].mxu1 }
0x1a6c   : > { %v11996_v42 = vpop.f32.mrb[91].mxu1 }
0x1a6f   : > { %v8849_v20 = vpop.f32.mrb[98].mxu0 }
0x1a70   : > { %9882 = vrot.lane.b32.xlu0 %v8849_v20, %s18524_s11  ;;  %v12091_v61 = vpop.f32.mrb[99].mxu0 }
0x1a71   : > { %13035 = vmatpush3.bf16.xpose.msk.msra.mxu1 %vm16631_vm14, %v13033_v1 }
0x1a78   : > { %12261 = vmatmul.mubr.msk.f32.vlgmr.msra.gmra.mrb[104].mxu1 %vm6544_vm13, %v17743_v11 }
0x1a8b   : > { %v8543_v26 = vpop.f32.mrb[92].mxu1 }
0x1a8c   : > { %v12034_v58 = vpop.f32.mrb[93].mxu1 }
0x1a8f   : > { %v9053_v57 = vpop.f32.mrb[100].mxu0 }
0x1a90   : > { %9886 = vrot.lane.b32.xlu1 %v9053_v57, %s18524_s11  ;;  %v12129_v13 = vpop.f32.mrb[101].mxu0 }
0x1aa2   : > { %v9875_v63 = vpop.permute.xlu0 %9874 }
0x1aa3   : > { %v9905_v15 = vsel %vm1695_vm4, %v8339_v7, %v9875_v63 }
0x1aab   : > { %v8747_v21 = vpop.f32.mrb[94].mxu1 }
0x1aac   : > { %v12072_v2 = vpop.f32.mrb[95].mxu1 }
0x1aaf   : > { %v9257_v14 = vpop.f32.mrb[102].mxu0 }
0x1ab0   : > { %9890 = vrot.lane.b32.xlu0 %v9257_v14, %s18524_s11  ;;  %v12167_v53 = vpop.f32.mrb[103].mxu0 }
0x1ac2   : > { %v9879_v48 = vpop.permute.xlu1 %9878 }
0x1ac3   : > { %v9906_v56 = vsel %vm1695_vm4, %v8543_v26, %v9879_v48 }
0x1ac4   : > { %v9921_v11 = vcombine.low %v9905_v15, %v9906_v56 }
0x1ac6   : > { %10526 = vst [vmem:[%s18026_s5 + $0x20] sm:$0xff] %v9921_v11 }
0x1acb   : > { %v8951_v28 = vpop.f32.mrb[96].mxu1 }
0x1acc   : > { %v12110_v31 = vpop.f32.mrb[97].mxu1 }
0x1acf   : > { %v9461_v50 = vpop.f32.mrb[104].mxu0 }
0x1ad0   : > { %9894 = vrot.lane.b32.xlu1 %v9461_v50, %s18524_s11  ;;  %v12205_v34 = vpop.f32.mrb[105].mxu0 }
0x1ae2   : > { %v9883_v3 = vpop.permute.xlu0 %9882 }
0x1ae3   : > { %v9907_v51 = vsel %vm1695_vm4, %v8747_v21, %v9883_v3 }
0x1aeb   : > { %v9155_v40 = vpop.f32.mrb[98].mxu1 }
0x1aec   : > { %v12148_v32 = vpop.f32.mrb[99].mxu1 }
0x1aef   : > { %v9665_v46 = vpop.f32.mrb[106].mxu0 }
0x1af0   : > { %9898 = vrot.lane.b32.xlu0 %v9665_v46, %s18524_s11  ;;  %v12243_v62 = vpop.f32.mrb[107].mxu0 }
0x1b02   : > { %v9887_v44 = vpop.permute.xlu1 %9886 }
0x1b03   : > { %v9908_v25 = vsel %vm1695_vm4, %v8951_v28, %v9887_v44 }
0x1b04   : > { %v9922_v6 = vcombine.low %v9907_v51, %v9908_v25 }
0x1b06   : > { %10527 = vst [vmem:[%s18026_s5 + $0x28] sm:$0xff] %v9922_v6 }
0x1b0b   : > { %v9359_v59 = vpop.f32.mrb[100].mxu1 }
0x1b0c   : > { %v12186_v49 = vpop.f32.mrb[101].mxu1 }
0x1b0f   : > { %v9869_v39 = vpop.f32.mrb[108].mxu0 }
0x1b10   : > { %9902 = vrot.lane.b32.xlu1 %v9869_v39, %s18524_s11  ;;  %v12281_v19 = vpop.f32.mrb[109].mxu0 }
0x1b22   : > { %v9891_v4 = vpop.permute.xlu0 %9890 }
0x1b23   : > { %v9909_v18 = vsel %vm1695_vm4, %v9155_v40, %v9891_v4 }
0x1b2b   : > { %v9563_v38 = vpop.f32.mrb[102].mxu1 }
0x1b2c   : > { %v12224_v23 = vpop.f32.mrb[103].mxu1 }
0x1b42   : > { %v9895_v41 = vpop.permute.xlu1 %9894 }
0x1b43   : > { %v9910_v30 = vsel %vm1695_vm4, %v9359_v59, %v9895_v41 }
0x1b44   : > { %v9923_v8 = vcombine.low %v9909_v18, %v9910_v30 }
0x1b46   : > { %10528 = vst [vmem:[%s18026_s5 + $0x30] sm:$0xff] %v9923_v8 }
0x1b4b   : > { %v9767_v10 = vpop.f32.mrb[104].mxu1 }
0x1b4c   : > { %v12262_v9 = vpop.f32.mrb[105].mxu1 }
0x1b62   : > { %v9899_v45 = vpop.permute.xlu0 %9898 }
0x1b63   : > { %v9911_v55 = vsel %vm1695_vm4, %v9563_v38, %v9899_v45 }
0x1b82   : > { %v9903_v52 = vpop.permute.xlu1 %9902 }
0x1b83   : > { %v9912_v27 = vsel %vm1695_vm4, %v9767_v10, %v9903_v52 }
0x1b84   : > { %v9924_v24 = vcombine.low %v9911_v55, %v9912_v27 }
0x1b86   : > { %10529 = vst [vmem:[%s18026_s5 + $0x38] sm:$0xff] %v9924_v24 }
0x1b87 PF: > { %s18525_s29 = sld [smem:[#allocation2_spill]] }
0x1b8d   : > { %s39_s8 = sadd.s32 1, %s18525_s29  }
0x1b8e   : > { %p36_p4 = scmp.ge.s32.totalorder %s39_s8, 4  }
0x1b90   :  { %38 = sbr.rel (!%p36_p4) target bundleno = 14 (0xe), region = 184 }

</bundles_post_ra>
